<compile_context>
chip_gen: v7x
topology: tpu7x:2x2x1
jax: 0.10.0
libtpu: 0.0.40
codegen_flags: <defaults>
</compile_context>

<pallas_src>
import functools

import jax
import jax.numpy as jnp
from jax.experimental import pallas as pl
from jax.experimental.pallas import tpu as pltpu

LN_EPS = 1e-5  # F.layer_norm default


# ----------------------------------------------------------------------------- #
# Kernels
# ----------------------------------------------------------------------------- #
def _qkv_kernel(x_ref, w_ref, o_ref):
    # x: (TM, D), w: (D, 3*inner), o: (TM, 3*inner)
    o_ref[...] = jnp.dot(
        x_ref[...], w_ref[...], preferred_element_type=jnp.float32
    ).astype(o_ref.dtype)


def _flash_attn_kernel(q_ref, k_ref, v_ref, o_ref, m_sc, l_sc, acc_sc,
                       *, scale, hpb, dh):
    # Blocks: q (1, tq, hpb*dh), k/v (1, tk, hpb*dh), o (1, tq, hpb*dh).
    # hpb heads are packed side-by-side along lanes; each head is dh wide.
    ki = pl.program_id(3)

    @pl.when(ki == 0)
    def _():
        m_sc[...] = jnp.full(m_sc.shape, -jnp.inf, dtype=m_sc.dtype)
        l_sc[...] = jnp.zeros(l_sc.shape, dtype=l_sc.dtype)
        acc_sc[...] = jnp.zeros(acc_sc.shape, dtype=acc_sc.dtype)

    q_blk = q_ref[0]          # (tq, hpb*dh), native dtype
    k_blk = k_ref[0]          # (tk, hpb*dh)
    v_blk = v_ref[0]          # (tk, hpb*dh)

    for h in range(hpb):      # static, tiny (usually 2)
        q = q_blk[:, h * dh:(h + 1) * dh] * scale      # keep native dtype (bf16 path)
        k = k_blk[:, h * dh:(h + 1) * dh]
        v = v_blk[:, h * dh:(h + 1) * dh]

        # s[i, j] = sum_d q[i, d] * k[j, d]   (contract last dims, f32 accumulate)
        s = jax.lax.dot_general(
            q, k, (((1,), (1,)), ((), ())), preferred_element_type=jnp.float32
        )                                               # (tq, tk) f32

        m_prev = m_sc[h]                                # (tq, 1)
        m_new = jnp.maximum(m_prev, jnp.max(s, axis=-1, keepdims=True))
        alpha = jnp.exp(m_prev - m_new)
        p = jnp.exp(s - m_new)                          # unnormalized probs
        l_sc[h] = alpha * l_sc[h] + jnp.sum(p, axis=-1, keepdims=True)
        acc_sc[h] = alpha * acc_sc[h] + jnp.dot(
            p.astype(v.dtype), v, preferred_element_type=jnp.float32
        )
        m_sc[h] = m_new

    @pl.when(ki == pl.num_programs(3) - 1)
    def _():
        # Deferred normalization with an EUP reciprocal; lane-dense 128-wide store.
        outs = [acc_sc[h] * pl.reciprocal(l_sc[h], approx=True) for h in range(hpb)]
        o_ref[0] = jnp.concatenate(outs, axis=-1).astype(o_ref.dtype)


def _proj_ln_kernel(x_ref, w_ref, gamma_ref, beta_ref, o_ref, *, eps):
    # x: (TM, inner), w: (inner, D), gamma/beta: (1, D), o: (TM, D)
    y = jnp.dot(x_ref[...], w_ref[...], preferred_element_type=jnp.float32)
    mean = jnp.mean(y, axis=-1, keepdims=True)
    yc = y - mean
    var = jnp.mean(yc * yc, axis=-1, keepdims=True)
    inv = jax.lax.rsqrt(var + eps)
    o_ref[...] = (
        yc * inv * gamma_ref[...].astype(jnp.float32)
        + beta_ref[...].astype(jnp.float32)
    ).astype(o_ref.dtype)


# ----------------------------------------------------------------------------- #
# Wrapper helpers
# ----------------------------------------------------------------------------- #
def _round_up(x, m):
    return (x + m - 1) // m * m


def _pick_seq_tile(n, target):
    """Largest divisor of n that is <= target and a multiple of 8, else n itself."""
    if n <= target:
        return n
    for t in range(target, 7, -1):
        if n % t == 0 and t % 8 == 0:
            return t
    return n


def _vmem_limit(tile_bytes):
    # double-buffered tiles + 50% headroom, kept at/above the 32 MiB scoped default
    # but capped at 40 MiB so v7x (64 MiB physical VMEM) keeps headroom.
    need = int(2 * tile_bytes * 1.5)
    return min(max(need, 32 * 1024 * 1024), 40 * 1024 * 1024)


# ----------------------------------------------------------------------------- #
# Forward
# ----------------------------------------------------------------------------- #
@functools.partial(jax.jit, static_argnames=("heads", "dim_head", "tm", "tq", "tk"))
def attention_forward(x, w_qkv, w_out, gamma, beta, *, heads, dim_head,
                      tm=512, tq=256, tk=512):
    B, N, D = x.shape
    inner = heads * dim_head
    scale = dim_head ** -0.5
    itemsize = jnp.dtype(x.dtype).itemsize

    # Heads per block so each q/k/v column block is a lane-dense multiple of 128.
    hpb = None
    for cand in range(1, heads + 1):
        if heads % cand == 0 and (cand * dim_head) % 128 == 0:
            hpb = cand
            break
    assert hpb is not None, "unsupported heads/dim_head combination"  # TODO(synk)
    bw = hpb * dim_head          # block width (lanes)
    G = heads // hpb             # number of head groups (grid axis)

    tokens = B * N
    tm_eff = min(tm, _round_up(tokens, 8))
    tokens_pad = _round_up(tokens, tm_eff)

    x2d = x.reshape(tokens, D)
    if tokens_pad != tokens:
        x2d = jnp.pad(x2d, ((0, tokens_pad - tokens), (0, 0)))

    # ---------------- 1) QKV projection: (tokens, D) @ (D, 3*inner) ------------ #
    qkv = pl.pallas_call(
        _qkv_kernel,
        out_shape=jax.ShapeDtypeStruct((tokens_pad, 3 * inner), x.dtype),
        grid_spec=pltpu.PrefetchScalarGridSpec(
            num_scalar_prefetch=0,
            grid=(tokens_pad // tm_eff,),
            in_specs=[
                pl.BlockSpec((tm_eff, D), lambda i: (i, 0)),
                pl.BlockSpec((D, 3 * inner), lambda i: (0, 0)),
            ],
            out_specs=pl.BlockSpec((tm_eff, 3 * inner), lambda i: (i, 0)),
        ),
        compiler_params=pltpu.CompilerParams(
            dimension_semantics=("parallel",),
            vmem_limit_bytes=_vmem_limit(
                (tm_eff * D + D * 3 * inner + tm_eff * 3 * inner) * itemsize
            ),
        ),
        cost_estimate=pl.CostEstimate(
            flops=int(2 * tokens_pad * D * 3 * inner),
            transcendentals=0,
            bytes_accessed=int(
                (tokens_pad * D + D * 3 * inner + tokens_pad * 3 * inner) * itemsize
            ),
        ),
    )(x2d, w_qkv)

    # Free reshape only — the head split is folded into the attention index_maps.
    qkv = qkv[:tokens].reshape(B, N, 3 * inner)

    # ---------------- 2) Flash attention straight out of the qkv layout -------- #
    tq_eff = _pick_seq_tile(N, tq)
    tk_eff = _pick_seq_tile(N, tk)
    grid = (B, G, N // tq_eff, N // tk_eff)

    attn_vmem = _vmem_limit(
        (2 * tq_eff * bw + 2 * tk_eff * bw) * itemsize   # q, out, k, v blocks
        + 3 * tq_eff * tk_eff * 4                        # s / p f32 intermediates
        + hpb * tq_eff * (dim_head + 2) * 4              # m, l, acc scratch
    )

    attn_out = pl.pallas_call(
        functools.partial(_flash_attn_kernel, scale=scale, hpb=hpb, dh=dim_head),
        out_shape=jax.ShapeDtypeStruct((B, N, inner), x.dtype),
        grid_spec=pltpu.PrefetchScalarGridSpec(
            num_scalar_prefetch=0,
            grid=grid,
            in_specs=[
                # q heads of group g live at block column g of the q section,
                # k at G + g, v at 2*G + g  (block width = hpb*dim_head).
                pl.BlockSpec((1, tq_eff, bw), lambda b, g, qi, ki: (b, qi, g)),
                pl.BlockSpec((1, tk_eff, bw), lambda b, g, qi, ki: (b, ki, G + g)),
                pl.BlockSpec((1, tk_eff, bw), lambda b, g, qi, ki: (b, ki, 2 * G + g)),
            ],
            # written directly in 'b n (h d)' layout — no merge transpose afterwards
            out_specs=pl.BlockSpec((1, tq_eff, bw), lambda b, g, qi, ki: (b, qi, g)),
            scratch_shapes=[
                pltpu.VMEM((hpb, tq_eff, 1), jnp.float32),          # running max
                pltpu.VMEM((hpb, tq_eff, 1), jnp.float32),          # running sum
                pltpu.VMEM((hpb, tq_eff, dim_head), jnp.float32),   # output accum
            ],
        ),
        compiler_params=pltpu.CompilerParams(
            dimension_semantics=("parallel", "parallel", "parallel", "arbitrary"),
            vmem_limit_bytes=attn_vmem,
        ),
        cost_estimate=pl.CostEstimate(
            flops=int(4 * B * heads * N * N * dim_head),
            transcendentals=int(B * heads * N * N),
            bytes_accessed=int(
                # q read + out written once; k/v re-read once per q tile
                (2 * B * N * inner + 2 * (N // tq_eff) * B * N * inner) * itemsize
            ),
        ),
    )(qkv, qkv, qkv)

    # Free reshape only.
    o2d = attn_out.reshape(tokens, inner)
    if tokens_pad != tokens:
        o2d = jnp.pad(o2d, ((0, tokens_pad - tokens), (0, 0)))

    # ---------------- 3) Output projection + LayerNorm (to_out) ---------------- #
    out = pl.pallas_call(
        functools.partial(_proj_ln_kernel, eps=LN_EPS),
        out_shape=jax.ShapeDtypeStruct((tokens_pad, D), x.dtype),
        grid_spec=pltpu.PrefetchScalarGridSpec(
            num_scalar_prefetch=0,
            grid=(tokens_pad // tm_eff,),
            in_specs=[
                pl.BlockSpec((tm_eff, inner), lambda i: (i, 0)),
                pl.BlockSpec((inner, D), lambda i: (0, 0)),
                pl.BlockSpec((1, D), lambda i: (0, 0)),
                pl.BlockSpec((1, D), lambda i: (0, 0)),
            ],
            out_specs=pl.BlockSpec((tm_eff, D), lambda i: (i, 0)),
        ),
        compiler_params=pltpu.CompilerParams(
            dimension_semantics=("parallel",),
            vmem_limit_bytes=_vmem_limit(
                (tm_eff * inner + inner * D + 2 * D + tm_eff * D) * itemsize
            ),
        ),
        cost_estimate=pl.CostEstimate(
            flops=int(2 * tokens_pad * inner * D),
            transcendentals=int(tokens_pad),
            bytes_accessed=int(
                (tokens_pad * inner + inner * D + 2 * D + tokens_pad * D) * itemsize
            ),
        ),
    )(o2d, w_out, gamma.reshape(1, D), beta.reshape(1, D))

    return out[:tokens].reshape(B, N, D)


# ----------------------------------------------------------------------------- #
# Pure-JAX reference (mirrors the PyTorch forward)
# ----------------------------------------------------------------------------- #
def attention_reference(x, w_qkv, w_out, gamma, beta, *, heads, dim_head):
    B, N, D = x.shape
    scale = dim_head ** -0.5
    qkv = x @ w_qkv
    q, k, v = jnp.split(qkv, 3, axis=-1)

    def split_heads(t):
        return jnp.transpose(t.reshape(B, N, heads, dim_head), (0, 2, 1, 3))

    q, k, v = map(split_heads, (q, k, v))
    q = q * scale
    sim = jnp.einsum("bhid,bhjd->bhij", q, k)
    sim = sim - jnp.max(sim, axis=-1, keepdims=True)
    attn = jax.nn.softmax(sim, axis=-1)
    out = jnp.einsum("bhij,bhjd->bhid", attn, v)
    out = jnp.transpose(out, (0, 2, 1, 3)).reshape(B, N, heads * dim_head)
    out = out @ w_out
    mean = jnp.mean(out, axis=-1, keepdims=True)
    var = jnp.mean((out - mean) ** 2, axis=-1, keepdims=True)
    return (out - mean) / jnp.sqrt(var + LN_EPS) * gamma + beta


if __name__ == "__main__":
    batch, seq, dim = 2, 256, 128
    heads, dim_head = 8, 64            # module defaults
    inner = heads * dim_head

    key = jax.random.PRNGKey(0)
    kx, kq, ko = jax.random.split(key, 3)

    x = jax.random.normal(kx, (batch, seq, dim), dtype=jnp.float32)
    # nn.Linear stores (out, in) and applies x @ W.T; we keep (in, out) directly.
    w_qkv = jax.random.normal(kq, (dim, 3 * inner), dtype=jnp.float32) / dim ** 0.5
    w_out = jax.random.normal(ko, (inner, dim), dtype=jnp.float32) / inner ** 0.5
    gamma = jnp.ones((dim,), dtype=jnp.float32)   # LayerNorm.gamma parameter
    beta = jnp.zeros((dim,), dtype=jnp.float32)   # LayerNorm.beta buffer

    # tq=tk=128 so the online-softmax accumulation runs over multiple kv steps.
    out = attention_forward(x, w_qkv, w_out, gamma, beta,
                            heads=heads, dim_head=dim_head, tm=512, tq=128, tk=128)
    jax.block_until_ready(out)

    ref = attention_reference(x, w_qkv, w_out, gamma, beta,
                              heads=heads, dim_head=dim_head)
    assert out.shape == ref.shape
    err = float(jnp.max(jnp.abs(out - ref)))
    # approx reciprocal in the softmax epilogue -> slightly relaxed tolerance
    assert jnp.allclose(out, ref, atol=1e-2, rtol=1e-2), f"mismatch vs reference: {err}"

    print("KERNEL_OK")
</pallas_src>

<mosaic_0001>
module attributes {stable_mosaic.version = 11 : i64} {
  func.func @_qkv_kernel(%arg0: i32, %arg1: memref<512x128xf32, #tpu.memory_space<vmem>>, %arg2: memref<128x1536xf32, #tpu.memory_space<vmem>>, %arg3: memref<512x1536xf32, #tpu.memory_space<vmem>>) attributes {dimension_semantics = [#tpu.dimension_semantics<parallel>], iteration_bounds = array<i64: 1>, scalar_prefetch = 0 : i64, scratch_operands = 0 : i64, tpu.core_type = #tpu.core_type<tc>, window_params = [{transform_indices = @transform_0, window_bounds = array<i64: 512, 128>}, {pipeline_mode = #tpu.pipeline_mode<synchronous>, transform_indices = @transform_1, window_bounds = array<i64: 128, 1536>}, {transform_indices = @transform_2, window_bounds = array<i64: 512, 1536>}]} {
    %c0 = arith.constant 0 : index
    %c0_0 = arith.constant 0 : index
    %0 = vector.load %arg1[%c0, %c0_0] : memref<512x128xf32, #tpu.memory_space<vmem>>, vector<512x128xf32>
    %c0_1 = arith.constant 0 : index
    %c0_2 = arith.constant 0 : index
    %1 = vector.load %arg2[%c0_1, %c0_2] : memref<128x1536xf32, #tpu.memory_space<vmem>>, vector<128x1536xf32>
    %cst = arith.constant dense<0.000000e+00> : vector<512x1536xf32>
    %2 = tpu.matmul %0, %1, %cst {dimension_numbers = #tpu.dot_dimension_numbers<[1], [0], [0], [1], [0, 0, 1, 1], [], []>} : vector<512x128xf32>, vector<128x1536xf32>, vector<512x1536xf32> -> vector<512x1536xf32>
    %c0_3 = arith.constant 0 : index
    %c0_4 = arith.constant 0 : index
    %3 = vector.load %arg3[%c0_3, %c0_4] : memref<512x1536xf32, #tpu.memory_space<vmem>>, vector<512x1536xf32>
    tpu.vector_store %arg3[%c0_3, %c0_4], %2 {strides = array<i32>} : memref<512x1536xf32, #tpu.memory_space<vmem>>, vector<512x1536xf32>,
    return
  }
  func.func @transform_0(%arg0: i32) -> (i32, i32) {
    %c0_i32 = arith.constant 0 : i32
    %c0_i32_0 = arith.constant 0 : i32
    return %arg0, %c0_i32 : i32, i32
  }
  func.func @transform_1(%arg0: i32) -> (i32, i32) {
    %c0_i32 = arith.constant 0 : i32
    %c0_i32_0 = arith.constant 0 : i32
    %c0_i32_1 = arith.constant 0 : i32
    return %c0_i32, %c0_i32_0 : i32, i32
  }
  func.func @transform_2(%arg0: i32) -> (i32, i32) {
    %c0_i32 = arith.constant 0 : i32
    %c0_i32_0 = arith.constant 0 : i32
    return %arg0, %c0_i32 : i32, i32
  }
}

module attributes {stable_mosaic.version = 11 : i64} {
  func.func @_proj_ln_kernel(%arg0: i32, %arg1: memref<512x512xf32, #tpu.memory_space<vmem>>, %arg2: memref<512x128xf32, #tpu.memory_space<vmem>>, %arg3: memref<1x128xf32, #tpu.memory_space<vmem>>, %arg4: memref<1x128xf32, #tpu.memory_space<vmem>>, %arg5: memref<512x128xf32, #tpu.memory_space<vmem>>) attributes {dimension_semantics = [#tpu.dimension_semantics<parallel>], iteration_bounds = array<i64: 1>, scalar_prefetch = 0 : i64, scratch_operands = 0 : i64, tpu.core_type = #tpu.core_type<tc>, window_params = [{transform_indices = @transform_0, window_bounds = array<i64: 512, 512>}, {pipeline_mode = #tpu.pipeline_mode<synchronous>, transform_indices = @transform_1, window_bounds = array<i64: 512, 128>}, {pipeline_mode = #tpu.pipeline_mode<synchronous>, transform_indices = @transform_2, window_bounds = array<i64: 1, 128>}, {pipeline_mode = #tpu.pipeline_mode<synchronous>, transform_indices = @transform_3, window_bounds = array<i64: 1, 128>}, {transform_indices = @transform_4, window_bounds = array<i64: 512, 128>}]} {
    %c0 = arith.constant 0 : index
    %c0_0 = arith.constant 0 : index
    %0 = vector.load %arg1[%c0, %c0_0] : memref<512x512xf32, #tpu.memory_space<vmem>>, vector<512x512xf32>
    %c0_1 = arith.constant 0 : index
    %c0_2 = arith.constant 0 : index
    %1 = vector.load %arg2[%c0_1, %c0_2] : memref<512x128xf32, #tpu.memory_space<vmem>>, vector<512x128xf32>
    %cst = arith.constant dense<0.000000e+00> : vector<512x128xf32>
    %2 = tpu.matmul %0, %1, %cst {dimension_numbers = #tpu.dot_dimension_numbers<[1], [0], [0], [1], [0, 0, 1, 1], [], []>} : vector<512x512xf32>, vector<512x128xf32>, vector<512x128xf32> -> vector<512x128xf32>
    %cst_3 = arith.constant dense<0.000000e+00> : vector<512xf32>
    %3 = vector.multi_reduction <add>, %2, %cst_3 [1] : vector<512x128xf32> to vector<512xf32>
    %4 = vector.shape_cast %3 : vector<512xf32> to vector<512x1xf32>
    %cst_4 = arith.constant 1.280000e+02 : f32
    %5 = vector.broadcast %cst_4 : f32 to vector<512x1xf32>
    %6 = arith.divf %4, %5 : vector<512x1xf32>
    %7 = vector.broadcast %6 : vector<512x1xf32> to vector<512x128xf32>
    %8 = arith.subf %2, %7 : vector<512x128xf32>
    %9 = arith.mulf %8, %8 : vector<512x128xf32>
    %cst_5 = arith.constant dense<0.000000e+00> : vector<512xf32>
    %10 = vector.multi_reduction <add>, %9, %cst_5 [1] : vector<512x128xf32> to vector<512xf32>
    %11 = vector.shape_cast %10 : vector<512xf32> to vector<512x1xf32>
    %cst_6 = arith.constant 1.280000e+02 : f32
    %12 = vector.broadcast %cst_6 : f32 to vector<512x1xf32>
    %13 = arith.divf %11, %12 : vector<512x1xf32>
    %cst_7 = arith.constant 9.99999974E-6 : f32
    %14 = vector.broadcast %cst_7 : f32 to vector<512x1xf32>
    %15 = arith.addf %13, %14 : vector<512x1xf32>
    %16 = math.rsqrt %15 : vector<512x1xf32>
    %17 = vector.broadcast %16 : vector<512x1xf32> to vector<512x128xf32>
    %18 = arith.mulf %8, %17 : vector<512x128xf32>
    %c0_8 = arith.constant 0 : index
    %c0_9 = arith.constant 0 : index
    %19 = vector.load %arg3[%c0_8, %c0_9] : memref<1x128xf32, #tpu.memory_space<vmem>>, vector<1x128xf32>
    %20 = vector.broadcast %19 : vector<1x128xf32> to vector<512x128xf32>
    %21 = arith.mulf %18, %20 : vector<512x128xf32>
    %c0_10 = arith.constant 0 : index
    %c0_11 = arith.constant 0 : index
    %22 = vector.load %arg4[%c0_10, %c0_11] : memref<1x128xf32, #tpu.memory_space<vmem>>, vector<1x128xf32>
    %23 = vector.broadcast %22 : vector<1x128xf32> to vector<512x128xf32>
    %24 = arith.addf %21, %23 : vector<512x128xf32>
    %c0_12 = arith.constant 0 : index
    %c0_13 = arith.constant 0 : index
    %25 = vector.load %arg5[%c0_12, %c0_13] : memref<512x128xf32, #tpu.memory_space<vmem>>, vector<512x128xf32>
    tpu.vector_store %arg5[%c0_12, %c0_13], %24 {strides = array<i32>} : memref<512x128xf32, #tpu.memory_space<vmem>>, vector<512x128xf32>,
    return
  }
  func.func @transform_0(%arg0: i32) -> (i32, i32) {
    %c0_i32 = arith.constant 0 : i32
    %c0_i32_0 = arith.constant 0 : i32
    return %arg0, %c0_i32 : i32, i32
  }
  func.func @transform_1(%arg0: i32) -> (i32, i32) {
    %c0_i32 = arith.constant 0 : i32
    %c0_i32_0 = arith.constant 0 : i32
    %c0_i32_1 = arith.constant 0 : i32
    return %c0_i32, %c0_i32_0 : i32, i32
  }
  func.func @transform_2(%arg0: i32) -> (i32, i32) {
    %c0_i32 = arith.constant 0 : i32
    %c0_i32_0 = arith.constant 0 : i32
    %c0_i32_1 = arith.constant 0 : i32
    return %c0_i32, %c0_i32_0 : i32, i32
  }
  func.func @transform_3(%arg0: i32) -> (i32, i32) {
    %c0_i32 = arith.constant 0 : i32
    %c0_i32_0 = arith.constant 0 : i32
    %c0_i32_1 = arith.constant 0 : i32
    return %c0_i32, %c0_i32_0 : i32, i32
  }
  func.func @transform_4(%arg0: i32) -> (i32, i32) {
    %c0_i32 = arith.constant 0 : i32
    %c0_i32_0 = arith.constant 0 : i32
    return %arg0, %c0_i32 : i32, i32
  }
}

module attributes {stable_mosaic.version = 11 : i64} {
  func.func @_flash_attn_kernel(%arg0: i32, %arg1: i32, %arg2: i32, %arg3: i32, %arg4: memref<1x128x128xf32, #tpu.memory_space<vmem>>, %arg5: memref<1x128x128xf32, #tpu.memory_space<vmem>>, %arg6: memref<1x128x128xf32, #tpu.memory_space<vmem>>, %arg7: memref<1x128x128xf32, #tpu.memory_space<vmem>>, %arg8: memref<2x128x1xf32, #tpu.memory_space<vmem>>, %arg9: memref<2x128x1xf32, #tpu.memory_space<vmem>>, %arg10: memref<2x128x64xf32, #tpu.memory_space<vmem>>) attributes {dimension_semantics = [#tpu.dimension_semantics<parallel>, #tpu.dimension_semantics<parallel>, #tpu.dimension_semantics<parallel>, #tpu.dimension_semantics<arbitrary>], iteration_bounds = array<i64: 2, 4, 2, 2>, scalar_prefetch = 0 : i64, scratch_operands = 3 : i64, tpu.core_type = #tpu.core_type<tc>, window_params = [{transform_indices = @transform_0, window_bounds = array<i64: 1, 128, 128>}, {transform_indices = @transform_1, window_bounds = array<i64: 1, 128, 128>}, {transform_indices = @transform_2, window_bounds = array<i64: 1, 128, 128>}, {transform_indices = @transform_3, window_bounds = array<i64: 1, 128, 128>}]} {
    %c0_i32 = arith.constant 0 : i32
    %0 = arith.cmpi eq, %arg3, %c0_i32 : i32
    %1 = arith.extui %0 : i1 to i32
    %c0_i32_0 = arith.constant 0 : i32
    %2 = arith.cmpi ne, %1, %c0_i32_0 : i32
    scf.if %2 {
      %cst_54 = arith.constant 0xFF800000 : f32
      %86 = vector.broadcast %cst_54 : f32 to vector<2x128x1xf32>
      %c0_55 = arith.constant 0 : index
      %c0_56 = arith.constant 0 : index
      %c0_57 = arith.constant 0 : index
      %87 = vector.load %arg8[%c0_55, %c0_56, %c0_57] : memref<2x128x1xf32, #tpu.memory_space<vmem>>, vector<2x128x1xf32>
      tpu.vector_store %arg8[%c0_55, %c0_56, %c0_57], %86 {strides = array<i32>} : memref<2x128x1xf32, #tpu.memory_space<vmem>>, vector<2x128x1xf32>,
      %cst_58 = arith.constant 0.000000e+00 : f32
      %88 = vector.broadcast %cst_58 : f32 to vector<2x128x1xf32>
      %c0_59 = arith.constant 0 : index
      %c0_60 = arith.constant 0 : index
      %c0_61 = arith.constant 0 : index
      %89 = vector.load %arg9[%c0_59, %c0_60, %c0_61] : memref<2x128x1xf32, #tpu.memory_space<vmem>>, vector<2x128x1xf32>
      tpu.vector_store %arg9[%c0_59, %c0_60, %c0_61], %88 {strides = array<i32>} : memref<2x128x1xf32, #tpu.memory_space<vmem>>, vector<2x128x1xf32>,
      %cst_62 = arith.constant 0.000000e+00 : f32
      %90 = vector.broadcast %cst_62 : f32 to vector<2x128x64xf32>
      %c0_63 = arith.constant 0 : index
      %c0_64 = arith.constant 0 : index
      %c0_65 = arith.constant 0 : index
      %91 = vector.load %arg10[%c0_63, %c0_64, %c0_65] : memref<2x128x64xf32, #tpu.memory_space<vmem>>, vector<2x128x64xf32>
      tpu.vector_store %arg10[%c0_63, %c0_64, %c0_65], %90 {strides = array<i32>} : memref<2x128x64xf32, #tpu.memory_space<vmem>>, vector<2x128x64xf32>,
    } else {
    }
    %c0 = arith.constant 0 : index
    %c0_1 = arith.constant 0 : index
    %c0_2 = arith.constant 0 : index
    %3 = vector.load %arg4[%c0, %c0_1, %c0_2] : memref<1x128x128xf32, #tpu.memory_space<vmem>>, vector<1x128x128xf32>
    %4 = vector.shape_cast %3 : vector<1x128x128xf32> to vector<128x128xf32>
    %c0_3 = arith.constant 0 : index
    %c0_4 = arith.constant 0 : index
    %c0_5 = arith.constant 0 : index
    %5 = vector.load %arg5[%c0_3, %c0_4, %c0_5] : memref<1x128x128xf32, #tpu.memory_space<vmem>>, vector<1x128x128xf32>
    %6 = vector.shape_cast %5 : vector<1x128x128xf32> to vector<128x128xf32>
    %c0_6 = arith.constant 0 : index
    %c0_7 = arith.constant 0 : index
    %c0_8 = arith.constant 0 : index
    %7 = vector.load %arg6[%c0_6, %c0_7, %c0_8] : memref<1x128x128xf32, #tpu.memory_space<vmem>>, vector<1x128x128xf32>
    %8 = vector.shape_cast %7 : vector<1x128x128xf32> to vector<128x128xf32>
    %9 = vector.extract_strided_slice %4 {offsets = [0, 0], sizes = [128, 64], strides = [1, 1]} : vector<128x128xf32> to vector<128x64xf32>
    %cst = arith.constant 1.250000e-01 : f32
    %10 = vector.broadcast %cst : f32 to vector<128x64xf32>
    %11 = arith.mulf %9, %10 : vector<128x64xf32>
    %12 = vector.extract_strided_slice %6 {offsets = [0, 0], sizes = [128, 64], strides = [1, 1]} : vector<128x128xf32> to vector<128x64xf32>
    %13 = vector.extract_strided_slice %8 {offsets = [0, 0], sizes = [128, 64], strides = [1, 1]} : vector<128x128xf32> to vector<128x64xf32>
    %cst_9 = arith.constant dense<0.000000e+00> : vector<128x128xf32>
    %14 = tpu.matmul %11, %12, %cst_9 {dimension_numbers = #tpu.dot_dimension_numbers<[1], [1], [0], [0], [0, 0, 1, 0], [], []>} : vector<128x64xf32>, vector<128x64xf32>, vector<128x128xf32> -> vector<128x128xf32>
    %c0_10 = arith.constant 0 : index
    %c0_11 = arith.constant 0 : index
    %c0_12 = arith.constant 0 : index
    %15 = vector.load %arg8[%c0_10, %c0_11, %c0_12] : memref<2x128x1xf32, #tpu.memory_space<vmem>>, vector<1x128x1xf32>
    %16 = vector.shape_cast %15 : vector<1x128x1xf32> to vector<128x1xf32>
    %cst_13 = arith.constant dense<0xFF800000> : vector<128xf32>
    %17 = vector.multi_reduction <maximumf>, %14, %cst_13 [1] : vector<128x128xf32> to vector<128xf32>
    %18 = vector.shape_cast %17 : vector<128xf32> to vector<128x1xf32>
    %19 = arith.maximumf %16, %18 : vector<128x1xf32>
    %20 = arith.subf %16, %19 : vector<128x1xf32>
    %21 = math.exp %20 : vector<128x1xf32>
    %22 = vector.broadcast %19 : vector<128x1xf32> to vector<128x128xf32>
    %23 = arith.subf %14, %22 : vector<128x128xf32>
    %24 = math.exp %23 : vector<128x128xf32>
    %c0_14 = arith.constant 0 : index
    %c0_15 = arith.constant 0 : index
    %c0_16 = arith.constant 0 : index
    %25 = vector.load %arg9[%c0_14, %c0_15, %c0_16] : memref<2x128x1xf32, #tpu.memory_space<vmem>>, vector<1x128x1xf32>
    %26 = vector.shape_cast %25 : vector<1x128x1xf32> to vector<128x1xf32>
    %27 = arith.mulf %21, %26 : vector<128x1xf32>
    %cst_17 = arith.constant dense<0.000000e+00> : vector<128xf32>
    %28 = vector.multi_reduction <add>, %24, %cst_17 [1] : vector<128x128xf32> to vector<128xf32>
    %29 = vector.shape_cast %28 : vector<128xf32> to vector<128x1xf32>
    %30 = arith.addf %27, %29 : vector<128x1xf32>
    %c0_18 = arith.constant 0 : index
    %c0_19 = arith.constant 0 : index
    %c0_20 = arith.constant 0 : index
    %31 = vector.load %arg9[%c0_18, %c0_19, %c0_20] : memref<2x128x1xf32, #tpu.memory_space<vmem>>, vector<1x128x1xf32>
    %32 = vector.shape_cast %31 : vector<1x128x1xf32> to vector<128x1xf32>
    %33 = vector.shape_cast %30 : vector<128x1xf32> to vector<1x128x1xf32>
    tpu.vector_store %arg9[%c0_18, %c0_19, %c0_20], %33 {strides = array<i32>} : memref<2x128x1xf32, #tpu.memory_space<vmem>>, vector<1x128x1xf32>,
    %c0_21 = arith.constant 0 : index
    %c0_22 = arith.constant 0 : index
    %c0_23 = arith.constant 0 : index
    %34 = vector.load %arg10[%c0_21, %c0_22, %c0_23] : memref<2x128x64xf32, #tpu.memory_space<vmem>>, vector<1x128x64xf32>
    %35 = vector.shape_cast %34 : vector<1x128x64xf32> to vector<128x64xf32>
    %36 = vector.broadcast %21 : vector<128x1xf32> to vector<128x64xf32>
    %37 = arith.mulf %36, %35 : vector<128x64xf32>
    %cst_24 = arith.constant dense<0.000000e+00> : vector<128x64xf32>
    %38 = tpu.matmul %24, %13, %cst_24 {dimension_numbers = #tpu.dot_dimension_numbers<[1], [0], [0], [1], [0, 0, 1, 1], [], []>} : vector<128x128xf32>, vector<128x64xf32>, vector<128x64xf32> -> vector<128x64xf32>
    %39 = arith.addf %37, %38 : vector<128x64xf32>
    %c0_25 = arith.constant 0 : index
    %c0_26 = arith.constant 0 : index
    %c0_27 = arith.constant 0 : index
    %40 = vector.load %arg10[%c0_25, %c0_26, %c0_27] : memref<2x128x64xf32, #tpu.memory_space<vmem>>, vector<1x128x64xf32>
    %41 = vector.shape_cast %40 : vector<1x128x64xf32> to vector<128x64xf32>
    %42 = vector.shape_cast %39 : vector<128x64xf32> to vector<1x128x64xf32>
    tpu.vector_store %arg10[%c0_25, %c0_26, %c0_27], %42 {strides = array<i32>} : memref<2x128x64xf32, #tpu.memory_space<vmem>>, vector<1x128x64xf32>,
    %c0_28 = arith.constant 0 : index
    %c0_29 = arith.constant 0 : index
    %c0_30 = arith.constant 0 : index
    %43 = vector.load %arg8[%c0_28, %c0_29, %c0_30] : memref<2x128x1xf32, #tpu.memory_space<vmem>>, vector<1x128x1xf32>
    %44 = vector.shape_cast %43 : vector<1x128x1xf32> to vector<128x1xf32>
    %45 = vector.shape_cast %19 : vector<128x1xf32> to vector<1x128x1xf32>
    tpu.vector_store %arg8[%c0_28, %c0_29, %c0_30], %45 {strides = array<i32>} : memref<2x128x1xf32, #tpu.memory_space<vmem>>, vector<1x128x1xf32>,
    %46 = vector.extract_strided_slice %4 {offsets = [0, 64], sizes = [128, 64], strides = [1, 1]} : vector<128x128xf32> to vector<128x64xf32>
    %cst_31 = arith.constant 1.250000e-01 : f32
    %47 = vector.broadcast %cst_31 : f32 to vector<128x64xf32>
    %48 = arith.mulf %46, %47 : vector<128x64xf32>
    %49 = vector.extract_strided_slice %6 {offsets = [0, 64], sizes = [128, 64], strides = [1, 1]} : vector<128x128xf32> to vector<128x64xf32>
    %50 = vector.extract_strided_slice %8 {offsets = [0, 64], sizes = [128, 64], strides = [1, 1]} : vector<128x128xf32> to vector<128x64xf32>
    %cst_32 = arith.constant dense<0.000000e+00> : vector<128x128xf32>
    %51 = tpu.matmul %48, %49, %cst_32 {dimension_numbers = #tpu.dot_dimension_numbers<[1], [1], [0], [0], [0, 0, 1, 0], [], []>} : vector<128x64xf32>, vector<128x64xf32>, vector<128x128xf32> -> vector<128x128xf32>
    %c1 = arith.constant 1 : index
    %c0_33 = arith.constant 0 : index
    %c0_34 = arith.constant 0 : index
    %52 = vector.load %arg8[%c1, %c0_33, %c0_34] : memref<2x128x1xf32, #tpu.memory_space<vmem>>, vector<1x128x1xf32>
    %53 = vector.shape_cast %52 : vector<1x128x1xf32> to vector<128x1xf32>
    %cst_35 = arith.constant dense<0xFF800000> : vector<128xf32>
    %54 = vector.multi_reduction <maximumf>, %51, %cst_35 [1] : vector<128x128xf32> to vector<128xf32>
    %55 = vector.shape_cast %54 : vector<128xf32> to vector<128x1xf32>
    %56 = arith.maximumf %53, %55 : vector<128x1xf32>
    %57 = arith.subf %53, %56 : vector<128x1xf32>
    %58 = math.exp %57 : vector<128x1xf32>
    %59 = vector.broadcast %56 : vector<128x1xf32> to vector<128x128xf32>
    %60 = arith.subf %51, %59 : vector<128x128xf32>
    %61 = math.exp %60 : vector<128x128xf32>
    %c1_36 = arith.constant 1 : index
    %c0_37 = arith.constant 0 : index
    %c0_38 = arith.constant 0 : index
    %62 = vector.load %arg9[%c1_36, %c0_37, %c0_38] : memref<2x128x1xf32, #tpu.memory_space<vmem>>, vector<1x128x1xf32>
    %63 = vector.shape_cast %62 : vector<1x128x1xf32> to vector<128x1xf32>
    %64 = arith.mulf %58, %63 : vector<128x1xf32>
    %cst_39 = arith.constant dense<0.000000e+00> : vector<128xf32>
    %65 = vector.multi_reduction <add>, %61, %cst_39 [1] : vector<128x128xf32> to vector<128xf32>
    %66 = vector.shape_cast %65 : vector<128xf32> to vector<128x1xf32>
    %67 = arith.addf %64, %66 : vector<128x1xf32>
    %c1_40 = arith.constant 1 : index
    %c0_41 = arith.constant 0 : index
    %c0_42 = arith.constant 0 : index
    %68 = vector.load %arg9[%c1_40, %c0_41, %c0_42] : memref<2x128x1xf32, #tpu.memory_space<vmem>>, vector<1x128x1xf32>
    %69 = vector.shape_cast %68 : vector<1x128x1xf32> to vector<128x1xf32>
    %70 = vector.shape_cast %67 : vector<128x1xf32> to vector<1x128x1xf32>
    tpu.vector_store %arg9[%c1_40, %c0_41, %c0_42], %70 {strides = array<i32>} : memref<2x128x1xf32, #tpu.memory_space<vmem>>, vector<1x128x1xf32>,
    %c1_43 = arith.constant 1 : index
    %c0_44 = arith.constant 0 : index
    %c0_45 = arith.constant 0 : index
    %71 = vector.load %arg10[%c1_43, %c0_44, %c0_45] : memref<2x128x64xf32, #tpu.memory_space<vmem>>, vector<1x128x64xf32>
    %72 = vector.shape_cast %71 : vector<1x128x64xf32> to vector<128x64xf32>
    %73 = vector.broadcast %58 : vector<128x1xf32> to vector<128x64xf32>
    %74 = arith.mulf %73, %72 : vector<128x64xf32>
    %cst_46 = arith.constant dense<0.000000e+00> : vector<128x64xf32>
    %75 = tpu.matmul %61, %50, %cst_46 {dimension_numbers = #tpu.dot_dimension_numbers<[1], [0], [0], [1], [0, 0, 1, 1], [], []>} : vector<128x128xf32>, vector<128x64xf32>, vector<128x64xf32> -> vector<128x64xf32>
    %76 = arith.addf %74, %75 : vector<128x64xf32>
    %c1_47 = arith.constant 1 : index
    %c0_48 = arith.constant 0 : index
    %c0_49 = arith.constant 0 : index
    %77 = vector.load %arg10[%c1_47, %c0_48, %c0_49] : memref<2x128x64xf32, #tpu.memory_space<vmem>>, vector<1x128x64xf32>
    %78 = vector.shape_cast %77 : vector<1x128x64xf32> to vector<128x64xf32>
    %79 = vector.shape_cast %76 : vector<128x64xf32> to vector<1x128x64xf32>
    tpu.vector_store %arg10[%c1_47, %c0_48, %c0_49], %79 {strides = array<i32>} : memref<2x128x64xf32, #tpu.memory_space<vmem>>, vector<1x128x64xf32>,
    %c1_50 = arith.constant 1 : index
    %c0_51 = arith.constant 0 : index
    %c0_52 = arith.constant 0 : index
    %80 = vector.load %arg8[%c1_50, %c0_51, %c0_52] : memref<2x128x1xf32, #tpu.memory_space<vmem>>, vector<1x128x1xf32>
    %81 = vector.shape_cast %80 : vector<1x128x1xf32> to vector<128x1xf32>
    %82 = vector.shape_cast %56 : vector<128x1xf32> to vector<1x128x1xf32>
    tpu.vector_store %arg8[%c1_50, %c0_51, %c0_52], %82 {strides = array<i32>} : memref<2x128x1xf32, #tpu.memory_space<vmem>>, vector<1x128x1xf32>,
    %c1_i32 = arith.constant 1 : i32
    %83 = arith.cmpi eq, %arg3, %c1_i32 : i32
    %84 = arith.extui %83 : i1 to i32
    %c0_i32_53 = arith.constant 0 : i32
    %85 = arith.cmpi ne, %84, %c0_i32_53 : i32
    scf.if %85 {
      %c0_54 = arith.constant 0 : index
      %c0_55 = arith.constant 0 : index
      %c0_56 = arith.constant 0 : index
      %86 = vector.load %arg10[%c0_54, %c0_55, %c0_56] : memref<2x128x64xf32, #tpu.memory_space<vmem>>, vector<1x128x64xf32>
      %87 = vector.shape_cast %86 : vector<1x128x64xf32> to vector<128x64xf32>
      %c0_57 = arith.constant 0 : index
      %c0_58 = arith.constant 0 : index
      %c0_59 = arith.constant 0 : index
      %88 = vector.load %arg9[%c0_57, %c0_58, %c0_59] : memref<2x128x1xf32, #tpu.memory_space<vmem>>, vector<1x128x1xf32>
      %89 = vector.shape_cast %88 : vector<1x128x1xf32> to vector<128x1xf32>
      %90 = tpu.reciprocal %89 {approx = true} : vector<128x1xf32> -> vector<128x1xf32>
      %91 = vector.broadcast %90 : vector<128x1xf32> to vector<128x64xf32>
      %92 = arith.mulf %87, %91 : vector<128x64xf32>
      %c1_60 = arith.constant 1 : index
      %c0_61 = arith.constant 0 : index
      %c0_62 = arith.constant 0 : index
      %93 = vector.load %arg10[%c1_60, %c0_61, %c0_62] : memref<2x128x64xf32, #tpu.memory_space<vmem>>, vector<1x128x64xf32>
      %94 = vector.shape_cast %93 : vector<1x128x64xf32> to vector<128x64xf32>
      %c1_63 = arith.constant 1 : index
      %c0_64 = arith.constant 0 : index
      %c0_65 = arith.constant 0 : index
      %95 = vector.load %arg9[%c1_63, %c0_64, %c0_65] : memref<2x128x1xf32, #tpu.memory_space<vmem>>, vector<1x128x1xf32>
      %96 = vector.shape_cast %95 : vector<1x128x1xf32> to vector<128x1xf32>
      %97 = tpu.reciprocal %96 {approx = true} : vector<128x1xf32> -> vector<128x1xf32>
      %98 = vector.broadcast %97 : vector<128x1xf32> to vector<128x64xf32>
      %99 = arith.mulf %94, %98 : vector<128x64xf32>
      %100 = tpu.concatenate %92, %99 in 1 : vector<128x64xf32>, vector<128x64xf32> -> vector<128x128xf32>
      %c0_66 = arith.constant 0 : index
      %c0_67 = arith.constant 0 : index
      %c0_68 = arith.constant 0 : index
      %101 = vector.load %arg7[%c0_66, %c0_67, %c0_68] : memref<1x128x128xf32, #tpu.memory_space<vmem>>, vector<1x128x128xf32>
      %102 = vector.shape_cast %101 : vector<1x128x128xf32> to vector<128x128xf32>
      %103 = vector.shape_cast %100 : vector<128x128xf32> to vector<1x128x128xf32>
      tpu.vector_store %arg7[%c0_66, %c0_67, %c0_68], %103 {strides = array<i32>} : memref<1x128x128xf32, #tpu.memory_space<vmem>>, vector<1x128x128xf32>,
    } else {
    }
    return
  }
  func.func @transform_0(%arg0: i32, %arg1: i32, %arg2: i32, %arg3: i32) -> (i32, i32, i32) {
    %c0_i32 = arith.constant 0 : i32
    return %arg0, %arg2, %arg1 : i32, i32, i32
  }
  func.func @transform_1(%arg0: i32, %arg1: i32, %arg2: i32, %arg3: i32) -> (i32, i32, i32) {
    %c4_i32 = arith.constant 4 : i32
    %0 = arith.addi %c4_i32, %arg1 : i32
    %c0_i32 = arith.constant 0 : i32
    return %arg0, %arg3, %0 : i32, i32, i32
  }
  func.func @transform_2(%arg0: i32, %arg1: i32, %arg2: i32, %arg3: i32) -> (i32, i32, i32) {
    %c8_i32 = arith.constant 8 : i32
    %0 = arith.addi %c8_i32, %arg1 : i32
    %c0_i32 = arith.constant 0 : i32
    return %arg0, %arg3, %0 : i32, i32, i32
  }
  func.func @transform_3(%arg0: i32, %arg1: i32, %arg2: i32, %arg3: i32) -> (i32, i32, i32) {
    %c0_i32 = arith.constant 0 : i32
    return %arg0, %arg2, %arg1 : i32, i32, i32
  }
}

</mosaic_0001>

<bundles_post_ra>
// kernel: attention_forward.5
= control target key start
LH: loop header
LB: loop body
LE: loop exit
PB: predicated region body
PF: predicated region fallthrough
CT: control target
= control target key end

     0   :  { %v2355_v3 = vmov 0.0|0.0   ;;  %s4112_s0 = inlined_call_operand.vmem [shape: f32[512,512], index: 0, kind: input, shape index: {}]   ;;  %s4113_s1 = inlined_call_operand.vmem [shape: f32[512,128], index: 1, kind: input, shape index: {}]   ;;  %s4114_s2 = inlined_call_operand.vmem [shape: f32[1,128], index: 2, kind: input, shape index: {}]   ;;  %s4115_s3 = inlined_call_operand.vmem [shape: f32[1,128], index: 3, kind: input, shape index: {}]   ;;  %s4116_s4 = inlined_call_operand.hbm [shape: f32[512,128], index: 4, kind: output, shape index: {}]  }
   0x1   :  { %v274_v0 = vld [vmem:[%s4113_s1] sm:$0xff]  ;;  %v275_v1 = vld [vmem:[%s4113_s1 + $0x8] sm:$0xff]  ;;  %2037 = vmatprep.subr.bf16.mxu1 %v2355_v3  ;;  %2085 = vmatprep.subr.bf16.mxu0 %v2355_v3  ;;  %v276_v6 = vld [vmem:[%s4113_s1 + $0x10] sm:$0xff] }
   0x2   :  { %v306_v2 = vld [vmem:[%s4113_s1 + $0x100] sm:$0xff]  ;;  %v2038_v4 = vpack.c.bf16 %v275_v1, %v274_v0  ;;  %v307_v5 = vld [vmem:[%s4113_s1 + $0x108] sm:$0xff]  ;;  %v277_v7 = vld [vmem:[%s4113_s1 + $0x18] sm:$0xff] }
   0x3   :  { %v2086_v8 = vpack.c.bf16 %v307_v5, %v306_v2  ;;  %v308_v9 = vld [vmem:[%s4113_s1 + $0x110] sm:$0xff]  ;;  %v309_v10 = vld [vmem:[%s4113_s1 + $0x118] sm:$0xff]  ;;  %v2041_v11 = vpack.c.bf16 %v277_v7, %v276_v6  ;;  %v278_v13 = vld [vmem:[%s4113_s1 + $0x20] sm:$0xff] }
   0x4   :  { %2039 = vmatpush1.bf16.msra.mxu1 %v2038_v4  ;;  %v2089_v12 = vpack.c.bf16 %v309_v10, %v308_v9  ;;  %v279_v14 = vld [vmem:[%s4113_s1 + $0x28] sm:$0xff]  ;;  %v310_v15 = vld [vmem:[%s4113_s1 + $0x120] sm:$0xff]  ;;  %v280_v19 = vld [vmem:[%s4113_s1 + $0x30] sm:$0xff] }
   0x5   :  { %2087 = vmatpush1.bf16.msra.mxu0 %v2086_v8  ;;  %2040 = vmatprep.subr.bf16.mxu1 %v2355_v3  ;;  %v311_v16 = vld [vmem:[%s4113_s1 + $0x128] sm:$0xff]  ;;  %v2044_v17 = vpack.c.bf16 %v279_v14, %v278_v13  ;;  %v281_v20 = vld [vmem:[%s4113_s1 + $0x38] sm:$0xff]  ;;  %v312_v21 = vld [vmem:[%s4113_s1 + $0x130] sm:$0xff] }
   0x6   :  { %2088 = vmatprep.subr.bf16.mxu0 %v2355_v3  ;;  %v2092_v18 = vpack.c.bf16 %v311_v16, %v310_v15  ;;  %v313_v22 = vld [vmem:[%s4113_s1 + $0x138] sm:$0xff]  ;;  %v2047_v23 = vpack.c.bf16 %v281_v20, %v280_v19  ;;  %v282_v25 = vld [vmem:[%s4113_s1 + $0x40] sm:$0xff]  ;;  %v283_v26 = vld [vmem:[%s4113_s1 + $0x48] sm:$0xff] }
   0x7   :  { %v2095_v24 = vpack.c.bf16 %v313_v22, %v312_v21  ;;  %v314_v27 = vld [vmem:[%s4113_s1 + $0x140] sm:$0xff]  ;;  %v315_v28 = vld [vmem:[%s4113_s1 + $0x148] sm:$0xff]  ;;  %v2050_v29 = vpack.c.bf16 %v283_v26, %v282_v25  ;;  %v284_v31 = vld [vmem:[%s4113_s1 + $0x50] sm:$0xff] }
   0x8   :  { %2042 = vmatpush1.bf16.msra.mxu1 %v2041_v11  ;;  %v2098_v30 = vpack.c.bf16 %v315_v28, %v314_v27  ;;  %v285_v32 = vld [vmem:[%s4113_s1 + $0x58] sm:$0xff]  ;;  %v316_v33 = vld [vmem:[%s4113_s1 + $0x150] sm:$0xff]  ;;  %v286_v37 = vld [vmem:[%s4113_s1 + $0x60] sm:$0xff] }
   0x9   :  { %2090 = vmatpush1.bf16.msra.mxu0 %v2089_v12  ;;  %2043 = vmatprep.subr.bf16.mxu1 %v2355_v3  ;;  %v317_v34 = vld [vmem:[%s4113_s1 + $0x158] sm:$0xff]  ;;  %v2053_v35 = vpack.c.bf16 %v285_v32, %v284_v31  ;;  %v287_v38 = vld [vmem:[%s4113_s1 + $0x68] sm:$0xff]  ;;  %v318_v39 = vld [vmem:[%s4113_s1 + $0x160] sm:$0xff] }
   0xa   :  { %2091 = vmatprep.subr.bf16.mxu0 %v2355_v3  ;;  %v2101_v36 = vpack.c.bf16 %v317_v34, %v316_v33  ;;  %v319_v40 = vld [vmem:[%s4113_s1 + $0x168] sm:$0xff]  ;;  %v21_v42 = vld [vmem:[%s4112_s0 + $0x18] sm:$0xff]  ;;  %v2056_v43 = vpack.c.bf16 %v287_v38, %v286_v37  ;;  %v288_v45 = vld [vmem:[%s4113_s1 + $0x70] sm:$0xff] }
   0xb   :  { %v19_v41 = vld [vmem:[%s4112_s0 + $0x8] sm:$0xff]  ;;  %787 = vmatprep.mubr.f32.mxu0 %v21_v42  ;;  %v2104_v44 = vpack.c.bf16 %v319_v40, %v318_v39  ;;  %v289_v46 = vld [vmem:[%s4113_s1 + $0x78] sm:$0xff]  ;;  %v320_v47 = vld [vmem:[%s4113_s1 + $0x170] sm:$0xff] }
   0xc   :  { %2045 = vmatpush1.bf16.msra.mxu1 %v2044_v17  ;;  %402 = vmatprep.mubr.f32.mxu1 %v19_v41  ;;  %v321_v48 = vld [vmem:[%s4113_s1 + $0x178] sm:$0xff]  ;;  %v2059_v49 = vpack.c.bf16 %v289_v46, %v288_v45  ;;  %v290_v51 = vld [vmem:[%s4113_s1 + $0x80] sm:$0xff]  ;;  %v291_v52 = vld [vmem:[%s4113_s1 + $0x88] sm:$0xff] }
   0xd   :  { %2093 = vmatpush1.bf16.msra.mxu0 %v2092_v18  ;;  %2046 = vmatprep.subr.bf16.mxu1 %v2355_v3  ;;  %v2107_v50 = vpack.c.bf16 %v321_v48, %v320_v47  ;;  %v322_v53 = vld [vmem:[%s4113_s1 + $0x180] sm:$0xff]  ;;  %v323_v54 = vld [vmem:[%s4113_s1 + $0x188] sm:$0xff]  ;;  %v2062_v55 = vpack.c.bf16 %v291_v52, %v290_v51  ;;  %v292_v57 = vld [vmem:[%s4113_s1 + $0x90] sm:$0xff] }
   0xe   :  { %2094 = vmatprep.subr.bf16.mxu0 %v2355_v3  ;;  %v2110_v56 = vpack.c.bf16 %v323_v54, %v322_v53  ;;  %v293_v58 = vld [vmem:[%s4113_s1 + $0x98] sm:$0xff]  ;;  %v324_v59 = vld [vmem:[%s4113_s1 + $0x190] sm:$0xff]  ;;  %v294_v63 = vld [vmem:[%s4113_s1 + $0xa0] sm:$0xff] }
   0xf   :  { %v325_v60 = vld [vmem:[%s4113_s1 + $0x198] sm:$0xff]  ;;  %v2065_v61 = vpack.c.bf16 %v293_v58, %v292_v57  ;;  %v295_v0 = vld [vmem:[%s4113_s1 + $0xa8] sm:$0xff]  ;;  %v326_v1 = vld [vmem:[%s4113_s1 + $0x1a0] sm:$0xff] }
  0x10   :  { %2048 = vmatpush1.bf16.msra.mxu1 %v2047_v23  ;;  %v2113_v62 = vpack.c.bf16 %v325_v60, %v324_v59  ;;  %v327_v2 = vld [vmem:[%s4113_s1 + $0x1a8] sm:$0xff]  ;;  %v2068_v4 = vpack.c.bf16 %v295_v0, %v294_v63  ;;  %v296_v6 = vld [vmem:[%s4113_s1 + $0xb0] sm:$0xff]  ;;  %v297_v7 = vld [vmem:[%s4113_s1 + $0xb8] sm:$0xff] }
  0x11   :  { %2096 = vmatpush1.bf16.msra.mxu0 %v2095_v24  ;;  %2049 = vmatprep.subr.bf16.mxu1 %v2355_v3  ;;  %v2116_v5 = vpack.c.bf16 %v327_v2, %v326_v1  ;;  %v328_v8 = vld [vmem:[%s4113_s1 + $0x1b0] sm:$0xff]  ;;  %v329_v9 = vld [vmem:[%s4113_s1 + $0x1b8] sm:$0xff]  ;;  %v2071_v10 = vpack.c.bf16 %v297_v7, %v296_v6  ;;  %v298_v12 = vld [vmem:[%s4113_s1 + $0xc0] sm:$0xff] }
  0x12   :  { %2097 = vmatprep.subr.bf16.mxu0 %v2355_v3  ;;  %v2119_v11 = vpack.c.bf16 %v329_v9, %v328_v8  ;;  %v299_v13 = vld [vmem:[%s4113_s1 + $0xc8] sm:$0xff]  ;;  %v330_v14 = vld [vmem:[%s4113_s1 + $0x1c0] sm:$0xff]  ;;  %v300_v18 = vld [vmem:[%s4113_s1 + $0xd0] sm:$0xff] }
  0x13   :  { %v331_v15 = vld [vmem:[%s4113_s1 + $0x1c8] sm:$0xff]  ;;  %v2074_v16 = vpack.c.bf16 %v299_v13, %v298_v12  ;;  %v301_v19 = vld [vmem:[%s4113_s1 + $0xd8] sm:$0xff]  ;;  %v332_v20 = vld [vmem:[%s4113_s1 + $0x1d0] sm:$0xff] }
  0x14   :  { %2051 = vmatpush1.bf16.msra.mxu1 %v2050_v29  ;;  %v2122_v17 = vpack.c.bf16 %v331_v15, %v330_v14  ;;  %v333_v21 = vld [vmem:[%s4113_s1 + $0x1d8] sm:$0xff]  ;;  %v2077_v22 = vpack.c.bf16 %v301_v19, %v300_v18  ;;  %v302_v24 = vld [vmem:[%s4113_s1 + $0xe0] sm:$0xff]  ;;  %v303_v25 = vld [vmem:[%s4113_s1 + $0xe8] sm:$0xff] }
  0x15   :  { %2099 = vmatpush1.bf16.msra.mxu0 %v2098_v30  ;;  %2052 = vmatprep.subr.bf16.mxu1 %v2355_v3  ;;  %v2125_v23 = vpack.c.bf16 %v333_v21, %v332_v20  ;;  %v334_v26 = vld [vmem:[%s4113_s1 + $0x1e0] sm:$0xff]  ;;  %v335_v27 = vld [vmem:[%s4113_s1 + $0x1e8] sm:$0xff]  ;;  %v2080_v28 = vpack.c.bf16 %v303_v25, %v302_v24  ;;  %v304_v30 = vld [vmem:[%s4113_s1 + $0xf0] sm:$0xff] }
  0x16   :  { %2100 = vmatprep.subr.bf16.mxu0 %v2355_v3  ;;  %v2128_v29 = vpack.c.bf16 %v335_v27, %v334_v26  ;;  %v305_v31 = vld [vmem:[%s4113_s1 + $0xf8] sm:$0xff]  ;;  %v336_v32 = vld [vmem:[%s4113_s1 + $0x1f0] sm:$0xff]  ;;  %v23_v38 = vld [vmem:[%s4112_s0 + $0x28] sm:$0xff] }
  0x17   :  { %v337_v33 = vld [vmem:[%s4113_s1 + $0x1f8] sm:$0xff]  ;;  %v2083_v34 = vpack.c.bf16 %v305_v31, %v304_v30  ;;  %v20_v37 = vld [vmem:[%s4112_s0 + $0x10] sm:$0xff] }
  0x18   :  { %2054 = vmatpush1.bf16.msra.mxu1 %v2053_v35  ;;  %v2131_v35 = vpack.c.bf16 %v337_v33, %v336_v32  ;;  %v25_v39 = vld [vmem:[%s4112_s0 + $0x38] sm:$0xff] }
  0x19   :  { %2102 = vmatpush1.bf16.msra.mxu0 %v2101_v36  ;;  %2055 = vmatprep.subr.bf16.mxu1 %v2355_v3  ;;  %v18_v36 = vld [vmem:[%s4112_s0] sm:$0xff] }
  0x1a   :  { %2103 = vmatprep.subr.bf16.mxu0 %v2355_v3 }
  0x1c   :  { %2057 = vmatpush1.bf16.msra.mxu1 %v2056_v43 }
  0x1d   :  { %2105 = vmatpush1.bf16.msra.mxu0 %v2104_v44  ;;  %2058 = vmatprep.subr.bf16.mxu1 %v2355_v3 }
  0x1e   :  { %2106 = vmatprep.subr.bf16.mxu0 %v2355_v3 }
  0x20   :  { %2060 = vmatpush1.bf16.msra.mxu1 %v2059_v49 }
  0x21   :  { %2108 = vmatpush1.bf16.msra.mxu0 %v2107_v50  ;;  %2061 = vmatprep.subr.bf16.mxu1 %v2355_v3 }
  0x22   :  { %2109 = vmatprep.subr.bf16.mxu0 %v2355_v3 }
  0x24   :  { %2063 = vmatpush1.bf16.msra.mxu1 %v2062_v55 }
  0x25   :  { %2111 = vmatpush1.bf16.msra.mxu0 %v2110_v56  ;;  %2064 = vmatprep.subr.bf16.mxu1 %v2355_v3 }
  0x26   :  { %2112 = vmatprep.subr.bf16.mxu0 %v2355_v3 }
  0x28   :  { %2066 = vmatpush1.bf16.msra.mxu1 %v2065_v61 }
  0x29   :  { %2114 = vmatpush1.bf16.msra.mxu0 %v2113_v62  ;;  %2067 = vmatprep.subr.bf16.mxu1 %v2355_v3 }
  0x2a   :  { %2115 = vmatprep.subr.bf16.mxu0 %v2355_v3 }
  0x2c   :  { %2069 = vmatpush1.bf16.msra.mxu1 %v2068_v4 }
  0x2d   :  { %2117 = vmatpush1.bf16.msra.mxu0 %v2116_v5  ;;  %2070 = vmatprep.subr.bf16.mxu1 %v2355_v3 }
  0x2e   :  { %2118 = vmatprep.subr.bf16.mxu0 %v2355_v3 }
  0x30   :  { %2072 = vmatpush1.bf16.msra.mxu1 %v2071_v10 }
  0x31   :  { %2120 = vmatpush1.bf16.msra.mxu0 %v2119_v11  ;;  %2073 = vmatprep.subr.bf16.mxu1 %v2355_v3 }
  0x32   :  { %2121 = vmatprep.subr.bf16.mxu0 %v2355_v3 }
  0x34   :  { %2075 = vmatpush1.bf16.msra.mxu1 %v2074_v16 }
  0x35   :  { %2123 = vmatpush1.bf16.msra.mxu0 %v2122_v17  ;;  %2076 = vmatprep.subr.bf16.mxu1 %v2355_v3 }
  0x36   :  { %2124 = vmatprep.subr.bf16.mxu0 %v2355_v3 }
  0x38   :  { %2078 = vmatpush1.bf16.msra.mxu1 %v2077_v22 }
  0x39   :  { %2126 = vmatpush1.bf16.msra.mxu0 %v2125_v23  ;;  %2079 = vmatprep.subr.bf16.mxu1 %v2355_v3 }
  0x3a   :  { %2127 = vmatprep.subr.bf16.mxu0 %v2355_v3 }
  0x3c   :  { %2081 = vmatpush1.bf16.msra.mxu1 %v2080_v28 }
  0x3d   :  { %2129 = vmatpush1.bf16.msra.mxu0 %v2128_v29  ;;  %2082 = vmatprep.subr.bf16.mxu1 %v2355_v3 }
  0x3e   :  { %2130 = vmatprep.subr.bf16.mxu0 %v2355_v3 }
  0x40   :  { %2084 = vmatpush1.bf16.msra.mxu1 %v2083_v34 }
  0x41   :  { %2132 = vmatpush1.bf16.msra.mxu0 %v2131_v35 }
  0x42   :  { %9 = vsyncpa [#allocation3], 0  ;;  %v22_v3 = vld [vmem:[%s4112_s0 + $0x20] sm:$0xff]  ;;  %v24_v40 = vld [vmem:[%s4112_s0 + $0x30] sm:$0xff] }
  0x43   :  { %403 = vmatmul.mubr.f32.vlgmr.msra.gmra.mrb[0].mxu1 %v18_v36  ;;  %v27_v41 = vld [vmem:[%s4112_s0 + $0x48] sm:$0xff]  ;;  %v29_v42 = vld [vmem:[%s4112_s0 + $0x58] sm:$0xff]  ;;  %v26_v43 = vld [vmem:[%s4112_s0 + $0x40] sm:$0xff] }
  0x44   :  { %788 = vmatmul.mubr.f32.vlgmr.msra.gmra.mrb[0].mxu0 %v20_v37  ;;  %407 = vmatprep.mubr.f32.mxu1 %v23_v38  ;;  %v28_v44 = vld [vmem:[%s4112_s0 + $0x50] sm:$0xff]  ;;  %v31_v45 = vld [vmem:[%s4112_s0 + $0x68] sm:$0xff]  ;;  %v33_v46 = vld [vmem:[%s4112_s0 + $0x78] sm:$0xff] }
  0x45   :  { %792 = vmatprep.mubr.f32.mxu0 %v25_v39  ;;  %v30_v47 = vld [vmem:[%s4112_s0 + $0x60] sm:$0xff]  ;;  %v32_v48 = vld [vmem:[%s4112_s0 + $0x70] sm:$0xff]  ;;  %v35_v49 = vld [vmem:[%s4112_s0 + $0x88] sm:$0xff] }
  0x46   :  { %v37_v50 = vld [vmem:[%s4112_s0 + $0x98] sm:$0xff]  ;;  %v34_v51 = vld [vmem:[%s4112_s0 + $0x80] sm:$0xff]  ;;  %v36_v52 = vld [vmem:[%s4112_s0 + $0x90] sm:$0xff] }
  0x47   :  { %408 = vmatmul.mubr.f32.gmra.mrb[2].mxu1 %v22_v3  ;;  %v39_v53 = vld [vmem:[%s4112_s0 + $0xa8] sm:$0xff]  ;;  %v41_v54 = vld [vmem:[%s4112_s0 + $0xb8] sm:$0xff]  ;;  %v38_v55 = vld [vmem:[%s4112_s0 + $0xa0] sm:$0xff] }
  0x48   :  { %793 = vmatmul.mubr.f32.gmra.mrb[2].mxu0 %v24_v40  ;;  %412 = vmatprep.mubr.f32.mxu1 %v27_v41  ;;  %v40_v56 = vld [vmem:[%s4112_s0 + $0xb0] sm:$0xff]  ;;  %v43_v57 = vld [vmem:[%s4112_s0 + $0xc8] sm:$0xff]  ;;  %v45_v58 = vld [vmem:[%s4112_s0 + $0xd8] sm:$0xff] }
  0x49   :  { %797 = vmatprep.mubr.f32.mxu0 %v29_v42  ;;  %v42_v59 = vld [vmem:[%s4112_s0 + $0xc0] sm:$0xff]  ;;  %v44_v60 = vld [vmem:[%s4112_s0 + $0xd0] sm:$0xff]  ;;  %v47_v61 = vld [vmem:[%s4112_s0 + $0xe8] sm:$0xff] }
  0x4a   :  { %v49_v62 = vld [vmem:[%s4112_s0 + $0xf8] sm:$0xff]  ;;  %v46_v63 = vld [vmem:[%s4112_s0 + $0xe0] sm:$0xff]  ;;  %v48_v0 = vld [vmem:[%s4112_s0 + $0xf0] sm:$0xff] }
  0x4b   :  { %413 = vmatmul.mubr.f32.gmra.mrb[4].mxu1 %v26_v43  ;;  %v51_v1 = vld [vmem:[%s4112_s0 + $0x108] sm:$0xff]  ;;  %v53_v2 = vld [vmem:[%s4112_s0 + $0x118] sm:$0xff]  ;;  %v50_v4 = vld [vmem:[%s4112_s0 + $0x100] sm:$0xff] }
  0x4c   :  { %798 = vmatmul.mubr.f32.gmra.mrb[4].mxu0 %v28_v44  ;;  %417 = vmatprep.mubr.f32.mxu1 %v31_v45  ;;  %v52_v5 = vld [vmem:[%s4112_s0 + $0x110] sm:$0xff]  ;;  %v55_v6 = vld [vmem:[%s4112_s0 + $0x128] sm:$0xff]  ;;  %v57_v7 = vld [vmem:[%s4112_s0 + $0x138] sm:$0xff] }
  0x4d   :  { %802 = vmatprep.mubr.f32.mxu0 %v33_v46  ;;  %v54_v8 = vld [vmem:[%s4112_s0 + $0x120] sm:$0xff]  ;;  %v56_v9 = vld [vmem:[%s4112_s0 + $0x130] sm:$0xff]  ;;  %v59_v10 = vld [vmem:[%s4112_s0 + $0x148] sm:$0xff] }
  0x4e   :  { %v61_v11 = vld [vmem:[%s4112_s0 + $0x158] sm:$0xff]  ;;  %v58_v12 = vld [vmem:[%s4112_s0 + $0x140] sm:$0xff]  ;;  %v60_v13 = vld [vmem:[%s4112_s0 + $0x150] sm:$0xff] }
  0x4f   :  { %418 = vmatmul.mubr.f32.gmra.mrb[6].mxu1 %v30_v47  ;;  %v63_v14 = vld [vmem:[%s4112_s0 + $0x168] sm:$0xff]  ;;  %v65_v15 = vld [vmem:[%s4112_s0 + $0x178] sm:$0xff]  ;;  %v62_v16 = vld [vmem:[%s4112_s0 + $0x160] sm:$0xff] }
  0x50   :  { %803 = vmatmul.mubr.f32.gmra.mrb[6].mxu0 %v32_v48  ;;  %422 = vmatprep.mubr.f32.mxu1 %v35_v49  ;;  %v64_v17 = vld [vmem:[%s4112_s0 + $0x170] sm:$0xff]  ;;  %v67_v18 = vld [vmem:[%s4112_s0 + $0x188] sm:$0xff]  ;;  %v69_v19 = vld [vmem:[%s4112_s0 + $0x198] sm:$0xff] }
  0x51   :  { %807 = vmatprep.mubr.f32.mxu0 %v37_v50  ;;  %v66_v20 = vld [vmem:[%s4112_s0 + $0x180] sm:$0xff]  ;;  %v68_v21 = vld [vmem:[%s4112_s0 + $0x190] sm:$0xff]  ;;  %v71_v22 = vld [vmem:[%s4112_s0 + $0x1a8] sm:$0xff] }
  0x52   :  { %v73_v23 = vld [vmem:[%s4112_s0 + $0x1b8] sm:$0xff]  ;;  %v70_v24 = vld [vmem:[%s4112_s0 + $0x1a0] sm:$0xff]  ;;  %v72_v25 = vld [vmem:[%s4112_s0 + $0x1b0] sm:$0xff] }
  0x53   :  { %423 = vmatmul.mubr.f32.gmra.mrb[8].mxu1 %v34_v51  ;;  %v75_v26 = vld [vmem:[%s4112_s0 + $0x1c8] sm:$0xff]  ;;  %v77_v27 = vld [vmem:[%s4112_s0 + $0x1d8] sm:$0xff]  ;;  %v74_v28 = vld [vmem:[%s4112_s0 + $0x1c0] sm:$0xff] }
  0x54   :  { %808 = vmatmul.mubr.f32.gmra.mrb[8].mxu0 %v36_v52  ;;  %427 = vmatprep.mubr.f32.mxu1 %v39_v53  ;;  %v76_v29 = vld [vmem:[%s4112_s0 + $0x1d0] sm:$0xff]  ;;  %v79_v30 = vld [vmem:[%s4112_s0 + $0x1e8] sm:$0xff]  ;;  %v81_v31 = vld [vmem:[%s4112_s0 + $0x1f8] sm:$0xff] }
  0x55   :  { %812 = vmatprep.mubr.f32.mxu0 %v41_v54  ;;  %v78_v32 = vld [vmem:[%s4112_s0 + $0x1e0] sm:$0xff]  ;;  %v80_v33 = vld [vmem:[%s4112_s0 + $0x1f0] sm:$0xff]  ;;  %v83_v34 = vld [vmem:[%s4112_s0 + $0x208] sm:$0xff] }
  0x56   :  { %v85_v35 = vld [vmem:[%s4112_s0 + $0x218] sm:$0xff]  ;;  %v82_v36 = vld [vmem:[%s4112_s0 + $0x200] sm:$0xff]  ;;  %v84_v37 = vld [vmem:[%s4112_s0 + $0x210] sm:$0xff] }
  0x57   :  { %428 = vmatmul.mubr.f32.gmra.mrb[10].mxu1 %v38_v55  ;;  %v87_v38 = vld [vmem:[%s4112_s0 + $0x228] sm:$0xff]  ;;  %v89_v39 = vld [vmem:[%s4112_s0 + $0x238] sm:$0xff]  ;;  %v86_v3 = vld [vmem:[%s4112_s0 + $0x220] sm:$0xff] }
  0x58   :  { %813 = vmatmul.mubr.f32.gmra.mrb[10].mxu0 %v40_v56  ;;  %432 = vmatprep.mubr.f32.mxu1 %v43_v57  ;;  %v88_v40 = vld [vmem:[%s4112_s0 + $0x230] sm:$0xff]  ;;  %v91_v41 = vld [vmem:[%s4112_s0 + $0x248] sm:$0xff]  ;;  %v93_v42 = vld [vmem:[%s4112_s0 + $0x258] sm:$0xff] }
  0x59   :  { %817 = vmatprep.mubr.f32.mxu0 %v45_v58  ;;  %v90_v43 = vld [vmem:[%s4112_s0 + $0x240] sm:$0xff]  ;;  %v92_v44 = vld [vmem:[%s4112_s0 + $0x250] sm:$0xff]  ;;  %v95_v45 = vld [vmem:[%s4112_s0 + $0x268] sm:$0xff] }
  0x5a   :  { %v97_v46 = vld [vmem:[%s4112_s0 + $0x278] sm:$0xff]  ;;  %v94_v47 = vld [vmem:[%s4112_s0 + $0x260] sm:$0xff]  ;;  %v96_v48 = vld [vmem:[%s4112_s0 + $0x270] sm:$0xff] }
  0x5b   :  { %433 = vmatmul.mubr.f32.gmra.mrb[12].mxu1 %v42_v59  ;;  %v99_v49 = vld [vmem:[%s4112_s0 + $0x288] sm:$0xff]  ;;  %v101_v50 = vld [vmem:[%s4112_s0 + $0x298] sm:$0xff]  ;;  %v98_v51 = vld [vmem:[%s4112_s0 + $0x280] sm:$0xff] }
  0x5c   :  { %818 = vmatmul.mubr.f32.gmra.mrb[12].mxu0 %v44_v60  ;;  %437 = vmatprep.mubr.f32.mxu1 %v47_v61  ;;  %v100_v52 = vld [vmem:[%s4112_s0 + $0x290] sm:$0xff]  ;;  %v103_v53 = vld [vmem:[%s4112_s0 + $0x2a8] sm:$0xff]  ;;  %v105_v54 = vld [vmem:[%s4112_s0 + $0x2b8] sm:$0xff] }
  0x5d   :  { %822 = vmatprep.mubr.f32.mxu0 %v49_v62  ;;  %v102_v55 = vld [vmem:[%s4112_s0 + $0x2a0] sm:$0xff]  ;;  %v104_v56 = vld [vmem:[%s4112_s0 + $0x2b0] sm:$0xff]  ;;  %v107_v57 = vld [vmem:[%s4112_s0 + $0x2c8] sm:$0xff] }
  0x5e   :  { %v109_v58 = vld [vmem:[%s4112_s0 + $0x2d8] sm:$0xff]  ;;  %v106_v59 = vld [vmem:[%s4112_s0 + $0x2c0] sm:$0xff]  ;;  %v108_v60 = vld [vmem:[%s4112_s0 + $0x2d0] sm:$0xff] }
  0x5f   :  { %438 = vmatmul.mubr.f32.gmra.mrb[14].mxu1 %v46_v63  ;;  %v111_v61 = vld [vmem:[%s4112_s0 + $0x2e8] sm:$0xff]  ;;  %v113_v62 = vld [vmem:[%s4112_s0 + $0x2f8] sm:$0xff]  ;;  %v110_v63 = vld [vmem:[%s4112_s0 + $0x2e0] sm:$0xff] }
  0x60   :  { %823 = vmatmul.mubr.f32.gmra.mrb[14].mxu0 %v48_v0  ;;  %442 = vmatprep.mubr.f32.mxu1 %v51_v1  ;;  %v112_v0 = vld [vmem:[%s4112_s0 + $0x2f0] sm:$0xff]  ;;  %v115_v1 = vld [vmem:[%s4112_s0 + $0x308] sm:$0xff] }
  0x61   :  { %827 = vmatprep.mubr.f32.mxu0 %v53_v2  ;;  %v117_v2 = vld [vmem:[%s4112_s0 + $0x318] sm:$0xff] }
  0x63   :  { %443 = vmatmul.mubr.f32.gmra.mrb[16].mxu1 %v50_v4  ;;  %v114_v4 = vld [vmem:[%s4112_s0 + $0x300] sm:$0xff] }
  0x64   :  { %828 = vmatmul.mubr.f32.gmra.mrb[16].mxu0 %v52_v5  ;;  %447 = vmatprep.mubr.f32.mxu1 %v55_v6  ;;  %v116_v5 = vld [vmem:[%s4112_s0 + $0x310] sm:$0xff]  ;;  %v119_v6 = vld [vmem:[%s4112_s0 + $0x328] sm:$0xff] }
  0x65   :  { %832 = vmatprep.mubr.f32.mxu0 %v57_v7  ;;  %v121_v7 = vld [vmem:[%s4112_s0 + $0x338] sm:$0xff] }
  0x67   :  { %448 = vmatmul.mubr.f32.gmra.mrb[18].mxu1 %v54_v8  ;;  %v118_v8 = vld [vmem:[%s4112_s0 + $0x320] sm:$0xff] }
  0x68   :  { %833 = vmatmul.mubr.f32.gmra.mrb[18].mxu0 %v56_v9  ;;  %452 = vmatprep.mubr.f32.mxu1 %v59_v10  ;;  %v120_v9 = vld [vmem:[%s4112_s0 + $0x330] sm:$0xff]  ;;  %v123_v10 = vld [vmem:[%s4112_s0 + $0x348] sm:$0xff] }
  0x69   :  { %837 = vmatprep.mubr.f32.mxu0 %v61_v11  ;;  %v125_v11 = vld [vmem:[%s4112_s0 + $0x358] sm:$0xff] }
  0x6b   :  { %453 = vmatmul.mubr.f32.gmra.mrb[20].mxu1 %v58_v12  ;;  %v122_v12 = vld [vmem:[%s4112_s0 + $0x340] sm:$0xff] }
  0x6c   :  { %838 = vmatmul.mubr.f32.gmra.mrb[20].mxu0 %v60_v13  ;;  %457 = vmatprep.mubr.f32.mxu1 %v63_v14  ;;  %v124_v13 = vld [vmem:[%s4112_s0 + $0x350] sm:$0xff]  ;;  %v127_v14 = vld [vmem:[%s4112_s0 + $0x368] sm:$0xff] }
  0x6d   :  { %842 = vmatprep.mubr.f32.mxu0 %v65_v15  ;;  %v129_v15 = vld [vmem:[%s4112_s0 + $0x378] sm:$0xff] }
  0x6f   :  { %458 = vmatmul.mubr.f32.gmra.mrb[22].mxu1 %v62_v16  ;;  %v126_v16 = vld [vmem:[%s4112_s0 + $0x360] sm:$0xff] }
  0x70   :  { %843 = vmatmul.mubr.f32.gmra.mrb[22].mxu0 %v64_v17  ;;  %462 = vmatprep.mubr.f32.mxu1 %v67_v18  ;;  %v128_v17 = vld [vmem:[%s4112_s0 + $0x370] sm:$0xff]  ;;  %v131_v18 = vld [vmem:[%s4112_s0 + $0x388] sm:$0xff] }
  0x71   :  { %847 = vmatprep.mubr.f32.mxu0 %v69_v19  ;;  %v133_v19 = vld [vmem:[%s4112_s0 + $0x398] sm:$0xff] }
  0x73   :  { %463 = vmatmul.mubr.f32.gmra.mrb[24].mxu1 %v66_v20  ;;  %v130_v20 = vld [vmem:[%s4112_s0 + $0x380] sm:$0xff] }
  0x74   :  { %848 = vmatmul.mubr.f32.gmra.mrb[24].mxu0 %v68_v21  ;;  %467 = vmatprep.mubr.f32.mxu1 %v71_v22  ;;  %v132_v21 = vld [vmem:[%s4112_s0 + $0x390] sm:$0xff]  ;;  %v135_v22 = vld [vmem:[%s4112_s0 + $0x3a8] sm:$0xff] }
  0x75   :  { %852 = vmatprep.mubr.f32.mxu0 %v73_v23  ;;  %v137_v23 = vld [vmem:[%s4112_s0 + $0x3b8] sm:$0xff] }
  0x77   :  { %468 = vmatmul.mubr.f32.gmra.mrb[26].mxu1 %v70_v24  ;;  %v134_v24 = vld [vmem:[%s4112_s0 + $0x3a0] sm:$0xff] }
  0x78   :  { %853 = vmatmul.mubr.f32.gmra.mrb[26].mxu0 %v72_v25  ;;  %472 = vmatprep.mubr.f32.mxu1 %v75_v26  ;;  %v136_v25 = vld [vmem:[%s4112_s0 + $0x3b0] sm:$0xff]  ;;  %v139_v26 = vld [vmem:[%s4112_s0 + $0x3c8] sm:$0xff] }
  0x79   :  { %857 = vmatprep.mubr.f32.mxu0 %v77_v27  ;;  %v141_v27 = vld [vmem:[%s4112_s0 + $0x3d8] sm:$0xff] }
  0x7b   :  { %473 = vmatmul.mubr.f32.gmra.mrb[28].mxu1 %v74_v28  ;;  %v138_v28 = vld [vmem:[%s4112_s0 + $0x3c0] sm:$0xff] }
  0x7c   :  { %858 = vmatmul.mubr.f32.gmra.mrb[28].mxu0 %v76_v29  ;;  %477 = vmatprep.mubr.f32.mxu1 %v79_v30  ;;  %v140_v29 = vld [vmem:[%s4112_s0 + $0x3d0] sm:$0xff]  ;;  %v143_v30 = vld [vmem:[%s4112_s0 + $0x3e8] sm:$0xff] }
  0x7d   :  { %862 = vmatprep.mubr.f32.mxu0 %v81_v31  ;;  %v145_v31 = vld [vmem:[%s4112_s0 + $0x3f8] sm:$0xff] }
  0x7f   :  { %478 = vmatmul.mubr.f32.gmra.mrb[30].mxu1 %v78_v32  ;;  %v142_v32 = vld [vmem:[%s4112_s0 + $0x3e0] sm:$0xff] }
  0x80   :  { %863 = vmatmul.mubr.f32.gmra.mrb[30].mxu0 %v80_v33  ;;  %482 = vmatprep.mubr.f32.mxu1 %v83_v34  ;;  %v144_v33 = vld [vmem:[%s4112_s0 + $0x3f0] sm:$0xff]  ;;  %v147_v34 = vld [vmem:[%s4112_s0 + $0x408] sm:$0xff] }
  0x81   :  { %867 = vmatprep.mubr.f32.mxu0 %v85_v35  ;;  %v149_v35 = vld [vmem:[%s4112_s0 + $0x418] sm:$0xff] }
  0x83   :  { %483 = vmatmul.mubr.f32.gmra.mrb[32].mxu1 %v82_v36  ;;  %v146_v36 = vld [vmem:[%s4112_s0 + $0x400] sm:$0xff] }
  0x84   :  { %868 = vmatmul.mubr.f32.gmra.mrb[32].mxu0 %v84_v37  ;;  %487 = vmatprep.mubr.f32.mxu1 %v87_v38  ;;  %v148_v37 = vld [vmem:[%s4112_s0 + $0x410] sm:$0xff]  ;;  %v151_v38 = vld [vmem:[%s4112_s0 + $0x428] sm:$0xff] }
  0x85   :  { %872 = vmatprep.mubr.f32.mxu0 %v89_v39  ;;  %v153_v39 = vld [vmem:[%s4112_s0 + $0x438] sm:$0xff] }
  0x87   :  { %488 = vmatmul.mubr.f32.gmra.mrb[34].mxu1 %v86_v3  ;;  %v150_v3 = vld [vmem:[%s4112_s0 + $0x420] sm:$0xff] }
  0x88   :  { %873 = vmatmul.mubr.f32.gmra.mrb[34].mxu0 %v88_v40  ;;  %492 = vmatprep.mubr.f32.mxu1 %v91_v41  ;;  %v152_v40 = vld [vmem:[%s4112_s0 + $0x430] sm:$0xff]  ;;  %v155_v41 = vld [vmem:[%s4112_s0 + $0x448] sm:$0xff] }
  0x89   :  { %877 = vmatprep.mubr.f32.mxu0 %v93_v42  ;;  %v157_v42 = vld [vmem:[%s4112_s0 + $0x458] sm:$0xff] }
  0x8b   :  { %493 = vmatmul.mubr.f32.gmra.mrb[36].mxu1 %v90_v43  ;;  %v154_v43 = vld [vmem:[%s4112_s0 + $0x440] sm:$0xff] }
  0x8c   :  { %878 = vmatmul.mubr.f32.gmra.mrb[36].mxu0 %v92_v44  ;;  %497 = vmatprep.mubr.f32.mxu1 %v95_v45  ;;  %v156_v44 = vld [vmem:[%s4112_s0 + $0x450] sm:$0xff]  ;;  %v159_v45 = vld [vmem:[%s4112_s0 + $0x468] sm:$0xff] }
  0x8d   :  { %882 = vmatprep.mubr.f32.mxu0 %v97_v46  ;;  %v161_v46 = vld [vmem:[%s4112_s0 + $0x478] sm:$0xff] }
  0x8f   :  { %498 = vmatmul.mubr.f32.gmra.mrb[38].mxu1 %v94_v47  ;;  %v158_v47 = vld [vmem:[%s4112_s0 + $0x460] sm:$0xff] }
  0x90   :  { %883 = vmatmul.mubr.f32.gmra.mrb[38].mxu0 %v96_v48  ;;  %502 = vmatprep.mubr.f32.mxu1 %v99_v49  ;;  %v160_v48 = vld [vmem:[%s4112_s0 + $0x470] sm:$0xff]  ;;  %v163_v49 = vld [vmem:[%s4112_s0 + $0x488] sm:$0xff] }
  0x91   :  { %887 = vmatprep.mubr.f32.mxu0 %v101_v50  ;;  %v165_v50 = vld [vmem:[%s4112_s0 + $0x498] sm:$0xff] }
  0x93   :  { %503 = vmatmul.mubr.f32.gmra.mrb[40].mxu1 %v98_v51  ;;  %v162_v51 = vld [vmem:[%s4112_s0 + $0x480] sm:$0xff] }
  0x94   :  { %888 = vmatmul.mubr.f32.gmra.mrb[40].mxu0 %v100_v52  ;;  %507 = vmatprep.mubr.f32.mxu1 %v103_v53  ;;  %v164_v52 = vld [vmem:[%s4112_s0 + $0x490] sm:$0xff]  ;;  %v167_v53 = vld [vmem:[%s4112_s0 + $0x4a8] sm:$0xff] }
  0x95   :  { %892 = vmatprep.mubr.f32.mxu0 %v105_v54  ;;  %v169_v54 = vld [vmem:[%s4112_s0 + $0x4b8] sm:$0xff] }
  0x97   :  { %508 = vmatmul.mubr.f32.gmra.mrb[42].mxu1 %v102_v55  ;;  %v166_v55 = vld [vmem:[%s4112_s0 + $0x4a0] sm:$0xff] }
  0x98   :  { %893 = vmatmul.mubr.f32.gmra.mrb[42].mxu0 %v104_v56  ;;  %512 = vmatprep.mubr.f32.mxu1 %v107_v57  ;;  %v168_v56 = vld [vmem:[%s4112_s0 + $0x4b0] sm:$0xff]  ;;  %v171_v57 = vld [vmem:[%s4112_s0 + $0x4c8] sm:$0xff] }
  0x99   :  { %897 = vmatprep.mubr.f32.mxu0 %v109_v58  ;;  %v173_v58 = vld [vmem:[%s4112_s0 + $0x4d8] sm:$0xff] }
  0x9b   :  { %513 = vmatmul.mubr.f32.gmra.mrb[44].mxu1 %v106_v59  ;;  %v170_v59 = vld [vmem:[%s4112_s0 + $0x4c0] sm:$0xff] }
  0x9c   :  { %898 = vmatmul.mubr.f32.gmra.mrb[44].mxu0 %v108_v60  ;;  %517 = vmatprep.mubr.f32.mxu1 %v111_v61  ;;  %v172_v60 = vld [vmem:[%s4112_s0 + $0x4d0] sm:$0xff]  ;;  %v175_v61 = vld [vmem:[%s4112_s0 + $0x4e8] sm:$0xff] }
  0x9d   :  { %902 = vmatprep.mubr.f32.mxu0 %v113_v62  ;;  %v177_v62 = vld [vmem:[%s4112_s0 + $0x4f8] sm:$0xff] }
  0x9f   :  { %518 = vmatmul.mubr.f32.gmra.mrb[46].mxu1 %v110_v63  ;;  %v174_v63 = vld [vmem:[%s4112_s0 + $0x4e0] sm:$0xff] }
  0xa0   :  { %903 = vmatmul.mubr.f32.gmra.mrb[46].mxu0 %v112_v0  ;;  %522 = vmatprep.mubr.f32.mxu1 %v115_v1  ;;  %v176_v0 = vld [vmem:[%s4112_s0 + $0x4f0] sm:$0xff]  ;;  %v179_v1 = vld [vmem:[%s4112_s0 + $0x508] sm:$0xff] }
  0xa1   :  { %907 = vmatprep.mubr.f32.mxu0 %v117_v2  ;;  %v181_v2 = vld [vmem:[%s4112_s0 + $0x518] sm:$0xff] }
  0xa3   :  { %523 = vmatmul.mubr.f32.gmra.mrb[48].mxu1 %v114_v4  ;;  %v178_v4 = vld [vmem:[%s4112_s0 + $0x500] sm:$0xff] }
  0xa4   :  { %908 = vmatmul.mubr.f32.gmra.mrb[48].mxu0 %v116_v5  ;;  %527 = vmatprep.mubr.f32.mxu1 %v119_v6  ;;  %v180_v5 = vld [vmem:[%s4112_s0 + $0x510] sm:$0xff]  ;;  %v183_v6 = vld [vmem:[%s4112_s0 + $0x528] sm:$0xff] }
  0xa5   :  { %912 = vmatprep.mubr.f32.mxu0 %v121_v7  ;;  %v185_v7 = vld [vmem:[%s4112_s0 + $0x538] sm:$0xff] }
  0xa7   :  { %528 = vmatmul.mubr.f32.gmra.mrb[50].mxu1 %v118_v8  ;;  %v182_v8 = vld [vmem:[%s4112_s0 + $0x520] sm:$0xff] }
  0xa8   :  { %913 = vmatmul.mubr.f32.gmra.mrb[50].mxu0 %v120_v9  ;;  %532 = vmatprep.mubr.f32.mxu1 %v123_v10  ;;  %v184_v9 = vld [vmem:[%s4112_s0 + $0x530] sm:$0xff]  ;;  %v187_v10 = vld [vmem:[%s4112_s0 + $0x548] sm:$0xff] }
  0xa9   :  { %917 = vmatprep.mubr.f32.mxu0 %v125_v11  ;;  %v189_v11 = vld [vmem:[%s4112_s0 + $0x558] sm:$0xff] }
  0xab   :  { %533 = vmatmul.mubr.f32.gmra.mrb[52].mxu1 %v122_v12  ;;  %v186_v12 = vld [vmem:[%s4112_s0 + $0x540] sm:$0xff] }
  0xac   :  { %918 = vmatmul.mubr.f32.gmra.mrb[52].mxu0 %v124_v13  ;;  %537 = vmatprep.mubr.f32.mxu1 %v127_v14  ;;  %v188_v13 = vld [vmem:[%s4112_s0 + $0x550] sm:$0xff]  ;;  %v191_v14 = vld [vmem:[%s4112_s0 + $0x568] sm:$0xff] }
  0xad   :  { %922 = vmatprep.mubr.f32.mxu0 %v129_v15  ;;  %v193_v15 = vld [vmem:[%s4112_s0 + $0x578] sm:$0xff] }
  0xaf   :  { %538 = vmatmul.mubr.f32.gmra.mrb[54].mxu1 %v126_v16  ;;  %v190_v16 = vld [vmem:[%s4112_s0 + $0x560] sm:$0xff] }
  0xb0   :  { %923 = vmatmul.mubr.f32.gmra.mrb[54].mxu0 %v128_v17  ;;  %542 = vmatprep.mubr.f32.mxu1 %v131_v18  ;;  %v192_v17 = vld [vmem:[%s4112_s0 + $0x570] sm:$0xff]  ;;  %v195_v18 = vld [vmem:[%s4112_s0 + $0x588] sm:$0xff] }
  0xb1   :  { %927 = vmatprep.mubr.f32.mxu0 %v133_v19  ;;  %v197_v19 = vld [vmem:[%s4112_s0 + $0x598] sm:$0xff] }
  0xb3   :  { %543 = vmatmul.mubr.f32.gmra.mrb[56].mxu1 %v130_v20  ;;  %v194_v20 = vld [vmem:[%s4112_s0 + $0x580] sm:$0xff] }
  0xb4   :  { %928 = vmatmul.mubr.f32.gmra.mrb[56].mxu0 %v132_v21  ;;  %547 = vmatprep.mubr.f32.mxu1 %v135_v22  ;;  %v196_v21 = vld [vmem:[%s4112_s0 + $0x590] sm:$0xff]  ;;  %v199_v22 = vld [vmem:[%s4112_s0 + $0x5a8] sm:$0xff] }
  0xb5   :  { %932 = vmatprep.mubr.f32.mxu0 %v137_v23  ;;  %v201_v23 = vld [vmem:[%s4112_s0 + $0x5b8] sm:$0xff] }
  0xb7   :  { %548 = vmatmul.mubr.f32.gmra.mrb[58].mxu1 %v134_v24  ;;  %v198_v24 = vld [vmem:[%s4112_s0 + $0x5a0] sm:$0xff] }
  0xb8   :  { %933 = vmatmul.mubr.f32.gmra.mrb[58].mxu0 %v136_v25  ;;  %552 = vmatprep.mubr.f32.mxu1 %v139_v26  ;;  %v200_v25 = vld [vmem:[%s4112_s0 + $0x5b0] sm:$0xff]  ;;  %v203_v26 = vld [vmem:[%s4112_s0 + $0x5c8] sm:$0xff] }
  0xb9   :  { %937 = vmatprep.mubr.f32.mxu0 %v141_v27  ;;  %v205_v27 = vld [vmem:[%s4112_s0 + $0x5d8] sm:$0xff] }
  0xbb   :  { %553 = vmatmul.mubr.f32.gmra.mrb[60].mxu1 %v138_v28  ;;  %v202_v28 = vld [vmem:[%s4112_s0 + $0x5c0] sm:$0xff] }
  0xbc   :  { %938 = vmatmul.mubr.f32.gmra.mrb[60].mxu0 %v140_v29  ;;  %557 = vmatprep.mubr.f32.mxu1 %v143_v30  ;;  %v204_v29 = vld [vmem:[%s4112_s0 + $0x5d0] sm:$0xff]  ;;  %v207_v30 = vld [vmem:[%s4112_s0 + $0x5e8] sm:$0xff] }
  0xbd   :  { %942 = vmatprep.mubr.f32.mxu0 %v145_v31  ;;  %v209_v31 = vld [vmem:[%s4112_s0 + $0x5f8] sm:$0xff] }
  0xbf   :  { %558 = vmatmul.mubr.f32.gmra.mrb[62].mxu1 %v142_v32  ;;  %v206_v32 = vld [vmem:[%s4112_s0 + $0x5e0] sm:$0xff] }
  0xc0   :  { %943 = vmatmul.mubr.f32.gmra.mrb[62].mxu0 %v144_v33  ;;  %562 = vmatprep.mubr.f32.mxu1 %v147_v34  ;;  %v208_v33 = vld [vmem:[%s4112_s0 + $0x5f0] sm:$0xff]  ;;  %v211_v34 = vld [vmem:[%s4112_s0 + $0x608] sm:$0xff] }
  0xc1   :  { %947 = vmatprep.mubr.f32.mxu0 %v149_v35  ;;  %v213_v35 = vld [vmem:[%s4112_s0 + $0x618] sm:$0xff] }
  0xc3   :  { %563 = vmatmul.mubr.f32.gmra.mrb[64].mxu1 %v146_v36  ;;  %v210_v36 = vld [vmem:[%s4112_s0 + $0x600] sm:$0xff] }
  0xc4   :  { %948 = vmatmul.mubr.f32.gmra.mrb[64].mxu0 %v148_v37  ;;  %567 = vmatprep.mubr.f32.mxu1 %v151_v38  ;;  %v212_v37 = vld [vmem:[%s4112_s0 + $0x610] sm:$0xff]  ;;  %v215_v38 = vld [vmem:[%s4112_s0 + $0x628] sm:$0xff] }
  0xc5   :  { %952 = vmatprep.mubr.f32.mxu0 %v153_v39  ;;  %v217_v39 = vld [vmem:[%s4112_s0 + $0x638] sm:$0xff] }
  0xc7   :  { %568 = vmatmul.mubr.f32.gmra.mrb[66].mxu1 %v150_v3  ;;  %v214_v3 = vld [vmem:[%s4112_s0 + $0x620] sm:$0xff] }
  0xc8   :  { %953 = vmatmul.mubr.f32.gmra.mrb[66].mxu0 %v152_v40  ;;  %572 = vmatprep.mubr.f32.mxu1 %v155_v41  ;;  %v216_v40 = vld [vmem:[%s4112_s0 + $0x630] sm:$0xff]  ;;  %v219_v41 = vld [vmem:[%s4112_s0 + $0x648] sm:$0xff] }
  0xc9   :  { %957 = vmatprep.mubr.f32.mxu0 %v157_v42  ;;  %v221_v42 = vld [vmem:[%s4112_s0 + $0x658] sm:$0xff] }
  0xcb   :  { %573 = vmatmul.mubr.f32.gmra.mrb[68].mxu1 %v154_v43  ;;  %v218_v43 = vld [vmem:[%s4112_s0 + $0x640] sm:$0xff] }
  0xcc   :  { %958 = vmatmul.mubr.f32.gmra.mrb[68].mxu0 %v156_v44  ;;  %577 = vmatprep.mubr.f32.mxu1 %v159_v45  ;;  %v220_v44 = vld [vmem:[%s4112_s0 + $0x650] sm:$0xff]  ;;  %v223_v45 = vld [vmem:[%s4112_s0 + $0x668] sm:$0xff] }
  0xcd   :  { %962 = vmatprep.mubr.f32.mxu0 %v161_v46  ;;  %v225_v46 = vld [vmem:[%s4112_s0 + $0x678] sm:$0xff] }
  0xcf   :  { %578 = vmatmul.mubr.f32.gmra.mrb[70].mxu1 %v158_v47  ;;  %v222_v47 = vld [vmem:[%s4112_s0 + $0x660] sm:$0xff] }
  0xd0   :  { %963 = vmatmul.mubr.f32.gmra.mrb[70].mxu0 %v160_v48  ;;  %582 = vmatprep.mubr.f32.mxu1 %v163_v49  ;;  %v224_v48 = vld [vmem:[%s4112_s0 + $0x670] sm:$0xff]  ;;  %v227_v49 = vld [vmem:[%s4112_s0 + $0x688] sm:$0xff] }
  0xd1   :  { %967 = vmatprep.mubr.f32.mxu0 %v165_v50  ;;  %v229_v50 = vld [vmem:[%s4112_s0 + $0x698] sm:$0xff] }
  0xd3   :  { %583 = vmatmul.mubr.f32.gmra.mrb[72].mxu1 %v162_v51  ;;  %v226_v51 = vld [vmem:[%s4112_s0 + $0x680] sm:$0xff] }
  0xd4   :  { %968 = vmatmul.mubr.f32.gmra.mrb[72].mxu0 %v164_v52  ;;  %587 = vmatprep.mubr.f32.mxu1 %v167_v53  ;;  %v228_v52 = vld [vmem:[%s4112_s0 + $0x690] sm:$0xff]  ;;  %v231_v53 = vld [vmem:[%s4112_s0 + $0x6a8] sm:$0xff] }
  0xd5   :  { %972 = vmatprep.mubr.f32.mxu0 %v169_v54  ;;  %v233_v54 = vld [vmem:[%s4112_s0 + $0x6b8] sm:$0xff] }
  0xd7   :  { %588 = vmatmul.mubr.f32.gmra.mrb[74].mxu1 %v166_v55  ;;  %v230_v55 = vld [vmem:[%s4112_s0 + $0x6a0] sm:$0xff] }
  0xd8   :  { %973 = vmatmul.mubr.f32.gmra.mrb[74].mxu0 %v168_v56  ;;  %592 = vmatprep.mubr.f32.mxu1 %v171_v57  ;;  %v232_v56 = vld [vmem:[%s4112_s0 + $0x6b0] sm:$0xff]  ;;  %v235_v57 = vld [vmem:[%s4112_s0 + $0x6c8] sm:$0xff] }
  0xd9   :  { %977 = vmatprep.mubr.f32.mxu0 %v173_v58 }
  0xdb   :  { %593 = vmatmul.mubr.f32.gmra.mrb[76].mxu1 %v170_v59  ;;  %v237_v59 = vld [vmem:[%s4112_s0 + $0x6d8] sm:$0xff] }
  0xdc   :  { %978 = vmatmul.mubr.f32.gmra.mrb[76].mxu0 %v172_v60  ;;  %597 = vmatprep.mubr.f32.mxu1 %v175_v61 }
  0xdd   :  { %982 = vmatprep.mubr.f32.mxu0 %v177_v62 }
  0xdf   :  { %598 = vmatmul.mubr.f32.gmra.mrb[78].mxu1 %v174_v63 }
  0xe0   :  { %983 = vmatmul.mubr.f32.gmra.mrb[78].mxu0 %v176_v0  ;;  %602 = vmatprep.mubr.f32.mxu1 %v179_v1  ;;  %v234_v0 = vld [vmem:[%s4112_s0 + $0x6c0] sm:$0xff]  ;;  %v236_v1 = vld [vmem:[%s4112_s0 + $0x6d0] sm:$0xff] }
  0xe1   :  { %987 = vmatprep.mubr.f32.mxu0 %v181_v2  ;;  %v239_v2 = vld [vmem:[%s4112_s0 + $0x6e8] sm:$0xff] }
  0xe3   :  { %603 = vmatmul.mubr.f32.gmra.mrb[80].mxu1 %v178_v4 }
  0xe4   :  { %988 = vmatmul.mubr.f32.gmra.mrb[80].mxu0 %v180_v5  ;;  %607 = vmatprep.mubr.f32.mxu1 %v183_v6  ;;  %v241_v5 = vld [vmem:[%s4112_s0 + $0x6f8] sm:$0xff] }
  0xe5   :  { %992 = vmatprep.mubr.f32.mxu0 %v185_v7 }
  0xe7   :  { %608 = vmatmul.mubr.f32.gmra.mrb[82].mxu1 %v182_v8 }
  0xe8   :  { %993 = vmatmul.mubr.f32.gmra.mrb[82].mxu0 %v184_v9  ;;  %612 = vmatprep.mubr.f32.mxu1 %v187_v10  ;;  %v238_v10 = vld [vmem:[%s4112_s0 + $0x6e0] sm:$0xff] }
  0xe9   :  { %997 = vmatprep.mubr.f32.mxu0 %v189_v11  ;;  %v240_v11 = vld [vmem:[%s4112_s0 + $0x6f0] sm:$0xff] }
  0xeb   :  { %613 = vmatmul.mubr.f32.gmra.mrb[84].mxu1 %v186_v12  ;;  %v243_v12 = vld [vmem:[%s4112_s0 + $0x708] sm:$0xff] }
  0xec   :  { %998 = vmatmul.mubr.f32.gmra.mrb[84].mxu0 %v188_v13  ;;  %617 = vmatprep.mubr.f32.mxu1 %v191_v14  ;;  %v245_v14 = vld [vmem:[%s4112_s0 + $0x718] sm:$0xff] }
  0xed   :  { %1002 = vmatprep.mubr.f32.mxu0 %v193_v15 }
  0xef   :  { %618 = vmatmul.mubr.f32.gmra.mrb[86].mxu1 %v190_v16 }
  0xf0   :  { %1003 = vmatmul.mubr.f32.gmra.mrb[86].mxu0 %v192_v17  ;;  %622 = vmatprep.mubr.f32.mxu1 %v195_v18 }
  0xf1   :  { %1007 = vmatprep.mubr.f32.mxu0 %v197_v19  ;;  %v242_v19 = vld [vmem:[%s4112_s0 + $0x700] sm:$0xff] }
  0xf3   :  { %623 = vmatmul.mubr.f32.gmra.mrb[88].mxu1 %v194_v20  ;;  %v244_v20 = vld [vmem:[%s4112_s0 + $0x710] sm:$0xff] }
  0xf4   :  { %1008 = vmatmul.mubr.f32.gmra.mrb[88].mxu0 %v196_v21  ;;  %627 = vmatprep.mubr.f32.mxu1 %v199_v22  ;;  %v247_v21 = vld [vmem:[%s4112_s0 + $0x728] sm:$0xff] }
  0xf5   :  { %1012 = vmatprep.mubr.f32.mxu0 %v201_v23  ;;  %v249_v23 = vld [vmem:[%s4112_s0 + $0x738] sm:$0xff] }
  0xf7   :  { %628 = vmatmul.mubr.f32.gmra.mrb[90].mxu1 %v198_v24 }
  0xf8   :  { %1013 = vmatmul.mubr.f32.gmra.mrb[90].mxu0 %v200_v25  ;;  %632 = vmatprep.mubr.f32.mxu1 %v203_v26 }
  0xf9   :  { %1017 = vmatprep.mubr.f32.mxu0 %v205_v27 }
  0xfb   :  { %633 = vmatmul.mubr.f32.gmra.mrb[92].mxu1 %v202_v28  ;;  %v246_v28 = vld [vmem:[%s4112_s0 + $0x720] sm:$0xff] }
  0xfc   :  { %1018 = vmatmul.mubr.f32.gmra.mrb[92].mxu0 %v204_v29  ;;  %637 = vmatprep.mubr.f32.mxu1 %v207_v30  ;;  %v248_v29 = vld [vmem:[%s4112_s0 + $0x730] sm:$0xff]  ;;  %v251_v30 = vld [vmem:[%s4112_s0 + $0x748] sm:$0xff] }
  0xfd   :  { %1022 = vmatprep.mubr.f32.mxu0 %v209_v31 }
  0xff   :  { %638 = vmatmul.mubr.f32.gmra.mrb[94].mxu1 %v206_v32  ;;  %v253_v32 = vld [vmem:[%s4112_s0 + $0x758] sm:$0xff] }
 0x100   :  { %1023 = vmatmul.mubr.f32.gmra.mrb[94].mxu0 %v208_v33  ;;  %642 = vmatprep.mubr.f32.mxu1 %v211_v34 }
 0x101   :  { %1027 = vmatprep.mubr.f32.mxu0 %v213_v35 }
 0x103   :  { %643 = vmatmul.mubr.f32.gmra.mrb[96].mxu1 %v210_v36 }
 0x104   :  { %1028 = vmatmul.mubr.f32.gmra.mrb[96].mxu0 %v212_v37  ;;  %647 = vmatprep.mubr.f32.mxu1 %v215_v38  ;;  %v250_v37 = vld [vmem:[%s4112_s0 + $0x740] sm:$0xff]  ;;  %v252_v38 = vld [vmem:[%s4112_s0 + $0x750] sm:$0xff] }
 0x105   :  { %1032 = vmatprep.mubr.f32.mxu0 %v217_v39  ;;  %v255_v39 = vld [vmem:[%s4112_s0 + $0x768] sm:$0xff] }
 0x107   :  { %648 = vmatmul.mubr.f32.gmra.mrb[98].mxu1 %v214_v3 }
 0x108   :  { %1033 = vmatmul.mubr.f32.gmra.mrb[98].mxu0 %v216_v40  ;;  %652 = vmatprep.mubr.f32.mxu1 %v219_v41  ;;  %v257_v40 = vld [vmem:[%s4112_s0 + $0x778] sm:$0xff] }
 0x109   :  { %1037 = vmatprep.mubr.f32.mxu0 %v221_v42 }
 0x10b   :  { %653 = vmatmul.mubr.f32.gmra.mrb[100].mxu1 %v218_v43 }
 0x10c   :  { %1038 = vmatmul.mubr.f32.gmra.mrb[100].mxu0 %v220_v44  ;;  %657 = vmatprep.mubr.f32.mxu1 %v223_v45  ;;  %v254_v45 = vld [vmem:[%s4112_s0 + $0x760] sm:$0xff] }
 0x10d   :  { %1042 = vmatprep.mubr.f32.mxu0 %v225_v46  ;;  %v256_v46 = vld [vmem:[%s4112_s0 + $0x770] sm:$0xff] }
 0x10f   :  { %658 = vmatmul.mubr.f32.gmra.mrb[102].mxu1 %v222_v47  ;;  %v259_v47 = vld [vmem:[%s4112_s0 + $0x788] sm:$0xff] }
 0x110   :  { %1043 = vmatmul.mubr.f32.gmra.mrb[102].mxu0 %v224_v48  ;;  %662 = vmatprep.mubr.f32.mxu1 %v227_v49  ;;  %v261_v49 = vld [vmem:[%s4112_s0 + $0x798] sm:$0xff] }
 0x111   :  { %1047 = vmatprep.mubr.f32.mxu0 %v229_v50 }
 0x113   :  { %663 = vmatmul.mubr.f32.gmra.mrb[104].mxu1 %v226_v51 }
 0x114   :  { %1048 = vmatmul.mubr.f32.gmra.mrb[104].mxu0 %v228_v52  ;;  %667 = vmatprep.mubr.f32.mxu1 %v231_v53 }
 0x115   :  { %1052 = vmatprep.mubr.f32.mxu0 %v233_v54  ;;  %v258_v54 = vld [vmem:[%s4112_s0 + $0x780] sm:$0xff] }
 0x116   :  { %v404_v58 = vpop.f32.mrb[0].mxu1 }
 0x117   :  { %v789_v60 = vpop.f32.mrb[0].mxu0  ;;  %v406_v61 = vpop.f32.mrb[1].mxu1  ;;  %668 = vmatmul.mubr.f32.gmra.mrb[106].mxu1 %v230_v55  ;;  %v260_v55 = vld [vmem:[%s4112_s0 + $0x790] sm:$0xff] }
 0x118   :  { %v3262_v62 = vadd.f32 %v789_v60, %v404_v58  ;;  %v791_v63 = vpop.f32.mrb[1].mxu0  ;;  %1053 = vmatmul.mubr.f32.gmra.mrb[106].mxu0 %v232_v56  ;;  %672 = vmatprep.mubr.f32.mxu1 %v235_v57  ;;  %v263_v56 = vld [vmem:[%s4112_s0 + $0x7a8] sm:$0xff]  ;;  %v265_v58 = vld [vmem:[%s4112_s0 + $0x7b8] sm:$0xff] }
 0x119   :  { %1057 = vmatprep.mubr.f32.mxu0 %v237_v59 }
 0x11a   :  { %1108 = vadd.xlane.f32.xlu0 %v3262_v62  ;;  %v409_v4 = vpop.f32.mrb[2].mxu1 }
 0x11b   :  { %v794_v6 = vpop.f32.mrb[2].mxu0  ;;  %v411_v7 = vpop.f32.mrb[3].mxu1  ;;  %673 = vmatmul.mubr.f32.gmra.mrb[108].mxu1 %v234_v0  ;;  %v262_v0 = vld [vmem:[%s4112_s0 + $0x7a0] sm:$0xff] }
 0x11c   :  { %v3277_v8 = vadd.f32 %v794_v6, %v409_v4  ;;  %v796_v9 = vpop.f32.mrb[3].mxu0  ;;  %1058 = vmatmul.mubr.f32.gmra.mrb[108].mxu0 %v236_v1  ;;  %677 = vmatprep.mubr.f32.mxu1 %v239_v2  ;;  %v264_v1 = vld [vmem:[%s4112_s0 + $0x7b0] sm:$0xff]  ;;  %v267_v2 = vld [vmem:[%s4112_s0 + $0x7c8] sm:$0xff] }
 0x11d   :  { %1062 = vmatprep.mubr.f32.mxu0 %v241_v5  ;;  %v269_v5 = vld [vmem:[%s4112_s0 + $0x7d8] sm:$0xff] }
 0x11e   :  { %1110 = vadd.xlane.f32.xlu0 %v3277_v8  ;;  %v414_v13 = vpop.f32.mrb[4].mxu1 }
 0x11f   :  { %v799_v15 = vpop.f32.mrb[4].mxu0  ;;  %v416_v16 = vpop.f32.mrb[5].mxu1  ;;  %678 = vmatmul.mubr.f32.gmra.mrb[110].mxu1 %v238_v10 }
 0x120   :  { %v3292_v17 = vadd.f32 %v799_v15, %v414_v13  ;;  %v801_v18 = vpop.f32.mrb[5].mxu0  ;;  %1063 = vmatmul.mubr.f32.gmra.mrb[110].mxu0 %v240_v11  ;;  %682 = vmatprep.mubr.f32.mxu1 %v243_v12  ;;  %v266_v11 = vld [vmem:[%s4112_s0 + $0x7c0] sm:$0xff]  ;;  %v268_v12 = vld [vmem:[%s4112_s0 + $0x7d0] sm:$0xff]  ;;  %v271_v13 = vld [vmem:[%s4112_s0 + $0x7e8] sm:$0xff] }
 0x121   :  { %1067 = vmatprep.mubr.f32.mxu0 %v245_v14  ;;  %v273_v15 = vld [vmem:[%s4112_s0 + $0x7f8] sm:$0xff] }
 0x122   :  { %1112 = vadd.xlane.f32.xlu1 %v3292_v17  ;;  %v419_v22 = vpop.f32.mrb[6].mxu1 }
 0x123   :  { %v804_v24 = vpop.f32.mrb[6].mxu0  ;;  %v421_v25 = vpop.f32.mrb[7].mxu1  ;;  %683 = vmatmul.mubr.f32.gmra.mrb[112].mxu1 %v242_v19 }
 0x124   :  { %v3307_v26 = vadd.f32 %v804_v24, %v419_v22  ;;  %v806_v27 = vpop.f32.mrb[7].mxu0  ;;  %1068 = vmatmul.mubr.f32.gmra.mrb[112].mxu0 %v244_v20  ;;  %687 = vmatprep.mubr.f32.mxu1 %v247_v21  ;;  %v270_v21 = vld [vmem:[%s4112_s0 + $0x7e0] sm:$0xff]  ;;  %v272_v22 = vld [vmem:[%s4112_s0 + $0x7f0] sm:$0xff] }
 0x125   :  { %1072 = vmatprep.mubr.f32.mxu0 %v249_v23 }
 0x126   :  { %1114 = vadd.xlane.f32.xlu1 %v3307_v26  ;;  %v424_v31 = vpop.f32.mrb[8].mxu1 }
 0x127   :  { %v809_v33 = vpop.f32.mrb[8].mxu0  ;;  %v426_v34 = vpop.f32.mrb[9].mxu1  ;;  %688 = vmatmul.mubr.f32.gmra.mrb[114].mxu1 %v246_v28 }
 0x128   :  { %v3322_v35 = vadd.f32 %v809_v33, %v424_v31  ;;  %v811_v36 = vpop.f32.mrb[9].mxu0  ;;  %1073 = vmatmul.mubr.f32.gmra.mrb[114].mxu0 %v248_v29  ;;  %692 = vmatprep.mubr.f32.mxu1 %v251_v30 }
 0x129   :  { %1077 = vmatprep.mubr.f32.mxu0 %v253_v32 }
 0x12a   :  { %1116 = vadd.xlane.f32.xlu0 %v3322_v35  ;;  %v429_v3 = vpop.f32.mrb[10].mxu1 }
 0x12b   :  { %v814_v41 = vpop.f32.mrb[10].mxu0  ;;  %v431_v42 = vpop.f32.mrb[11].mxu1  ;;  %693 = vmatmul.mubr.f32.gmra.mrb[116].mxu1 %v250_v37 }
 0x12c   :  { %v3337_v43 = vadd.f32 %v814_v41, %v429_v3  ;;  %v816_v44 = vpop.f32.mrb[11].mxu0  ;;  %1078 = vmatmul.mubr.f32.gmra.mrb[116].mxu0 %v252_v38  ;;  %697 = vmatprep.mubr.f32.mxu1 %v255_v39 }
 0x12d   :  { %1082 = vmatprep.mubr.f32.mxu0 %v257_v40 }
 0x12e   :  { %1118 = vadd.xlane.f32.xlu1 %v3337_v43  ;;  %v434_v48 = vpop.f32.mrb[12].mxu1 }
 0x12f   :  { %v819_v50 = vpop.f32.mrb[12].mxu0  ;;  %v436_v51 = vpop.f32.mrb[13].mxu1  ;;  %698 = vmatmul.mubr.f32.gmra.mrb[118].mxu1 %v254_v45 }
 0x130   :  { %v3352_v52 = vadd.f32 %v819_v50, %v434_v48  ;;  %v821_v53 = vpop.f32.mrb[13].mxu0  ;;  %1083 = vmatmul.mubr.f32.gmra.mrb[118].mxu0 %v256_v46  ;;  %702 = vmatprep.mubr.f32.mxu1 %v259_v47 }
 0x131   :  { %1087 = vmatprep.mubr.f32.mxu0 %v261_v49 }
 0x132   :  { %1120 = vadd.xlane.f32.xlu0 %v3352_v52  ;;  %v439_v57 = vpop.f32.mrb[14].mxu1 }
 0x133   :  { %v824_v59 = vpop.f32.mrb[14].mxu0  ;;  %v441_v60 = vpop.f32.mrb[15].mxu1  ;;  %703 = vmatmul.mubr.f32.gmra.mrb[120].mxu1 %v258_v54 }
 0x134   :  { %v3367_v61 = vadd.f32 %v824_v59, %v439_v57  ;;  %v826_v63 = vpop.f32.mrb[15].mxu0  ;;  %1088 = vmatmul.mubr.f32.gmra.mrb[120].mxu0 %v260_v55  ;;  %707 = vmatprep.mubr.f32.mxu1 %v263_v56 }
 0x135   :  { %1092 = vmatprep.mubr.f32.mxu0 %v265_v58 }
 0x136   :  { %1122 = vadd.xlane.f32.xlu1 %v3367_v61  ;;  %v444_v4 = vpop.f32.mrb[16].mxu1 }
 0x137   :  { %v829_v6 = vpop.f32.mrb[16].mxu0  ;;  %v446_v7 = vpop.f32.mrb[17].mxu1  ;;  %708 = vmatmul.mubr.f32.gmra.mrb[122].mxu1 %v262_v0 }
 0x138   :  { %v3382_v9 = vadd.f32 %v829_v6, %v444_v4  ;;  %v831_v10 = vpop.f32.mrb[17].mxu0  ;;  %1093 = vmatmul.mubr.f32.gmra.mrb[122].mxu0 %v264_v1  ;;  %712 = vmatprep.mubr.f32.mxu1 %v267_v2 }
 0x139   :  { %1097 = vmatprep.mubr.f32.mxu0 %v269_v5 }
 0x13a   :  { %1124 = vadd.xlane.f32.xlu0 %v3382_v9  ;;  %v449_v14 = vpop.f32.mrb[18].mxu1 }
 0x13b   :  { %v834_v16 = vpop.f32.mrb[18].mxu0  ;;  %v451_v18 = vpop.f32.mrb[19].mxu1  ;;  %713 = vmatmul.mubr.f32.gmra.mrb[124].mxu1 %v266_v11 }
 0x13c   :  { %v3397_v19 = vadd.f32 %v834_v16, %v449_v14  ;;  %v836_v20 = vpop.f32.mrb[19].mxu0  ;;  %1098 = vmatmul.mubr.f32.gmra.mrb[124].mxu0 %v268_v12  ;;  %717 = vmatprep.mubr.f32.mxu1 %v271_v13 }
 0x13d   :  { %1102 = vmatprep.mubr.f32.mxu0 %v273_v15 }
 0x13e   :  { %1126 = vadd.xlane.f32.xlu1 %v3397_v19  ;;  %v454_v23 = vpop.f32.mrb[20].mxu1 }
 0x13f   :  { %v839_v24 = vpop.f32.mrb[20].mxu0  ;;  %v456_v25 = vpop.f32.mrb[21].mxu1  ;;  %718 = vmatmul.mubr.f32.gmra.mrb[126].mxu1 %v270_v21 }
 0x140   :  { %v3406_v27 = vadd.f32 %v839_v24, %v454_v23  ;;  %v841_v28 = vpop.f32.mrb[21].mxu0  ;;  %1103 = vmatmul.mubr.f32.gmra.mrb[126].mxu0 %v272_v22 }
 0x142   :  { %1128 = vadd.xlane.f32.xlu0 %v3406_v27  ;;  %v459_v29 = vpop.f32.mrb[22].mxu1 }
 0x143   :  { %v844_v30 = vpop.f32.mrb[22].mxu0  ;;  %v461_v31 = vpop.f32.mrb[23].mxu1 }
 0x144   :  { %v3409_v32 = vadd.f32 %v844_v30, %v459_v29  ;;  %v846_v33 = vpop.f32.mrb[23].mxu0 }
 0x146   :  { %1130 = vadd.xlane.f32.xlu1 %v3409_v32  ;;  %v464_v34 = vpop.f32.mrb[24].mxu1 }
 0x147   :  { %v849_v36 = vpop.f32.mrb[24].mxu0  ;;  %v466_v37 = vpop.f32.mrb[25].mxu1 }
 0x148   :  { %v3412_v38 = vadd.f32 %v849_v36, %v464_v34  ;;  %v851_v39 = vpop.f32.mrb[25].mxu0 }
 0x14a   :  { %1132 = vadd.xlane.f32.xlu0 %v3412_v38  ;;  %v469_v3 = vpop.f32.mrb[26].mxu1 }
 0x14b   :  { %v854_v40 = vpop.f32.mrb[26].mxu0  ;;  %v471_v41 = vpop.f32.mrb[27].mxu1 }
 0x14c   :  { %v3415_v42 = vadd.f32 %v854_v40, %v469_v3  ;;  %v856_v44 = vpop.f32.mrb[27].mxu0 }
 0x14e   :  { %1134 = vadd.xlane.f32.xlu1 %v3415_v42  ;;  %v474_v45 = vpop.f32.mrb[28].mxu1 }
 0x14f   :  { %v859_v46 = vpop.f32.mrb[28].mxu0  ;;  %v476_v47 = vpop.f32.mrb[29].mxu1 }
 0x150   :  { %v3418_v48 = vadd.f32 %v859_v46, %v474_v45  ;;  %v861_v49 = vpop.f32.mrb[29].mxu0 }
 0x152   :  { %1136 = vadd.xlane.f32.xlu0 %v3418_v48  ;;  %v479_v50 = vpop.f32.mrb[30].mxu1 }
 0x153   :  { %v864_v51 = vpop.f32.mrb[30].mxu0  ;;  %v481_v53 = vpop.f32.mrb[31].mxu1 }
 0x154   :  { %v3421_v54 = vadd.f32 %v864_v51, %v479_v50  ;;  %v866_v55 = vpop.f32.mrb[31].mxu0 }
 0x156   :  { %1138 = vadd.xlane.f32.xlu1 %v3421_v54  ;;  %v484_v56 = vpop.f32.mrb[32].mxu1 }
 0x157   :  { %v869_v57 = vpop.f32.mrb[32].mxu0  ;;  %v486_v58 = vpop.f32.mrb[33].mxu1 }
 0x158   :  { %v3424_v59 = vadd.f32 %v869_v57, %v484_v56  ;;  %v871_v60 = vpop.f32.mrb[33].mxu0 }
 0x15a   :  { %1140 = vadd.xlane.f32.xlu0 %v3424_v59  ;;  %v489_v63 = vpop.f32.mrb[34].mxu1 }
 0x15b   :  { %v874_v0 = vpop.f32.mrb[34].mxu0  ;;  %v491_v1 = vpop.f32.mrb[35].mxu1 }
 0x15c   :  { %v3427_v2 = vadd.f32 %v874_v0, %v489_v63  ;;  %v876_v4 = vpop.f32.mrb[35].mxu0 }
 0x15e   :  { %1142 = vadd.xlane.f32.xlu1 %v3427_v2  ;;  %v494_v5 = vpop.f32.mrb[36].mxu1 }
 0x15f   :  { %v879_v6 = vpop.f32.mrb[36].mxu0  ;;  %v496_v7 = vpop.f32.mrb[37].mxu1 }
 0x160   :  { %v3430_v10 = vadd.f32 %v879_v6, %v494_v5  ;;  %v881_v11 = vpop.f32.mrb[37].mxu0 }
 0x162   :  { %1144 = vadd.xlane.f32.xlu0 %v3430_v10  ;;  %v499_v12 = vpop.f32.mrb[38].mxu1 }
 0x163   :  { %v884_v13 = vpop.f32.mrb[38].mxu0  ;;  %v501_v14 = vpop.f32.mrb[39].mxu1 }
 0x164   :  { %v3433_v15 = vadd.f32 %v884_v13, %v499_v12  ;;  %v886_v16 = vpop.f32.mrb[39].mxu0 }
 0x166   :  { %1146 = vadd.xlane.f32.xlu1 %v3433_v15  ;;  %v504_v18 = vpop.f32.mrb[40].mxu1 }
 0x167   :  { %v889_v20 = vpop.f32.mrb[40].mxu0  ;;  %v506_v21 = vpop.f32.mrb[41].mxu1 }
 0x168   :  { %v3436_v22 = vadd.f32 %v889_v20, %v504_v18  ;;  %v891_v23 = vpop.f32.mrb[41].mxu0 }
 0x16a   :  { %1148 = vadd.xlane.f32.xlu0 %v3436_v22  ;;  %v509_v24 = vpop.f32.mrb[42].mxu1 }
 0x16b   :  { %v894_v25 = vpop.f32.mrb[42].mxu0  ;;  %v511_v28 = vpop.f32.mrb[43].mxu1 }
 0x16c   :  { %v3439_v29 = vadd.f32 %v894_v25, %v509_v24  ;;  %v896_v30 = vpop.f32.mrb[43].mxu0 }
 0x16e   :  { %1150 = vadd.xlane.f32.xlu1 %v3439_v29  ;;  %v514_v31 = vpop.f32.mrb[44].mxu1 }
 0x16f   :  { %v899_v33 = vpop.f32.mrb[44].mxu0  ;;  %v516_v34 = vpop.f32.mrb[45].mxu1 }
 0x170   :  { %v3442_v36 = vadd.f32 %v899_v33, %v514_v31  ;;  %v901_v37 = vpop.f32.mrb[45].mxu0 }
 0x172   :  { %1152 = vadd.xlane.f32.xlu0 %v3442_v36  ;;  %v519_v39 = vpop.f32.mrb[46].mxu1 }
 0x173   :  { %v904_v3 = vpop.f32.mrb[46].mxu0  ;;  %v521_v40 = vpop.f32.mrb[47].mxu1 }
 0x174   :  { %v3445_v41 = vadd.f32 %v904_v3, %v519_v39  ;;  %v906_v44 = vpop.f32.mrb[47].mxu0 }
 0x176   :  { %1154 = vadd.xlane.f32.xlu1 %v3445_v41  ;;  %v524_v45 = vpop.f32.mrb[48].mxu1 }
 0x177   :  { %v909_v46 = vpop.f32.mrb[48].mxu0  ;;  %v526_v47 = vpop.f32.mrb[49].mxu1 }
 0x178   :  { %v3448_v49 = vadd.f32 %v909_v46, %v524_v45  ;;  %v911_v50 = vpop.f32.mrb[49].mxu0 }
 0x17a   :  { %1156 = vadd.xlane.f32.xlu0 %v3448_v49  ;;  %v529_v51 = vpop.f32.mrb[50].mxu1 }
 0x17b   :  { %v914_v53 = vpop.f32.mrb[50].mxu0  ;;  %v531_v55 = vpop.f32.mrb[51].mxu1 }
 0x17c   :  { %v3451_v56 = vadd.f32 %v914_v53, %v529_v51  ;;  %v916_v57 = vpop.f32.mrb[51].mxu0 }
 0x17e   :  { %1158 = vadd.xlane.f32.xlu1 %v3451_v56  ;;  %v534_v58 = vpop.f32.mrb[52].mxu1 }
 0x17f   :  { %v919_v60 = vpop.f32.mrb[52].mxu0  ;;  %v536_v63 = vpop.f32.mrb[53].mxu1 }
 0x180   :  { %v3454_v0 = vadd.f32 %v919_v60, %v534_v58  ;;  %v921_v1 = vpop.f32.mrb[53].mxu0 }
 0x182   :  { %1160 = vadd.xlane.f32.xlu0 %v3454_v0  ;;  %v539_v4 = vpop.f32.mrb[54].mxu1 }
 0x183   :  { %v924_v5 = vpop.f32.mrb[54].mxu0  ;;  %v541_v6 = vpop.f32.mrb[55].mxu1 }
 0x184   :  { %v3457_v7 = vadd.f32 %v924_v5, %v539_v4  ;;  %v926_v11 = vpop.f32.mrb[55].mxu0 }
 0x186   :  { %1162 = vadd.xlane.f32.xlu1 %v3457_v7  ;;  %v544_v12 = vpop.f32.mrb[56].mxu1 }
 0x187   :  { %v929_v13 = vpop.f32.mrb[56].mxu0  ;;  %v546_v14 = vpop.f32.mrb[57].mxu1 }
 0x188   :  { %v3460_v16 = vadd.f32 %v929_v13, %v544_v12  ;;  %v931_v18 = vpop.f32.mrb[57].mxu0 }
 0x18a   :  { %1164 = vadd.xlane.f32.xlu0 %v3460_v16  ;;  %v549_v20 = vpop.f32.mrb[58].mxu1 }
 0x18b   :  { %v934_v21 = vpop.f32.mrb[58].mxu0  ;;  %v551_v23 = vpop.f32.mrb[59].mxu1 }
 0x18c   :  { %v3463_v24 = vadd.f32 %v934_v21, %v549_v20  ;;  %v936_v25 = vpop.f32.mrb[59].mxu0 }
 0x18e   :  { %1166 = vadd.xlane.f32.xlu1 %v3463_v24  ;;  %v554_v28 = vpop.f32.mrb[60].mxu1 }
 0x18f   :  { %v939_v30 = vpop.f32.mrb[60].mxu0  ;;  %v556_v31 = vpop.f32.mrb[61].mxu1 }
 0x190   :  { %v3466_v33 = vadd.f32 %v939_v30, %v554_v28  ;;  %v941_v34 = vpop.f32.mrb[61].mxu0 }
 0x192   :  { %1168 = vadd.xlane.f32.xlu0 %v3466_v33  ;;  %v559_v37 = vpop.f32.mrb[62].mxu1 }
 0x193   :  { %v944_v39 = vpop.f32.mrb[62].mxu0  ;;  %v561_v3 = vpop.f32.mrb[63].mxu1 }
 0x194   :  { %v3469_v40 = vadd.f32 %v944_v39, %v559_v37  ;;  %v946_v44 = vpop.f32.mrb[63].mxu0 }
 0x196   :  { %1170 = vadd.xlane.f32.xlu1 %v3469_v40  ;;  %v564_v45 = vpop.f32.mrb[64].mxu1 }
 0x197   :  { %v949_v46 = vpop.f32.mrb[64].mxu0  ;;  %v566_v47 = vpop.f32.mrb[65].mxu1 }
 0x198   :  { %v3472_v50 = vadd.f32 %v949_v46, %v564_v45  ;;  %v951_v51 = vpop.f32.mrb[65].mxu0 }
 0x19a   :  { %1172 = vadd.xlane.f32.xlu0 %v3472_v50  ;;  %v569_v53 = vpop.f32.mrb[66].mxu1 }
 0x19b   :  { %v954_v55 = vpop.f32.mrb[66].mxu0  ;;  %v571_v57 = vpop.f32.mrb[67].mxu1 }
 0x19c   :  { %v3475_v58 = vadd.f32 %v954_v55, %v569_v53  ;;  %v956_v60 = vpop.f32.mrb[67].mxu0 }
 0x19e   :  { %1174 = vadd.xlane.f32.xlu1 %v3475_v58  ;;  %v574_v63 = vpop.f32.mrb[68].mxu1 }
 0x19f   :  { %v959_v1 = vpop.f32.mrb[68].mxu0  ;;  %v576_v4 = vpop.f32.mrb[69].mxu1 }
 0x1a0   :  { %v3478_v5 = vadd.f32 %v959_v1, %v574_v63  ;;  %v961_v6 = vpop.f32.mrb[69].mxu0 }
 0x1a2   :  { %1176 = vadd.xlane.f32.xlu0 %v3478_v5  ;;  %v579_v11 = vpop.f32.mrb[70].mxu1 }
 0x1a3   :  { %v964_v12 = vpop.f32.mrb[70].mxu0  ;;  %v581_v13 = vpop.f32.mrb[71].mxu1 }
 0x1a4   :  { %v3481_v14 = vadd.f32 %v964_v12, %v579_v11  ;;  %v966_v18 = vpop.f32.mrb[71].mxu0 }
 0x1a6   :  { %1178 = vadd.xlane.f32.xlu1 %v3481_v14  ;;  %v584_v20 = vpop.f32.mrb[72].mxu1 }
 0x1a7   :  { %v969_v21 = vpop.f32.mrb[72].mxu0  ;;  %v1109_v23 = vpop.xlane.xlu0 %1108 }
 0x1a8   :  { %v1237_v25 = vmul.f32 0.0078125, %v1109_v23  ;;  %v3484_v28 = vadd.f32 %v969_v21, %v584_v20  ;;  %v586_v30 = vpop.f32.mrb[73].mxu1  ;;  %v971_v31 = vpop.f32.mrb[73].mxu0 }
 0x1aa   :  { %1180 = vadd.xlane.f32.xlu0 %v3484_v28  ;;  %v589_v34 = vpop.f32.mrb[74].mxu1  ;;  %v3488_v37 = vsub.f32 %v3262_v62, %v1237_v25 }
 0x1ab   :  { %v974_v39 = vpop.f32.mrb[74].mxu0  ;;  %v1111_v3 = vpop.xlane.xlu0 %1110 }
 0x1ac   :  { %v1238_v44 = vmul.f32 0.0078125, %v1111_v3  ;;  %v3490_v45 = vadd.f32 %v974_v39, %v589_v34  ;;  %v591_v46 = vpop.f32.mrb[75].mxu1  ;;  %v976_v47 = vpop.f32.mrb[75].mxu0  ;;  %v1365_v51 = vmul.f32 %v3488_v37, %v3488_v37 }
 0x1ae   :  { %1429 = vadd.xlane.f32.xlu0 %v1365_v51  ;;  %1182 = vadd.xlane.f32.xlu1 %v3490_v45  ;;  %v594_v53 = vpop.f32.mrb[76].mxu1  ;;  %v3496_v55 = vsub.f32 %v3277_v8, %v1238_v44 }
 0x1af   :  { %v979_v57 = vpop.f32.mrb[76].mxu0  ;;  %v1113_v62 = vpop.xlane.xlu1 %1112 }
 0x1b0   :  { %v1239_v60 = vmul.f32 0.0078125, %v1113_v62  ;;  %v3498_v63 = vadd.f32 %v979_v57, %v594_v53  ;;  %v596_v1 = vpop.f32.mrb[77].mxu1  ;;  %v981_v4 = vpop.f32.mrb[77].mxu0  ;;  %v1366_v6 = vmul.f32 %v3496_v55, %v3496_v55 }
 0x1b2   :  { %1431 = vadd.xlane.f32.xlu1 %v1366_v6  ;;  %1184 = vadd.xlane.f32.xlu0 %v3498_v63  ;;  %v599_v11 = vpop.f32.mrb[78].mxu1  ;;  %v3504_v12 = vsub.f32 %v3292_v17, %v1239_v60 }
 0x1b3   :  { %v984_v13 = vpop.f32.mrb[78].mxu0  ;;  %v1115_v8 = vpop.xlane.xlu1 %1114 }
 0x1b4   :  { %v1240_v18 = vmul.f32 0.0078125, %v1115_v8  ;;  %v3506_v20 = vadd.f32 %v984_v13, %v599_v11  ;;  %v601_v21 = vpop.f32.mrb[79].mxu1  ;;  %v986_v23 = vpop.f32.mrb[79].mxu0  ;;  %v1367_v25 = vmul.f32 %v3504_v12, %v3504_v12 }
 0x1b6   :  { %1433 = vadd.xlane.f32.xlu0 %v1367_v25  ;;  %1186 = vadd.xlane.f32.xlu1 %v3506_v20  ;;  %v604_v30 = vpop.f32.mrb[80].mxu1  ;;  %v3512_v31 = vsub.f32 %v3307_v26, %v1240_v18 }
 0x1b7   :  { %v989_v34 = vpop.f32.mrb[80].mxu0  ;;  %v1117_v17 = vpop.xlane.xlu0 %1116 }
 0x1b8   :  { %v1241_v39 = vmul.f32 0.0078125, %v1117_v17  ;;  %v3514_v3 = vadd.f32 %v989_v34, %v604_v30  ;;  %v606_v44 = vpop.f32.mrb[81].mxu1  ;;  %v991_v46 = vpop.f32.mrb[81].mxu0  ;;  %v1368_v47 = vmul.f32 %v3512_v31, %v3512_v31 }
 0x1ba   :  { %1435 = vadd.xlane.f32.xlu1 %v1368_v47  ;;  %1188 = vadd.xlane.f32.xlu0 %v3514_v3  ;;  %v609_v51 = vpop.f32.mrb[82].mxu1  ;;  %v3520_v53 = vsub.f32 %v3322_v35, %v1241_v39 }
 0x1bb   :  { %v994_v57 = vpop.f32.mrb[82].mxu0  ;;  %v1119_v26 = vpop.xlane.xlu1 %1118 }
 0x1bc   :  { %v1242_v62 = vmul.f32 0.0078125, %v1119_v26  ;;  %v3522_v60 = vadd.f32 %v994_v57, %v609_v51  ;;  %v611_v1 = vpop.f32.mrb[83].mxu1  ;;  %v996_v4 = vpop.f32.mrb[83].mxu0  ;;  %v1369_v6 = vmul.f32 %v3520_v53, %v3520_v53 }
 0x1be   :  { %1437 = vadd.xlane.f32.xlu0 %v1369_v6  ;;  %1190 = vadd.xlane.f32.xlu1 %v3522_v60  ;;  %v614_v11 = vpop.f32.mrb[84].mxu1  ;;  %v3528_v13 = vsub.f32 %v3337_v43, %v1242_v62 }
 0x1bf   :  { %v999_v8 = vpop.f32.mrb[84].mxu0  ;;  %v1121_v35 = vpop.xlane.xlu0 %1120 }
 0x1c0   :  { %v1243_v18 = vmul.f32 0.0078125, %v1121_v35  ;;  %v3530_v21 = vadd.f32 %v999_v8, %v614_v11  ;;  %v616_v23 = vpop.f32.mrb[85].mxu1  ;;  %v1001_v25 = vpop.f32.mrb[85].mxu0  ;;  %v1370_v30 = vmul.f32 %v3528_v13, %v3528_v13 }
 0x1c2   :  { %1439 = vadd.xlane.f32.xlu1 %v1370_v30  ;;  %1192 = vadd.xlane.f32.xlu0 %v3530_v21  ;;  %v619_v34 = vpop.f32.mrb[86].mxu1  ;;  %v3536_v17 = vsub.f32 %v3352_v52, %v1243_v18 }
 0x1c3   :  { %v1004_v39 = vpop.f32.mrb[86].mxu0  ;;  %v1123_v43 = vpop.xlane.xlu1 %1122 }
 0x1c4   :  { %v1244_v44 = vmul.f32 0.0078125, %v1123_v43  ;;  %v3538_v46 = vadd.f32 %v1004_v39, %v619_v34  ;;  %v621_v47 = vpop.f32.mrb[87].mxu1  ;;  %v1006_v51 = vpop.f32.mrb[87].mxu0  ;;  %v1371_v57 = vmul.f32 %v3536_v17, %v3536_v17 }
 0x1c6   :  { %1441 = vadd.xlane.f32.xlu0 %v1371_v57  ;;  %1194 = vadd.xlane.f32.xlu1 %v3538_v46  ;;  %v624_v26 = vpop.f32.mrb[88].mxu1  ;;  %v3544_v62 = vsub.f32 %v3367_v61, %v1244_v44 }
 0x1c7   :  { %v1009_v1 = vpop.f32.mrb[88].mxu0  ;;  %v1125_v52 = vpop.xlane.xlu0 %1124 }
 0x1c8   :  { %v1245_v4 = vmul.f32 0.0078125, %v1125_v52  ;;  %v3546_v6 = vadd.f32 %v1009_v1, %v624_v26  ;;  %v626_v11 = vpop.f32.mrb[89].mxu1  ;;  %v1011_v8 = vpop.f32.mrb[89].mxu0  ;;  %v1372_v35 = vmul.f32 %v3544_v62, %v3544_v62 }
 0x1ca   :  { %1443 = vadd.xlane.f32.xlu1 %v1372_v35  ;;  %1196 = vadd.xlane.f32.xlu0 %v3546_v6  ;;  %v629_v18 = vpop.f32.mrb[90].mxu1  ;;  %v3552_v23 = vsub.f32 %v3382_v9, %v1245_v4 }
 0x1cb   :  { %v1014_v25 = vpop.f32.mrb[90].mxu0  ;;  %v1127_v61 = vpop.xlane.xlu1 %1126 }
 0x1cc   :  { %v1246_v30 = vmul.f32 0.0078125, %v1127_v61  ;;  %v3554_v34 = vadd.f32 %v1014_v25, %v629_v18  ;;  %v631_v39 = vpop.f32.mrb[91].mxu1  ;;  %v1016_v43 = vpop.f32.mrb[91].mxu0  ;;  %v1373_v44 = vmul.f32 %v3552_v23, %v3552_v23 }
 0x1ce   :  { %1445 = vadd.xlane.f32.xlu0 %v1373_v44  ;;  %1198 = vadd.xlane.f32.xlu1 %v3554_v34  ;;  %v634_v47 = vpop.f32.mrb[92].mxu1  ;;  %v3560_v51 = vsub.f32 %v3397_v19, %v1246_v30 }
 0x1cf   :  { %v1019_v57 = vpop.f32.mrb[92].mxu0  ;;  %v1129_v9 = vpop.xlane.xlu0 %1128 }
 0x1d0   :  { %v1247_v26 = vmul.f32 0.0078125, %v1129_v9  ;;  %v3562_v1 = vadd.f32 %v1019_v57, %v634_v47  ;;  %v636_v52 = vpop.f32.mrb[93].mxu1  ;;  %v1021_v4 = vpop.f32.mrb[93].mxu0  ;;  %v1374_v11 = vmul.f32 %v3560_v51, %v3560_v51 }
 0x1d2   :  { %1447 = vadd.xlane.f32.xlu1 %v1374_v11  ;;  %1200 = vadd.xlane.f32.xlu0 %v3562_v1  ;;  %v639_v8 = vpop.f32.mrb[94].mxu1  ;;  %v3568_v35 = vsub.f32 %v3406_v27, %v1247_v26 }
 0x1d3   :  { %v1024_v18 = vpop.f32.mrb[94].mxu0  ;;  %v1131_v19 = vpop.xlane.xlu1 %1130 }
 0x1d4   :  { %v1248_v25 = vmul.f32 0.0078125, %v1131_v19  ;;  %v3570_v61 = vadd.f32 %v1024_v18, %v639_v8  ;;  %v641_v30 = vpop.f32.mrb[95].mxu1  ;;  %v1026_v39 = vpop.f32.mrb[95].mxu0  ;;  %v1375_v43 = vmul.f32 %v3568_v35, %v3568_v35 }
 0x1d6   :  { %1449 = vadd.xlane.f32.xlu0 %v1375_v43  ;;  %1202 = vadd.xlane.f32.xlu1 %v3570_v61  ;;  %v644_v44 = vpop.f32.mrb[96].mxu1  ;;  %v3576_v47 = vsub.f32 %v3409_v32, %v1248_v25 }
 0x1d7   :  { %v1029_v57 = vpop.f32.mrb[96].mxu0  ;;  %v1133_v27 = vpop.xlane.xlu0 %1132 }
 0x1d8   :  { %v1249_v9 = vmul.f32 0.0078125, %v1133_v27  ;;  %v3578_v26 = vadd.f32 %v1029_v57, %v644_v44  ;;  %v646_v52 = vpop.f32.mrb[97].mxu1  ;;  %v1031_v4 = vpop.f32.mrb[97].mxu0  ;;  %v1376_v11 = vmul.f32 %v3576_v47, %v3576_v47 }
 0x1da   :  { %1451 = vadd.xlane.f32.xlu1 %v1376_v11  ;;  %1204 = vadd.xlane.f32.xlu0 %v3578_v26  ;;  %v649_v8 = vpop.f32.mrb[98].mxu1  ;;  %v3584_v18 = vsub.f32 %v3412_v38, %v1249_v9 }
 0x1db   :  { %v1034_v19 = vpop.f32.mrb[98].mxu0  ;;  %v1135_v32 = vpop.xlane.xlu1 %1134 }
 0x1dc   :  { %v1250_v25 = vmul.f32 0.0078125, %v1135_v32  ;;  %v3586_v30 = vadd.f32 %v1034_v19, %v649_v8  ;;  %v651_v39 = vpop.f32.mrb[99].mxu1  ;;  %v1036_v43 = vpop.f32.mrb[99].mxu0  ;;  %v1377_v44 = vmul.f32 %v3584_v18, %v3584_v18 }
 0x1de   :  { %1453 = vadd.xlane.f32.xlu0 %v1377_v44  ;;  %1206 = vadd.xlane.f32.xlu1 %v3586_v30  ;;  %v654_v57 = vpop.f32.mrb[100].mxu1  ;;  %v3592_v27 = vsub.f32 %v3415_v42, %v1250_v25 }
 0x1df   :  { %v1039_v52 = vpop.f32.mrb[100].mxu0  ;;  %v1137_v38 = vpop.xlane.xlu0 %1136 }
 0x1e0   :  { %4134 = vst [vmem:[#allocation5_spill] sm:$0xff] %v3592_v27  ;;  %v1251_v9 = vmul.f32 0.0078125, %v1137_v38  ;;  %v3594_v4 = vadd.f32 %v1039_v52, %v654_v57  ;;  %v656_v11 = vpop.f32.mrb[101].mxu1  ;;  %v1041_v8 = vpop.f32.mrb[101].mxu0  ;;  %v1378_v19 = vmul.f32 %v3592_v27, %v3592_v27 }
 0x1e2   :  { %1455 = vadd.xlane.f32.xlu1 %v1378_v19  ;;  %1208 = vadd.xlane.f32.xlu0 %v3594_v4  ;;  %v659_v32 = vpop.f32.mrb[102].mxu1  ;;  %v3600_v39 = vsub.f32 %v3418_v48, %v1251_v9 }
 0x1e3   :  { %v1044_v43 = vpop.f32.mrb[102].mxu0  ;;  %v1139_v42 = vpop.xlane.xlu1 %1138 }
 0x1e4   :  { %4135 = vst [vmem:[#allocation6_spill] sm:$0xff] %v3600_v39  ;;  %v1252_v25 = vmul.f32 0.0078125, %v1139_v42  ;;  %v3602_v44 = vadd.f32 %v1044_v43, %v659_v32  ;;  %v661_v38 = vpop.f32.mrb[103].mxu1  ;;  %v1046_v57 = vpop.f32.mrb[103].mxu0  ;;  %v1379_v52 = vmul.f32 %v3600_v39, %v3600_v39 }
 0x1e6   :  { %1457 = vadd.xlane.f32.xlu0 %v1379_v52  ;;  %1210 = vadd.xlane.f32.xlu1 %v3602_v44  ;;  %v664_v11 = vpop.f32.mrb[104].mxu1  ;;  %v3608_v8 = vsub.f32 %v3421_v54, %v1252_v25 }
 0x1e7   :  { %v1049_v19 = vpop.f32.mrb[104].mxu0  ;;  %v1141_v48 = vpop.xlane.xlu0 %1140 }
 0x1e8   :  { %4136 = vst [vmem:[#allocation7_spill] sm:$0xff] %v3608_v8  ;;  %v1253_v9 = vmul.f32 0.0078125, %v1141_v48  ;;  %v3610_v27 = vadd.f32 %v1049_v19, %v664_v11  ;;  %v666_v42 = vpop.f32.mrb[105].mxu1  ;;  %v1051_v32 = vpop.f32.mrb[105].mxu0  ;;  %v1380_v43 = vmul.f32 %v3608_v8, %v3608_v8 }
 0x1ea   :  { %1459 = vadd.xlane.f32.xlu1 %v1380_v43  ;;  %1212 = vadd.xlane.f32.xlu0 %v3610_v27  ;;  %v669_v38 = vpop.f32.mrb[106].mxu1  ;;  %v3616_v57 = vsub.f32 %v3424_v59, %v1253_v9 }
 0x1eb   :  { %v1054_v52 = vpop.f32.mrb[106].mxu0  ;;  %v1143_v54 = vpop.xlane.xlu1 %1142 }
 0x1ec   :  { %4137 = vst [vmem:[#allocation8_spill] sm:$0xff] %v3616_v57  ;;  %v1254_v25 = vmul.f32 0.0078125, %v1143_v54  ;;  %v3618_v39 = vadd.f32 %v1054_v52, %v669_v38  ;;  %v671_v48 = vpop.f32.mrb[107].mxu1  ;;  %v1056_v11 = vpop.f32.mrb[107].mxu0  ;;  %v1381_v19 = vmul.f32 %v3616_v57, %v3616_v57 }
 0x1ee   :  { %1461 = vadd.xlane.f32.xlu0 %v1381_v19  ;;  %1214 = vadd.xlane.f32.xlu1 %v3618_v39  ;;  %v674_v42 = vpop.f32.mrb[108].mxu1  ;;  %v3624_v32 = vsub.f32 %v3427_v2, %v1254_v25 }
 0x1ef   :  { %v1059_v43 = vpop.f32.mrb[108].mxu0  ;;  %v1145_v59 = vpop.xlane.xlu0 %1144 }
 0x1f0   :  { %4138 = vst [vmem:[#allocation9_spill] sm:$0xff] %v3624_v32  ;;  %v1255_v9 = vmul.f32 0.0078125, %v1145_v59  ;;  %v3626_v8 = vadd.f32 %v1059_v43, %v674_v42  ;;  %v676_v54 = vpop.f32.mrb[109].mxu1  ;;  %v1061_v38 = vpop.f32.mrb[109].mxu0  ;;  %v1382_v52 = vmul.f32 %v3624_v32, %v3624_v32 }
 0x1f2   :  { %1463 = vadd.xlane.f32.xlu1 %v1382_v52  ;;  %1216 = vadd.xlane.f32.xlu0 %v3626_v8  ;;  %v679_v48 = vpop.f32.mrb[110].mxu1  ;;  %v3632_v11 = vsub.f32 %v3430_v10, %v1255_v9 }
 0x1f3   :  { %v1064_v19 = vpop.f32.mrb[110].mxu0  ;;  %v1147_v2 = vpop.xlane.xlu1 %1146 }
 0x1f4   :  { %4139 = vst [vmem:[#allocation10_spill] sm:$0xff] %v3632_v11  ;;  %v1256_v25 = vmul.f32 0.0078125, %v1147_v2  ;;  %v3634_v57 = vadd.f32 %v1064_v19, %v679_v48  ;;  %v681_v59 = vpop.f32.mrb[111].mxu1  ;;  %v1066_v42 = vpop.f32.mrb[111].mxu0  ;;  %v1383_v43 = vmul.f32 %v3632_v11, %v3632_v11 }
 0x1f6   :  { %1465 = vadd.xlane.f32.xlu0 %v1383_v43  ;;  %1218 = vadd.xlane.f32.xlu1 %v3634_v57  ;;  %v684_v54 = vpop.f32.mrb[112].mxu1  ;;  %v3640_v38 = vsub.f32 %v3433_v15, %v1256_v25 }
 0x1f7   :  { %v1069_v52 = vpop.f32.mrb[112].mxu0  ;;  %v1149_v10 = vpop.xlane.xlu0 %1148 }
 0x1f8   :  { %4140 = vst [vmem:[#allocation11_spill] sm:$0xff] %v3640_v38  ;;  %v1257_v9 = vmul.f32 0.0078125, %v1149_v10  ;;  %v3642_v32 = vadd.f32 %v1069_v52, %v684_v54  ;;  %v686_v2 = vpop.f32.mrb[113].mxu1  ;;  %v1071_v48 = vpop.f32.mrb[113].mxu0  ;;  %v1384_v19 = vmul.f32 %v3640_v38, %v3640_v38 }
 0x1fa   :  { %1467 = vadd.xlane.f32.xlu1 %v1384_v19  ;;  %1220 = vadd.xlane.f32.xlu0 %v3642_v32  ;;  %v689_v59 = vpop.f32.mrb[114].mxu1  ;;  %v3648_v42 = vsub.f32 %v3436_v22, %v1257_v9 }
 0x1fb   :  { %v1074_v43 = vpop.f32.mrb[114].mxu0  ;;  %v1151_v15 = vpop.xlane.xlu1 %1150 }
 0x1fc   :  { %4141 = vst [vmem:[#allocation12_spill] sm:$0xff] %v3648_v42  ;;  %v1258_v25 = vmul.f32 0.0078125, %v1151_v15  ;;  %v3650_v11 = vadd.f32 %v1074_v43, %v689_v59  ;;  %v691_v10 = vpop.f32.mrb[115].mxu1  ;;  %v1076_v54 = vpop.f32.mrb[115].mxu0  ;;  %v1385_v52 = vmul.f32 %v3648_v42, %v3648_v42 }
 0x1fe   :  { %4142 = vst [vmem:[#allocation13_spill] sm:$0xff] %v3650_v11  ;;  %1469 = vadd.xlane.f32.xlu0 %v1385_v52  ;;  %1222 = vadd.xlane.f32.xlu1 %v3650_v11  ;;  %v694_v2 = vpop.f32.mrb[116].mxu1  ;;  %v3656_v48 = vsub.f32 %v3439_v29, %v1258_v25 }
 0x1ff   :  { %v1079_v19 = vpop.f32.mrb[116].mxu0  ;;  %v1153_v22 = vpop.xlane.xlu0 %1152 }
 0x200   :  { %4143 = vst [vmem:[#allocation14_spill] sm:$0xff] %v3656_v48  ;;  %v1259_v9 = vmul.f32 0.0078125, %v1153_v22  ;;  %v3658_v38 = vadd.f32 %v1079_v19, %v694_v2  ;;  %v696_v15 = vpop.f32.mrb[117].mxu1  ;;  %v1081_v59 = vpop.f32.mrb[117].mxu0  ;;  %v1386_v43 = vmul.f32 %v3656_v48, %v3656_v48 }
 0x202   :  { %4144 = vst [vmem:[#allocation15_spill] sm:$0xff] %v3658_v38  ;;  %1471 = vadd.xlane.f32.xlu1 %v1386_v43  ;;  %1224 = vadd.xlane.f32.xlu0 %v3658_v38  ;;  %v699_v10 = vpop.f32.mrb[118].mxu1  ;;  %v3664_v54 = vsub.f32 %v3442_v36, %v1259_v9 }
 0x203   :  { %v1084_v52 = vpop.f32.mrb[118].mxu0  ;;  %v1155_v29 = vpop.xlane.xlu1 %1154 }
 0x204   :  { %4145 = vst [vmem:[#allocation16_spill] sm:$0xff] %v3664_v54  ;;  %v1260_v25 = vmul.f32 0.0078125, %v1155_v29  ;;  %v3666_v42 = vadd.f32 %v1084_v52, %v699_v10  ;;  %v701_v22 = vpop.f32.mrb[119].mxu1  ;;  %v1086_v2 = vpop.f32.mrb[119].mxu0  ;;  %v1387_v19 = vmul.f32 %v3664_v54, %v3664_v54 }
 0x206   :  { %4146 = vst [vmem:[#allocation17_spill] sm:$0xff] %v3666_v42  ;;  %1473 = vadd.xlane.f32.xlu0 %v1387_v19  ;;  %1226 = vadd.xlane.f32.xlu1 %v3666_v42  ;;  %v704_v15 = vpop.f32.mrb[120].mxu1  ;;  %v3672_v59 = vsub.f32 %v3445_v41, %v1260_v25 }
 0x207   :  { %v1089_v43 = vpop.f32.mrb[120].mxu0  ;;  %v1157_v36 = vpop.xlane.xlu0 %1156 }
 0x208   :  { %4147 = vst [vmem:[#allocation18_spill] sm:$0xff] %v3672_v59  ;;  %v3674_v9 = vadd.f32 %v1089_v43, %v704_v15  ;;  %v706_v48 = vpop.f32.mrb[121].mxu1  ;;  %v1091_v29 = vpop.f32.mrb[121].mxu0  ;;  %v1388_v10 = vmul.f32 %v3672_v59, %v3672_v59  ;;  %v1261_v22 = vmul.f32 0.0078125, %v1157_v36 }
 0x20a   :  { %4148 = vst [vmem:[#allocation19_spill] sm:$0xff] %v3674_v9  ;;  %1475 = vadd.xlane.f32.xlu1 %v1388_v10  ;;  %1228 = vadd.xlane.f32.xlu0 %v3674_v9  ;;  %v709_v52 = vpop.f32.mrb[122].mxu1  ;;  %v3683_v29 = vsub.f32 %v3448_v49, %v1261_v22 }
 0x20b   :  { %v1094_v2 = vpop.f32.mrb[122].mxu0  ;;  %v711_v54 = vpop.f32.mrb[123].mxu1 }
 0x20c   :  { %v3679_v19 = vadd.f32 %v1094_v2, %v709_v52  ;;  %v1096_v41 = vpop.f32.mrb[123].mxu0  ;;  %v1159_v25 = vpop.xlane.xlu1 %1158 }
 0x20d   :  { %v1262_v59 = vmul.f32 0.0078125, %v1159_v25  ;;  %v1389_v41 = vmul.f32 %v3683_v29, %v3683_v29 }
 0x20e   :  { %4149 = vst [vmem:[#allocation20_spill] sm:$0xff] %v3679_v19  ;;  %1230 = vadd.xlane.f32.xlu1 %v3679_v19  ;;  %v714_v15 = vpop.f32.mrb[124].mxu1 }
 0x20f   :  { %v1099_v43 = vpop.f32.mrb[124].mxu0  ;;  %v1161_v48 = vpop.xlane.xlu0 %1160  ;;  %v3696_v25 = vsub.f32 %v3451_v56, %v1262_v59 }
 0x210   :  { %v1263_v10 = vmul.f32 0.0078125, %v1161_v48  ;;  %v3685_v42 = vadd.f32 %v1099_v43, %v714_v15  ;;  %v716_v9 = vpop.f32.mrb[125].mxu1  ;;  %v1101_v36 = vpop.f32.mrb[125].mxu0 }
 0x211   :  { %v1390_v48 = vmul.f32 %v3696_v25, %v3696_v25 }
 0x212   :  { %1232 = vadd.xlane.f32.xlu0 %v3685_v42  ;;  %v719_v52 = vpop.f32.mrb[126].mxu1  ;;  %v3693_v22 = vsub.f32 %v3454_v0, %v1263_v10 }
 0x213   :  { %v1104_v54 = vpop.f32.mrb[126].mxu0  ;;  %v1163_v2 = vpop.xlane.xlu1 %1162 }
 0x214   :  { %v1264_v19 = vmul.f32 0.0078125, %v1163_v2  ;;  %v3690_v38 = vadd.f32 %v1104_v54, %v719_v52  ;;  %v721_v11 = vpop.f32.mrb[127].mxu1  ;;  %v1106_v49 = vpop.f32.mrb[127].mxu0  ;;  %v1391_v43 = vmul.f32 %v3693_v22, %v3693_v22 }
 0x216   :  { %1477 = vadd.xlane.f32.xlu0 %v1389_v41  ;;  %1234 = vadd.xlane.f32.xlu1 %v3690_v38  ;;  %v3704_v11 = vsub.f32 %v3457_v7, %v1264_v19 }
 0x217   :  { %v1165_v9 = vpop.xlane.xlu0 %1164 }
 0x218   :  { %v1265_v15 = vmul.f32 0.0078125, %v1165_v9  ;;  %v1392_v36 = vmul.f32 %v3704_v11, %v3704_v11 }
 0x21a   :  { %1481 = vadd.xlane.f32.xlu0 %v1391_v43  ;;  %1479 = vadd.xlane.f32.xlu1 %v1390_v48  ;;  %v3707_v0 = vsub.f32 %v3460_v16, %v1265_v15 }
 0x21b   :  { %v1167_v56 = vpop.xlane.xlu1 %1166 }
 0x21c   :  { %v1266_v59 = vmul.f32 0.0078125, %v1167_v56  ;;  %v1393_v10 = vmul.f32 %v3707_v0, %v3707_v0 }
 0x21e   :  { %1485 = vadd.xlane.f32.xlu0 %v1393_v10  ;;  %1483 = vadd.xlane.f32.xlu1 %v1392_v36  ;;  %v3714_v52 = vsub.f32 %v3463_v24, %v1266_v59 }
 0x21f   :  { %v1169_v7 = vpop.xlane.xlu0 %1168 }
 0x220   :  { %v1267_v19 = vmul.f32 0.0078125, %v1169_v7  ;;  %v1394_v54 = vmul.f32 %v3714_v52, %v3714_v52 }
 0x222   :  { %v3719_v16 = vsub.f32 %v3466_v33, %v1267_v19  ;;  %1487 = vadd.xlane.f32.xlu1 %v1394_v54 }
 0x223   :  { %v1171_v2 = vpop.xlane.xlu1 %1170 }
 0x224   :  { %v1268_v41 = vmul.f32 0.0078125, %v1171_v2  ;;  %v1395_v49 = vmul.f32 %v3719_v16, %v3719_v16 }
 0x226   :  { %v3724_v9 = vsub.f32 %v3469_v40, %v1268_v41  ;;  %1489 = vadd.xlane.f32.xlu0 %v1395_v49 }
 0x227   :  { %v1173_v24 = vpop.xlane.xlu0 %1172 }
 0x228   :  { %v1269_v15 = vmul.f32 0.0078125, %v1173_v24  ;;  %v1396_v43 = vmul.f32 %v3724_v9, %v3724_v9 }
 0x22a   :  { %v3729_v48 = vsub.f32 %v3472_v50, %v1269_v15  ;;  %1491 = vadd.xlane.f32.xlu1 %v1396_v43 }
 0x22b   :  { %v1175_v33 = vpop.xlane.xlu1 %1174 }
 0x22c   :  { %v1270_v56 = vmul.f32 0.0078125, %v1175_v33  ;;  %v1397_v59 = vmul.f32 %v3729_v48, %v3729_v48 }
 0x22e   :  { %v3734_v10 = vsub.f32 %v3475_v58, %v1270_v56  ;;  %1493 = vadd.xlane.f32.xlu0 %v1397_v59 }
 0x22f   :  { %v1177_v40 = vpop.xlane.xlu0 %1176 }
 0x230   :  { %v1271_v36 = vmul.f32 0.0078125, %v1177_v40  ;;  %v1398_v7 = vmul.f32 %v3734_v10, %v3734_v10 }
 0x232   :  { %v3739_v19 = vsub.f32 %v3478_v5, %v1271_v36  ;;  %1495 = vadd.xlane.f32.xlu1 %v1398_v7 }
 0x233   :  { %v1179_v50 = vpop.xlane.xlu1 %1178 }
 0x234   :  { %v1272_v54 = vmul.f32 0.0078125, %v1179_v50  ;;  %v1399_v2 = vmul.f32 %v3739_v19, %v3739_v19 }
 0x236   :  { %v3744_v41 = vsub.f32 %v3481_v14, %v1272_v54  ;;  %1497 = vadd.xlane.f32.xlu0 %v1399_v2 }
 0x237   :  { %v1181_v58 = vpop.xlane.xlu0 %1180 }
 0x238   :  { %v1273_v49 = vmul.f32 0.0078125, %v1181_v58  ;;  %v1400_v24 = vmul.f32 %v3744_v41, %v3744_v41 }
 0x23a   :  { %v3749_v15 = vsub.f32 %v3484_v28, %v1273_v49  ;;  %1499 = vadd.xlane.f32.xlu1 %v1400_v24 }
 0x23b   :  { %v1430_v5 = vpop.xlane.xlu0 %1429  ;;  %v1183_v43 = vpop.xlane.xlu1 %1182 }
 0x23c   :  { %v1557_v33 = vmul.f32 0.0078125, %v1430_v5  ;;  %v1274_v56 = vmul.f32 0.0078125, %v1183_v43  ;;  %v1401_v59 = vmul.f32 %v3749_v15, %v3749_v15 }
 0x23e   :  { %v1621_v40 = vadd.f32 1e-05, %v1557_v33  ;;  %v3754_v14 = vsub.f32 %v3490_v45, %v1274_v56  ;;  %1501 = vadd.xlane.f32.xlu0 %v1401_v59 }
 0x23f   :  { %v1432_v36 = vpop.xlane.xlu1 %1431  ;;  %v1185_v7 = vpop.xlane.xlu0 %1184 }
 0x240   :  { %2201 = vrsqrt.f32 %v1621_v40  ;;  %v1558_v50 = vmul.f32 0.0078125, %v1432_v36  ;;  %v1275_v54 = vmul.f32 0.0078125, %v1185_v7  ;;  %v1402_v28 = vmul.f32 %v3754_v14, %v3754_v14 }
 0x242   :  { %v1622_v2 = vadd.f32 1e-05, %v1558_v50  ;;  %v3759_v58 = vsub.f32 %v3498_v63, %v1275_v54  ;;  %1503 = vadd.xlane.f32.xlu1 %v1402_v28  ;;  %v3771_v54 = vld [vmem:[%s4114_s2] ss:$0 sm:$0xff] }
 0x243   :  { %v1434_v49 = vpop.xlane.xlu0 %1433  ;;  %v1187_v24 = vpop.xlane.xlu1 %1186 }
 0x244   :  { %2203 = vrsqrt.f32 %v1622_v2  ;;  %v1559_v5 = vmul.f32 0.0078125, %v1434_v49  ;;  %v1276_v45 = vmul.f32 0.0078125, %v1187_v24  ;;  %v1403_v43 = vmul.f32 %v3759_v58, %v3759_v58 }
 0x246   :  { %v1623_v33 = vadd.f32 1e-05, %v1559_v5  ;;  %v3764_v56 = vsub.f32 %v3506_v20, %v1276_v45  ;;  %1505 = vadd.xlane.f32.xlu0 %v1403_v43  ;;  %v3780_v5 = vld [vmem:[%s4115_s3] ss:$0 sm:$0xff] }
 0x247   :  { %v1436_v59 = vpop.xlane.xlu1 %1435  ;;  %v1189_v40 = vpop.xlane.xlu0 %1188 }
 0x248   :  { %2205 = vrsqrt.f32 %v1623_v33  ;;  %v1560_v36 = vmul.f32 0.0078125, %v1436_v59  ;;  %v1277_v63 = vmul.f32 0.0078125, %v1189_v40  ;;  %v1404_v7 = vmul.f32 %v3764_v56, %v3764_v56 }
 0x24a   :  { %v2202_v50 = vpop.eup %2201  ;;  %v1624_v28 = vadd.f32 1e-05, %v1560_v36  ;;  %v3774_v2 = vsub.f32 %v3514_v3, %v1277_v63  ;;  %1507 = vadd.xlane.f32.xlu1 %v1404_v7 }
 0x24b   :  { %v1749_v20 = vmul.f32 %v2202_v50, %v3488_v37  ;;  %v1438_v49 = vpop.xlane.xlu0 %1437  ;;  %v1191_v24 = vpop.xlane.xlu1 %1190 }
 0x24c   :  { %4150 = vst [vmem:[#allocation21_spill] sm:$0xff] %v3774_v2  ;;  %2207 = vrsqrt.f32 %v1624_v28  ;;  %v1561_v45 = vmul.f32 0.0078125, %v1438_v49  ;;  %v1278_v43 = vmul.f32 0.0078125, %v1191_v24  ;;  %v1405_v33 = vmul.f32 %v3774_v2, %v3774_v2 }
 0x24d   :  { %v1820_v59 = vmul.f32 %v3771_v54, %v1749_v20 }
 0x24e   :  { %v2204_v3 = vpop.eup %2203  ;;  %v1625_v40 = vadd.f32 1e-05, %v1561_v45  ;;  %v3786_v36 = vsub.f32 %v3522_v60, %v1278_v43  ;;  %1509 = vadd.xlane.f32.xlu0 %v1405_v33 }
 0x24f   :  { %v1891_v37 = vadd.f32 %v3780_v5, %v1820_v59  ;;  %v1750_v63 = vmul.f32 %v2204_v3, %v3496_v55  ;;  %v1440_v7 = vpop.xlane.xlu1 %1439  ;;  %v1193_v50 = vpop.xlane.xlu0 %1192 }
 0x250   :  { %2209 = vrsqrt.f32 %v1625_v40  ;;  %v1562_v28 = vmul.f32 0.0078125, %v1440_v7  ;;  %v1279_v49 = vmul.f32 0.0078125, %v1193_v50  ;;  %v1406_v24 = vmul.f32 %v3786_v36, %v3786_v36 }
 0x251   :  { %1955 = vst [vmem:[#allocation2] sm:$0xff] %v1891_v37  ;;  %v1821_v20 = vmul.f32 %v3771_v54, %v1750_v63 }
 0x252   :  { %v2206_v45 = vpop.eup %2205  ;;  %v1626_v2 = vadd.f32 1e-05, %v1562_v28  ;;  %v3794_v60 = vsub.f32 %v3530_v21, %v1279_v49  ;;  %1511 = vadd.xlane.f32.xlu1 %v1406_v24 }
 0x253   :  { %v1892_v43 = vadd.f32 %v3780_v5, %v1821_v20  ;;  %v1751_v55 = vmul.f32 %v2206_v45, %v3504_v12  ;;  %v1442_v33 = vpop.xlane.xlu0 %1441  ;;  %v1195_v59 = vpop.xlane.xlu1 %1194 }
 0x254   :  { %2211 = vrsqrt.f32 %v1626_v2  ;;  %v1563_v3 = vmul.f32 0.0078125, %v1442_v33  ;;  %v1280_v40 = vmul.f32 0.0078125, %v1195_v59  ;;  %v1407_v37 = vmul.f32 %v3794_v60, %v3794_v60 }
 0x255   :  { %1956 = vst [vmem:[#allocation2 + $0x8] sm:$0xff] %v1892_v43  ;;  %v1822_v63 = vmul.f32 %v3771_v54, %v1751_v55 }
 0x256   :  { %v2208_v7 = vpop.eup %2207  ;;  %v1627_v50 = vadd.f32 1e-05, %v1563_v3  ;;  %v3802_v21 = vsub.f32 %v3538_v46, %v1280_v40  ;;  %1513 = vadd.xlane.f32.xlu0 %v1407_v37 }
 0x257   :  { %v1893_v28 = vadd.f32 %v3780_v5, %v1822_v63  ;;  %v1752_v12 = vmul.f32 %v2208_v7, %v3512_v31  ;;  %v1444_v49 = vpop.xlane.xlu1 %1443  ;;  %v1197_v2 = vpop.xlane.xlu0 %1196 }
 0x258   :  { %2213 = vrsqrt.f32 %v1627_v50  ;;  %v1564_v24 = vmul.f32 0.0078125, %v1444_v49  ;;  %v1281_v20 = vmul.f32 0.0078125, %v1197_v2  ;;  %v1408_v45 = vmul.f32 %v3802_v21, %v3802_v21 }
 0x259   :  { %1957 = vst [vmem:[#allocation2 + $0x10] sm:$0xff] %v1893_v28  ;;  %v1823_v43 = vmul.f32 %v3771_v54, %v1752_v12 }
 0x25a   :  { %v2210_v55 = vpop.eup %2209  ;;  %v1628_v33 = vadd.f32 1e-05, %v1564_v24  ;;  %v3810_v46 = vsub.f32 %v3546_v6, %v1281_v20  ;;  %1515 = vadd.xlane.f32.xlu1 %v1408_v45 }
 0x25b   :  { %v1894_v59 = vadd.f32 %v3780_v5, %v1823_v43  ;;  %v1753_v31 = vmul.f32 %v2210_v55, %v3520_v53  ;;  %v1446_v3 = vpop.xlane.xlu0 %1445  ;;  %v1199_v40 = vpop.xlane.xlu1 %1198 }
 0x25c   :  { %2215 = vrsqrt.f32 %v1628_v33  ;;  %v1565_v37 = vmul.f32 0.0078125, %v1446_v3  ;;  %v1282_v63 = vmul.f32 0.0078125, %v1199_v40  ;;  %v1409_v7 = vmul.f32 %v3810_v46, %v3810_v46 }
 0x25d   :  { %1958 = vst [vmem:[#allocation2 + $0x18] sm:$0xff] %v1894_v59  ;;  %v1824_v50 = vmul.f32 %v3771_v54, %v1753_v31 }
 0x25e   :  { %v2212_v28 = vpop.eup %2211  ;;  %v1629_v12 = vadd.f32 1e-05, %v1565_v37  ;;  %v3818_v6 = vsub.f32 %v3554_v34, %v1282_v63  ;;  %1517 = vadd.xlane.f32.xlu0 %v1409_v7 }
 0x25f   :  { %v1895_v49 = vadd.f32 %v3780_v5, %v1824_v50  ;;  %v1754_v53 = vmul.f32 %v2212_v28, %v3528_v13  ;;  %v1448_v2 = vpop.xlane.xlu1 %1447  ;;  %v1201_v24 = vpop.xlane.xlu0 %1200 }
 0x260   :  { %2217 = vrsqrt.f32 %v1629_v12  ;;  %v1566_v20 = vmul.f32 0.0078125, %v1448_v2  ;;  %v1283_v45 = vmul.f32 0.0078125, %v1201_v24  ;;  %v1410_v43 = vmul.f32 %v3818_v6, %v3818_v6 }
 0x261   :  { %1959 = vst [vmem:[#allocation2 + $0x20] sm:$0xff] %v1895_v49  ;;  %v1825_v55 = vmul.f32 %v3771_v54, %v1754_v53 }
 0x262   :  { %v2214_v33 = vpop.eup %2213  ;;  %v1630_v59 = vadd.f32 1e-05, %v1566_v20  ;;  %v3826_v34 = vsub.f32 %v3562_v1, %v1283_v45  ;;  %1519 = vadd.xlane.f32.xlu1 %v1410_v43 }
 0x263   :  { %v1896_v31 = vadd.f32 %v3780_v5, %v1825_v55  ;;  %v1755_v13 = vmul.f32 %v2214_v33, %v3536_v17  ;;  %v1450_v3 = vpop.xlane.xlu0 %1449  ;;  %v1203_v40 = vpop.xlane.xlu1 %1202 }
 0x264   :  { %2219 = vrsqrt.f32 %v1630_v59  ;;  %v1567_v37 = vmul.f32 0.0078125, %v1450_v3  ;;  %v1284_v63 = vmul.f32 0.0078125, %v1203_v40  ;;  %v1411_v7 = vmul.f32 %v3826_v34, %v3826_v34 }
 0x265   :  { %1960 = vst [vmem:[#allocation2 + $0x28] sm:$0xff] %v1896_v31  ;;  %v1826_v50 = vmul.f32 %v3771_v54, %v1755_v13 }
 0x266   :  { %v2216_v28 = vpop.eup %2215  ;;  %v1631_v12 = vadd.f32 1e-05, %v1567_v37  ;;  %v3834_v1 = vsub.f32 %v3570_v61, %v1284_v63  ;;  %1521 = vadd.xlane.f32.xlu0 %v1411_v7 }
 0x267   :  { %v1897_v49 = vadd.f32 %v3780_v5, %v1826_v50  ;;  %v1756_v17 = vmul.f32 %v2216_v28, %v3544_v62  ;;  %v1452_v53 = vpop.xlane.xlu1 %1451  ;;  %v1205_v2 = vpop.xlane.xlu0 %1204 }
 0x268   :  { %2221 = vrsqrt.f32 %v1631_v12  ;;  %v1568_v24 = vmul.f32 0.0078125, %v1452_v53  ;;  %v1285_v20 = vmul.f32 0.0078125, %v1205_v2  ;;  %v1412_v45 = vmul.f32 %v3834_v1, %v3834_v1 }
 0x269   :  { %1961 = vst [vmem:[#allocation2 + $0x30] sm:$0xff] %v1897_v49  ;;  %v1827_v43 = vmul.f32 %v3771_v54, %v1756_v17 }
 0x26a   :  { %v2218_v55 = vpop.eup %2217  ;;  %v1632_v33 = vadd.f32 1e-05, %v1568_v24  ;;  %v3842_v61 = vsub.f32 %v3578_v26, %v1285_v20  ;;  %1523 = vadd.xlane.f32.xlu1 %v1412_v45 }
 0x26b   :  { %v1898_v59 = vadd.f32 %v3780_v5, %v1827_v43  ;;  %v1757_v62 = vmul.f32 %v2218_v55, %v3552_v23  ;;  %v1454_v31 = vpop.xlane.xlu0 %1453  ;;  %v1207_v13 = vpop.xlane.xlu1 %1206 }
 0x26c   :  { %2223 = vrsqrt.f32 %v1632_v33  ;;  %v1569_v3 = vmul.f32 0.0078125, %v1454_v31  ;;  %v1286_v40 = vmul.f32 0.0078125, %v1207_v13  ;;  %v1413_v37 = vmul.f32 %v3842_v61, %v3842_v61 }
 0x26d   :  { %1962 = vst [vmem:[#allocation2 + $0x38] sm:$0xff] %v1898_v59  ;;  %v1828_v63 = vmul.f32 %v3771_v54, %v1757_v62 }
 0x26e   :  { %v2220_v7 = vpop.eup %2219  ;;  %v1633_v50 = vadd.f32 1e-05, %v1569_v3  ;;  %v3850_v26 = vsub.f32 %v3586_v30, %v1286_v40  ;;  %1525 = vadd.xlane.f32.xlu0 %v1413_v37 }
 0x26f   :  { %v1899_v28 = vadd.f32 %v3780_v5, %v1828_v63  ;;  %v1758_v23 = vmul.f32 %v2220_v7, %v3560_v51  ;;  %v1456_v12 = vpop.xlane.xlu1 %1455  ;;  %v1209_v49 = vpop.xlane.xlu0 %1208 }
 0x270   :  { %2225 = vrsqrt.f32 %v1633_v50  ;;  %v1570_v17 = vmul.f32 0.0078125, %v1456_v12  ;;  %v1287_v53 = vmul.f32 0.0078125, %v1209_v49  ;;  %v1414_v2 = vmul.f32 %v3850_v26, %v3850_v26 }
 0x271   :  { %1963 = vst [vmem:[#allocation2 + $0x40] sm:$0xff] %v1899_v28  ;;  %v1829_v24 = vmul.f32 %v3771_v54, %v1758_v23 }
 0x272   :  { %v2222_v20 = vpop.eup %2221  ;;  %v1634_v45 = vadd.f32 1e-05, %v1570_v17  ;;  %v3858_v30 = vsub.f32 %v3594_v4, %v1287_v53  ;;  %1527 = vadd.xlane.f32.xlu1 %v1414_v2 }
 0x273   :  { %v1900_v43 = vadd.f32 %v3780_v5, %v1829_v24  ;;  %v1759_v51 = vmul.f32 %v2222_v20, %v3568_v35  ;;  %v1458_v55 = vpop.xlane.xlu0 %1457  ;;  %v1211_v33 = vpop.xlane.xlu1 %1210 }
 0x274   :  { %2227 = vrsqrt.f32 %v1634_v45  ;;  %v1571_v59 = vmul.f32 0.0078125, %v1458_v55  ;;  %v1288_v62 = vmul.f32 0.0078125, %v1211_v33  ;;  %v1415_v31 = vmul.f32 %v3858_v30, %v3858_v30 }
 0x275   :  { %1964 = vst [vmem:[#allocation2 + $0x48] sm:$0xff] %v1900_v43  ;;  %v1830_v13 = vmul.f32 %v3771_v54, %v1759_v51 }
 0x276   :  { %v2224_v3 = vpop.eup %2223  ;;  %v1635_v40 = vadd.f32 1e-05, %v1571_v59  ;;  %v3866_v4 = vsub.f32 %v3602_v44, %v1288_v62  ;;  %1529 = vadd.xlane.f32.xlu0 %v1415_v31 }
 0x277   :  { %v1901_v37 = vadd.f32 %v3780_v5, %v1830_v13  ;;  %v1760_v35 = vmul.f32 %v2224_v3, %v3576_v47  ;;  %v1460_v63 = vpop.xlane.xlu1 %1459  ;;  %v1213_v7 = vpop.xlane.xlu0 %1212 }
 0x278   :  { %2229 = vrsqrt.f32 %v1635_v40  ;;  %v1572_v50 = vmul.f32 0.0078125, %v1460_v63  ;;  %v1289_v28 = vmul.f32 0.0078125, %v1213_v7  ;;  %v1416_v23 = vmul.f32 %v3866_v4, %v3866_v4 }
 0x279   :  { %1965 = vst [vmem:[#allocation2 + $0x50] sm:$0xff] %v1901_v37  ;;  %v1831_v12 = vmul.f32 %v3771_v54, %v1760_v35 }
 0x27a   :  { %v2226_v49 = vpop.eup %2225  ;;  %v1636_v17 = vadd.f32 1e-05, %v1572_v50  ;;  %v3874_v44 = vsub.f32 %v3610_v27, %v1289_v28  ;;  %1531 = vadd.xlane.f32.xlu1 %v1416_v23  ;;  %v4152_v28 = vld [vmem:[#allocation6_spill] sm:$0xff] }
 0x27b   :  { %v1902_v53 = vadd.f32 %v3780_v5, %v1831_v12  ;;  %v1761_v47 = vmul.f32 %v2226_v49, %v3584_v18  ;;  %v1462_v2 = vpop.xlane.xlu0 %1461  ;;  %v1215_v24 = vpop.xlane.xlu1 %1214  ;;  %v4151_v18 = vld [vmem:[#allocation5_spill] sm:$0xff] }
 0x27c   :  { %2231 = vrsqrt.f32 %v1636_v17  ;;  %v1573_v20 = vmul.f32 0.0078125, %v1462_v2  ;;  %v1290_v45 = vmul.f32 0.0078125, %v1215_v24  ;;  %v1417_v43 = vmul.f32 %v3874_v44, %v3874_v44 }
 0x27d   :  { %1966 = vst [vmem:[#allocation2 + $0x58] sm:$0xff] %v1902_v53  ;;  %v1832_v51 = vmul.f32 %v3771_v54, %v1761_v47 }
 0x27e   :  { %v2228_v55 = vpop.eup %2227  ;;  %v1637_v33 = vadd.f32 1e-05, %v1573_v20  ;;  %v3882_v27 = vsub.f32 %v3618_v39, %v1290_v45  ;;  %1533 = vadd.xlane.f32.xlu0 %v1417_v43  ;;  %v4153_v43 = vld [vmem:[#allocation7_spill] sm:$0xff] }
 0x27f   :  { %v1903_v59 = vadd.f32 %v3780_v5, %v1832_v51  ;;  %v1762_v62 = vmul.f32 %v2228_v55, %v4151_v18  ;;  %v1464_v31 = vpop.xlane.xlu1 %1463  ;;  %v1217_v13 = vpop.xlane.xlu0 %1216 }
 0x280   :  { %2233 = vrsqrt.f32 %v1637_v33  ;;  %v1574_v3 = vmul.f32 0.0078125, %v1464_v31  ;;  %v1291_v40 = vmul.f32 0.0078125, %v1217_v13  ;;  %v1418_v37 = vmul.f32 %v3882_v27, %v3882_v27 }
 0x281   :  { %1967 = vst [vmem:[#allocation2 + $0x60] sm:$0xff] %v1903_v59  ;;  %v1833_v35 = vmul.f32 %v3771_v54, %v1762_v62 }
 0x282   :  { %v2230_v63 = vpop.eup %2229  ;;  %v1638_v7 = vadd.f32 1e-05, %v1574_v3  ;;  %v3890_v39 = vsub.f32 %v3626_v8, %v1291_v40  ;;  %1535 = vadd.xlane.f32.xlu1 %v1418_v37  ;;  %v4154_v37 = vld [vmem:[#allocation8_spill] sm:$0xff] }
 0x283   :  { %v1904_v50 = vadd.f32 %v3780_v5, %v1833_v35  ;;  %v1763_v23 = vmul.f32 %v2230_v63, %v4152_v28  ;;  %v1466_v12 = vpop.xlane.xlu0 %1465  ;;  %v1219_v49 = vpop.xlane.xlu1 %1218 }
 0x284   :  { %2235 = vrsqrt.f32 %v1638_v7  ;;  %v1575_v17 = vmul.f32 0.0078125, %v1466_v12  ;;  %v1292_v53 = vmul.f32 0.0078125, %v1219_v49  ;;  %v1419_v47 = vmul.f32 %v3890_v39, %v3890_v39 }
 0x285   :  { %1968 = vst [vmem:[#allocation2 + $0x68] sm:$0xff] %v1904_v50  ;;  %v1834_v2 = vmul.f32 %v3771_v54, %v1763_v23 }
 0x286   :  { %v2232_v24 = vpop.eup %2231  ;;  %v1639_v20 = vadd.f32 1e-05, %v1575_v17  ;;  %v3898_v8 = vsub.f32 %v3634_v57, %v1292_v53  ;;  %1537 = vadd.xlane.f32.xlu0 %v1419_v47 }
 0x287   :  { %v1905_v45 = vadd.f32 %v3780_v5, %v1834_v2  ;;  %v1764_v51 = vmul.f32 %v2232_v24, %v4153_v43  ;;  %v1468_v55 = vpop.xlane.xlu1 %1467  ;;  %v1221_v33 = vpop.xlane.xlu0 %1220  ;;  %v4156_v2 = vld [vmem:[#allocation9_spill] sm:$0xff] }
 0x288   :  { %2237 = vrsqrt.f32 %v1639_v20  ;;  %v1576_v59 = vmul.f32 0.0078125, %v1468_v55  ;;  %v1293_v18 = vmul.f32 0.0078125, %v1221_v33  ;;  %v1420_v62 = vmul.f32 %v3898_v8, %v3898_v8 }
 0x289   :  { %1969 = vst [vmem:[#allocation2 + $0x70] sm:$0xff] %v1905_v45  ;;  %v1835_v31 = vmul.f32 %v3771_v54, %v1764_v51 }
 0x28a   :  { %v2234_v13 = vpop.eup %2233  ;;  %v1640_v3 = vadd.f32 1e-05, %v1576_v59  ;;  %v3906_v57 = vsub.f32 %v3642_v32, %v1293_v18  ;;  %1539 = vadd.xlane.f32.xlu1 %v1420_v62  ;;  %v4155_v32 = vld [vmem:[#allocation13_spill] sm:$0xff]  ;;  %v4157_v62 = vld [vmem:[#allocation15_spill] sm:$0xff] }
 0x28b   :  { %v1906_v40 = vadd.f32 %v3780_v5, %v1835_v31  ;;  %v1765_v35 = vmul.f32 %v2234_v13, %v4154_v37  ;;  %v1470_v63 = vpop.xlane.xlu0 %1469  ;;  %v1223_v7 = vpop.xlane.xlu1 %1222 }
 0x28c   :  { %2239 = vrsqrt.f32 %v1640_v3  ;;  %v1577_v50 = vmul.f32 0.0078125, %v1470_v63  ;;  %v1294_v28 = vmul.f32 0.0078125, %v1223_v7  ;;  %v1421_v23 = vmul.f32 %v3906_v57, %v3906_v57  ;;  %v4158_v3 = vld [vmem:[#allocation10_spill] sm:$0xff] }
 0x28d   :  { %1970 = vst [vmem:[#allocation2 + $0x78] sm:$0xff] %v1906_v40  ;;  %v1836_v12 = vmul.f32 %v3771_v54, %v1765_v35 }
 0x28e   :  { %v2236_v49 = vpop.eup %2235  ;;  %v1641_v17 = vadd.f32 1e-05, %v1577_v50  ;;  %v3914_v53 = vsub.f32 %v4155_v32, %v1294_v28  ;;  %1541 = vadd.xlane.f32.xlu0 %v1421_v23 }
 0x28f   :  { %v1907_v47 = vadd.f32 %v3780_v5, %v1836_v12  ;;  %v1766_v24 = vmul.f32 %v2236_v49, %v4156_v2  ;;  %v1472_v20 = vpop.xlane.xlu1 %1471  ;;  %v1225_v45 = vpop.xlane.xlu0 %1224  ;;  %v4159_v49 = vld [vmem:[#allocation17_spill] sm:$0xff] }
 0x290   :  { %2241 = vrsqrt.f32 %v1641_v17  ;;  %v1578_v43 = vmul.f32 0.0078125, %v1472_v20  ;;  %v1295_v51 = vmul.f32 0.0078125, %v1225_v45  ;;  %v1422_v55 = vmul.f32 %v3914_v53, %v3914_v53 }
 0x291   :  { %1971 = vst [vmem:[#allocation2 + $0x80] sm:$0xff] %v1907_v47  ;;  %v1837_v33 = vmul.f32 %v3771_v54, %v1766_v24  ;;  %v4160_v47 = vld [vmem:[#allocation11_spill] sm:$0xff] }
 0x292   :  { %v2238_v59 = vpop.eup %2237  ;;  %v1642_v18 = vadd.f32 1e-05, %v1578_v43  ;;  %v3922_v31 = vsub.f32 %v4157_v62, %v1295_v51  ;;  %1543 = vadd.xlane.f32.xlu1 %v1422_v55 }
 0x293   :  { %v1908_v13 = vadd.f32 %v3780_v5, %v1837_v33  ;;  %v1767_v40 = vmul.f32 %v2238_v59, %v4158_v3  ;;  %v1474_v37 = vpop.xlane.xlu0 %1473  ;;  %v1227_v35 = vpop.xlane.xlu1 %1226  ;;  %v4162_v3 = vld [vmem:[#allocation12_spill] sm:$0xff] }
 0x294   :  { %2243 = vrsqrt.f32 %v1642_v18  ;;  %v1579_v63 = vmul.f32 0.0078125, %v1474_v37  ;;  %v1296_v7 = vmul.f32 0.0078125, %v1227_v35  ;;  %v1423_v50 = vmul.f32 %v3922_v31, %v3922_v31  ;;  %v4161_v18 = vld [vmem:[#allocation19_spill] sm:$0xff] }
 0x295   :  { %1972 = vst [vmem:[#allocation2 + $0x88] sm:$0xff] %v1908_v13  ;;  %v1838_v28 = vmul.f32 %v3771_v54, %v1767_v40 }
 0x296   :  { %v2240_v23 = vpop.eup %2239  ;;  %v1643_v12 = vadd.f32 1e-05, %v1579_v63  ;;  %v3930_v17 = vsub.f32 %v4159_v49, %v1296_v7  ;;  %1545 = vadd.xlane.f32.xlu0 %v1423_v50  ;;  %v4164_v49 = vld [vmem:[#allocation14_spill] sm:$0xff] }
 0x297   :  { %v1909_v32 = vadd.f32 %v3780_v5, %v1838_v28  ;;  %v1768_v2 = vmul.f32 %v2240_v23, %v4160_v47  ;;  %v1476_v24 = vpop.xlane.xlu1 %1475  ;;  %v1229_v20 = vpop.xlane.xlu0 %1228  ;;  %v4163_v28 = vld [vmem:[#allocation20_spill] sm:$0xff] }
 0x298   :  { %2245 = vrsqrt.f32 %v1643_v12  ;;  %v1580_v45 = vmul.f32 0.0078125, %v1476_v24  ;;  %v1297_v43 = vmul.f32 0.0078125, %v1229_v20  ;;  %v1424_v51 = vmul.f32 %v3930_v17, %v3930_v17 }
 0x299   :  { %1973 = vst [vmem:[#allocation2 + $0x90] sm:$0xff] %v1909_v32  ;;  %v1839_v55 = vmul.f32 %v3771_v54, %v1768_v2 }
 0x29a   :  { %v2242_v33 = vpop.eup %2241  ;;  %v1644_v59 = vadd.f32 1e-05, %v1580_v45  ;;  %v3938_v62 = vsub.f32 %v4161_v18, %v1297_v43  ;;  %1547 = vadd.xlane.f32.xlu1 %v1424_v51 }
 0x29b   :  { %v1910_v13 = vadd.f32 %v3780_v5, %v1839_v55  ;;  %v1769_v40 = vmul.f32 %v2242_v33, %v4162_v3  ;;  %v1231_v37 = vpop.xlane.xlu1 %1230  ;;  %v4165_v55 = vld [vmem:[#allocation16_spill] sm:$0xff] }
 0x29c   :  { %2247 = vrsqrt.f32 %v1644_v59  ;;  %v1298_v35 = vmul.f32 0.0078125, %v1231_v37  ;;  %v1425_v63 = vmul.f32 %v3938_v62, %v3938_v62 }
 0x29d   :  { %1974 = vst [vmem:[#allocation2 + $0x98] sm:$0xff] %v1910_v13  ;;  %v1840_v7 = vmul.f32 %v3771_v54, %v1769_v40 }
 0x29e   :  { %v2244_v50 = vpop.eup %2243  ;;  %v3946_v23 = vsub.f32 %v4163_v28, %v1298_v35  ;;  %1549 = vadd.xlane.f32.xlu0 %v1425_v63 }
 0x29f   :  { %v1911_v12 = vadd.f32 %v3780_v5, %v1840_v7  ;;  %v1770_v32 = vmul.f32 %v2244_v50, %v4164_v49  ;;  %v1233_v47 = vpop.xlane.xlu0 %1232  ;;  %v4166_v50 = vld [vmem:[#allocation18_spill] sm:$0xff] }
 0x2a0   :  { %v1299_v2 = vmul.f32 0.0078125, %v1233_v47  ;;  %v1426_v24 = vmul.f32 %v3946_v23, %v3946_v23 }
 0x2a1   :  { %1975 = vst [vmem:[#allocation2 + $0xa0] sm:$0xff] %v1911_v12  ;;  %v1841_v20 = vmul.f32 %v3771_v54, %v1770_v32 }
 0x2a2   :  { %v2246_v45 = vpop.eup %2245  ;;  %v3954_v43 = vsub.f32 %v3685_v42, %v1299_v2  ;;  %1551 = vadd.xlane.f32.xlu1 %v1426_v24 }
 0x2a3   :  { %v1912_v51 = vadd.f32 %v3780_v5, %v1841_v20  ;;  %v1771_v33 = vmul.f32 %v2246_v45, %v4165_v55  ;;  %v1478_v59 = vpop.xlane.xlu0 %1477  ;;  %v1235_v18 = vpop.xlane.xlu1 %1234 }
 0x2a4   :  { %v1581_v13 = vmul.f32 0.0078125, %v1478_v59  ;;  %v1300_v3 = vmul.f32 0.0078125, %v1235_v18  ;;  %v1427_v40 = vmul.f32 %v3954_v43, %v3954_v43 }
 0x2a5   :  { %1976 = vst [vmem:[#allocation2 + $0xa8] sm:$0xff] %v1912_v51  ;;  %v1842_v37 = vmul.f32 %v3771_v54, %v1771_v33 }
 0x2a6   :  { %v2248_v35 = vpop.eup %2247  ;;  %v1645_v63 = vadd.f32 1e-05, %v1581_v13  ;;  %v3962_v42 = vsub.f32 %v3690_v38, %v1300_v3  ;;  %1553 = vadd.xlane.f32.xlu0 %v1427_v40 }
 0x2a7   :  { %v1913_v7 = vadd.f32 %v3780_v5, %v1842_v37  ;;  %v1772_v28 = vmul.f32 %v2248_v35, %v4166_v50  ;;  %v1482_v12 = vpop.xlane.xlu0 %1481  ;;  %v1480_v49 = vpop.xlane.xlu1 %1479 }
 0x2a8   :  { %2249 = vrsqrt.f32 %v1645_v63  ;;  %v1583_v32 = vmul.f32 0.0078125, %v1482_v12  ;;  %v1582_v47 = vmul.f32 0.0078125, %v1480_v49  ;;  %v1428_v2 = vmul.f32 %v3962_v42, %v3962_v42 }
 0x2a9   :  { %1977 = vst [vmem:[#allocation2 + $0xb0] sm:$0xff] %v1913_v7  ;;  %v1843_v24 = vmul.f32 %v3771_v54, %v1772_v28 }
 0x2aa   :  { %v1647_v20 = vadd.f32 1e-05, %v1583_v32  ;;  %v1646_v45 = vadd.f32 1e-05, %v1582_v47  ;;  %1555 = vadd.xlane.f32.xlu1 %v1428_v2 }
 0x2ab   :  { %v1914_v38 = vadd.f32 %v3780_v5, %v1843_v24  ;;  %v1486_v51 = vpop.xlane.xlu0 %1485  ;;  %v1484_v55 = vpop.xlane.xlu1 %1483 }
 0x2ac   :  { %2251 = vrsqrt.f32 %v1647_v20  ;;  %v1585_v33 = vmul.f32 0.0078125, %v1486_v51  ;;  %v1584_v59 = vmul.f32 0.0078125, %v1484_v55 }
 0x2ad   :  { %1978 = vst [vmem:[#allocation2 + $0xb8] sm:$0xff] %v1914_v38  ;;  %2253 = vrsqrt.f32 %v1646_v45 }
 0x2ae   :  { %v1649_v18 = vadd.f32 1e-05, %v1585_v33  ;;  %v1648_v13 = vadd.f32 1e-05, %v1584_v59 }
 0x2af   :  { %v1488_v3 = vpop.xlane.xlu1 %1487 }
 0x2b0   :  { %2255 = vrsqrt.f32 %v1649_v18  ;;  %v1586_v40 = vmul.f32 0.0078125, %v1488_v3 }
 0x2b1   :  { %2257 = vrsqrt.f32 %v1648_v13 }
 0x2b2   :  { %v2250_v37 = vpop.eup %2249  ;;  %v1650_v35 = vadd.f32 1e-05, %v1586_v40 }
 0x2b3   :  { %v1773_v63 = vmul.f32 %v2250_v37, %v3683_v29  ;;  %v1490_v7 = vpop.xlane.xlu0 %1489 }
 0x2b4   :  { %2259 = vrsqrt.f32 %v1650_v35  ;;  %v1587_v50 = vmul.f32 0.0078125, %v1490_v7 }
 0x2b5   :  { %v1844_v28 = vmul.f32 %v3771_v54, %v1773_v63 }
 0x2b6   :  { %v2252_v12 = vpop.eup %2251  ;;  %v1651_v49 = vadd.f32 1e-05, %v1587_v50 }
 0x2b7   :  { %v2254_v32 = vpop.eup %2253  ;;  %v1915_v47 = vadd.f32 %v3780_v5, %v1844_v28  ;;  %v1775_v2 = vmul.f32 %v2252_v12, %v3693_v22  ;;  %v1492_v24 = vpop.xlane.xlu1 %1491 }
 0x2b8   :  { %v1774_v20 = vmul.f32 %v2254_v32, %v3696_v25  ;;  %2261 = vrsqrt.f32 %v1651_v49  ;;  %v1588_v45 = vmul.f32 0.0078125, %v1492_v24 }
 0x2b9   :  { %1979 = vst [vmem:[#allocation2 + $0xc0] sm:$0xff] %v1915_v47  ;;  %v1846_v29 = vmul.f32 %v3771_v54, %v1775_v2 }
 0x2ba   :  { %v2256_v38 = vpop.eup %2255  ;;  %v1845_v51 = vmul.f32 %v3771_v54, %v1774_v20  ;;  %v1652_v55 = vadd.f32 1e-05, %v1588_v45 }
 0x2bb   :  { %v2258_v33 = vpop.eup %2257  ;;  %v1917_v59 = vadd.f32 %v3780_v5, %v1846_v29  ;;  %v1777_v18 = vmul.f32 %v2256_v38, %v3707_v0  ;;  %v1494_v13 = vpop.xlane.xlu0 %1493 }
 0x2bc   :  { %v1916_v22 = vadd.f32 %v3780_v5, %v1845_v51  ;;  %v1776_v3 = vmul.f32 %v2258_v33, %v3704_v11  ;;  %2263 = vrsqrt.f32 %v1652_v55  ;;  %v1589_v25 = vmul.f32 0.0078125, %v1494_v13 }
 0x2bd   :  { %1981 = vst [vmem:[#allocation2 + $0xd0] sm:$0xff] %v1917_v59  ;;  %v1848_v40 = vmul.f32 %v3771_v54, %v1777_v18 }
 0x2be   :  { %v2260_v37 = vpop.eup %2259  ;;  %1980 = vst [vmem:[#allocation2 + $0xc8] sm:$0xff] %v1916_v22  ;;  %v1847_v35 = vmul.f32 %v3771_v54, %v1776_v3  ;;  %v1653_v63 = vadd.f32 1e-05, %v1589_v25 }
 0x2bf   :  { %v1919_v7 = vadd.f32 %v3780_v5, %v1848_v40  ;;  %v1778_v50 = vmul.f32 %v2260_v37, %v3714_v52  ;;  %v1496_v0 = vpop.xlane.xlu1 %1495 }
 0x2c0   :  { %v1918_v28 = vadd.f32 %v3780_v5, %v1847_v35  ;;  %2265 = vrsqrt.f32 %v1653_v63  ;;  %v1590_v12 = vmul.f32 0.0078125, %v1496_v0 }
 0x2c1   :  { %1983 = vst [vmem:[#allocation2 + $0xe0] sm:$0xff] %v1919_v7  ;;  %v1849_v11 = vmul.f32 %v3771_v54, %v1778_v50 }
 0x2c2   :  { %v2262_v49 = vpop.eup %2261  ;;  %1982 = vst [vmem:[#allocation2 + $0xd8] sm:$0xff] %v1918_v28  ;;  %v1654_v32 = vadd.f32 1e-05, %v1590_v12 }
 0x2c3   :  { %v1920_v47 = vadd.f32 %v3780_v5, %v1849_v11  ;;  %v1779_v2 = vmul.f32 %v2262_v49, %v3719_v16  ;;  %v1498_v24 = vpop.xlane.xlu0 %1497 }
 0x2c4   :  { %2267 = vrsqrt.f32 %v1654_v32  ;;  %v1591_v20 = vmul.f32 0.0078125, %v1498_v24 }
 0x2c5   :  { %1984 = vst [vmem:[#allocation2 + $0xe8] sm:$0xff] %v1920_v47  ;;  %v1850_v52 = vmul.f32 %v3771_v54, %v1779_v2 }
 0x2c6   :  { %v2264_v45 = vpop.eup %2263  ;;  %v1655_v29 = vadd.f32 1e-05, %v1591_v20 }
 0x2c7   :  { %v1921_v38 = vadd.f32 %v3780_v5, %v1850_v52  ;;  %v1780_v51 = vmul.f32 %v2264_v45, %v3724_v9  ;;  %v1500_v55 = vpop.xlane.xlu1 %1499 }
 0x2c8   :  { %2269 = vrsqrt.f32 %v1655_v29  ;;  %v1592_v33 = vmul.f32 0.0078125, %v1500_v55 }
 0x2c9   :  { %1985 = vst [vmem:[#allocation2 + $0xf0] sm:$0xff] %v1921_v38  ;;  %v1851_v59 = vmul.f32 %v3771_v54, %v1780_v51 }
 0x2ca   :  { %v2266_v18 = vpop.eup %2265  ;;  %v1656_v16 = vadd.f32 1e-05, %v1592_v33 }
 0x2cb   :  { %v1922_v13 = vadd.f32 %v3780_v5, %v1851_v59  ;;  %v1781_v22 = vmul.f32 %v2266_v18, %v3729_v48  ;;  %v1502_v3 = vpop.xlane.xlu0 %1501 }
 0x2cc   :  { %2271 = vrsqrt.f32 %v1656_v16  ;;  %v1593_v25 = vmul.f32 0.0078125, %v1502_v3 }
 0x2cd   :  { %1986 = vst [vmem:[#allocation2 + $0xf8] sm:$0xff] %v1922_v13  ;;  %v1852_v40 = vmul.f32 %v3771_v54, %v1781_v22 }
 0x2ce   :  { %v2268_v37 = vpop.eup %2267  ;;  %v1657_v9 = vadd.f32 1e-05, %v1593_v25 }
 0x2cf   :  { %v1923_v35 = vadd.f32 %v3780_v5, %v1852_v40  ;;  %v1782_v63 = vmul.f32 %v2268_v37, %v3734_v10  ;;  %v1504_v7 = vpop.xlane.xlu1 %1503 }
 0x2d0   :  { %2273 = vrsqrt.f32 %v1657_v9  ;;  %v1594_v50 = vmul.f32 0.0078125, %v1504_v7 }
 0x2d1   :  { %1987 = vst [vmem:[#allocation2 + $0x100] sm:$0xff] %v1923_v35  ;;  %v1853_v0 = vmul.f32 %v3771_v54, %v1782_v63 }
 0x2d2   :  { %v2270_v28 = vpop.eup %2269  ;;  %v1658_v48 = vadd.f32 1e-05, %v1594_v50 }
 0x2d3   :  { %v1924_v12 = vadd.f32 %v3780_v5, %v1853_v0  ;;  %v1783_v11 = vmul.f32 %v2270_v28, %v3739_v19  ;;  %v1506_v49 = vpop.xlane.xlu0 %1505 }
 0x2d4   :  { %2275 = vrsqrt.f32 %v1658_v48  ;;  %v1595_v32 = vmul.f32 0.0078125, %v1506_v49 }
 0x2d5   :  { %1988 = vst [vmem:[#allocation2 + $0x108] sm:$0xff] %v1924_v12  ;;  %v1854_v47 = vmul.f32 %v3771_v54, %v1783_v11 }
 0x2d6   :  { %v2272_v2 = vpop.eup %2271  ;;  %v1659_v10 = vadd.f32 1e-05, %v1595_v32 }
 0x2d7   :  { %v1925_v24 = vadd.f32 %v3780_v5, %v1854_v47  ;;  %v1784_v20 = vmul.f32 %v2272_v2, %v3744_v41  ;;  %v1508_v52 = vpop.xlane.xlu1 %1507  ;;  %v4167_v2 = vld [vmem:[#allocation21_spill] sm:$0xff] }
 0x2d8   :  { %2277 = vrsqrt.f32 %v1659_v10  ;;  %v1596_v45 = vmul.f32 0.0078125, %v1508_v52 }
 0x2d9   :  { %1989 = vst [vmem:[#allocation2 + $0x110] sm:$0xff] %v1925_v24  ;;  %v1855_v29 = vmul.f32 %v3771_v54, %v1784_v20 }
 0x2da   :  { %v2274_v38 = vpop.eup %2273  ;;  %v1660_v19 = vadd.f32 1e-05, %v1596_v45 }
 0x2db   :  { %v1926_v51 = vadd.f32 %v3780_v5, %v1855_v29  ;;  %v1785_v55 = vmul.f32 %v2274_v38, %v3749_v15  ;;  %v1510_v33 = vpop.xlane.xlu0 %1509 }
 0x2dc   :  { %2279 = vrsqrt.f32 %v1660_v19  ;;  %v1597_v59 = vmul.f32 0.0078125, %v1510_v33 }
 0x2dd   :  { %1990 = vst [vmem:[#allocation2 + $0x118] sm:$0xff] %v1926_v51  ;;  %v1856_v18 = vmul.f32 %v3771_v54, %v1785_v55 }
 0x2de   :  { %v2276_v16 = vpop.eup %2275  ;;  %v1661_v41 = vadd.f32 1e-05, %v1597_v59 }
 0x2df   :  { %v1927_v13 = vadd.f32 %v3780_v5, %v1856_v18  ;;  %v1786_v22 = vmul.f32 %v2276_v16, %v3754_v14  ;;  %v1512_v3 = vpop.xlane.xlu1 %1511 }
 0x2e0   :  { %2281 = vrsqrt.f32 %v1661_v41  ;;  %v1598_v25 = vmul.f32 0.0078125, %v1512_v3 }
 0x2e1   :  { %1991 = vst [vmem:[#allocation2 + $0x120] sm:$0xff] %v1927_v13  ;;  %v1857_v40 = vmul.f32 %v3771_v54, %v1786_v22 }
 0x2e2   :  { %v2278_v37 = vpop.eup %2277  ;;  %v1662_v15 = vadd.f32 1e-05, %v1598_v25 }
 0x2e3   :  { %v1928_v9 = vadd.f32 %v3780_v5, %v1857_v40  ;;  %v1787_v35 = vmul.f32 %v2278_v37, %v3759_v58  ;;  %v1514_v63 = vpop.xlane.xlu0 %1513 }
 0x2e4   :  { %2283 = vrsqrt.f32 %v1662_v15  ;;  %v1599_v7 = vmul.f32 0.0078125, %v1514_v63 }
 0x2e5   :  { %1992 = vst [vmem:[#allocation2 + $0x128] sm:$0xff] %v1928_v9  ;;  %v1858_v50 = vmul.f32 %v3771_v54, %v1787_v35 }
 0x2e6   :  { %v2280_v0 = vpop.eup %2279  ;;  %v1663_v14 = vadd.f32 1e-05, %v1599_v7 }
 0x2e7   :  { %v1929_v28 = vadd.f32 %v3780_v5, %v1858_v50  ;;  %v1788_v48 = vmul.f32 %v2280_v0, %v3764_v56  ;;  %v1516_v12 = vpop.xlane.xlu1 %1515 }
 0x2e8   :  { %2285 = vrsqrt.f32 %v1663_v14  ;;  %v1600_v11 = vmul.f32 0.0078125, %v1516_v12 }
 0x2e9   :  { %1993 = vst [vmem:[#allocation2 + $0x130] sm:$0xff] %v1929_v28  ;;  %v1859_v49 = vmul.f32 %v3771_v54, %v1788_v48  ;;  %v4040_v48 = vld [vmem:[%s4115_s3] ss:$0 sm:$0xff] }
 0x2ea   :  { %v2282_v32 = vpop.eup %2281  ;;  %v1664_v58 = vadd.f32 1e-05, %v1600_v11 }
 0x2eb   :  { %v1930_v47 = vadd.f32 %v3780_v5, %v1859_v49  ;;  %v1789_v10 = vmul.f32 %v2282_v32, %v4167_v2  ;;  %v1518_v24 = vpop.xlane.xlu0 %1517 }
 0x2ec   :  { %2287 = vrsqrt.f32 %v1664_v58  ;;  %v1601_v20 = vmul.f32 0.0078125, %v1518_v24 }
 0x2ed   :  { %1994 = vst [vmem:[#allocation2 + $0x138] sm:$0xff] %v1930_v47  ;;  %v1860_v52 = vmul.f32 %v3771_v54, %v1789_v10 }
 0x2ee   :  { %v2284_v45 = vpop.eup %2283  ;;  %v1665_v56 = vadd.f32 1e-05, %v1601_v20 }
 0x2ef   :  { %v1931_v29 = vadd.f32 %v3780_v5, %v1860_v52  ;;  %v1790_v38 = vmul.f32 %v2284_v45, %v3786_v36  ;;  %v1520_v19 = vpop.xlane.xlu1 %1519 }
 0x2f0   :  { %2289 = vrsqrt.f32 %v1665_v56  ;;  %v1602_v51 = vmul.f32 0.0078125, %v1520_v19 }
 0x2f1   :  { %1995 = vst [vmem:[#allocation2 + $0x140] sm:$0xff] %v1931_v29  ;;  %v1861_v55 = vmul.f32 %v3771_v54, %v1790_v38 }
 0x2f2   :  { %v2286_v33 = vpop.eup %2285  ;;  %v1666_v59 = vadd.f32 1e-05, %v1602_v51 }
 0x2f3   :  { %v1932_v18 = vadd.f32 %v3780_v5, %v1861_v55  ;;  %v1791_v16 = vmul.f32 %v2286_v33, %v3794_v60  ;;  %v1522_v41 = vpop.xlane.xlu0 %1521  ;;  %v4031_v60 = vld [vmem:[%s4114_s2] ss:$0 sm:$0xff]  ;;  %s2356_s2 = smov [#allocation2]  }
 0x2f4   :  { %2291 = vrsqrt.f32 %v1666_v59  ;;  %v1603_v13 = vmul.f32 0.0078125, %v1522_v41  ;;  %s2024_s3 = sshll.u32 %s2356_s2, 4  ;;  %s2025_s3 = int_to_ptr.vmem [resolvable:$true] %s2024_s3 }
 0x2f5   :  { %1996 = vst [vmem:[#allocation2 + $0x148] sm:$0xff] %v1932_v18  ;;  %v1862_v22 = vmul.f32 %v3771_v54, %v1791_v16  ;;  %s2331_s19 = scalar_lea.vmem %s2025_s3, 8192  ;;  %p2336_p1 = scmp.lt.s32.totalorder %s2025_s3, %s2025_s3 }
 0x2f6   :  { %v2288_v3 = vpop.eup %2287  ;;  %v1667_v36 = vadd.f32 1e-05, %v1603_v13  ;;  %p2332_p0 = scmp.ne.s32.totalorder %s2025_s3, %s2331_s19  ;;  %p2337_p2 = scmp.lt.s32.totalorder %s2331_s19, %s2331_s19 }
 0x2f7   :  { %v1933_v25 = vadd.f32 %v3780_v5, %v1862_v22  ;;  %v1792_v40 = vmul.f32 %v2288_v3, %v3802_v21  ;;  %v1524_v37 = vpop.xlane.xlu1 %1523 }
 0x2f8   :  { %2293 = vrsqrt.f32 %v1667_v36  ;;  %v1604_v15 = vmul.f32 0.0078125, %v1524_v37  ;;  %p2338_p3 = por %p2337_p2, %p2336_p1 }
 0x2f9   :  { %1997 = vst [vmem:[#allocation2 + $0x150] sm:$0xff] %v1933_v25  ;;  %v1863_v9 = vmul.f32 %v4031_v60, %v1792_v40 }
 0x2fa   :  { %v2290_v35 = vpop.eup %2289  ;;  %v1668_v63 = vadd.f32 1e-05, %v1604_v15  ;;  %p2339_p4 = pnand %p2338_p3, %p2332_p0 }
 0x2fb   :  { %v1934_v54 = vadd.f32 %v3780_v5, %v1863_v9  ;;  %v1793_v7 = vmul.f32 %v2290_v35, %v3810_v46  ;;  %v1526_v50 = vpop.xlane.xlu0 %1525 }
 0x2fc   :  { %2295 = vrsqrt.f32 %v1668_v63  ;;  %v1605_v21 = vmul.f32 0.0078125, %v1526_v50 }
 0x2fd   :  { %1998 = vst [vmem:[#allocation2 + $0x158] sm:$0xff] %v1934_v54  ;;  %v1864_v0 = vmul.f32 %v4031_v60, %v1793_v7 }
 0x2fe   :  { %v2292_v14 = vpop.eup %2291  ;;  %v1669_v28 = vadd.f32 1e-05, %v1605_v21 }
 0x2ff   :  { %v1935_v12 = vadd.f32 %v4040_v48, %v1864_v0  ;;  %v1794_v11 = vmul.f32 %v2292_v14, %v3818_v6  ;;  %v1528_v5 = vpop.xlane.xlu1 %1527 }
 0x300   :  { %2297 = vrsqrt.f32 %v1669_v28  ;;  %v1606_v46 = vmul.f32 0.0078125, %v1528_v5 }
 0x301   :  { %1999 = vst [vmem:[#allocation2 + $0x160] sm:$0xff] %v1935_v12  ;;  %v1865_v49 = vmul.f32 %v4031_v60, %v1794_v11 }
 0x302   :  { %v2294_v32 = vpop.eup %2293  ;;  %v1670_v58 = vadd.f32 1e-05, %v1606_v46 }
 0x303   :  { %v1936_v47 = vadd.f32 %v4040_v48, %v1865_v49  ;;  %v1795_v2 = vmul.f32 %v2294_v32, %v3826_v34  ;;  %v1530_v10 = vpop.xlane.xlu0 %1529 }
 0x304   :  { %2299 = vrsqrt.f32 %v1670_v58  ;;  %v1607_v24 = vmul.f32 0.0078125, %v1530_v10 }
 0x305   :  { %2000 = vst [vmem:[#allocation2 + $0x168] sm:$0xff] %v1936_v47  ;;  %v1866_v20 = vmul.f32 %v4031_v60, %v1795_v2 }
 0x306   :  { %v2296_v52 = vpop.eup %2295  ;;  %v1671_v6 = vadd.f32 1e-05, %v1607_v24 }
 0x307   :  { %v1937_v45 = vadd.f32 %v4040_v48, %v1866_v20  ;;  %v1796_v56 = vmul.f32 %v2296_v52, %v3834_v1  ;;  %v1532_v29 = vpop.xlane.xlu1 %1531 }
 0x308   :  { %2301 = vrsqrt.f32 %v1671_v6  ;;  %v1608_v38 = vmul.f32 0.0078125, %v1532_v29 }
 0x309   :  { %2001 = vst [vmem:[#allocation2 + $0x170] sm:$0xff] %v1937_v45  ;;  %v1867_v19 = vmul.f32 %v4031_v60, %v1796_v56 }
 0x30a   :  { %v2298_v51 = vpop.eup %2297  ;;  %v1672_v34 = vadd.f32 1e-05, %v1608_v38 }
 0x30b   :  { %v1938_v55 = vadd.f32 %v4040_v48, %v1867_v19  ;;  %v1797_v33 = vmul.f32 %v2298_v51, %v3842_v61  ;;  %v1534_v59 = vpop.xlane.xlu0 %1533 }
 0x30c   :  { %2303 = vrsqrt.f32 %v1672_v34  ;;  %v1609_v18 = vmul.f32 0.0078125, %v1534_v59 }
 0x30d   :  { %2002 = vst [vmem:[#allocation2 + $0x178] sm:$0xff] %v1938_v55  ;;  %v1868_v16 = vmul.f32 %v4031_v60, %v1797_v33 }
 0x30e   :  { %v2300_v41 = vpop.eup %2299  ;;  %v1673_v1 = vadd.f32 1e-05, %v1609_v18 }
 0x30f   :  { %v1939_v13 = vadd.f32 %v4040_v48, %v1868_v16  ;;  %v1798_v22 = vmul.f32 %v2300_v41, %v3850_v26  ;;  %v1536_v3 = vpop.xlane.xlu1 %1535 }
 0x310   :  { %2305 = vrsqrt.f32 %v1673_v1  ;;  %v1610_v36 = vmul.f32 0.0078125, %v1536_v3 }
 0x311   :  { %2003 = vst [vmem:[#allocation2 + $0x180] sm:$0xff] %v1939_v13  ;;  %v1869_v25 = vmul.f32 %v4031_v60, %v1798_v22 }
 0x312   :  { %v2302_v40 = vpop.eup %2301  ;;  %v1674_v61 = vadd.f32 1e-05, %v1610_v36 }
 0x313   :  { %v1940_v37 = vadd.f32 %v4040_v48, %v1869_v25  ;;  %v1799_v15 = vmul.f32 %v2302_v40, %v3858_v30  ;;  %v1538_v9 = vpop.xlane.xlu0 %1537 }
 0x314   :  { %2307 = vrsqrt.f32 %v1674_v61  ;;  %v1611_v35 = vmul.f32 0.0078125, %v1538_v9 }
 0x315   :  { %2004 = vst [vmem:[#allocation2 + $0x188] sm:$0xff] %v1940_v37  ;;  %v1870_v63 = vmul.f32 %v4031_v60, %v1799_v15 }
 0x316   :  { %v2304_v54 = vpop.eup %2303  ;;  %v1675_v26 = vadd.f32 1e-05, %v1611_v35 }
 0x317   :  { %v1941_v7 = vadd.f32 %v4040_v48, %v1870_v63  ;;  %v1800_v50 = vmul.f32 %v2304_v54, %v3866_v4  ;;  %v1540_v21 = vpop.xlane.xlu1 %1539 }
 0x318   :  { %2309 = vrsqrt.f32 %v1675_v26  ;;  %v1612_v0 = vmul.f32 0.0078125, %v1540_v21 }
 0x319   :  { %2005 = vst [vmem:[#allocation2 + $0x190] sm:$0xff] %v1941_v7  ;;  %v1871_v14 = vmul.f32 %v4031_v60, %v1800_v50 }
 0x31a   :  { %v2306_v28 = vpop.eup %2305  ;;  %v1676_v30 = vadd.f32 1e-05, %v1612_v0 }
 0x31b   :  { %v1942_v12 = vadd.f32 %v4040_v48, %v1871_v14  ;;  %v1801_v11 = vmul.f32 %v2306_v28, %v3874_v44  ;;  %v1542_v5 = vpop.xlane.xlu0 %1541 }
 0x31c   :  { %2311 = vrsqrt.f32 %v1676_v30  ;;  %v1613_v46 = vmul.f32 0.0078125, %v1542_v5 }
 0x31d   :  { %2006 = vst [vmem:[#allocation2 + $0x198] sm:$0xff] %v1942_v12  ;;  %v1872_v49 = vmul.f32 %v4031_v60, %v1801_v11 }
 0x31e   :  { %v2308_v32 = vpop.eup %2307  ;;  %v1677_v4 = vadd.f32 1e-05, %v1613_v46 }
 0x31f   :  { %v1943_v58 = vadd.f32 %v4040_v48, %v1872_v49  ;;  %v1802_v47 = vmul.f32 %v2308_v32, %v3882_v27  ;;  %v1544_v2 = vpop.xlane.xlu1 %1543 }
 0x320   :  { %2313 = vrsqrt.f32 %v1677_v4  ;;  %v1614_v10 = vmul.f32 0.0078125, %v1544_v2 }
 0x321   :  { %2007 = vst [vmem:[#allocation2 + $0x1a0] sm:$0xff] %v1943_v58  ;;  %v1873_v24 = vmul.f32 %v4031_v60, %v1802_v47 }
 0x322   :  { %v2310_v20 = vpop.eup %2309  ;;  %v1678_v44 = vadd.f32 1e-05, %v1614_v10 }
 0x323   :  { %v1944_v52 = vadd.f32 %v4040_v48, %v1873_v24  ;;  %v1803_v6 = vmul.f32 %v2310_v20, %v3890_v39  ;;  %v1546_v45 = vpop.xlane.xlu0 %1545 }
 0x324   :  { %2315 = vrsqrt.f32 %v1678_v44  ;;  %v1615_v56 = vmul.f32 0.0078125, %v1546_v45 }
 0x325   :  { %2008 = vst [vmem:[#allocation2 + $0x1a8] sm:$0xff] %v1944_v52  ;;  %v1874_v29 = vmul.f32 %v4031_v60, %v1803_v6 }
 0x326   :  { %v2312_v38 = vpop.eup %2311  ;;  %v1679_v27 = vadd.f32 1e-05, %v1615_v56 }
 0x327   :  { %v1945_v19 = vadd.f32 %v4040_v48, %v1874_v29  ;;  %v1804_v51 = vmul.f32 %v2312_v38, %v3898_v8  ;;  %v1548_v34 = vpop.xlane.xlu1 %1547 }
 0x328   :  { %2317 = vrsqrt.f32 %v1679_v27  ;;  %v1616_v55 = vmul.f32 0.0078125, %v1548_v34 }
 0x329   :  { %2009 = vst [vmem:[#allocation2 + $0x1b0] sm:$0xff] %v1945_v19  ;;  %v1875_v33 = vmul.f32 %v4031_v60, %v1804_v51 }
 0x32a   :  { %v2314_v59 = vpop.eup %2313  ;;  %v1680_v39 = vadd.f32 1e-05, %v1616_v55 }
 0x32b   :  { %v1946_v18 = vadd.f32 %v4040_v48, %v1875_v33  ;;  %v1805_v16 = vmul.f32 %v2314_v59, %v3906_v57  ;;  %v1550_v41 = vpop.xlane.xlu0 %1549 }
 0x32c   :  { %2319 = vrsqrt.f32 %v1680_v39  ;;  %v1617_v1 = vmul.f32 0.0078125, %v1550_v41 }
 0x32d   :  { %2010 = vst [vmem:[#allocation2 + $0x1b8] sm:$0xff] %v1946_v18  ;;  %v1876_v13 = vmul.f32 %v4031_v60, %v1805_v16 }
 0x32e   :  { %v2316_v22 = vpop.eup %2315  ;;  %v1681_v8 = vadd.f32 1e-05, %v1617_v1 }
 0x32f   :  { %v1947_v3 = vadd.f32 %v4040_v48, %v1876_v13  ;;  %v1806_v36 = vmul.f32 %v2316_v22, %v3914_v53  ;;  %v1552_v25 = vpop.xlane.xlu1 %1551 }
 0x330   :  { %2321 = vrsqrt.f32 %v1681_v8  ;;  %v1618_v40 = vmul.f32 0.0078125, %v1552_v25 }
 0x331   :  { %2011 = vst [vmem:[#allocation2 + $0x1c0] sm:$0xff] %v1947_v3  ;;  %v1877_v61 = vmul.f32 %v4031_v60, %v1806_v36 }
 0x332   :  { %v2318_v37 = vpop.eup %2317  ;;  %v1682_v57 = vadd.f32 1e-05, %v1618_v40 }
 0x333   :  { %v1948_v15 = vadd.f32 %v4040_v48, %v1877_v61  ;;  %v1807_v9 = vmul.f32 %v2318_v37, %v3922_v31  ;;  %v1554_v35 = vpop.xlane.xlu0 %1553 }
 0x334   :  { %2323 = vrsqrt.f32 %v1682_v57  ;;  %v1619_v63 = vmul.f32 0.0078125, %v1554_v35 }
 0x335   :  { %2012 = vst [vmem:[#allocation2 + $0x1c8] sm:$0xff] %v1948_v15  ;;  %v1878_v54 = vmul.f32 %v4031_v60, %v1807_v9 }
 0x336   :  { %v2320_v26 = vpop.eup %2319  ;;  %v1683_v53 = vadd.f32 1e-05, %v1619_v63 }
 0x337   :  { %v1949_v7 = vadd.f32 %v4040_v48, %v1878_v54  ;;  %v1808_v50 = vmul.f32 %v2320_v26, %v3930_v17  ;;  %v1556_v21 = vpop.xlane.xlu1 %1555 }
 0x338   :  { %2325 = vrsqrt.f32 %v1683_v53  ;;  %v1620_v0 = vmul.f32 0.0078125, %v1556_v21 }
 0x339   :  { %2013 = vst [vmem:[#allocation2 + $0x1d0] sm:$0xff] %v1949_v7  ;;  %v1879_v14 = vmul.f32 %v4031_v60, %v1808_v50 }
 0x33a   :  { %v2322_v28 = vpop.eup %2321  ;;  %v1684_v31 = vadd.f32 1e-05, %v1620_v0 }
 0x33b   :  { %v1950_v30 = vadd.f32 %v4040_v48, %v1879_v14  ;;  %v1809_v12 = vmul.f32 %v2322_v28, %v3938_v62 }
 0x33c   :  { %2327 = vrsqrt.f32 %v1684_v31 }
 0x33d   :  { %2014 = vst [vmem:[#allocation2 + $0x1d8] sm:$0xff] %v1950_v30  ;;  %v1880_v11 = vmul.f32 %v4031_v60, %v1809_v12 }
 0x33e   :  { %v2324_v5 = vpop.eup %2323 }
 0x33f   :  { %v1951_v46 = vadd.f32 %v4040_v48, %v1880_v11  ;;  %v1810_v17 = vmul.f32 %v2324_v5, %v3946_v23 }
 0x341   :  { %2015 = vst [vmem:[#allocation2 + $0x1e0] sm:$0xff] %v1951_v46  ;;  %v1881_v49 = vmul.f32 %v4031_v60, %v1810_v17 }
 0x342   :  { %v2326_v32 = vpop.eup %2325 }
 0x343   :  { %v1952_v4 = vadd.f32 %v4040_v48, %v1881_v49  ;;  %v1811_v58 = vmul.f32 %v2326_v32, %v3954_v43 }
 0x345   :  { %2016 = vst [vmem:[#allocation2 + $0x1e8] sm:$0xff] %v1952_v4  ;;  %v1882_v62 = vmul.f32 %v4031_v60, %v1811_v58 }
 0x346   :  { %v2328_v47 = vpop.eup %2327 }
 0x347   :  { %v1953_v2 = vadd.f32 %v4040_v48, %v1882_v62  ;;  %v1812_v10 = vmul.f32 %v2328_v47, %v3962_v42 }
 0x349   :  { %2017 = vst [vmem:[#allocation2 + $0x1f0] sm:$0xff] %v1953_v2  ;;  %v1883_v23 = vmul.f32 %v4031_v60, %v1812_v10 }
 0x34b   :  { %v1954_v24 = vadd.f32 %v4040_v48, %v1883_v23 }
 0x34d   :  { %2018 = vst [vmem:[#allocation2 + $0x1f8] sm:$0xff] %v1954_v24 }
 0x34e   :  { %2342 = shalt.err (!%p2339_p4)
}
 0x34f   :  { %s2343_s1 = scalar_lea.hbm %s4116_s4, 8192 }
 0x350   :  { %p2344_p5 = scmp.ne.s32.totalorder %s4116_s4, %s2343_s1  ;;  %p2347_p6 = scmp.lt.u32.totalorder %s2343_s1, %s4116_s4 }
 0x352   :  { %p2349_p7 = pnand %p2347_p6, %p2344_p5 }
 0x354   :  { %2352 = shalt.err (!%p2349_p7)
}
 0x355   :  { %s2357_s26 = smov 128   ;;  %s2358_s27 = smov 8  }
 0x356   :  { %2030 = dma.vmem_to_hbm [thread:$0]  %s2025_s3, 8192, %s4116_s4, [#allocation3], %s2357_s26, %s2357_s26, %s2358_s27  }
 0x357   :  { %2353 = dma.done.wait [#allocation3], 8192  }
 0x358   :  { %2354 = vsyncadd [#allocation3], 4294959104 }
 0x359   :  { %2034 = vsyncpa [#allocation3], 1 }

// kernel: attention_forward.4
= control target key start
LH: loop header
LB: loop body
LE: loop exit
PB: predicated region body
PF: predicated region fallthrough
CT: control target
= control target key end

     0   :  { %s6134_s0 = inlined_call_operand.vmem [shape: f32[2,256,1536], index: 0, kind: input, shape index: {}, may-alias: {0,1,2}]   ;;  %s6135_s1 = inlined_call_operand.vmem [shape: f32[2,256,1536], index: 1, kind: input, shape index: {}, may-alias: {0,1,2}]   ;;  %s6136_s2 = inlined_call_operand.vmem [shape: f32[2,256,1536], index: 2, kind: input, shape index: {}, may-alias: {0,1,2}]   ;;  %s6137_s3 = inlined_call_operand.vmem [shape: f32[2,256,512], index: 3, kind: output, shape index: {}]  }
   0x1   :  { %6180 = sst [smem:[#allocation53_spill]] %s6135_s1 }
   0x2   :  { %6181 = sst [smem:[#allocation54_spill]] %s6136_s2 }
   0x3   :  { %6182 = sst [smem:[#allocation55_spill]] %s6137_s3 }
   0x4   :  { %s4406_s12 = smov 0   ;;  %s4408_s13 = smov 0  }
   0x5   :  { %s4410_s14 = smov 0   ;;  %s4412_s15 = smov 0  }
   0x6   :  { %s4414_s16 = smov 0   ;;  %s4416_s17 = smov 0  }
   0x7   :  { %s4418_s18 = smov 0   ;;  %s4420_s19 = smov 0  }
   0x8   :  { %s4422_s20 = smov 0   ;;  %s4424_s21 = smov 0  }
   0x9   :  { %s4426_s22 = smov 0   ;;  %s4428_s23 = smov 0  }
   0xa   :  { %s4430_s24 = smov 0   ;;  %s4432_s25 = smov 0  }
   0xb   :  { %s4434_s26 = smov 0  }
   0xc LB: > { %6183 = sst [smem:[#allocation9_spill]] %s4330_s14  ;;  %s28_s28 = sadd.s32 1, %s4362_s22  ;;  %s4378_s26 = sphi %s4434_s26, %s13_s26   ;;  %s4374_s25 = sphi %s4432_s25, %s6353_s25   ;;  %s4370_s24 = sphi %s4430_s24, %s6352_s24   ;;  %s4366_s23 = sphi %s4428_s23, %s6351_s23   ;;  %s4362_s22 = sphi %s4426_s22, %s6350_s22   ;;  %s4358_s21 = sphi %s4424_s21, %s6349_s21   ;;  %s4354_s20 = sphi %s4422_s20, %s6348_s20   ;;  %s4350_s19 = sphi %s4420_s19, %s6347_s19   ;;  %s4346_s18 = sphi %s4418_s18, %s6346_s18   ;;  %s4342_s17 = sphi %s4416_s17, %s6345_s17   ;;  %s4338_s16 = sphi %s4414_s16, %s6344_s16   ;;  %s4334_s15 = sphi %s4412_s15, %s6343_s15   ;;  %s4330_s14 = sphi %s4410_s14, %s6342_s14   ;;  %s4326_s13 = sphi %s4408_s13, %s6341_s13   ;;  %s4322_s12 = sphi %s4406_s12, %s6340_s12  }
   0xd   : > { %6184 = sst [smem:[#allocation10_spill]] %s4346_s18  ;;  %p29_p0 = scmp.ge.s32.totalorder %s28_s28, 2 }
   0xe   : > { %6185 = sst [smem:[#allocation11_spill]] %s4350_s19  ;;  %s31_s29 = sadd.s32 1, %s4366_s23 }
   0xf   : > { %6186 = sst [smem:[#allocation12_spill]] %s4354_s20  ;;  %s35_s30 = sadd.s32 1, %s4370_s24 }
  0x10   : > { %6187 = sst [smem:[#allocation13_spill]] %s4358_s21  ;;  %s39_s4 = sadd.s32 1, %s4374_s25 }
  0x11   : > { %s6355_s28 = smov (%p29_p0, %s28_s28), 0  ;;  %s6357_s29 = smov (!%p29_p0, %s31_s29), %s4366_s23 }
  0x12   : > { %6188 = sst [smem:[#allocation14_spill]] %s6355_s28  ;;  %p57_p1 = scmp.ne.s32.totalorder %s4342_s17, %s4338_s16 }
  0x13   : > { %p33_p2 = scmp.ge.s32.totalorder %s6357_s29, 2  ;;  %p58_p3 = scmp.eq.s32.totalorder %s4378_s26, 0 }
  0x14   : > { %s73_s6 = sadd.s32 4, %s4370_s24  ;;  %s76_s7 = ssub.s32 %s4362_s22, %s6355_s28 }
  0x15   : > { %s6359_s29 = smov (%p33_p2, %s6357_s29), 0  ;;  %s6361_s30 = smov (!%p33_p2, %s35_s30), %s4370_s24 }
  0x16   : > { %6189 = sst [smem:[#allocation15_spill]] %s6359_s29  ;;  %s44_s8 = ssub.s32 %s4366_s23, %s6359_s29 }
  0x17   : > { %p4506_p4 = por %p58_p3, %p57_p1  ;;  %p37_p5 = scmp.ge.s32.totalorder %s6361_s30, 4 }
  0x18   : > { %s82_s10 = sadd.s32 1, %s4334_s15  ;;  %p89_p6 = scmp.ne.s32.totalorder %s4334_s15, %s4330_s14 }
  0x19   : > { %s105_s11 = sadd.s32 8, %s4370_s24  ;;  %s6363_s30 = smov (%p37_p5, %s6361_s30), 0 }
  0x1a   : > { %6191 = sst [smem:[#allocation16_spill]] %s6363_s30  ;;  %s6365_s4 = smov (!%p37_p5, %s39_s4), %s4374_s25 }
  0x1b   : > { %s46_s27 = ssub.s32 %s4370_s24, %s6363_s30  ;;  %s74_s5 = sadd.s32 4, %s6363_s30 }
  0x1c   : > { %p41_p7 = scmp.ge.s32.totalorder %s6365_s4, 2  ;;  %s78_s29 = ssub.s32 %s73_s6, %s74_s5 }
  0x1d   : > { %p4522_p8 = por %p89_p6, %p58_p3  ;;  %s106_s3 = sadd.s32 8, %s6363_s30 }
  0x1e   : > { %s6367_s4 = smov (%p41_p7, %s6365_s4), 0  ;;  %s110_s20 = ssub.s32 %s105_s11, %s106_s3 }
  0x1f   : > { %6193 = sst [smem:[#allocation17_spill]] %s6367_s4  ;;  %s114_s21 = sadd.s32 1, %s4326_s13 }
  0x20   : > { %s43_s19 = ssub.s32 %s4374_s25, %s6367_s4  ;;  %p121_p9 = scmp.ne.s32.totalorder %s4326_s13, %s4322_s12 }
  0x21   : > { %s45_s5 = sor.u32 %s44_s8, %s43_s19  ;;  %s77_s6 = sor.u32 %s76_s7, %s43_s19 }
  0x22   : > { %s47_s18 = sor.u32 %s46_s27, %s45_s5  ;;  %s79_s14 = sor.u32 %s78_s29, %s77_s6 }
  0x23   : > { %p48_p10 = scmp.eq.s32.totalorder %s47_s18, 0  ;;  %p80_p11 = scmp.eq.s32.totalorder %s79_s14, 0 }
  0x24   : > { %s111_s2 = sor.u32 %s110_s20, %s77_s6  ;;  %p4536_p12 = por %p121_p9, %p58_p3 }
  0x25   : > { %s6195_s1 = sadd.s32 1, %s4342_s17  ;;  %p112_p13 = scmp.eq.s32.totalorder %s111_s2, 0 }
  0x26   : > { %s4543_s3 = scalar_select %p48_p10, %s4342_s17, %s6195_s1  }
  0x27   : > { %s4546_s11 = scalar_select %p80_p11, %s4334_s15, %s82_s10  }
  0x28   : > { %s6196_s4 = sadd.s32 4294967295, %s4378_s26   ;;  %p3218_p3 = scmp.ge.s32.totalorder %s4378_s26, 32 }
  0x29   : > { %p155_p0 = scmp.eq.s32.totalorder %s6196_s4, 31 }
  0x2a   : > { %s4551_s8 = scalar_select %p112_p13, %s4326_s13, %s114_s21  }
  0x2b   : > { %p4556_p2 = por %p155_p0, %p57_p1  ;;  %177 = sbr.rel (%p3218_p3) target bundleno = 126 (0x7e), region = 16 }
  0x32   : > { %180 = sbr.rel (!%p4506_p4) target bundleno = 74 (0x4a), region = 20  ;;  %s182_s1 = sand.u32 (%p4506_p4), 1, %s4342_s17  }
  0x33   : > { %s3850_s2 = smul.u32 (%p4506_p4), 192, %s4366_s23  ;;  %s3219_s14 = sshll.u32 (%p4506_p4), %s182_s1, 7 }
  0x34   : > { %s3851_s19 = smul.u32 (%p4506_p4), 384, %s4374_s25  ;;  %s184_s9 = scalar_lea.vmem (%p4506_p4), [#allocation5], %s3219_s14 }
  0x35   : > { %s187_s20 = sadd.s32 (%p4506_p4), %s4370_s24, %s3850_s2 }
  0x36   : > { %s189_s21 = sadd.s32 (%p4506_p4), %s3851_s19, %s187_s20 }
  0x37   : > { %s3222_s27 = sshll.u32 (%p4506_p4), %s189_s21, 3 }
  0x38   : > { %s4570_s7 = scalar_lea.vmem (%p4506_p4), %s6134_s0, %s3222_s27 }
  0x39   : > { %v249_v0 = vld [vmem:[%s4570_s7] sm:$0xff] }
  0x3a   : > { %v251_v1 = vld [vmem:[%s4570_s7 + $0x60] sm:$0xff]  ;;  %250 = vst [vmem:[%s184_s9] sm:$0xff] %v249_v0 }
  0x3b   : > { %v253_v2 = vld [vmem:[%s4570_s7 + $0xc0] sm:$0xff]  ;;  %252 = vst [vmem:[%s184_s9 + $0x8] sm:$0xff] %v251_v1 }
  0x3c   : > { %254 = vst [vmem:[%s184_s9 + $0x10] sm:$0xff] %v253_v2  ;;  %v255_v3 = vld [vmem:[%s4570_s7 + $0x120] sm:$0xff] }
  0x3d   : > { %v257_v4 = vld [vmem:[%s4570_s7 + $0x180] sm:$0xff]  ;;  %256 = vst [vmem:[%s184_s9 + $0x18] sm:$0xff] %v255_v3 }
  0x3e   : > { %v259_v5 = vld [vmem:[%s4570_s7 + $0x1e0] sm:$0xff]  ;;  %258 = vst [vmem:[%s184_s9 + $0x20] sm:$0xff] %v257_v4 }
  0x3f   : > { %260 = vst [vmem:[%s184_s9 + $0x28] sm:$0xff] %v259_v5  ;;  %v261_v6 = vld [vmem:[%s4570_s7 + $0x240] sm:$0xff] }
  0x40   : > { %v263_v7 = vld [vmem:[%s4570_s7 + $0x2a0] sm:$0xff]  ;;  %262 = vst [vmem:[%s184_s9 + $0x30] sm:$0xff] %v261_v6 }
  0x41   : > { %v265_v8 = vld [vmem:[%s4570_s7 + $0x300] sm:$0xff]  ;;  %264 = vst [vmem:[%s184_s9 + $0x38] sm:$0xff] %v263_v7 }
  0x42   : > { %266 = vst [vmem:[%s184_s9 + $0x40] sm:$0xff] %v265_v8  ;;  %v267_v9 = vld [vmem:[%s4570_s7 + $0x360] sm:$0xff] }
  0x43   : > { %v269_v10 = vld [vmem:[%s4570_s7 + $0x3c0] sm:$0xff]  ;;  %268 = vst [vmem:[%s184_s9 + $0x48] sm:$0xff] %v267_v9 }
  0x44   : > { %v271_v11 = vld [vmem:[%s4570_s7 + $0x420] sm:$0xff]  ;;  %270 = vst [vmem:[%s184_s9 + $0x50] sm:$0xff] %v269_v10 }
  0x45   : > { %272 = vst [vmem:[%s184_s9 + $0x58] sm:$0xff] %v271_v11  ;;  %v273_v12 = vld [vmem:[%s4570_s7 + $0x480] sm:$0xff] }
  0x46   : > { %v275_v13 = vld [vmem:[%s4570_s7 + $0x4e0] sm:$0xff]  ;;  %274 = vst [vmem:[%s184_s9 + $0x60] sm:$0xff] %v273_v12 }
  0x47   : > { %v277_v14 = vld [vmem:[%s4570_s7 + $0x540] sm:$0xff]  ;;  %276 = vst [vmem:[%s184_s9 + $0x68] sm:$0xff] %v275_v13 }
  0x48   : > { %278 = vst [vmem:[%s184_s9 + $0x70] sm:$0xff] %v277_v14  ;;  %v279_v15 = vld [vmem:[%s4570_s7 + $0x5a0] sm:$0xff] }
  0x49   : > { %280 = vst [vmem:[%s184_s9 + $0x78] sm:$0xff] %v279_v15 }
  0x4a PF: > { %286 = sbr.rel (!%p4522_p8) target bundleno = 100 (0x64), region = 58  ;;  %s288_s10 = sand.u32 (%p4522_p8), 1, %s4334_s15  }
  0x4b   : > { %s3103_s5 = smul.u32 (%p4522_p8), 192, %s4362_s22  ;;  %s3223_s6 = sshll.u32 (%p4522_p8), %s288_s10, 7 }
  0x4c   : > { %s3105_s1 = smul.u32 (%p4522_p8), 384, %s4374_s25  ;;  %s6198_s27 = sld [smem:[#allocation53_spill]] (%p4522_p8) }
  0x4d   : > { %s3104_s2 = sadd.s32 (%p4522_p8), %s4370_s24, %s3103_s5  ;;  %s290_s28 = scalar_lea.vmem (%p4522_p8), [#allocation6], %s3223_s6 }
  0x4e   : > { %s3106_s14 = sadd.s32 (%p4522_p8), %s3105_s1, %s3104_s2 }
  0x4f   : > { %s3224_s19 = sshll.u32 (%p4522_p8), %s3106_s14, 3 }
  0x52   : > { %s4597_s29 = scalar_lea.vmem %s6198_s27, %s3224_s19 }
  0x53   : > { %v3225_v16 = vld [vmem:[%s4597_s29 + $0x20] sm:$0xff] }
  0x54   : > { %v3226_v17 = vld [vmem:[%s4597_s29 + $0x80] sm:$0xff]  ;;  %357 = vst [vmem:[%s290_s28] sm:$0xff] %v3225_v16 }
  0x55   : > { %v3227_v18 = vld [vmem:[%s4597_s29 + $0xe0] sm:$0xff]  ;;  %359 = vst [vmem:[%s290_s28 + $0x8] sm:$0xff] %v3226_v17 }
  0x56   : > { %361 = vst [vmem:[%s290_s28 + $0x10] sm:$0xff] %v3227_v18  ;;  %v3228_v19 = vld [vmem:[%s4597_s29 + $0x140] sm:$0xff] }
  0x57   : > { %v3229_v20 = vld [vmem:[%s4597_s29 + $0x1a0] sm:$0xff]  ;;  %363 = vst [vmem:[%s290_s28 + $0x18] sm:$0xff] %v3228_v19 }
  0x58   : > { %v3230_v21 = vld [vmem:[%s4597_s29 + $0x200] sm:$0xff]  ;;  %365 = vst [vmem:[%s290_s28 + $0x20] sm:$0xff] %v3229_v20 }
  0x59   : > { %367 = vst [vmem:[%s290_s28 + $0x28] sm:$0xff] %v3230_v21  ;;  %v3231_v22 = vld [vmem:[%s4597_s29 + $0x260] sm:$0xff] }
  0x5a   : > { %v3232_v23 = vld [vmem:[%s4597_s29 + $0x2c0] sm:$0xff]  ;;  %369 = vst [vmem:[%s290_s28 + $0x30] sm:$0xff] %v3231_v22 }
  0x5b   : > { %v3233_v24 = vld [vmem:[%s4597_s29 + $0x320] sm:$0xff]  ;;  %371 = vst [vmem:[%s290_s28 + $0x38] sm:$0xff] %v3232_v23 }
  0x5c   : > { %373 = vst [vmem:[%s290_s28 + $0x40] sm:$0xff] %v3233_v24  ;;  %v3234_v25 = vld [vmem:[%s4597_s29 + $0x380] sm:$0xff] }
  0x5d   : > { %v3235_v26 = vld [vmem:[%s4597_s29 + $0x3e0] sm:$0xff]  ;;  %375 = vst [vmem:[%s290_s28 + $0x48] sm:$0xff] %v3234_v25 }
  0x5e   : > { %v3236_v27 = vld [vmem:[%s4597_s29 + $0x440] sm:$0xff]  ;;  %377 = vst [vmem:[%s290_s28 + $0x50] sm:$0xff] %v3235_v26 }
  0x5f   : > { %379 = vst [vmem:[%s290_s28 + $0x58] sm:$0xff] %v3236_v27  ;;  %v3237_v28 = vld [vmem:[%s4597_s29 + $0x4a0] sm:$0xff] }
  0x60   : > { %v3238_v29 = vld [vmem:[%s4597_s29 + $0x500] sm:$0xff]  ;;  %381 = vst [vmem:[%s290_s28 + $0x60] sm:$0xff] %v3237_v28 }
  0x61   : > { %v3239_v30 = vld [vmem:[%s4597_s29 + $0x560] sm:$0xff]  ;;  %383 = vst [vmem:[%s290_s28 + $0x68] sm:$0xff] %v3238_v29 }
  0x62   : > { %385 = vst [vmem:[%s290_s28 + $0x70] sm:$0xff] %v3239_v30  ;;  %v3240_v31 = vld [vmem:[%s4597_s29 + $0x5c0] sm:$0xff] }
  0x63   : > { %387 = vst [vmem:[%s290_s28 + $0x78] sm:$0xff] %v3240_v31 }
  0x64 PF: > { %393 = sbr.rel (!%p4536_p12) target bundleno = 126 (0x7e), region = 96  ;;  %s395_s4 = sand.u32 (%p4536_p12), 1, %s4326_s13  }
  0x65   : > { %s3112_s7 = smul.u32 (%p4536_p12), 192, %s4362_s22  ;;  %s3241_s9 = sshll.u32 (%p4536_p12), %s395_s4, 7 }
  0x66   : > { %s3114_s10 = smul.u32 (%p4536_p12), 384, %s4374_s25  ;;  %s6199_s19 = sld [smem:[#allocation54_spill]] (%p4536_p12) }
  0x67   : > { %s3113_s5 = sadd.s32 (%p4536_p12), %s4370_s24, %s3112_s7  ;;  %s397_s30 = scalar_lea.vmem (%p4536_p12), [#allocation7], %s3241_s9 }
  0x68   : > { %s3115_s6 = sadd.s32 (%p4536_p12), %s3114_s10, %s3113_s5 }
  0x69   : > { %s3242_s1 = sshll.u32 (%p4536_p12), %s3115_s6, 3 }
  0x6c   : > { %s4624_s20 = scalar_lea.vmem %s6199_s19, %s3242_s1 }
  0x6d   : > { %v3243_v32 = vld [vmem:[%s4624_s20 + $0x40] sm:$0xff] }
  0x6e   : > { %v3244_v33 = vld [vmem:[%s4624_s20 + $0xa0] sm:$0xff]  ;;  %464 = vst [vmem:[%s397_s30] sm:$0xff] %v3243_v32 }
  0x6f   : > { %v3245_v34 = vld [vmem:[%s4624_s20 + $0x100] sm:$0xff]  ;;  %466 = vst [vmem:[%s397_s30 + $0x8] sm:$0xff] %v3244_v33 }
  0x70   : > { %468 = vst [vmem:[%s397_s30 + $0x10] sm:$0xff] %v3245_v34  ;;  %v3246_v35 = vld [vmem:[%s4624_s20 + $0x160] sm:$0xff] }
  0x71   : > { %v3247_v36 = vld [vmem:[%s4624_s20 + $0x1c0] sm:$0xff]  ;;  %470 = vst [vmem:[%s397_s30 + $0x18] sm:$0xff] %v3246_v35 }
  0x72   : > { %v3248_v37 = vld [vmem:[%s4624_s20 + $0x220] sm:$0xff]  ;;  %472 = vst [vmem:[%s397_s30 + $0x20] sm:$0xff] %v3247_v36 }
  0x73   : > { %474 = vst [vmem:[%s397_s30 + $0x28] sm:$0xff] %v3248_v37  ;;  %v3249_v38 = vld [vmem:[%s4624_s20 + $0x280] sm:$0xff] }
  0x74   : > { %v3250_v39 = vld [vmem:[%s4624_s20 + $0x2e0] sm:$0xff]  ;;  %476 = vst [vmem:[%s397_s30 + $0x30] sm:$0xff] %v3249_v38 }
  0x75   : > { %v3251_v40 = vld [vmem:[%s4624_s20 + $0x340] sm:$0xff]  ;;  %478 = vst [vmem:[%s397_s30 + $0x38] sm:$0xff] %v3250_v39 }
  0x76   : > { %480 = vst [vmem:[%s397_s30 + $0x40] sm:$0xff] %v3251_v40  ;;  %v3252_v41 = vld [vmem:[%s4624_s20 + $0x3a0] sm:$0xff] }
  0x77   : > { %v3253_v42 = vld [vmem:[%s4624_s20 + $0x400] sm:$0xff]  ;;  %482 = vst [vmem:[%s397_s30 + $0x48] sm:$0xff] %v3252_v41 }
  0x78   : > { %v3254_v43 = vld [vmem:[%s4624_s20 + $0x460] sm:$0xff]  ;;  %484 = vst [vmem:[%s397_s30 + $0x50] sm:$0xff] %v3253_v42 }
  0x79   : > { %486 = vst [vmem:[%s397_s30 + $0x58] sm:$0xff] %v3254_v43  ;;  %v3255_v44 = vld [vmem:[%s4624_s20 + $0x4c0] sm:$0xff] }
  0x7a   : > { %v3256_v45 = vld [vmem:[%s4624_s20 + $0x520] sm:$0xff]  ;;  %488 = vst [vmem:[%s397_s30 + $0x60] sm:$0xff] %v3255_v44 }
  0x7b   : > { %v3257_v46 = vld [vmem:[%s4624_s20 + $0x580] sm:$0xff]  ;;  %490 = vst [vmem:[%s397_s30 + $0x68] sm:$0xff] %v3256_v45 }
  0x7c   : > { %492 = vst [vmem:[%s397_s30 + $0x70] sm:$0xff] %v3257_v46  ;;  %v3258_v47 = vld [vmem:[%s4624_s20 + $0x5e0] sm:$0xff] }
  0x7d   : > { %494 = vst [vmem:[%s397_s30 + $0x78] sm:$0xff] %v3258_v47 }
  0x7e PF: > { %p3259_p1 = scmp.ge.s32.totalorder %s4378_s26, 1  ;;  %p499_p4 = scmp.lt.s32.totalorder %s4378_s26, 33 }
  0x80   : > { %p500_p5 = pnand %p3259_p1, %p499_p4 }
  0x82   : > { %503 = sbr.rel (%p500_p5) target bundleno = 1886 (0x75e), region = 134 }
  0x89   : > { %s6200_s21 = sld [smem:[#allocation9_spill]]  ;;  %s506_s27 = sand.u32 1, %s4338_s16  }
  0x8a   : > { %s3260_s28 = sshll.u32 %s506_s27, 7  ;;  %s520_s7 = sand.u32 1, %s4322_s12  }
  0x8b   : > { %s3262_s9 = sshll.u32 %s520_s7, 7  ;;  %s4647_s10 = scalar_lea.vmem [#allocation5], %s3260_s28 }
  0x8c   : > { %s4651_s6 = scalar_lea.vmem [#allocation7], %s3262_s9  ;;  %s4653_s1 = scalar_lea.vmem [#allocation8], %s3260_s28 }
  0x8d   : > { %s6201_s2 = sld [smem:[#allocation10_spill]] }
  0x8f   : > { %s513_s29 = sand.u32 1, %s6200_s21  }
  0x90   : > { %s3261_s4 = sshll.u32 %s513_s29, 7 }
  0x91   : > { %s4649_s5 = scalar_lea.vmem [#allocation6], %s3261_s4 }
  0x93   : > { %p3264_p6 = scmp.ne.s32.totalorder %s6201_s2, 0 }
  0x94   : > { %vm560_vm0 = vcmask (!%p3264_p6), 7168   ;;  %vm625_vm1 = vcmask (!%p3264_p6), 523264   ;;  %v4380_v48 = vmov (!%p3264_p6), -inf   ;;  %v4381_v49 = vmov (!%p3264_p6), 0.0  }
  0x95   : > { %559 = sbr.rel (%p3264_p6) target bundleno = 197 (0xc5), region = 150  ;;  %561 = vst.msk [vmem:[#allocation2] sm:$0xff] (!%p3264_p6), %vm560_vm0, %v4380_v48  ;;  %562 = vst.msk [vmem:[#allocation2 + $0x8] sm:$0xff] (!%p3264_p6), %vm560_vm0, %v4380_v48 }
  0x96   : > { %563 = vst.msk [vmem:[#allocation2 + $0x10] sm:$0xff] (!%p3264_p6), %vm560_vm0, %v4380_v48  ;;  %564 = vst.msk [vmem:[#allocation2 + $0x18] sm:$0xff] (!%p3264_p6), %vm560_vm0, %v4380_v48 }
  0x97   : > { %565 = vst.msk [vmem:[#allocation2 + $0x20] sm:$0xff] (!%p3264_p6), %vm560_vm0, %v4380_v48  ;;  %566 = vst.msk [vmem:[#allocation2 + $0x28] sm:$0xff] (!%p3264_p6), %vm560_vm0, %v4380_v48 }
  0x98   : > { %567 = vst.msk [vmem:[#allocation2 + $0x30] sm:$0xff] (!%p3264_p6), %vm560_vm0, %v4380_v48  ;;  %568 = vst.msk [vmem:[#allocation2 + $0x38] sm:$0xff] (!%p3264_p6), %vm560_vm0, %v4380_v48 }
  0x99   : > { %569 = vst.msk [vmem:[#allocation2 + $0x40] sm:$0xff] (!%p3264_p6), %vm560_vm0, %v4380_v48  ;;  %570 = vst.msk [vmem:[#allocation2 + $0x48] sm:$0xff] (!%p3264_p6), %vm560_vm0, %v4380_v48 }
  0x9a   : > { %571 = vst.msk [vmem:[#allocation2 + $0x50] sm:$0xff] (!%p3264_p6), %vm560_vm0, %v4380_v48  ;;  %572 = vst.msk [vmem:[#allocation2 + $0x58] sm:$0xff] (!%p3264_p6), %vm560_vm0, %v4380_v48 }
  0x9b   : > { %573 = vst.msk [vmem:[#allocation2 + $0x60] sm:$0xff] (!%p3264_p6), %vm560_vm0, %v4380_v48  ;;  %574 = vst.msk [vmem:[#allocation2 + $0x68] sm:$0xff] (!%p3264_p6), %vm560_vm0, %v4380_v48 }
  0x9c   : > { %575 = vst.msk [vmem:[#allocation2 + $0x70] sm:$0xff] %vm560_vm0, %v4380_v48  ;;  %576 = vst.msk [vmem:[#allocation2 + $0x78] sm:$0xff] %vm560_vm0, %v4380_v48 }
  0x9d   : > { %577 = vst.msk [vmem:[#allocation2 + $0x80] sm:$0xff] %vm560_vm0, %v4380_v48  ;;  %578 = vst.msk [vmem:[#allocation2 + $0x88] sm:$0xff] %vm560_vm0, %v4380_v48 }
  0x9e   : > { %579 = vst.msk [vmem:[#allocation2 + $0x90] sm:$0xff] %vm560_vm0, %v4380_v48  ;;  %580 = vst.msk [vmem:[#allocation2 + $0x98] sm:$0xff] %vm560_vm0, %v4380_v48 }
  0x9f   : > { %581 = vst.msk [vmem:[#allocation2 + $0xa0] sm:$0xff] %vm560_vm0, %v4380_v48  ;;  %582 = vst.msk [vmem:[#allocation2 + $0xa8] sm:$0xff] %vm560_vm0, %v4380_v48 }
  0xa0   : > { %583 = vst.msk [vmem:[#allocation2 + $0xb0] sm:$0xff] %vm560_vm0, %v4380_v48  ;;  %584 = vst.msk [vmem:[#allocation2 + $0xb8] sm:$0xff] %vm560_vm0, %v4380_v48 }
  0xa1   : > { %585 = vst.msk [vmem:[#allocation2 + $0xc0] sm:$0xff] %vm560_vm0, %v4380_v48  ;;  %586 = vst.msk [vmem:[#allocation2 + $0xc8] sm:$0xff] %vm560_vm0, %v4380_v48 }
  0xa2   : > { %587 = vst.msk [vmem:[#allocation2 + $0xd0] sm:$0xff] %vm560_vm0, %v4380_v48  ;;  %588 = vst.msk [vmem:[#allocation2 + $0xd8] sm:$0xff] %vm560_vm0, %v4380_v48 }
  0xa3   : > { %589 = vst.msk [vmem:[#allocation2 + $0xe0] sm:$0xff] %vm560_vm0, %v4380_v48  ;;  %590 = vst.msk [vmem:[#allocation2 + $0xe8] sm:$0xff] %vm560_vm0, %v4380_v48 }
  0xa4   : > { %591 = vst.msk [vmem:[#allocation2 + $0xf0] sm:$0xff] %vm560_vm0, %v4380_v48  ;;  %592 = vst.msk [vmem:[#allocation2 + $0xf8] sm:$0xff] %vm560_vm0, %v4380_v48 }
  0xa5   : > { %593 = vst.msk [vmem:[#allocation3] sm:$0xff] %vm560_vm0, %v4381_v49  ;;  %594 = vst.msk [vmem:[#allocation3 + $0x8] sm:$0xff] %vm560_vm0, %v4381_v49 }
  0xa6   : > { %595 = vst.msk [vmem:[#allocation3 + $0x10] sm:$0xff] %vm560_vm0, %v4381_v49  ;;  %596 = vst.msk [vmem:[#allocation3 + $0x18] sm:$0xff] %vm560_vm0, %v4381_v49 }
  0xa7   : > { %597 = vst.msk [vmem:[#allocation3 + $0x20] sm:$0xff] %vm560_vm0, %v4381_v49  ;;  %598 = vst.msk [vmem:[#allocation3 + $0x28] sm:$0xff] %vm560_vm0, %v4381_v49 }
  0xa8   : > { %599 = vst.msk [vmem:[#allocation3 + $0x30] sm:$0xff] %vm560_vm0, %v4381_v49  ;;  %600 = vst.msk [vmem:[#allocation3 + $0x38] sm:$0xff] %vm560_vm0, %v4381_v49 }
  0xa9   : > { %601 = vst.msk [vmem:[#allocation3 + $0x40] sm:$0xff] %vm560_vm0, %v4381_v49  ;;  %602 = vst.msk [vmem:[#allocation3 + $0x48] sm:$0xff] %vm560_vm0, %v4381_v49 }
  0xaa   : > { %603 = vst.msk [vmem:[#allocation3 + $0x50] sm:$0xff] %vm560_vm0, %v4381_v49  ;;  %604 = vst.msk [vmem:[#allocation3 + $0x58] sm:$0xff] %vm560_vm0, %v4381_v49 }
  0xab   : > { %605 = vst.msk [vmem:[#allocation3 + $0x60] sm:$0xff] %vm560_vm0, %v4381_v49  ;;  %606 = vst.msk [vmem:[#allocation3 + $0x68] sm:$0xff] %vm560_vm0, %v4381_v49 }
  0xac   : > { %607 = vst.msk [vmem:[#allocation3 + $0x70] sm:$0xff] %vm560_vm0, %v4381_v49  ;;  %608 = vst.msk [vmem:[#allocation3 + $0x78] sm:$0xff] %vm560_vm0, %v4381_v49 }
  0xad   : > { %609 = vst.msk [vmem:[#allocation3 + $0x80] sm:$0xff] %vm560_vm0, %v4381_v49  ;;  %610 = vst.msk [vmem:[#allocation3 + $0x88] sm:$0xff] %vm560_vm0, %v4381_v49 }
  0xae   : > { %611 = vst.msk [vmem:[#allocation3 + $0x90] sm:$0xff] %vm560_vm0, %v4381_v49  ;;  %612 = vst.msk [vmem:[#allocation3 + $0x98] sm:$0xff] %vm560_vm0, %v4381_v49 }
  0xaf   : > { %613 = vst.msk [vmem:[#allocation3 + $0xa0] sm:$0xff] %vm560_vm0, %v4381_v49  ;;  %614 = vst.msk [vmem:[#allocation3 + $0xa8] sm:$0xff] %vm560_vm0, %v4381_v49 }
  0xb0   : > { %615 = vst.msk [vmem:[#allocation3 + $0xb0] sm:$0xff] %vm560_vm0, %v4381_v49  ;;  %616 = vst.msk [vmem:[#allocation3 + $0xb8] sm:$0xff] %vm560_vm0, %v4381_v49 }
  0xb1   : > { %617 = vst.msk [vmem:[#allocation3 + $0xc0] sm:$0xff] %vm560_vm0, %v4381_v49  ;;  %618 = vst.msk [vmem:[#allocation3 + $0xc8] sm:$0xff] %vm560_vm0, %v4381_v49 }
  0xb2   : > { %619 = vst.msk [vmem:[#allocation3 + $0xd0] sm:$0xff] %vm560_vm0, %v4381_v49  ;;  %620 = vst.msk [vmem:[#allocation3 + $0xd8] sm:$0xff] %vm560_vm0, %v4381_v49 }
  0xb3   : > { %621 = vst.msk [vmem:[#allocation3 + $0xe0] sm:$0xff] %vm560_vm0, %v4381_v49  ;;  %622 = vst.msk [vmem:[#allocation3 + $0xe8] sm:$0xff] %vm560_vm0, %v4381_v49 }
  0xb4   : > { %623 = vst.msk [vmem:[#allocation3 + $0xf0] sm:$0xff] %vm560_vm0, %v4381_v49  ;;  %624 = vst.msk [vmem:[#allocation3 + $0xf8] sm:$0xff] %vm560_vm0, %v4381_v49 }
  0xb5   : > { %626 = vst.msk [vmem:[#allocation4] sm:$0xff] %vm625_vm1, %v4381_v49  ;;  %627 = vst.msk [vmem:[#allocation4 + $0x8] sm:$0xff] %vm625_vm1, %v4381_v49 }
  0xb6   : > { %628 = vst.msk [vmem:[#allocation4 + $0x10] sm:$0xff] %vm625_vm1, %v4381_v49  ;;  %629 = vst.msk [vmem:[#allocation4 + $0x18] sm:$0xff] %vm625_vm1, %v4381_v49 }
  0xb7   : > { %630 = vst.msk [vmem:[#allocation4 + $0x20] sm:$0xff] %vm625_vm1, %v4381_v49  ;;  %631 = vst.msk [vmem:[#allocation4 + $0x28] sm:$0xff] %vm625_vm1, %v4381_v49 }
  0xb8   : > { %632 = vst.msk [vmem:[#allocation4 + $0x30] sm:$0xff] %vm625_vm1, %v4381_v49  ;;  %633 = vst.msk [vmem:[#allocation4 + $0x38] sm:$0xff] %vm625_vm1, %v4381_v49 }
  0xb9   : > { %634 = vst.msk [vmem:[#allocation4 + $0x40] sm:$0xff] %vm625_vm1, %v4381_v49  ;;  %635 = vst.msk [vmem:[#allocation4 + $0x48] sm:$0xff] %vm625_vm1, %v4381_v49 }
  0xba   : > { %636 = vst.msk [vmem:[#allocation4 + $0x50] sm:$0xff] %vm625_vm1, %v4381_v49  ;;  %637 = vst.msk [vmem:[#allocation4 + $0x58] sm:$0xff] %vm625_vm1, %v4381_v49 }
  0xbb   : > { %638 = vst.msk [vmem:[#allocation4 + $0x60] sm:$0xff] %vm625_vm1, %v4381_v49  ;;  %639 = vst.msk [vmem:[#allocation4 + $0x68] sm:$0xff] %vm625_vm1, %v4381_v49 }
  0xbc   : > { %640 = vst.msk [vmem:[#allocation4 + $0x70] sm:$0xff] %vm625_vm1, %v4381_v49  ;;  %641 = vst.msk [vmem:[#allocation4 + $0x78] sm:$0xff] %vm625_vm1, %v4381_v49 }
  0xbd   : > { %642 = vst.msk [vmem:[#allocation4 + $0x80] sm:$0xff] %vm625_vm1, %v4381_v49  ;;  %643 = vst.msk [vmem:[#allocation4 + $0x88] sm:$0xff] %vm625_vm1, %v4381_v49 }
  0xbe   : > { %644 = vst.msk [vmem:[#allocation4 + $0x90] sm:$0xff] %vm625_vm1, %v4381_v49  ;;  %645 = vst.msk [vmem:[#allocation4 + $0x98] sm:$0xff] %vm625_vm1, %v4381_v49 }
  0xbf   : > { %646 = vst.msk [vmem:[#allocation4 + $0xa0] sm:$0xff] %vm625_vm1, %v4381_v49  ;;  %647 = vst.msk [vmem:[#allocation4 + $0xa8] sm:$0xff] %vm625_vm1, %v4381_v49 }
  0xc0   : > { %648 = vst.msk [vmem:[#allocation4 + $0xb0] sm:$0xff] %vm625_vm1, %v4381_v49  ;;  %649 = vst.msk [vmem:[#allocation4 + $0xb8] sm:$0xff] %vm625_vm1, %v4381_v49 }
  0xc1   : > { %650 = vst.msk [vmem:[#allocation4 + $0xc0] sm:$0xff] %vm625_vm1, %v4381_v49  ;;  %651 = vst.msk [vmem:[#allocation4 + $0xc8] sm:$0xff] %vm625_vm1, %v4381_v49 }
  0xc2   : > { %652 = vst.msk [vmem:[#allocation4 + $0xd0] sm:$0xff] %vm625_vm1, %v4381_v49  ;;  %653 = vst.msk [vmem:[#allocation4 + $0xd8] sm:$0xff] %vm625_vm1, %v4381_v49 }
  0xc3   : > { %654 = vst.msk [vmem:[#allocation4 + $0xe0] sm:$0xff] %vm625_vm1, %v4381_v49  ;;  %655 = vst.msk [vmem:[#allocation4 + $0xe8] sm:$0xff] %vm625_vm1, %v4381_v49 }
  0xc4   : > { %656 = vst.msk [vmem:[#allocation4 + $0xf0] sm:$0xff] %vm625_vm1, %v4381_v49  ;;  %657 = vst.msk [vmem:[#allocation4 + $0xf8] sm:$0xff] %vm625_vm1, %v4381_v49 }
  0xc5 PF: > { %v4817_v50 = vld [vmem:[%s4649_s5] sm:$0xff]  ;;  %v4820_v51 = vld [vmem:[%s4649_s5 + $0x8] sm:$0xff]  ;;  %vm722_vm2 = vcmask 523264   ;;  %v4823_v52 = vld [vmem:[%s4649_s5 + $0x10] sm:$0xff]  ;;  %vm1284_vm4 = vcmask 7168   ;;  %s4383_s12 = smov 64  }
  0xc6   : > { %vm4827_vm3 = vmpackc.low %vm722_vm2, %vm722_vm2  ;;  %v3690_v55 = vpack.c.bf16 %v4820_v51, %v4817_v50  ;;  %v4836_v56 = vld [vmem:[%s4649_s5 + $0x18] sm:$0xff]  ;;  %v658_v58 = vld [vmem:[%s4647_s10] sm:$0xff]  ;;  %s6330_s16 = sld [smem:[#allocation10_spill]] }
  0xc7   : > { %v3696_v57 = vpack.c.bf16 %v4836_v56, %v4823_v52  ;;  %v4848_v59 = vld [vmem:[%s4649_s5 + $0x20] sm:$0xff]  ;;  %v4851_v60 = vld [vmem:[%s4649_s5 + $0x28] sm:$0xff]  ;;  %v4853_v61 = vmul.f32 0.125, %v658_v58  ;;  %v4864_v63 = vld [vmem:[%s4649_s5 + $0x30] sm:$0xff] }
  0xc8   : > { %3692 = vmatprep.subr.msk.bf16.mxu0 %vm4827_vm3, %v3690_v55  ;;  %v3702_v62 = vpack.c.bf16 %v4851_v60, %v4848_v59  ;;  %v4867_v0 = vld [vmem:[%s4649_s5 + $0x38] sm:$0xff]  ;;  %v4876_v2 = vld [vmem:[%s4649_s5 + $0x40] sm:$0xff]  ;;  %v4879_v3 = vld [vmem:[%s4649_s5 + $0x48] sm:$0xff] }
  0xc9   : > { %3695 = vmatpush3.bf16.xpose.msk.msra.mxu0 %vm4827_vm3, %v3690_v55  ;;  %3498 = vmatprep.mubr.msk.f32.mxu0 %vm722_vm2, %v4853_v61  ;;  %v3708_v1 = vpack.c.bf16 %v4867_v0, %v4864_v63  ;;  %v3714_v4 = vpack.c.bf16 %v4879_v3, %v4876_v2  ;;  %v4888_v5 = vld [vmem:[%s4649_s5 + $0x50] sm:$0xff]  ;;  %v4891_v6 = vld [vmem:[%s4649_s5 + $0x58] sm:$0xff]  ;;  %v4900_v8 = vld [vmem:[%s4649_s5 + $0x60] sm:$0xff] }
  0xca   : > { %3698 = vmatprep.subr.msk.bf16.mxu0 %vm4827_vm3, %v3696_v57  ;;  %v3720_v7 = vpack.c.bf16 %v4891_v6, %v4888_v5  ;;  %v4903_v9 = vld [vmem:[%s4649_s5 + $0x68] sm:$0xff]  ;;  %v4912_v11 = vld [vmem:[%s4649_s5 + $0x70] sm:$0xff]  ;;  %v4915_v12 = vld [vmem:[%s4649_s5 + $0x78] sm:$0xff] }
  0xcb   : > { %v3726_v10 = vpack.c.bf16 %v4903_v9, %v4900_v8  ;;  %v3732_v13 = vpack.c.bf16 %v4915_v12, %v4912_v11  ;;  %v659_v14 = vld [vmem:[%s4647_s10 + $0x8] sm:$0xff]  ;;  %v660_v15 = vld [vmem:[%s4647_s10 + $0x10] sm:$0xff]  ;;  %v661_v18 = vld [vmem:[%s4647_s10 + $0x18] sm:$0xff] }
  0xcc   : > { %v4927_v16 = vmul.f32 0.125, %v659_v14  ;;  %v4929_v17 = vmul.f32 0.125, %v660_v15  ;;  %v662_v19 = vld [vmem:[%s4647_s10 + $0x20] sm:$0xff]  ;;  %v4935_v20 = vmul.f32 0.125, %v661_v18  ;;  %v663_v22 = vld [vmem:[%s4647_s10 + $0x28] sm:$0xff]  ;;  %v664_v23 = vld [vmem:[%s4647_s10 + $0x30] sm:$0xff] }
  0xcd   : > { %v4939_v21 = vmul.f32 0.125, %v662_v19  ;;  %v4945_v24 = vmul.f32 0.125, %v663_v22  ;;  %v4949_v25 = vmul.f32 0.125, %v664_v23  ;;  %v665_v26 = vld [vmem:[%s4647_s10 + $0x38] sm:$0xff]  ;;  %v666_v27 = vld [vmem:[%s4647_s10 + $0x40] sm:$0xff]  ;;  %v667_v30 = vld [vmem:[%s4647_s10 + $0x48] sm:$0xff] }
  0xce   : > { %v4955_v28 = vmul.f32 0.125, %v665_v26  ;;  %v4959_v29 = vmul.f32 0.125, %v666_v27  ;;  %v668_v31 = vld [vmem:[%s4647_s10 + $0x50] sm:$0xff]  ;;  %v4965_v32 = vmul.f32 0.125, %v667_v30  ;;  %v669_v34 = vld [vmem:[%s4647_s10 + $0x58] sm:$0xff]  ;;  %v670_v35 = vld [vmem:[%s4647_s10 + $0x60] sm:$0xff] }
  0xcf   : > { %v4969_v33 = vmul.f32 0.125, %v668_v31  ;;  %v4975_v36 = vmul.f32 0.125, %v669_v34  ;;  %v4979_v37 = vmul.f32 0.125, %v670_v35  ;;  %v671_v38 = vld [vmem:[%s4647_s10 + $0x68] sm:$0xff]  ;;  %v672_v39 = vld [vmem:[%s4647_s10 + $0x70] sm:$0xff]  ;;  %v673_v42 = vld [vmem:[%s4647_s10 + $0x78] sm:$0xff] }
  0xd0   : > { %v4985_v40 = vmul.f32 0.125, %v671_v38  ;;  %v4989_v41 = vmul.f32 0.125, %v672_v39  ;;  %v4994_v43 = vmul.f32 0.125, %v673_v42  ;;  %v5049_v18 = vld [vmem:[%s4651_s6] sm:$0xff]  ;;  %v5052_v19 = vld [vmem:[%s4651_s6 + $0x8] sm:$0xff]  ;;  %v692_v22 = vld [vmem:[%s4651_s6 + $0x10] sm:$0xff] }
  0xd1   : > { %3701 = vmatpush3.bf16.xpose.msk.msra.mxu0 %vm4827_vm3, %v3696_v57  ;;  %6204 = vst [vmem:[#allocation18_spill] sm:$0xff] %v5049_v18  ;;  %6205 = vst [vmem:[#allocation19_spill] sm:$0xff] %v5052_v19  ;;  %v3738_v26 = vpack.c.bf16 %v5052_v19, %v5049_v18  ;;  %v693_v27 = vld [vmem:[%s4651_s6 + $0x18] sm:$0xff]  ;;  %v694_v30 = vld [vmem:[%s4651_s6 + $0x20] sm:$0xff]  ;;  %p3329_p7 = scmp.ne.s32.totalorder %s6330_s16, 1 }
  0xd2   : > { %3704 = vmatprep.subr.msk.bf16.mxu0 %vm4827_vm3, %v3702_v62  ;;  %v3742_v31 = vpack.c.bf16 %v693_v27, %v692_v22  ;;  %v695_v34 = vld [vmem:[%s4651_s6 + $0x28] sm:$0xff]  ;;  %v5063_v35 = vld [vmem:[%s4651_s6 + $0x30] sm:$0xff]  ;;  %v5066_v38 = vld [vmem:[%s4651_s6 + $0x38] sm:$0xff]  ;;  %s4385_s14 = smov (!%p3329_p7), 64  }
  0xd3   : > { %6206 = vst [vmem:[#allocation20_spill] sm:$0xff] %v5063_v35  ;;  %6207 = vst [vmem:[#allocation21_spill] sm:$0xff] %v5066_v38  ;;  %3739 = vmatprep.subr.bf16.mxu1 %v3738_v26  ;;  %v3746_v42 = vpack.c.bf16 %v695_v34, %v694_v30  ;;  %v698_v22 = vld [vmem:[%s4651_s6 + $0x40] sm:$0xff]  ;;  %v699_v27 = vld [vmem:[%s4651_s6 + $0x48] sm:$0xff] }
  0xd4   : > { %3741 = vmatpush3.bf16.msra.mxu1 %v3738_v26  ;;  %v3754_v23 = vpack.c.bf16 %v699_v27, %v698_v22  ;;  %v5074_v54 = vld [vmem:[#allocation2] sm:$0xff]  ;;  %v5082_v34 = vld [vmem:[%s4651_s6 + $0x50] sm:$0xff]  ;;  %v5085_v39 = vld [vmem:[%s4651_s6 + $0x58] sm:$0xff]  ;;  %v3995_v27 = vpack.i.bf16 %v4867_v0, %v4864_v63 }
  0xd5   : > { %3743 = vmatprep.subr.bf16.mxu1 %v3742_v31  ;;  %6210 = vst [vmem:[#allocation24_spill] sm:$0xff] %v5082_v34  ;;  %6211 = vst [vmem:[#allocation25_spill] sm:$0xff] %v5085_v39  ;;  %v5104_v18 = vld [vmem:[#allocation2 + $0x10] sm:$0xff]  ;;  %v5110_v19 = vld [vmem:[%s4651_s6 + $0x68] sm:$0xff] }
  0xd6   : > { %6214 = vst [vmem:[#allocation28_spill] sm:$0xff] %v5104_v18  ;;  %6216 = vst [vmem:[#allocation30_spill] sm:$0xff] %v5110_v19  ;;  %v5116_v63 = vld [vmem:[#allocation2 + $0x20] sm:$0xff] }
  0xd7   : > { %6217 = vst [vmem:[#allocation31_spill] sm:$0xff] %v5116_v63 }
  0xd8   : > { %3745 = vmatpush3.bf16.msra.mxu1 %v3742_v31  ;;  %v5079_v31 = vld [vmem:[#allocation2 + $0x18] sm:$0xff] }
  0xd9   : > { %3707 = vmatpush3.bf16.xpose.msk.msra.mxu0 %vm4827_vm3, %v3702_v62  ;;  %3747 = vmatprep.subr.bf16.mxu1 %v3746_v42  ;;  %6209 = vst [vmem:[#allocation23_spill] sm:$0xff] %v5079_v31 }
  0xda   : > { %3710 = vmatprep.subr.msk.bf16.mxu0 %vm4827_vm3, %v3708_v1 }
  0xdc   : > { %3749 = vmatpush3.bf16.msra.mxu1 %v3746_v42  ;;  %v5087_v42 = vld [vmem:[#allocation2 + $0x8] sm:$0xff] }
  0xdd   : > { %6212 = vst [vmem:[#allocation26_spill] sm:$0xff] %v5087_v42 }
  0xe1   : > { %3713 = vmatpush3.bf16.xpose.msk.msra.mxu0 %vm4827_vm3, %v3708_v1  ;;  %v4382_v1 = vmov 0  }
  0xe2   : > { %3716 = vmatprep.subr.msk.bf16.mxu0 %vm4827_vm3, %v3714_v4  ;;  %3978 = vset.pattern.permute.xlu0 %v4382_v1 }
  0xe3   : > { %3979 = vset.pattern.permute.xlu1 %v4382_v1  ;;  %v3750_v1 = vpack.c.bf16 %v5066_v38, %v5063_v35 }
  0xe5   : > { %3751 = vmatprep.subr.bf16.mxu1 %v3750_v1 }
  0xe6   : > { %3753 = vmatpush3.bf16.msra.mxu1 %v3750_v1  ;;  %v5107_v1 = vld [vmem:[%s4651_s6 + $0x60] sm:$0xff] }
  0xe7   : > { %3755 = vmatprep.subr.bf16.mxu1 %v3754_v23  ;;  %6215 = vst [vmem:[#allocation29_spill] sm:$0xff] %v5107_v1  ;;  %v3762_v0 = vpack.c.bf16 %v5110_v19, %v5107_v1  ;;  %v5137_v1 = vld [vmem:[%s4651_s6 + $0x70] sm:$0xff] }
  0xe8   : > { %6218 = vst [vmem:[#allocation32_spill] sm:$0xff] %v5137_v1 }
  0xe9   : > { %3719 = vmatpush3.bf16.xpose.msk.msra.mxu0 %vm4827_vm3, %v3714_v4 }
  0xea   : > { %3722 = vmatprep.subr.msk.bf16.mxu0 %vm4827_vm3, %v3720_v7  ;;  %3757 = vmatpush3.bf16.msra.mxu1 %v3754_v23  ;;  %v3758_v23 = vpack.c.bf16 %v5085_v39, %v5082_v34  ;;  %v6220_v34 = vpack.i.bf16 %v4820_v51, %v4817_v50  ;;  %v5174_v51 = vld [vmem:[#allocation2 + $0x40] sm:$0xff] }
  0xeb   : > { %6221 = vst [vmem:[#allocation34_spill] sm:$0xff] %v5174_v51 }
  0xec   : > { %3759 = vmatprep.subr.bf16.mxu1 %v3758_v23 }
  0xee   : > { %3761 = vmatpush3.bf16.msra.mxu1 %v3758_v23 }
  0xef   : > { %3763 = vmatprep.subr.bf16.mxu1 %v3762_v0 }
  0xf1   : > { %3725 = vmatpush3.bf16.xpose.msk.msra.mxu0 %vm4827_vm3, %v3720_v7 }
  0xf2   : > { %3728 = vmatprep.subr.msk.bf16.mxu0 %vm4827_vm3, %v3726_v10  ;;  %3765 = vmatpush3.bf16.msra.mxu1 %v3762_v0 }
  0xf9   : > { %3731 = vmatpush3.bf16.xpose.msk.msra.mxu0 %vm4827_vm3, %v3726_v10 }
  0xfa   : > { %3734 = vmatprep.subr.msk.bf16.mxu0 %vm4827_vm3, %v3732_v13 }
 0x101   : > { %3737 = vmatpush3.bf16.xpose.msk.msra.mxu0 %vm4827_vm3, %v3732_v13 }
 0x108   : > { %3499 = vmatmul.mubr.msk.f32.vlgmr.msra.gmra.mrb[0].mxu0 %vm722_vm2, %v4927_v16 }
 0x109   : > { %3501 = vmatprep.mubr.msk.f32.mxu0 %vm722_vm2, %v4929_v17 }
 0x10c   : > { %3502 = vmatmul.mubr.msk.f32.gmra.mrb[2].mxu0 %vm722_vm2, %v4935_v20 }
 0x10d   : > { %3504 = vmatprep.mubr.msk.f32.mxu0 %vm722_vm2, %v4939_v21 }
 0x110   : > { %3505 = vmatmul.mubr.msk.f32.gmra.mrb[4].mxu0 %vm722_vm2, %v4945_v24 }
 0x111   : > { %3507 = vmatprep.mubr.msk.f32.mxu0 %vm722_vm2, %v4949_v25 }
 0x114   : > { %3508 = vmatmul.mubr.msk.f32.gmra.mrb[6].mxu0 %vm722_vm2, %v4955_v28 }
 0x115   : > { %3510 = vmatprep.mubr.msk.f32.mxu0 %vm722_vm2, %v4959_v29 }
 0x118   : > { %3511 = vmatmul.mubr.msk.f32.gmra.mrb[8].mxu0 %vm722_vm2, %v4965_v32 }
 0x119   : > { %3513 = vmatprep.mubr.msk.f32.mxu0 %vm722_vm2, %v4969_v33 }
 0x11c   : > { %3514 = vmatmul.mubr.msk.f32.gmra.mrb[10].mxu0 %vm722_vm2, %v4975_v36 }
 0x11d   : > { %3516 = vmatprep.mubr.msk.f32.mxu0 %vm722_vm2, %v4979_v37 }
 0x120   : > { %3517 = vmatmul.mubr.msk.f32.gmra.mrb[12].mxu0 %vm722_vm2, %v4985_v40 }
 0x121   : > { %3519 = vmatprep.mubr.msk.f32.mxu0 %vm722_vm2, %v4989_v41 }
 0x124   : > { %3520 = vmatmul.mubr.msk.f32.gmra.mrb[14].mxu0 %vm722_vm2, %v4994_v43 }
 0x1db   : > { %v5000_v44 = vpop.f32.mrb[0].mxu0 }
 0x1dc   : > { %v5002_v45 = vpop.f32.mrb[1].mxu0 }
 0x1dd   : > { %980 = vmax.xlane.f32.xlu0 %v5002_v45 }
 0x1df   : > { %v5005_v46 = vpop.f32.mrb[2].mxu0 }
 0x1e0   : > { %986 = vmax.xlane.f32.xlu1 %v5005_v46  ;;  %v5008_v47 = vpop.f32.mrb[3].mxu0 }
 0x1e1   : > { %982 = vmax.xlane.f32.xlu0 %v5000_v44 }
 0x1e3   : > { %v5011_v48 = vpop.f32.mrb[4].mxu0 }
 0x1e4   : > { %984 = vmax.xlane.f32.xlu1 %v5008_v47  ;;  %v5014_v49 = vpop.f32.mrb[5].mxu0 }
 0x1e5   : > { %988 = vmax.xlane.f32.xlu0 %v5014_v49 }
 0x1e7   : > { %v5017_v55 = vpop.f32.mrb[6].mxu0 }
 0x1e8   : > { %990 = vmax.xlane.f32.xlu1 %v5011_v48  ;;  %v5020_v57 = vpop.f32.mrb[7].mxu0 }
 0x1e9   : > { %992 = vmax.xlane.f32.xlu0 %v5020_v57 }
 0x1eb   : > { %v5023_v58 = vpop.f32.mrb[8].mxu0 }
 0x1ec   : > { %994 = vmax.xlane.f32.xlu1 %v5017_v55  ;;  %v5026_v62 = vpop.f32.mrb[9].mxu0 }
 0x1ed   : > { %996 = vmax.xlane.f32.xlu0 %v5026_v62 }
 0x1ef   : > { %v5029_v4 = vpop.f32.mrb[10].mxu0 }
 0x1f0   : > { %998 = vmax.xlane.f32.xlu1 %v5023_v58  ;;  %v5032_v7 = vpop.f32.mrb[11].mxu0 }
 0x1f1   : > { %1000 = vmax.xlane.f32.xlu0 %v5032_v7 }
 0x1f3   : > { %v5035_v10 = vpop.f32.mrb[12].mxu0 }
 0x1f4   : > { %1002 = vmax.xlane.f32.xlu1 %v5029_v4  ;;  %v5038_v13 = vpop.f32.mrb[13].mxu0 }
 0x1f5   : > { %1004 = vmax.xlane.f32.xlu0 %v5038_v13 }
 0x1f7   : > { %v5041_v14 = vpop.f32.mrb[14].mxu0 }
 0x1f8   : > { %v5043_v15 = vpop.f32.mrb[15].mxu0  ;;  %1006 = vmax.xlane.f32.xlu1 %v5035_v10 }
 0x1f9   : > { %1008 = vmax.xlane.f32.xlu0 %v5043_v15 }
 0x1fc   : > { %1010 = vmax.xlane.f32.xlu1 %v5041_v14 }
 0x26a   : > { %v981_v26 = vpop.xlane.xlu0 %980 }
 0x26b   : > { %v5077_v30 = vmax.f32 %v5074_v54, %v981_v26 }
 0x26d   : > { %6208 = vst [vmem:[#allocation22_spill] sm:$0xff] %v5077_v30  ;;  %1590 = vst.msk [vmem:[#allocation2] sm:$0xff] %vm1284_vm4, %v5077_v30  ;;  %v987_v22 = vpop.xlane.xlu1 %986  ;;  %1078 = vperm.xlu0 %3978, %v5077_v30  }
 0x26e   : > { %v5099_v26 = vmax.f32 %v5079_v31, %v987_v22  ;;  %v983_v35 = vpop.xlane.xlu0 %982 }
 0x26f   : > { %v5102_v38 = vmax.f32 %v5087_v42, %v983_v35  ;;  %v5134_v35 = vld [vmem:[#allocation2 + $0x28] sm:$0xff] }
 0x270   : > { %1593 = vst.msk [vmem:[#allocation2 + $0x18] sm:$0xff] %vm1284_vm4, %v5099_v26 }
 0x271   : > { %6213 = vst [vmem:[#allocation27_spill] sm:$0xff] %v5102_v38  ;;  %1591 = vst.msk [vmem:[#allocation2 + $0x8] sm:$0xff] %vm1284_vm4, %v5102_v38  ;;  %v985_v23 = vpop.xlane.xlu1 %984  ;;  %1083 = vperm.xlu1 %3979, %v5102_v38   ;;  %3996 = vrot.lane.b32.xlu0 %v3995_v27, %s4383_s12  ;;  %v5140_v38 = vld [vmem:[%s4651_s6 + $0x78] sm:$0xff]  ;;  %v3985_v27 = vpack.i.bf16 %v4836_v56, %v4823_v52 }
 0x272   : > { %v5129_v30 = vmax.f32 %v5104_v18, %v985_v23  ;;  %v989_v31 = vpop.xlane.xlu0 %988  ;;  %6219 = vst [vmem:[#allocation33_spill] sm:$0xff] %v5140_v38  ;;  %v5146_v23 = vld [vmem:[#allocation2 + $0x30] sm:$0xff]  ;;  %v3766_v22 = vpack.c.bf16 %v5140_v38, %v5137_v1 }
 0x273   : > { %v5132_v19 = vmax.f32 %v5116_v63, %v989_v31  ;;  %v5166_v31 = vld [vmem:[#allocation2 + $0x38] sm:$0xff] }
 0x274   : > { %1592 = vst.msk [vmem:[#allocation2 + $0x10] sm:$0xff] %vm1284_vm4, %v5129_v30  ;;  %3767 = vmatprep.subr.bf16.mxu1 %v3766_v22 }
 0x275   : > { %1594 = vst.msk [vmem:[#allocation2 + $0x20] sm:$0xff] %vm1284_vm4, %v5132_v19  ;;  %v991_v0 = vpop.xlane.xlu1 %990  ;;  %3981 = vrot.lane.b32.xlu1 %v6220_v34, %s4383_s12  ;;  %3769 = vmatpush3.bf16.msra.mxu1 %v3766_v22 }
 0x276   : > { %v5161_v39 = vmax.f32 %v5134_v35, %v991_v0  ;;  %v993_v18 = vpop.xlane.xlu0 %992  ;;  %v5187_v0 = vld [vmem:[#allocation2 + $0x48] sm:$0xff] }
 0x277   : > { %v5164_v42 = vmax.f32 %v5146_v23, %v993_v18  ;;  %v3990_v18 = vpack.i.bf16 %v4851_v60, %v4848_v59  ;;  %6222 = vst [vmem:[#allocation35_spill] sm:$0xff] %v5187_v0  ;;  %v5216_v59 = vld [vmem:[#allocation2 + $0x60] sm:$0xff] }
 0x278   : > { %1595 = vst.msk [vmem:[#allocation2 + $0x28] sm:$0xff] %vm1284_vm4, %v5161_v39  ;;  %6226 = vst [vmem:[#allocation39_spill] sm:$0xff] %v5216_v59 }
 0x279   : > { %1596 = vst.msk [vmem:[#allocation2 + $0x30] sm:$0xff] %vm1284_vm4, %v5164_v42  ;;  %v995_v56 = vpop.xlane.xlu1 %994  ;;  %3986 = vrot.lane.b32.xlu1 %v3985_v27, %s4383_s12  ;;  %1108 = vperm.xlu0 %3978, %v5164_v42   ;;  %v5196_v27 = vld [vmem:[#allocation2 + $0x50] sm:$0xff] }
 0x27a   : > { %v5185_v34 = vmax.f32 %v5166_v31, %v995_v56  ;;  %v997_v22 = vpop.xlane.xlu0 %996  ;;  %6223 = vst [vmem:[#allocation36_spill] sm:$0xff] %v5196_v27 }
 0x27b   : > { %v5190_v63 = vmax.f32 %v5174_v51, %v997_v22  ;;  %v5206_v22 = vld [vmem:[#allocation2 + $0x58] sm:$0xff] }
 0x27c   : > { %1597 = vst.msk [vmem:[#allocation2 + $0x38] sm:$0xff] %vm1284_vm4, %v5185_v34  ;;  %6225 = vst [vmem:[#allocation38_spill] sm:$0xff] %v5206_v22 }
 0x27d   : > { %v999_v50 = vpop.xlane.xlu1 %998  ;;  %1598 = vst.msk [vmem:[#allocation2 + $0x40] sm:$0xff] %vm1284_vm4, %v5190_v63  ;;  %3991 = vrot.lane.b32.xlu1 %v3990_v18, %s4383_s12 }
 0x27e   : > { %v5204_v60 = vmax.f32 %v5187_v0, %v999_v50  ;;  %v1001_v56 = vpop.xlane.xlu0 %1000  ;;  %v5229_v0 = vld [vmem:[#allocation2 + $0x68] sm:$0xff]  ;;  %v5236_v50 = vld [vmem:[#allocation2 + $0x70] sm:$0xff] }
 0x27f   : > { %v5209_v52 = vmax.f32 %v5196_v27, %v1001_v56  ;;  %6227 = vst [vmem:[#allocation40_spill] sm:$0xff] %v5229_v0 }
 0x280   : > { %6224 = vst [vmem:[#allocation37_spill] sm:$0xff] %v5204_v60  ;;  %1599 = vst.msk [vmem:[#allocation2 + $0x48] sm:$0xff] %vm1284_vm4, %v5204_v60  ;;  %1123 = vperm.xlu0 %3978, %v5204_v60  }
 0x281   : > { %v1003_v18 = vpop.xlane.xlu1 %1002  ;;  %1600 = vst.msk [vmem:[#allocation2 + $0x50] sm:$0xff] %vm1284_vm4, %v5209_v52  ;;  %1093 = vperm.xlu1 %3979, %v5099_v26  }
 0x282   : > { %v5224_v56 = vmax.f32 %v5206_v22, %v1003_v18  ;;  %v1005_v1 = vpop.xlane.xlu0 %1004  ;;  %v5249_v22 = vld [vmem:[#allocation2 + $0x78] sm:$0xff] }
 0x283   : > { %v5227_v38 = vmax.f32 %v5216_v59, %v1005_v1  ;;  %v4015_v59 = vpack.i.bf16 %v4915_v12, %v4912_v11 }
 0x284   : > { %1601 = vst.msk [vmem:[#allocation2 + $0x58] sm:$0xff] %vm1284_vm4, %v5224_v56  ;;  %1133 = vperm.xlu0 %3978, %v5224_v56  }
 0x285   : > { %1602 = vst.msk [vmem:[#allocation2 + $0x60] sm:$0xff] %vm1284_vm4, %v5227_v38  ;;  %1088 = vperm.xlu1 %3979, %v5129_v30   ;;  %v1007_v1 = vpop.xlane.xlu1 %1006 }
 0x286   : > { %v1009_v27 = vpop.xlane.xlu0 %1008  ;;  %v5244_v51 = vmax.f32 %v5229_v0, %v1007_v1  ;;  %v4005_v0 = vpack.i.bf16 %v4891_v6, %v4888_v5  ;;  %v4000_v5 = vpack.i.bf16 %v4879_v3, %v4876_v2  ;;  %v4010_v6 = vpack.i.bf16 %v4903_v9, %v4900_v8 }
 0x287   : > { %v5247_v60 = vmax.f32 %v5236_v50, %v1009_v27 }
 0x288   : > { %1138 = vperm.xlu0 %3978, %v5227_v38   ;;  %1603 = vst.msk [vmem:[#allocation2 + $0x68] sm:$0xff] %vm1284_vm4, %v5244_v51 }
 0x289   : > { %1103 = vperm.xlu1 %3979, %v5161_v39   ;;  %1604 = vst.msk [vmem:[#allocation2 + $0x70] sm:$0xff] %vm1284_vm4, %v5247_v60  ;;  %v1011_v27 = vpop.xlane.xlu1 %1010 }
 0x28a   : > { %v5262_v1 = vmax.f32 %v5249_v22, %v1011_v27 }
 0x28c   : > { %1148 = vperm.xlu0 %3978, %v5247_v60   ;;  %v1043_v18 = vsub.f32 %v5249_v22, %v5262_v1  ;;  %1605 = vst.msk [vmem:[#allocation2 + $0x78] sm:$0xff] %vm1284_vm4, %v5262_v1 }
 0x28d   : > { %1098 = vperm.xlu1 %3979, %v5132_v19  }
 0x290   : > { %4006 = vrot.lane.b32.xlu0 %v4005_v0, %s4383_s12 }
 0x291   : > { %1113 = vperm.xlu1 %3979, %v5185_v34  }
 0x294   : > { %4016 = vrot.lane.b32.xlu0 %v4015_v59, %s4383_s12 }
 0x295   : > { %1118 = vperm.xlu1 %3979, %v5190_v63  }
 0x298   : > { %1608 = vrot.lane.b32.xlu0 %v4927_v16, %s4383_s12 }
 0x299   : > { %1128 = vperm.xlu1 %3979, %v5209_v52  }
 0x29c   : > { %1612 = vrot.lane.b32.xlu0 %v4935_v20, %s4383_s12 }
 0x29d   : > { %4001 = vrot.lane.b32.xlu1 %v4000_v5, %s4383_s12 }
 0x2a0   : > { %1616 = vrot.lane.b32.xlu0 %v4945_v24, %s4383_s12 }
 0x2a1   : > { %1143 = vperm.xlu1 %3979, %v5244_v51  }
 0x2a4   : > { %1620 = vrot.lane.b32.xlu0 %v4955_v28, %s4383_s12 }
 0x2a5   : > { %1153 = vperm.xlu1 %3979, %v5262_v1  }
 0x2a8   : > { %1624 = vrot.lane.b32.xlu0 %v4965_v32, %s4383_s12 }
 0x2a9   : > { %4011 = vrot.lane.b32.xlu1 %v4010_v6, %s4383_s12 }
 0x2ac   : > { %1628 = vrot.lane.b32.xlu0 %v4975_v36, %s4383_s12 }
 0x2ad   : > { %1606 = vrot.lane.b32.xlu1 %v4853_v61, %s4383_s12 }
 0x2b0   : > { %1632 = vrot.lane.b32.xlu0 %v4985_v40, %s4383_s12 }
 0x2b1   : > { %1610 = vrot.lane.b32.xlu1 %v4929_v17, %s4383_s12 }
 0x2b4   : > { %1636 = vrot.lane.b32.xlu0 %v4994_v43, %s4383_s12 }
 0x2b5   : > { %1614 = vrot.lane.b32.xlu1 %v4939_v21, %s4383_s12 }
 0x2b9   : > { %1618 = vrot.lane.b32.xlu1 %v4949_v25, %s4383_s12 }
 0x2bd   : > { %1622 = vrot.lane.b32.xlu1 %v4959_v29, %s4383_s12 }
 0x2c1   : > { %1626 = vrot.lane.b32.xlu1 %v4969_v33, %s4383_s12 }
 0x2c5   : > { %1630 = vrot.lane.b32.xlu1 %v4979_v37, %s4383_s12 }
 0x2c9   : > { %1634 = vrot.lane.b32.xlu1 %v4989_v41, %s4383_s12 }
 0x2ec   : > { %v1079_v61 = vpop.permute.xlu0 %1078 }
 0x2ed   : > { %v1156_v2 = vsub.f32 %v5002_v45, %v1079_v61 }
 0x2ef   : > { %v1172_v3 = vmul.f32 1.442695, %v1156_v2 }
 0x2f0   : > { %v1084_v8 = vpop.permute.xlu1 %1083  ;;  %v3997_v21 = vpop.permute.xlu0 %3996 }
 0x2f1   : > { %4060 = vpow2.f32 %v1172_v3  ;;  %v1157_v9 = vsub.f32 %v5000_v44, %v1084_v8 }
 0x2f3   : > { %v1174_v11 = vmul.f32 1.442695, %v1157_v9  ;;  %v3999_v9 = vunpack.i.h.bf16 %v3997_v21 }
 0x2f4   : > { %v3982_v12 = vpop.permute.xlu1 %3981 }
 0x2f5   : > { %4062 = vpow2.f32 %v1174_v11  ;;  %v3984_v16 = vunpack.i.h.bf16 %v3982_v12  ;;  %v3983_v17 = vunpack.i.l.bf16 %v3982_v12  ;;  %v3998_v11 = vunpack.i.l.bf16 %v3997_v21 }
 0x2f7   : > { %v3770_v20 = vpack.c.bf16 %v3984_v16, %v3983_v17 }
 0x2f8   : > { %v3987_v24 = vpop.permute.xlu1 %3986  ;;  %v1109_v33 = vpop.permute.xlu0 %1108 }
 0x2f9   : > { %3772 = vmatprep.subr.msk.bf16.mxu1 %vm4827_vm3, %v3770_v20  ;;  %v3989_v28 = vunpack.i.h.bf16 %v3987_v24  ;;  %v3988_v29 = vunpack.i.l.bf16 %v3987_v24  ;;  %v1162_v3 = vsub.f32 %v5020_v57, %v1109_v33 }
 0x2fb   : > { %v4061_v25 = vpop.eup %4060  ;;  %v3776_v37 = vpack.c.bf16 %v3989_v28, %v3988_v29 }
 0x2fc   : > { %v3992_v32 = vpop.permute.xlu1 %3991  ;;  %1236 = vadd.xlane.f32.xlu1 %v4061_v25  ;;  %3554 = vmatprep.mubr.f32.mxu1 %v4061_v25 }
 0x2fd   : > { %v3994_v45 = vunpack.i.h.bf16 %v3992_v32  ;;  %v3993_v0 = vunpack.i.l.bf16 %v3992_v32 }
 0x2ff   : > { %v4063_v36 = vpop.eup %4062  ;;  %v1124_v43 = vpop.permute.xlu0 %1123  ;;  %v3782_v6 = vpack.c.bf16 %v3994_v45, %v3993_v0 }
 0x300   : > { %v1094_v40 = vpop.permute.xlu1 %1093  ;;  %1238 = vadd.xlane.f32.xlu0 %v4063_v36  ;;  %3555 = vmatmul.mubr.f32.vlgmr.msra.gmra.mrb[0].mxu1 %v4063_v36  ;;  %v1165_v57 = vsub.f32 %v5023_v58, %v1124_v43 }
 0x301   : > { %v1159_v41 = vsub.f32 %v5005_v46, %v1094_v40  ;;  %3775 = vmatpush3.bf16.xpose.msk.msra.mxu1 %vm4827_vm3, %v3770_v20  ;;  %v1184_v20 = vmul.f32 1.442695, %v1162_v3 }
 0x302   : > { %3778 = vmatprep.subr.msk.bf16.mxu1 %vm4827_vm3, %v3776_v37 }
 0x303   : > { %v1178_v44 = vmul.f32 1.442695, %v1159_v41  ;;  %v1134_v61 = vpop.permute.xlu0 %1133 }
 0x304   : > { %v1089_v59 = vpop.permute.xlu1 %1088  ;;  %v1167_v36 = vsub.f32 %v5029_v4, %v1134_v61 }
 0x305   : > { %4064 = vpow2.f32 %v1178_v44  ;;  %v1158_v27 = vsub.f32 %v5008_v47, %v1089_v59 }
 0x306   : > { %v1194_v45 = vmul.f32 1.442695, %v1167_v36 }
 0x307   : > { %v1176_v5 = vmul.f32 1.442695, %v1158_v27  ;;  %v1139_v16 = vpop.permute.xlu0 %1138 }
 0x308   : > { %v1104_v2 = vpop.permute.xlu1 %1103  ;;  %v1168_v58 = vsub.f32 %v5038_v13, %v1139_v16 }
 0x309   : > { %4066 = vpow2.f32 %v1176_v5  ;;  %v1161_v46 = vsub.f32 %v5011_v48, %v1104_v2  ;;  %3781 = vmatpush3.bf16.xpose.msk.msra.mxu1 %vm4827_vm3, %v3776_v37  ;;  %v3788_v48 = vpack.c.bf16 %v3999_v9, %v3998_v11 }
 0x30a   : > { %3784 = vmatprep.subr.msk.bf16.mxu1 %vm4827_vm3, %v3782_v6  ;;  %v1196_v0 = vmul.f32 1.442695, %v1168_v58 }
 0x30b   : > { %v1182_v8 = vmul.f32 1.442695, %v1161_v46  ;;  %v1149_v29 = vpop.permute.xlu0 %1148 }
 0x30c   : > { %v1099_v12 = vpop.permute.xlu1 %1098 }
 0x30d   : > { %4068 = vpow2.f32 %v1182_v8  ;;  %v1160_v47 = vsub.f32 %v5014_v49, %v1099_v12 }
 0x30f   : > { %v4065_v17 = vpop.eup %4064  ;;  %v1180_v24 = vmul.f32 1.442695, %v1160_v47  ;;  %v4007_v43 = vpop.permute.xlu0 %4006 }
 0x310   : > { %v1114_v25 = vpop.permute.xlu1 %1113  ;;  %1242 = vadd.xlane.f32.xlu1 %v4065_v17  ;;  %v4009_v27 = vunpack.i.h.bf16 %v4007_v43  ;;  %v4008_v4 = vunpack.i.l.bf16 %v4007_v43 }
 0x311   : > { %4070 = vpow2.f32 %v1180_v24  ;;  %v1163_v28 = vsub.f32 %v5017_v55, %v1114_v25  ;;  %3787 = vmatpush3.bf16.xpose.msk.msra.mxu1 %vm4827_vm3, %v3782_v6  ;;  %v1190_v55 = vmul.f32 1.442695, %v1165_v57 }
 0x312   : > { %3790 = vmatprep.subr.msk.bf16.mxu1 %vm4827_vm3, %v3788_v48  ;;  %4072 = vpow2.f32 %v1184_v20  ;;  %v3800_v3 = vpack.c.bf16 %v4009_v27, %v4008_v4 }
 0x313   : > { %v4067_v21 = vpop.eup %4066  ;;  %v1186_v49 = vmul.f32 1.442695, %v1163_v28  ;;  %v4017_v25 = vpop.permute.xlu0 %4016 }
 0x314   : > { %v1119_v32 = vpop.permute.xlu1 %1118  ;;  %1240 = vadd.xlane.f32.xlu0 %v4067_v21  ;;  %3557 = vmatprep.mubr.f32.mxu1 %v4067_v21 }
 0x315   : > { %4074 = vpow2.f32 %v1186_v49  ;;  %v1164_v33 = vsub.f32 %v5026_v62, %v1119_v32  ;;  %3558 = vmatmul.mubr.f32.gmra.mrb[2].mxu1 %v4065_v17  ;;  %v4019_v49 = vunpack.i.h.bf16 %v4017_v25 }
 0x317   : > { %v4069_v37 = vpop.eup %4068  ;;  %v1188_v40 = vmul.f32 1.442695, %v1164_v33 }
 0x318   : > { %v1129_v41 = vpop.permute.xlu1 %1128  ;;  %1246 = vadd.xlane.f32.xlu1 %v4069_v37 }
 0x319   : > { %4076 = vpow2.f32 %v1188_v40  ;;  %v1166_v44 = vsub.f32 %v5032_v7, %v1129_v41  ;;  %3793 = vmatpush3.bf16.xpose.msk.msra.mxu1 %vm4827_vm3, %v3788_v48  ;;  %v1170_v7 = vsub.f32 %v5043_v15, %v1149_v29  ;;  %v4018_v29 = vunpack.i.l.bf16 %v4017_v25 }
 0x31a   : > { %4078 = vpow2.f32 %v1190_v55 }
 0x31b   : > { %v4071_v62 = vpop.eup %4070  ;;  %v1192_v59 = vmul.f32 1.442695, %v1166_v44  ;;  %v1200_v11 = vmul.f32 1.442695, %v1170_v7  ;;  %v3812_v55 = vpack.c.bf16 %v4019_v49, %v4018_v29  ;;  %v6237_v49 = vsub.f32 %v5134_v35, %v5161_v39 }
 0x31c   : > { %v4002_v5 = vpop.permute.xlu1 %4001  ;;  %1244 = vadd.xlane.f32.xlu0 %v4071_v62  ;;  %3560 = vmatprep.mubr.f32.mxu1 %v4071_v62  ;;  %v4073_v13 = vpop.eup %4072 }
 0x31d   : > { %4080 = vpow2.f32 %v1192_v59  ;;  %v4004_v6 = vunpack.i.h.bf16 %v4002_v5  ;;  %v4003_v61 = vunpack.i.l.bf16 %v4002_v5  ;;  %3561 = vmatmul.mubr.f32.gmra.mrb[4].mxu1 %v4069_v37  ;;  %v1609_v37 = vpop.permute.xlu0 %1608  ;;  %v1054_v29 = vmul.f32 1.442695, %v6237_v49 }
 0x31e   : > { %4082 = vpow2.f32 %v1194_v45  ;;  %3563 = vmatprep.mubr.f32.mxu1 %v4073_v13 }
 0x31f   : > { %v4075_v2 = vpop.eup %4074  ;;  %4084 = vpow2.f32 %v1196_v0  ;;  %v3794_v46 = vpack.c.bf16 %v4004_v6, %v4003_v61  ;;  %v6228_v61 = vld [vmem:[#allocation22_spill] sm:$0xff] }
 0x320   : > { %v1144_v8 = vpop.permute.xlu1 %1143  ;;  %1250 = vadd.xlane.f32.xlu1 %v4075_v2  ;;  %1248 = vadd.xlane.f32.xlu0 %v4073_v13  ;;  %v6229_v7 = vsub.f32 %v5074_v54, %v6228_v61 }
 0x321   : > { %v1169_v9 = vsub.f32 %v5035_v10, %v1144_v8  ;;  %3564 = vmatmul.mubr.f32.gmra.mrb[6].mxu1 %v4075_v2  ;;  %3796 = vmatprep.subr.msk.bf16.mxu1 %vm4827_vm3, %v3794_v46  ;;  %v1613_v41 = vpop.permute.xlu0 %1612 }
 0x322   : > { %3799 = vmatpush3.bf16.xpose.msk.msra.mxu1 %vm4827_vm3, %v3794_v46  ;;  %v1044_v2 = vmul.f32 1.442695, %v6229_v7  ;;  %v6230_v46 = vld [vmem:[#allocation26_spill] sm:$0xff] }
 0x323   : > { %v4077_v12 = vpop.eup %4076  ;;  %v1198_v15 = vmul.f32 1.442695, %v1169_v9  ;;  %3802 = vmatprep.subr.msk.bf16.mxu1 %vm4827_vm3, %v3800_v3 }
 0x324   : > { %v4079_v47 = vpop.eup %4078  ;;  %v1154_v16 = vpop.permute.xlu1 %1153  ;;  %1252 = vadd.xlane.f32.xlu0 %v4077_v12  ;;  %3566 = vmatprep.mubr.f32.mxu1 %v4077_v12  ;;  %v1204_v12 = vld [vmem:[#allocation3] sm:$0xff] }
 0x325   : > { %4086 = vpow2.f32 %v1198_v15  ;;  %v1171_v10 = vsub.f32 %v5041_v14, %v1154_v16  ;;  %1254 = vadd.xlane.f32.xlu1 %v4079_v47  ;;  %3567 = vmatmul.mubr.f32.gmra.mrb[8].mxu1 %v4079_v47  ;;  %v1617_v44 = vpop.permute.xlu0 %1616 }
 0x326   : > { %4088 = vpow2.f32 %v1200_v11 }
 0x327   : > { %v4081_v17 = vpop.eup %4080  ;;  %v1202_v20 = vmul.f32 1.442695, %v1171_v10  ;;  %v1205_v10 = vld [vmem:[#allocation3 + $0x8] sm:$0xff] }
 0x328   : > { %v4083_v24 = vpop.eup %4082  ;;  %1256 = vadd.xlane.f32.xlu0 %v4081_v17  ;;  %3569 = vmatprep.mubr.f32.mxu1 %v4081_v17  ;;  %v4012_v48 = vpop.permute.xlu1 %4011 }
 0x329   : > { %v4085_v28 = vpop.eup %4084  ;;  %4090 = vpow2.f32 %v1202_v20  ;;  %1258 = vadd.xlane.f32.xlu1 %v4083_v24  ;;  %3570 = vmatmul.mubr.f32.gmra.mrb[10].mxu1 %v4083_v24  ;;  %v4014_v57 = vunpack.i.h.bf16 %v4012_v48  ;;  %v4013_v21 = vunpack.i.l.bf16 %v4012_v48  ;;  %v1621_v62 = vpop.permute.xlu0 %1620  ;;  %v6233_v20 = vld [vmem:[#allocation23_spill] sm:$0xff] }
 0x32a   : > { %3572 = vmatprep.mubr.f32.mxu1 %v4085_v28  ;;  %3805 = vmatpush3.bf16.xpose.msk.msra.mxu1 %vm4827_vm3, %v3800_v3  ;;  %4092 = vpow2.f32 %v1044_v2  ;;  %v6231_v3 = vld [vmem:[#allocation27_spill] sm:$0xff]  ;;  %v6234_v54 = vsub.f32 %v6233_v20, %v5099_v26  ;;  %v1211_v20 = vld [vmem:[#allocation3 + $0x38] sm:$0xff] }
 0x32b   : > { %v3806_v14 = vpack.c.bf16 %v4014_v57, %v4013_v21  ;;  %v6232_v8 = vsub.f32 %v6230_v46, %v6231_v3  ;;  %v6235_v57 = vld [vmem:[#allocation28_spill] sm:$0xff]  ;;  %v6238_v26 = vld [vmem:[#allocation31_spill] sm:$0xff] }
 0x32c   : > { %1260 = vadd.xlane.f32.xlu0 %v4085_v28  ;;  %v1607_v32 = vpop.permute.xlu1 %1606  ;;  %v1050_v24 = vmul.f32 1.442695, %v6234_v54  ;;  %v6236_v21 = vsub.f32 %v6235_v57, %v5129_v30  ;;  %v1210_v54 = vld [vmem:[#allocation3 + $0x30] sm:$0xff] }
 0x32d   : > { %3808 = vmatprep.subr.msk.bf16.mxu1 %vm4827_vm3, %v3806_v14  ;;  %v1625_v59 = vpop.permute.xlu0 %1624  ;;  %v1046_v9 = vmul.f32 1.442695, %v6232_v8  ;;  %v1208_v8 = vld [vmem:[#allocation3 + $0x20] sm:$0xff] }
 0x32f   : > { %v4087_v33 = vpop.eup %4086  ;;  %4094 = vpow2.f32 %v1046_v9 }
 0x330   : > { %v4089_v36 = vpop.eup %4088  ;;  %1262 = vadd.xlane.f32.xlu1 %v4087_v33  ;;  %3573 = vmatmul.mubr.f32.gmra.mrb[12].mxu1 %v4087_v33  ;;  %v1611_v40 = vpop.permute.xlu1 %1610  ;;  %4096 = vpow2.f32 %v1050_v24 }
 0x331   : > { %1264 = vadd.xlane.f32.xlu0 %v4089_v36  ;;  %3575 = vmatprep.mubr.f32.mxu1 %v4089_v36  ;;  %v1629_v53 = vpop.permute.xlu0 %1628  ;;  %v1207_v36 = vld [vmem:[#allocation3 + $0x18] sm:$0xff] }
 0x332   : > { %3811 = vmatpush3.bf16.xpose.msk.msra.mxu1 %vm4827_vm3, %v3806_v14  ;;  %v1048_v14 = vmul.f32 1.442695, %v6236_v21 }
 0x333   : > { %v4091_v58 = vpop.eup %4090  ;;  %3814 = vmatprep.subr.msk.bf16.mxu1 %vm4827_vm3, %v3812_v55 }
 0x334   : > { %1266 = vadd.xlane.f32.xlu1 %v4091_v58  ;;  %3576 = vmatmul.mubr.f32.gmra.mrb[14].mxu1 %v4091_v58  ;;  %v1615_v43 = vpop.permute.xlu1 %1614  ;;  %v5389_v11 = vpop.eup %4092  ;;  %4098 = vpow2.f32 %v1048_v14  ;;  %v6241_v58 = vsub.f32 %v5166_v31, %v5185_v34 }
 0x335   : > { %3610 = vmatprep.mubr.msk.f32.mxu1 %vm722_vm2, %v1607_v32  ;;  %v1633_v5 = vpop.permute.xlu0 %1632  ;;  %v1220_v15 = vmul.f32 %v5389_v11, %v1204_v12  ;;  %v6239_v32 = vsub.f32 %v6238_v26, %v5132_v19  ;;  %4100 = vpow2.f32 %v1054_v29  ;;  %v1206_v19 = vld [vmem:[#allocation3 + $0x10] sm:$0xff]  ;;  %v6251_v12 = vld [vmem:[#allocation39_spill] sm:$0xff] }
 0x337   : > { %v1052_v33 = vmul.f32 1.442695, %v6239_v32  ;;  %v1212_v32 = vld [vmem:[#allocation3 + $0x40] sm:$0xff] }
 0x338   : > { %v1619_v45 = vpop.permute.xlu1 %1618 }
 0x339   : > { %v1637_v6 = vpop.permute.xlu0 %1636  ;;  %v5392_v47 = vpop.eup %4094  ;;  %4102 = vpow2.f32 %v1052_v33 }
 0x33a   : > { %3817 = vmatpush3.bf16.xpose.msk.msra.mxu1 %vm4827_vm3, %v3812_v55  ;;  %v1221_v48 = vmul.f32 %v5392_v47, %v1205_v10  ;;  %v5409_v55 = vpop.eup %4096 }
 0x33b   : > { %v1223_v39 = vmul.f32 %v5409_v55, %v1207_v36 }
 0x33c   : > { %v1623_v0 = vpop.permute.xlu1 %1622 }
 0x33e   : > { %v5418_v35 = vpop.eup %4098 }
 0x33f   : > { %v1222_v31 = vmul.f32 %v5418_v35, %v1206_v19  ;;  %v5428_v34 = vpop.eup %4100 }
 0x340   : > { %v1627_v27 = vpop.permute.xlu1 %1626 }
 0x341   : > { %3611 = vmatmul.mubr.msk.f32.vlgmr.msra.gmra.mrb[16].mxu1 %vm722_vm2, %v1609_v37  ;;  %v6240_v37 = vsub.f32 %v5146_v23, %v5164_v42  ;;  %v6244_v42 = vld [vmem:[#allocation35_spill] sm:$0xff]  ;;  %v6245_v23 = vld [vmem:[#allocation37_spill] sm:$0xff] }
 0x342   : > { %3613 = vmatprep.mubr.msk.f32.mxu1 %vm722_vm2, %v1611_v40  ;;  %v1058_v40 = vmul.f32 1.442695, %v6241_v58 }
 0x343   : > { %v1056_v30 = vmul.f32 1.442695, %v6240_v37  ;;  %v5438_v46 = vpop.eup %4102  ;;  %v1213_v37 = vld [vmem:[#allocation3 + $0x48] sm:$0xff] }
 0x344   : > { %v1631_v4 = vpop.permute.xlu1 %1630 }
 0x345   : > { %3614 = vmatmul.mubr.msk.f32.gmra.mrb[18].mxu1 %vm722_vm2, %v1613_v41  ;;  %4104 = vpow2.f32 %v1056_v30 }
 0x346   : > { %3616 = vmatprep.mubr.msk.f32.mxu1 %vm722_vm2, %v1615_v43  ;;  %4106 = vpow2.f32 %v1058_v40 }
 0x348   : > { %v1635_v13 = vpop.permute.xlu1 %1634 }
 0x349   : > { %3617 = vmatmul.mubr.msk.f32.gmra.mrb[20].mxu1 %vm722_vm2, %v1617_v44  ;;  %v6242_v44 = vld [vmem:[#allocation34_spill] sm:$0xff] }
 0x34a   : > { %3619 = vmatprep.mubr.msk.f32.mxu1 %vm722_vm2, %v1619_v45  ;;  %v6243_v45 = vsub.f32 %v6242_v44, %v5190_v63  ;;  %v6249_v63 = vld [vmem:[#allocation38_spill] sm:$0xff]  ;;  %v1215_v44 = vld [vmem:[#allocation3 + $0x58] sm:$0xff] }
 0x34b   : > { %v6250_v61 = vsub.f32 %v6249_v63, %v5224_v56  ;;  %v1224_v56 = vmul.f32 %v5438_v46, %v1208_v8 }
 0x34d   : > { %3620 = vmatmul.mubr.msk.f32.gmra.mrb[22].mxu1 %vm722_vm2, %v1621_v62  ;;  %v1060_v62 = vmul.f32 1.442695, %v6243_v45  ;;  %v1066_v7 = vmul.f32 1.442695, %v6250_v61 }
 0x34e   : > { %3622 = vmatprep.mubr.msk.f32.mxu1 %vm722_vm2, %v1623_v0  ;;  %v6246_v0 = vsub.f32 %v6244_v42, %v6245_v23  ;;  %v1216_v42 = vld [vmem:[#allocation3 + $0x60] sm:$0xff] }
 0x34f   : > { %4108 = vpow2.f32 %v1060_v62 }
 0x351   : > { %3623 = vmatmul.mubr.msk.f32.gmra.mrb[24].mxu1 %vm722_vm2, %v1625_v59  ;;  %v1062_v59 = vmul.f32 1.442695, %v6246_v0 }
 0x352   : > { %3625 = vmatprep.mubr.msk.f32.mxu1 %vm722_vm2, %v1627_v27 }
 0x353   : > { %4110 = vpow2.f32 %v1062_v59 }
 0x355   : > { %3626 = vmatmul.mubr.msk.f32.gmra.mrb[26].mxu1 %vm722_vm2, %v1629_v53  ;;  %v1209_v53 = vld [vmem:[#allocation3 + $0x28] sm:$0xff] }
 0x356   : > { %3628 = vmatprep.mubr.msk.f32.mxu1 %vm722_vm2, %v1631_v4  ;;  %v1225_v2 = vmul.f32 %v5428_v34, %v1209_v53 }
 0x359   : > { %3629 = vmatmul.mubr.msk.f32.gmra.mrb[28].mxu1 %vm722_vm2, %v1633_v5  ;;  %v6247_v5 = vld [vmem:[#allocation36_spill] sm:$0xff] }
 0x35a   : > { %3631 = vmatprep.mubr.msk.f32.mxu1 %vm722_vm2, %v1635_v13  ;;  %v6248_v13 = vsub.f32 %v6247_v5, %v5209_v52 }
 0x35d   : > { %3632 = vmatmul.mubr.msk.f32.gmra.mrb[30].mxu1 %vm722_vm2, %v1637_v6  ;;  %v1064_v6 = vmul.f32 1.442695, %v6248_v13 }
 0x35f   : > { %4112 = vpow2.f32 %v1064_v6  ;;  %v1218_v6 = vld [vmem:[#allocation3 + $0x70] sm:$0xff] }
 0x360   : > { %4114 = vpow2.f32 %v1066_v7 }
 0x389   : > { %v1237_v16 = vpop.xlane.xlu1 %1236 }
 0x38a   : > { %v1268_v17 = vadd.f32 %v1237_v16, %v1220_v15  ;;  %v6252_v15 = vsub.f32 %v6251_v12, %v5227_v38  ;;  %v5443_v16 = vpop.eup %4104  ;;  %v6255_v38 = vsub.f32 %v5236_v50, %v5247_v60  ;;  %v1074_v60 = vmul.f32 1.442695, %v1043_v18 }
 0x38b   : > { %v5447_v10 = vpop.eup %4106  ;;  %v1226_v14 = vmul.f32 %v5443_v16, %v1210_v54 }
 0x38c   : > { %1285 = vst.msk [vmem:[#allocation3] sm:$0xff] %vm1284_vm4, %v1268_v17  ;;  %v1068_v52 = vmul.f32 1.442695, %v6252_v15  ;;  %v1072_v57 = vmul.f32 1.442695, %v6255_v38  ;;  %v1227_v21 = vmul.f32 %v5447_v10, %v1211_v20  ;;  %v5458_v49 = vpop.eup %4108 }
 0x38d   : > { %v1239_v25 = vpop.xlane.xlu0 %1238  ;;  %v5460_v33 = vpop.eup %4110  ;;  %v1228_v50 = vmul.f32 %v5458_v49, %v1212_v32 }
 0x38e   : > { %v1269_v28 = vadd.f32 %v1239_v25, %v1221_v48  ;;  %4116 = vpow2.f32 %v1068_v52  ;;  %v6253_v48 = vld [vmem:[#allocation40_spill] sm:$0xff]  ;;  %v5468_v30 = vpop.eup %4112  ;;  %v1229_v58 = vmul.f32 %v5460_v33, %v1213_v37 }
 0x38f   : > { %v6254_v25 = vsub.f32 %v6253_v48, %v5244_v51 }
 0x390   : > { %1286 = vst.msk [vmem:[#allocation3 + $0x8] sm:$0xff] %vm1284_vm4, %v1269_v28 }
 0x391   : > { %v1070_v28 = vmul.f32 1.442695, %v6254_v25 }
 0x393   : > { %4118 = vpow2.f32 %v1070_v28 }
 0x394   : > { %4120 = vpow2.f32 %v1072_v57 }
 0x395   : > { %4122 = vpow2.f32 %v1074_v60 }
 0x39d   : > { %v1243_v41 = vpop.xlane.xlu1 %1242 }
 0x39e   : > { %v1271_v43 = vadd.f32 %v1243_v41, %v1223_v39  ;;  %v1214_v39 = vld [vmem:[#allocation3 + $0x50] sm:$0xff]  ;;  %v5471_v41 = vpop.eup %4114 }
 0x39f   : > { %v1230_v18 = vmul.f32 %v5468_v30, %v1214_v39  ;;  %v5475_v1 = vpop.eup %4116  ;;  %v1231_v45 = vmul.f32 %v5471_v41, %v1215_v44 }
 0x3a0   : > { %1288 = vst.msk [vmem:[#allocation3 + $0x18] sm:$0xff] %vm1284_vm4, %v1271_v43 }
 0x3a1   : > { %v1241_v27 = vpop.xlane.xlu0 %1240 }
 0x3a2   : > { %v1270_v4 = vadd.f32 %v1241_v27, %v1222_v31  ;;  %v1232_v31 = vmul.f32 %v5475_v1, %v1216_v42  ;;  %v5481_v27 = vpop.eup %4118 }
 0x3a3   : > { %v5484_v5 = vpop.eup %4120 }
 0x3a4   : > { %1287 = vst.msk [vmem:[#allocation3 + $0x10] sm:$0xff] %vm1284_vm4, %v1270_v4  ;;  %v1217_v4 = vld [vmem:[#allocation3 + $0x68] sm:$0xff]  ;;  %v5488_v61 = vpop.eup %4122 }
 0x3a5   : > { %v1247_v3 = vpop.xlane.xlu1 %1246  ;;  %v1233_v63 = vmul.f32 %v5481_v27, %v1217_v4  ;;  %v4188_v4 = vld [vmem:[%s4651_s6 + $0x10] sm:$0xff] }
 0x3a6   : > { %v1273_v9 = vadd.f32 %v1247_v3, %v1225_v2  ;;  %v1234_v2 = vmul.f32 %v5484_v5, %v1218_v6  ;;  %v1219_v3 = vld [vmem:[#allocation3 + $0x78] sm:$0xff] }
 0x3a7   : > { %v1235_v15 = vmul.f32 %v5488_v61, %v1219_v3  ;;  %v6284_v3 = vld [vmem:[#allocation21_spill] sm:$0xff] }
 0x3a8   : > { %1290 = vst.msk [vmem:[#allocation3 + $0x28] sm:$0xff] %vm1284_vm4, %v1273_v9 }
 0x3a9   : > { %v1245_v17 = vpop.xlane.xlu0 %1244 }
 0x3aa   : > { %v1272_v24 = vadd.f32 %v1245_v17, %v1224_v56 }
 0x3ac   : > { %1289 = vst.msk [vmem:[#allocation3 + $0x20] sm:$0xff] %vm1284_vm4, %v1272_v24 }
 0x3ad   : > { %v1251_v29 = vpop.xlane.xlu1 %1250  ;;  %v1249_v26 = vpop.xlane.xlu0 %1248 }
 0x3ae   : > { %v1275_v36 = vadd.f32 %v1251_v29, %v1227_v21  ;;  %v1274_v51 = vadd.f32 %v1249_v26, %v1226_v14 }
 0x3b0   : > { %1292 = vst.msk [vmem:[#allocation3 + $0x38] sm:$0xff] %vm1284_vm4, %v1275_v36  ;;  %1291 = vst.msk [vmem:[#allocation3 + $0x30] sm:$0xff] %vm1284_vm4, %v1274_v51 }
 0x3b1   : > { %v1253_v40 = vpop.xlane.xlu0 %1252 }
 0x3b2   : > { %v1255_v19 = vpop.xlane.xlu1 %1254  ;;  %v1276_v43 = vadd.f32 %v1253_v40, %v1228_v50 }
 0x3b3   : > { %v1277_v22 = vadd.f32 %v1255_v19, %v1229_v58 }
 0x3b4   : > { %1293 = vst.msk [vmem:[#allocation3 + $0x40] sm:$0xff] %vm1284_vm4, %v1276_v43 }
 0x3b5   : > { %1294 = vst.msk [vmem:[#allocation3 + $0x48] sm:$0xff] %vm1284_vm4, %v1277_v22  ;;  %v1257_v62 = vpop.xlane.xlu0 %1256 }
 0x3b6   : > { %v1259_v23 = vpop.xlane.xlu1 %1258  ;;  %v1278_v0 = vadd.f32 %v1257_v62, %v1230_v18 }
 0x3b7   : > { %v1279_v59 = vadd.f32 %v1259_v23, %v1231_v45 }
 0x3b8   : > { %1295 = vst.msk [vmem:[#allocation3 + $0x50] sm:$0xff] %vm1284_vm4, %v1278_v0 }
 0x3b9   : > { %1296 = vst.msk [vmem:[#allocation3 + $0x58] sm:$0xff] %vm1284_vm4, %v1279_v59  ;;  %v1261_v53 = vpop.xlane.xlu0 %1260  ;;  %v6281_v59 = vld [vmem:[#allocation19_spill] sm:$0xff] }
 0x3ba   : > { %v1280_v13 = vadd.f32 %v1261_v53, %v1232_v31  ;;  %v6282_v31 = vld [vmem:[#allocation18_spill] sm:$0xff] }
 0x3bb   : > { %v6283_v53 = vpack.i.bf16 %v6281_v59, %v6282_v31  ;;  %v6288_v59 = vld [vmem:[#allocation24_spill] sm:$0xff] }
 0x3bc   : > { %1297 = vst.msk [vmem:[#allocation3 + $0x60] sm:$0xff] %vm1284_vm4, %v1280_v13  ;;  %v4189_v13 = vld [vmem:[%s4651_s6 + $0x18] sm:$0xff] }
 0x3bd   : > { %v1263_v7 = vpop.xlane.xlu1 %1262  ;;  %v4025_v6 = vpack.i.bf16 %v4189_v13, %v4188_v4  ;;  %v5600_v13 = vld [vmem:[#allocation2 + $0x88] sm:$0xff] }
 0x3be   : > { %v1281_v8 = vadd.f32 %v1263_v7, %v1233_v63  ;;  %v1265_v9 = vpop.xlane.xlu0 %1264  ;;  %v4190_v63 = vld [vmem:[%s4651_s6 + $0x20] sm:$0xff]  ;;  %v4191_v7 = vld [vmem:[%s4651_s6 + $0x28] sm:$0xff] }
 0x3bf   : > { %v1282_v12 = vadd.f32 %v1265_v9, %v1234_v2  ;;  %v4030_v2 = vpack.i.bf16 %v4191_v7, %v4190_v63 }
 0x3c0   : > { %1298 = vst.msk [vmem:[#allocation3 + $0x68] sm:$0xff] %vm1284_vm4, %v1281_v8  ;;  %v6285_v8 = vld [vmem:[#allocation20_spill] sm:$0xff] }
 0x3c1   : > { %1299 = vst.msk [vmem:[#allocation3 + $0x70] sm:$0xff] %vm1284_vm4, %v1282_v12  ;;  %v1267_v52 = vpop.xlane.xlu1 %1266  ;;  %v6286_v9 = vpack.i.bf16 %v6284_v3, %v6285_v8  ;;  %v4192_v12 = vld [vmem:[%s4651_s6 + $0x40] sm:$0xff]  ;;  %v5610_v8 = vld [vmem:[#allocation2 + $0x98] sm:$0xff] }
 0x3c2   : > { %v1283_v56 = vadd.f32 %v1267_v52, %v1235_v15  ;;  %v4193_v15 = vld [vmem:[%s4651_s6 + $0x48] sm:$0xff] }
 0x3c3   : > { %v4040_v52 = vpack.i.bf16 %v4193_v15, %v4192_v12 }
 0x3c4   : > { %1300 = vst.msk [vmem:[#allocation3 + $0x78] sm:$0xff] %vm1284_vm4, %v1283_v56  ;;  %v6287_v56 = vld [vmem:[#allocation25_spill] sm:$0xff] }
 0x3c5   : > { %v6289_v31 = vpack.i.bf16 %v6287_v56, %v6288_v59  ;;  %v5626_v59 = vld [vmem:[#allocation2 + $0xa8] sm:$0xff] }
 0x3d3   : > { %v5495_v17 = vpop.f32.mrb[0].mxu1 }
 0x3d4   : > { %6256 = vst [vmem:[#allocation22_spill] sm:$0xff] %v5495_v17  ;;  %v5497_v20 = vpop.f32.mrb[1].mxu1 }
 0x3e8   : > { %v5499_v54 = vpop.f32.mrb[2].mxu1 }
 0x3e9   : > { %6257 = vst [vmem:[#allocation26_spill] sm:$0xff] %v5499_v54  ;;  %v5501_v24 = vpop.f32.mrb[3].mxu1  ;;  %v6293_v54 = vld [vmem:[#allocation32_spill] sm:$0xff] }
 0x3ea   : > { %6258 = vst [vmem:[#allocation27_spill] sm:$0xff] %v5501_v24 }
 0x3f0   : > { %v5503_v48 = vpop.f32.mrb[4].mxu1 }
 0x3f1   : > { %6259 = vst [vmem:[#allocation23_spill] sm:$0xff] %v5503_v48  ;;  %v5505_v25 = vpop.f32.mrb[5].mxu1  ;;  %v5694_v48 = vld [vmem:[#allocation2 + $0xe0] sm:$0xff] }
 0x3f2   : > { %6260 = vst [vmem:[#allocation28_spill] sm:$0xff] %v5505_v25  ;;  %v6292_v25 = vld [vmem:[#allocation33_spill] sm:$0xff] }
 0x3f3   : > { %v6294_v24 = vpack.i.bf16 %v6292_v25, %v6293_v54 }
 0x3f4   : > { %v5507_v28 = vpop.f32.mrb[6].mxu1 }
 0x3f5   : > { %6261 = vst [vmem:[#allocation31_spill] sm:$0xff] %v5507_v28  ;;  %v5509_v38 = vpop.f32.mrb[7].mxu1 }
 0x3f6   : > { %6262 = vst [vmem:[#allocation34_spill] sm:$0xff] %v5509_v38  ;;  %v5690_v38 = vld [vmem:[#allocation2 + $0xe8] sm:$0xff] }
 0x3f8   : > { %v5511_v57 = vpop.f32.mrb[8].mxu1 }
 0x3f9   : > { %6263 = vst [vmem:[#allocation35_spill] sm:$0xff] %v5511_v57  ;;  %v5513_v21 = vpop.f32.mrb[9].mxu1  ;;  %v5678_v57 = vld [vmem:[#allocation2 + $0xd0] sm:$0xff] }
 0x3fa   : > { %6264 = vst [vmem:[#allocation37_spill] sm:$0xff] %v5513_v21 }
 0x3fc   : > { %v5515_v14 = vpop.f32.mrb[10].mxu1 }
 0x3fd   : > { %6265 = vst [vmem:[#allocation36_spill] sm:$0xff] %v5515_v14  ;;  %v5517_v29 = vpop.f32.mrb[11].mxu1 }
 0x3fe   : > { %6266 = vst [vmem:[#allocation38_spill] sm:$0xff] %v5517_v29  ;;  %v5674_v29 = vld [vmem:[#allocation2 + $0xd8] sm:$0xff] }
 0x403   : > { %v5519_v26 = vpop.f32.mrb[12].mxu1 }
 0x404   : > { %6267 = vst [vmem:[#allocation39_spill] sm:$0xff] %v5519_v26  ;;  %v5521_v32 = vpop.f32.mrb[13].mxu1  ;;  %v5662_v26 = vld [vmem:[#allocation2 + $0xc0] sm:$0xff] }
 0x405   : > { %6268 = vst [vmem:[#allocation40_spill] sm:$0xff] %v5521_v32 }
 0x407   : > { %v5523_v36 = vpop.f32.mrb[14].mxu1 }
 0x408   : > { %6269 = vst [vmem:[#allocation41_spill] sm:$0xff] %v5523_v36  ;;  %v5525_v51 = vpop.f32.mrb[15].mxu1 }
 0x409   : > { %6270 = vst [vmem:[#allocation42_spill] sm:$0xff] %v5525_v51  ;;  %v5658_v51 = vld [vmem:[#allocation2 + $0xc8] sm:$0xff] }
 0x414   : > { %v5527_v37 = vpop.f32.mrb[16].mxu1 }
 0x415   : > { %1898 = vmax.xlane.f32.xlu1 %v5527_v37  ;;  %v5530_v60 = vpop.f32.mrb[17].mxu1 }
 0x416   : > { %1896 = vmax.xlane.f32.xlu0 %v5530_v60 }
 0x418   : > { %v5533_v50 = vpop.f32.mrb[18].mxu1 }
 0x419   : > { %1902 = vmax.xlane.f32.xlu1 %v5533_v50  ;;  %v5536_v58 = vpop.f32.mrb[19].mxu1 }
 0x41a   : > { %1900 = vmax.xlane.f32.xlu0 %v5536_v58 }
 0x41c   : > { %v5539_v40 = vpop.f32.mrb[20].mxu1 }
 0x41d   : > { %1906 = vmax.xlane.f32.xlu1 %v5539_v40  ;;  %v5542_v39 = vpop.f32.mrb[21].mxu1 }
 0x41e   : > { %1904 = vmax.xlane.f32.xlu0 %v5542_v39 }
 0x420   : > { %v5545_v19 = vpop.f32.mrb[22].mxu1 }
 0x421   : > { %6271 = vst [vmem:[#allocation43_spill] sm:$0xff] %v5545_v19  ;;  %1910 = vmax.xlane.f32.xlu1 %v5545_v19  ;;  %v5548_v43 = vpop.f32.mrb[23].mxu1 }
 0x422   : > { %6272 = vst [vmem:[#allocation44_spill] sm:$0xff] %v5548_v43  ;;  %1908 = vmax.xlane.f32.xlu0 %v5548_v43 }
 0x424   : > { %v5551_v44 = vpop.f32.mrb[24].mxu1 }
 0x425   : > { %6273 = vst [vmem:[#allocation45_spill] sm:$0xff] %v5551_v44  ;;  %1914 = vmax.xlane.f32.xlu1 %v5551_v44  ;;  %v5554_v22 = vpop.f32.mrb[25].mxu1 }
 0x426   : > { %6274 = vst [vmem:[#allocation46_spill] sm:$0xff] %v5554_v22  ;;  %1912 = vmax.xlane.f32.xlu0 %v5554_v22 }
 0x428   : > { %v5557_v18 = vpop.f32.mrb[26].mxu1 }
 0x429   : > { %6275 = vst [vmem:[#allocation47_spill] sm:$0xff] %v5557_v18  ;;  %v5559_v45 = vpop.f32.mrb[27].mxu1  ;;  %1918 = vmax.xlane.f32.xlu1 %v5557_v18 }
 0x42a   : > { %6276 = vst [vmem:[#allocation48_spill] sm:$0xff] %v5559_v45  ;;  %1916 = vmax.xlane.f32.xlu0 %v5559_v45  ;;  %v1301_v45 = vld [vmem:[#allocation4] sm:$0xff] }
 0x42c   : > { %v5563_v62 = vpop.f32.mrb[28].mxu1 }
 0x42d   : > { %6277 = vst [vmem:[#allocation49_spill] sm:$0xff] %v5563_v62  ;;  %v5565_v42 = vpop.f32.mrb[29].mxu1  ;;  %1922 = vmax.xlane.f32.xlu1 %v5563_v62  ;;  %v5713_v62 = vld [vmem:[#allocation2 + $0xf0] sm:$0xff] }
 0x42e   : > { %6278 = vst [vmem:[#allocation50_spill] sm:$0xff] %v5565_v42  ;;  %1920 = vmax.xlane.f32.xlu0 %v5565_v42  ;;  %6296 = vst [vmem:[#allocation18_spill] sm:$0xff] %v5713_v62 }
 0x430   : > { %v5569_v23 = vpop.f32.mrb[30].mxu1 }
 0x431   : > { %6279 = vst [vmem:[#allocation51_spill] sm:$0xff] %v5569_v23  ;;  %v5571_v0 = vpop.f32.mrb[31].mxu1  ;;  %1926 = vmax.xlane.f32.xlu1 %v5569_v23 }
 0x432   : > { %6280 = vst [vmem:[#allocation52_spill] sm:$0xff] %v5571_v0  ;;  %1924 = vmax.xlane.f32.xlu0 %v5571_v0  ;;  %v5709_v0 = vld [vmem:[#allocation2 + $0xf8] sm:$0xff] }
 0x433   : > { %6295 = vst [vmem:[#allocation19_spill] sm:$0xff] %v5709_v0 }
 0x442   : > { %4021 = vrot.lane.b32.xlu1 %v6283_v53, %s4383_s12  ;;  %v6291_v53 = vld [vmem:[#allocation30_spill] sm:$0xff] }
 0x446   : > { %4026 = vrot.lane.b32.xlu1 %v4025_v6, %s4383_s12  ;;  %v5602_v6 = vld [vmem:[#allocation2 + $0x80] sm:$0xff] }
 0x448   : > { %1319 = vperm.xlu0 %3978, %v5389_v11   ;;  %v6290_v11 = vld [vmem:[#allocation29_spill] sm:$0xff] }
 0x449   : > { %v4050_v4 = vpack.i.bf16 %v6291_v53, %v6290_v11 }
 0x44a   : > { %4036 = vrot.lane.b32.xlu1 %v6286_v9, %s4383_s12  ;;  %v5615_v9 = vld [vmem:[#allocation2 + $0x90] sm:$0xff] }
 0x44c   : > { %4031 = vrot.lane.b32.xlu0 %v4030_v2, %s4383_s12 }
 0x44e   : > { %4046 = vrot.lane.b32.xlu1 %v6289_v31, %s4383_s12  ;;  %v5630_v31 = vld [vmem:[#allocation2 + $0xa0] sm:$0xff] }
 0x450   : > { %4041 = vrot.lane.b32.xlu0 %v4040_v52, %s4383_s12 }
 0x454   : > { %4051 = vrot.lane.b32.xlu0 %v4050_v4, %s4383_s12 }
 0x4a2   : > { %v1899_v63 = vpop.xlane.xlu1 %1898 }
 0x4a3   : > { %v5605_v7 = vmax.f32 %v5600_v13, %v1899_v63  ;;  %v1897_v2 = vpop.xlane.xlu0 %1896 }
 0x4a4   : > { %v5608_v3 = vmax.f32 %v5602_v6, %v1897_v2  ;;  %v5642_v2 = vld [vmem:[#allocation2 + $0xb8] sm:$0xff] }
 0x4a5   : > { %2572 = vst.msk [vmem:[#allocation2 + $0x88] sm:$0xff] %vm1284_vm4, %v5605_v7  ;;  %1999 = vperm.xlu0 %3978, %v5605_v7  }
 0x4a6   : > { %2571 = vst.msk [vmem:[#allocation2 + $0x80] sm:$0xff] %vm1284_vm4, %v5608_v3  ;;  %v1903_v12 = vpop.xlane.xlu1 %1902  ;;  %1994 = vperm.xlu1 %3979, %v5608_v3  }
 0x4a7   : > { %v5621_v15 = vmax.f32 %v5610_v8, %v1903_v12  ;;  %v1901_v52 = vpop.xlane.xlu0 %1900  ;;  %v5646_v12 = vld [vmem:[#allocation2 + $0xb0] sm:$0xff] }
 0x4a8   : > { %v5624_v56 = vmax.f32 %v5615_v9, %v1901_v52 }
 0x4a9   : > { %2574 = vst.msk [vmem:[#allocation2 + $0x98] sm:$0xff] %vm1284_vm4, %v5621_v15 }
 0x4aa   : > { %2573 = vst.msk [vmem:[#allocation2 + $0x90] sm:$0xff] %vm1284_vm4, %v5624_v56  ;;  %v1907_v11 = vpop.xlane.xlu1 %1906  ;;  %2009 = vperm.xlu1 %3979, %v5621_v15   ;;  %2004 = vperm.xlu0 %3978, %v5624_v56  }
 0x4ab   : > { %v5637_v53 = vmax.f32 %v5626_v59, %v1907_v11  ;;  %v1905_v4 = vpop.xlane.xlu0 %1904 }
 0x4ac   : > { %v5640_v63 = vmax.f32 %v5630_v31, %v1905_v4 }
 0x4ad   : > { %2576 = vst.msk [vmem:[#allocation2 + $0xa8] sm:$0xff] %vm1284_vm4, %v5637_v53 }
 0x4ae   : > { %2575 = vst.msk [vmem:[#allocation2 + $0xa0] sm:$0xff] %vm1284_vm4, %v5640_v63  ;;  %v1911_v52 = vpop.xlane.xlu1 %1910  ;;  %2014 = vperm.xlu1 %3979, %v5640_v63   ;;  %2019 = vperm.xlu0 %3978, %v5637_v53  }
 0x4af   : > { %v5653_v11 = vmax.f32 %v5642_v2, %v1911_v52  ;;  %v1909_v4 = vpop.xlane.xlu0 %1908 }
 0x4b0   : > { %v5656_v36 = vmax.f32 %v5646_v12, %v1909_v4 }
 0x4b1   : > { %2578 = vst.msk [vmem:[#allocation2 + $0xb8] sm:$0xff] %vm1284_vm4, %v5653_v11 }
 0x4b2   : > { %2577 = vst.msk [vmem:[#allocation2 + $0xb0] sm:$0xff] %vm1284_vm4, %v5656_v36  ;;  %v1915_v32 = vpop.xlane.xlu1 %1914  ;;  %2029 = vperm.xlu1 %3979, %v5653_v11   ;;  %2024 = vperm.xlu0 %3978, %v5656_v36  }
 0x4b3   : > { %v5669_v52 = vmax.f32 %v5658_v51, %v1915_v32  ;;  %v1913_v4 = vpop.xlane.xlu0 %1912 }
 0x4b4   : > { %v5672_v14 = vmax.f32 %v5662_v26, %v1913_v4 }
 0x4b5   : > { %2580 = vst.msk [vmem:[#allocation2 + $0xc8] sm:$0xff] %vm1284_vm4, %v5669_v52 }
 0x4b6   : > { %2579 = vst.msk [vmem:[#allocation2 + $0xc0] sm:$0xff] %vm1284_vm4, %v5672_v14  ;;  %2034 = vperm.xlu1 %3979, %v5672_v14   ;;  %2039 = vperm.xlu0 %3978, %v5669_v52   ;;  %v1919_v32 = vpop.xlane.xlu1 %1918 }
 0x4b7   : > { %v1917_v21 = vpop.xlane.xlu0 %1916  ;;  %v5685_v28 = vmax.f32 %v5674_v29, %v1919_v32 }
 0x4b8   : > { %v5688_v4 = vmax.f32 %v5678_v57, %v1917_v21 }
 0x4b9   : > { %2582 = vst.msk [vmem:[#allocation2 + $0xd8] sm:$0xff] %vm1284_vm4, %v5685_v28 }
 0x4ba   : > { %2581 = vst.msk [vmem:[#allocation2 + $0xd0] sm:$0xff] %vm1284_vm4, %v5688_v4  ;;  %4056 = vrot.lane.b32.xlu1 %v6294_v24, %s4383_s12  ;;  %2044 = vperm.xlu0 %3978, %v5688_v4   ;;  %v1923_v32 = vpop.xlane.xlu1 %1922 }
 0x4bb   : > { %v1921_v21 = vpop.xlane.xlu0 %1920  ;;  %v5704_v17 = vmax.f32 %v5690_v38, %v1923_v32 }
 0x4bc   : > { %v5707_v23 = vmax.f32 %v5694_v48, %v1921_v21 }
 0x4bd   : > { %2584 = vst.msk [vmem:[#allocation2 + $0xe8] sm:$0xff] %vm1284_vm4, %v5704_v17 }
 0x4be   : > { %2583 = vst.msk [vmem:[#allocation2 + $0xe0] sm:$0xff] %vm1284_vm4, %v5707_v23  ;;  %2049 = vperm.xlu1 %3979, %v5685_v28   ;;  %2054 = vperm.xlu0 %3978, %v5707_v23   ;;  %v1927_v54 = vpop.xlane.xlu1 %1926 }
 0x4bf   : > { %v1925_v24 = vpop.xlane.xlu0 %1924  ;;  %v5720_v25 = vmax.f32 %v5709_v0, %v1927_v54 }
 0x4c0   : > { %v5723_v32 = vmax.f32 %v5713_v62, %v1925_v24 }
 0x4c1   : > { %6297 = vst [vmem:[#allocation21_spill] sm:$0xff] %v5720_v25  ;;  %2586 = vst.msk [vmem:[#allocation2 + $0xf8] sm:$0xff] %vm1284_vm4, %v5720_v25 }
 0x4c2   : > { %6298 = vst [vmem:[#allocation20_spill] sm:$0xff] %v5723_v32  ;;  %2585 = vst.msk [vmem:[#allocation2 + $0xf0] sm:$0xff] %vm1284_vm4, %v5723_v32  ;;  %2059 = vperm.xlu1 %3979, %v5704_v17   ;;  %2064 = vperm.xlu0 %3978, %v5723_v32   ;;  %v4022_v54 = vpop.permute.xlu1 %4021 }
 0x4c3   : > { %v4024_v18 = vunpack.i.h.bf16 %v4022_v54  ;;  %v4023_v24 = vunpack.i.l.bf16 %v4022_v54 }
 0x4c5   : > { %v3818_v44 = vpack.c.bf16 %v4024_v18, %v4023_v24 }
 0x4c6   : > { %2069 = vperm.xlu1 %3979, %v5720_v25   ;;  %1324 = vperm.xlu0 %3978, %v5392_v47   ;;  %v4027_v21 = vpop.permute.xlu1 %4026 }
 0x4c7   : > { %v1320_v0 = vpop.permute.xlu0 %1319  ;;  %v4029_v22 = vunpack.i.h.bf16 %v4027_v21  ;;  %v4028_v42 = vunpack.i.l.bf16 %v4027_v21  ;;  %3819 = vmatprep.subr.bf16.mxu0 %v3818_v44 }
 0x4c8   : > { %v1397_v62 = vmul.f32 %v1320_v0, %v1301_v45  ;;  %3821 = vmatpush3.bf16.msra.mxu0 %v3818_v44 }
 0x4c9   : > { %v3822_v43 = vpack.c.bf16 %v4029_v22, %v4028_v42 }
 0x4ca   : > { %v1558_v19 = vadd.f32 %v5497_v20, %v1397_v62  ;;  %1329 = vperm.xlu1 %3979, %v5418_v35   ;;  %1334 = vperm.xlu0 %3978, %v5409_v55   ;;  %v4037_v54 = vpop.permute.xlu1 %4036  ;;  %v1945_v62 = vsub.f32 %v5600_v13, %v5605_v7 }
 0x4cb   : > { %v4032_v18 = vpop.permute.xlu0 %4031  ;;  %3823 = vmatprep.subr.bf16.mxu0 %v3822_v43  ;;  %v4039_v24 = vunpack.i.h.bf16 %v4037_v54  ;;  %v4038_v25 = vunpack.i.l.bf16 %v4037_v54 }
 0x4cc   : > { %1574 = vst.msk [vmem:[#allocation4] sm:$0xff] %vm722_vm2, %v1558_v19  ;;  %v4034_v47 = vunpack.i.h.bf16 %v4032_v18  ;;  %v4033_v32 = vunpack.i.l.bf16 %v4032_v18  ;;  %3825 = vmatpush3.bf16.msra.mxu0 %v3822_v43  ;;  %v1944_v19 = vsub.f32 %v5602_v6, %v5608_v3  ;;  %v1962_v0 = vmul.f32 1.442695, %v1945_v62 }
 0x4cd   : > { %v3830_v20 = vpack.c.bf16 %v4039_v24, %v4038_v25  ;;  %v1949_v3 = vsub.f32 %v5626_v59, %v5637_v53  ;;  %v1953_v59 = vsub.f32 %v5658_v51, %v5669_v52 }
 0x4ce   : > { %1339 = vperm.xlu1 %3979, %v5438_v46   ;;  %1344 = vperm.xlu0 %3978, %v5428_v34   ;;  %v3826_v44 = vpack.c.bf16 %v4034_v47, %v4033_v32  ;;  %v4047_v45 = vpop.permute.xlu1 %4046  ;;  %v1960_v25 = vmul.f32 1.442695, %v1944_v19  ;;  %v1947_v32 = vsub.f32 %v5610_v8, %v5621_v15  ;;  %4124 = vpow2.f32 %v1962_v0 }
 0x4cf   : > { %v4042_v22 = vpop.permute.xlu0 %4041  ;;  %v4049_v34 = vunpack.i.h.bf16 %v4047_v45  ;;  %v4048_v43 = vunpack.i.l.bf16 %v4047_v45  ;;  %v1951_v15 = vsub.f32 %v5642_v2, %v5653_v11  ;;  %v1957_v2 = vsub.f32 %v5690_v38, %v5704_v17 }
 0x4d0   : > { %3827 = vmatprep.subr.bf16.mxu0 %v3826_v44  ;;  %v4044_v35 = vunpack.i.h.bf16 %v4042_v22  ;;  %v4043_v55 = vunpack.i.l.bf16 %v4042_v22  ;;  %v1966_v7 = vmul.f32 1.442695, %v1947_v32  ;;  %4126 = vpow2.f32 %v1960_v25 }
 0x4d1   : > { %3829 = vmatpush3.bf16.msra.mxu0 %v3826_v44  ;;  %v3838_v13 = vpack.c.bf16 %v4049_v34, %v4048_v43  ;;  %v1986_v11 = vmul.f32 1.442695, %v1957_v2 }
 0x4d2   : > { %1349 = vperm.xlu1 %3979, %v5443_v16   ;;  %1354 = vperm.xlu0 %3978, %v5447_v10   ;;  %v3834_v46 = vpack.c.bf16 %v4044_v35, %v4043_v55  ;;  %v1946_v16 = vsub.f32 %v5615_v9, %v5624_v56  ;;  %4128 = vpow2.f32 %v1966_v7  ;;  %v1970_v9 = vmul.f32 1.442695, %v1949_v3 }
 0x4d3   : > { %3831 = vmatprep.subr.bf16.mxu0 %v3830_v20  ;;  %v4052_v42 = vpop.permute.xlu0 %4051  ;;  %v1974_v56 = vmul.f32 1.442695, %v1951_v15 }
 0x4d4   : > { %v4054_v10 = vunpack.i.h.bf16 %v4052_v42  ;;  %v4053_v6 = vunpack.i.l.bf16 %v4052_v42 }
 0x4d5   : > { %3833 = vmatpush3.bf16.msra.mxu0 %v3830_v20 }
 0x4d6   : > { %1359 = vperm.xlu1 %3979, %v5458_v49   ;;  %1364 = vperm.xlu0 %3978, %v5460_v33   ;;  %v1964_v49 = vmul.f32 1.442695, %v1946_v16  ;;  %v1948_v33 = vsub.f32 %v5630_v31, %v5640_v63  ;;  %v3842_v8 = vpack.c.bf16 %v4054_v10, %v4053_v6  ;;  %v1955_v63 = vsub.f32 %v5674_v29, %v5685_v28 }
 0x4d7   : > { %3835 = vmatprep.subr.bf16.mxu0 %v3834_v46  ;;  %v1956_v29 = vsub.f32 %v5694_v48, %v5707_v23 }
 0x4d8   : > { %4130 = vpow2.f32 %v1964_v49  ;;  %v5773_v31 = vpop.eup %4124 }
 0x4d9   : > { %3837 = vmatpush3.bf16.msra.mxu0 %v3834_v46  ;;  %4132 = vpow2.f32 %v1970_v9  ;;  %v1984_v17 = vmul.f32 1.442695, %v1956_v29  ;;  %v6302_v9 = vld [vmem:[#allocation45_spill] sm:$0xff] }
 0x4da   : > { %1369 = vperm.xlu1 %3979, %v5468_v30   ;;  %1374 = vperm.xlu0 %3978, %v5471_v41   ;;  %v1968_v30 = vmul.f32 1.442695, %v1948_v33  ;;  %v1950_v41 = vsub.f32 %v5646_v12, %v5656_v36  ;;  %v5775_v53 = vpop.eup %4126  ;;  %v1978_v36 = vmul.f32 1.442695, %v1953_v59  ;;  %v6301_v33 = vld [vmem:[#allocation46_spill] sm:$0xff] }
 0x4db   : > { %3839 = vmatprep.subr.bf16.mxu0 %v3838_v13 }
 0x4dc   : > { %4134 = vpow2.f32 %v1968_v30  ;;  %v5783_v51 = vpop.eup %4128 }
 0x4dd   : > { %3841 = vmatpush3.bf16.msra.mxu0 %v3838_v13  ;;  %4136 = vpow2.f32 %v1974_v56  ;;  %v6299_v13 = vld [vmem:[#allocation43_spill] sm:$0xff] }
 0x4de   : > { %1379 = vperm.xlu1 %3979, %v5475_v1   ;;  %1384 = vperm.xlu0 %3978, %v5481_v27   ;;  %v1972_v1 = vmul.f32 1.442695, %v1950_v41  ;;  %v1952_v27 = vsub.f32 %v5662_v26, %v5672_v14  ;;  %v1982_v26 = vmul.f32 1.442695, %v1955_v63 }
 0x4df   : > { %3843 = vmatprep.subr.bf16.mxu0 %v3842_v8 }
 0x4e0   : > { %4138 = vpow2.f32 %v1972_v1 }
 0x4e1   : > { %3845 = vmatpush3.bf16.msra.mxu0 %v3842_v8  ;;  %4140 = vpow2.f32 %v1978_v36 }
 0x4e2   : > { %1389 = vperm.xlu1 %3979, %v5484_v5   ;;  %1394 = vperm.xlu0 %3978, %v5488_v61   ;;  %v1976_v5 = vmul.f32 1.442695, %v1952_v27  ;;  %v1954_v61 = vsub.f32 %v5678_v57, %v5688_v4  ;;  %v5785_v14 = vpop.eup %4130 }
 0x4e3   : > { %v5793_v12 = vpop.eup %4132 }
 0x4e4   : > { %4142 = vpow2.f32 %v1976_v5  ;;  %v1980_v28 = vmul.f32 1.442695, %v1954_v61  ;;  %v6303_v5 = vld [vmem:[#allocation48_spill] sm:$0xff] }
 0x4e5   : > { %4144 = vpow2.f32 %v1982_v26 }
 0x4e6   : > { %2241 = vperm.xlu1 %3979, %v5773_v31   ;;  %2236 = vperm.xlu0 %3978, %v5775_v53   ;;  %v5795_v57 = vpop.eup %4134  ;;  %4146 = vpow2.f32 %v1980_v28 }
 0x4e7   : > { %v5799_v38 = vpop.eup %4136  ;;  %4148 = vpow2.f32 %v1986_v11 }
 0x4e8   : > { %4150 = vpow2.f32 %v1984_v17 }
 0x4ea   : > { %2246 = vperm.xlu1 %3979, %v5785_v14   ;;  %2251 = vperm.xlu0 %3978, %v5783_v51   ;;  %v5801_v52 = vpop.eup %4138 }
 0x4eb   : > { %v5805_v48 = vpop.eup %4140 }
 0x4ee   : > { %2256 = vperm.xlu1 %3979, %v5795_v57   ;;  %2261 = vperm.xlu0 %3978, %v5793_v12   ;;  %v5807_v23 = vpop.eup %4142 }
 0x4ef   : > { %v5811_v4 = vpop.eup %4144 }
 0x4f0   : > { %v5813_v21 = vpop.eup %4146 }
 0x4f1   : > { %v5817_v54 = vpop.eup %4148 }
 0x4f2   : > { %2266 = vperm.xlu1 %3979, %v5801_v52   ;;  %2271 = vperm.xlu0 %3978, %v5799_v38   ;;  %v5819_v18 = vpop.eup %4150 }
 0x4f6   : > { %2276 = vperm.xlu1 %3979, %v5807_v23   ;;  %2281 = vperm.xlu0 %3978, %v5805_v48  }
 0x4fa   : > { %2286 = vperm.xlu1 %3979, %v5813_v21   ;;  %2291 = vperm.xlu0 %3978, %v5811_v4  }
 0x4fe   : > { %2296 = vperm.xlu1 %3979, %v5819_v18   ;;  %2301 = vperm.xlu0 %3978, %v5817_v54  }
 0x524   : > { %v2000_v24 = vpop.permute.xlu0 %1999 }
 0x525   : > { %v2073_v47 = vsub.f32 %v5527_v37, %v2000_v24  ;;  %v1995_v44 = vpop.permute.xlu1 %1994  ;;  %v6304_v24 = vld [vmem:[#allocation47_spill] sm:$0xff] }
 0x526   : > { %v2072_v20 = vsub.f32 %v5530_v60, %v1995_v44  ;;  %v6305_v44 = vld [vmem:[#allocation50_spill] sm:$0xff] }
 0x527   : > { %v2090_v22 = vmul.f32 1.442695, %v2073_v47 }
 0x528   : > { %v2088_v35 = vmul.f32 1.442695, %v2072_v20 }
 0x529   : > { %4152 = vpow2.f32 %v2090_v22  ;;  %v2010_v55 = vpop.permute.xlu1 %2009  ;;  %v2005_v45 = vpop.permute.xlu0 %2004 }
 0x52a   : > { %4154 = vpow2.f32 %v2088_v35  ;;  %v2075_v62 = vsub.f32 %v5533_v50, %v2010_v55  ;;  %v2074_v19 = vsub.f32 %v5536_v58, %v2005_v45  ;;  %v6300_v50 = vld [vmem:[#allocation44_spill] sm:$0xff] }
 0x52c   : > { %v2094_v46 = vmul.f32 1.442695, %v2075_v62  ;;  %v2092_v34 = vmul.f32 1.442695, %v2074_v19 }
 0x52d   : > { %v2015_v43 = vpop.permute.xlu1 %2014  ;;  %v2020_v42 = vpop.permute.xlu0 %2019 }
 0x52e   : > { %4156 = vpow2.f32 %v2094_v46  ;;  %v2076_v37 = vsub.f32 %v5542_v39, %v2015_v43  ;;  %v2077_v0 = vsub.f32 %v5539_v40, %v2020_v42  ;;  %v6306_v46 = vld [vmem:[#allocation49_spill] sm:$0xff]  ;;  %v6307_v43 = vld [vmem:[#allocation52_spill] sm:$0xff] }
 0x52f   : > { %4158 = vpow2.f32 %v2092_v34 }
 0x530   : > { %v2096_v60 = vmul.f32 1.442695, %v2076_v37  ;;  %v2098_v25 = vmul.f32 1.442695, %v2077_v0  ;;  %v1302_v37 = vld [vmem:[#allocation4 + $0x8] sm:$0xff] }
 0x531   : > { %v2030_v32 = vpop.permute.xlu1 %2029  ;;  %v2025_v16 = vpop.permute.xlu0 %2024 }
 0x532   : > { %4160 = vpow2.f32 %v2096_v60  ;;  %v2079_v10 = vsub.f32 %v6299_v13, %v2030_v32  ;;  %v2078_v6 = vsub.f32 %v6300_v50, %v2025_v16 }
 0x533   : > { %v4153_v58 = vpop.eup %4152  ;;  %4162 = vpow2.f32 %v2098_v25 }
 0x534   : > { %v4155_v7 = vpop.eup %4154  ;;  %v2102_v3 = vmul.f32 1.442695, %v2079_v10  ;;  %v2100_v49 = vmul.f32 1.442695, %v2078_v6  ;;  %2155 = vadd.xlane.f32.xlu0 %v4153_v58  ;;  %v6308_v10 = vld [vmem:[#allocation51_spill] sm:$0xff] }
 0x535   : > { %2153 = vadd.xlane.f32.xlu1 %v4155_v7  ;;  %3666 = vmatprep.mubr.f32.mxu0 %v4155_v7  ;;  %v2035_v39 = vpop.permute.xlu1 %2034  ;;  %v2040_v40 = vpop.permute.xlu0 %2039  ;;  %v1303_v7 = vld [vmem:[#allocation4 + $0x10] sm:$0xff] }
 0x536   : > { %4164 = vpow2.f32 %v2102_v3  ;;  %v2080_v8 = vsub.f32 %v6301_v33, %v2035_v39  ;;  %v2081_v15 = vsub.f32 %v6302_v9, %v2040_v40  ;;  %v1304_v3 = vld [vmem:[#allocation4 + $0x18] sm:$0xff]  ;;  %v6309_v39 = vld [vmem:[#allocation22_spill] sm:$0xff] }
 0x537   : > { %4166 = vpow2.f32 %v2100_v49 }
 0x538   : > { %v4157_v30 = vpop.eup %4156  ;;  %v2104_v41 = vmul.f32 1.442695, %v2080_v8  ;;  %v2106_v56 = vmul.f32 1.442695, %v2081_v15 }
 0x539   : > { %v4159_v59 = vpop.eup %4158  ;;  %2159 = vadd.xlane.f32.xlu1 %v4157_v30  ;;  %v4057_v1 = vpop.permute.xlu1 %4056 }
 0x53a   : > { %v2045_v27 = vpop.permute.xlu0 %2044  ;;  %4168 = vpow2.f32 %v2104_v41  ;;  %v4059_v36 = vunpack.i.h.bf16 %v4057_v1  ;;  %v4058_v63 = vunpack.i.l.bf16 %v4057_v1  ;;  %2157 = vadd.xlane.f32.xlu0 %v4159_v59  ;;  %v1305_v41 = vld [vmem:[#allocation4 + $0x20] sm:$0xff] }
 0x53b   : > { %v2082_v61 = vsub.f32 %v6303_v5, %v2045_v27  ;;  %4170 = vpow2.f32 %v2106_v56  ;;  %v1306_v56 = vld [vmem:[#allocation4 + $0x28] sm:$0xff]  ;;  %v6311_v27 = vld [vmem:[#allocation26_spill] sm:$0xff] }
 0x53c   : > { %v4161_v26 = vpop.eup %4160  ;;  %v3846_v2 = vpack.c.bf16 %v4059_v36, %v4058_v63 }
 0x53d   : > { %v2108_v28 = vmul.f32 1.442695, %v2082_v61  ;;  %v4163_v29 = vpop.eup %4162  ;;  %v2050_v11 = vpop.permute.xlu1 %2049 }
 0x53e   : > { %v2055_v17 = vpop.permute.xlu0 %2054  ;;  %v2083_v47 = vsub.f32 %v6304_v24, %v2050_v11  ;;  %2161 = vadd.xlane.f32.xlu0 %v4161_v26  ;;  %2163 = vadd.xlane.f32.xlu1 %v4163_v29 }
 0x53f   : > { %4172 = vpow2.f32 %v2108_v28  ;;  %v2084_v20 = vsub.f32 %v6305_v44, %v2055_v17  ;;  %3847 = vmatprep.subr.bf16.mxu0 %v3846_v2  ;;  %v1307_v28 = vld [vmem:[#allocation4 + $0x30] sm:$0xff] }
 0x540   : > { %v4165_v22 = vpop.eup %4164  ;;  %v2110_v35 = vmul.f32 1.442695, %v2083_v47  ;;  %3849 = vmatpush3.bf16.msra.mxu0 %v3846_v2  ;;  %v6312_v17 = vld [vmem:[#allocation28_spill] sm:$0xff]  ;;  %v6313_v47 = vld [vmem:[#allocation23_spill] sm:$0xff] }
 0x541   : > { %v2112_v55 = vmul.f32 1.442695, %v2084_v20  ;;  %v4167_v45 = vpop.eup %4166  ;;  %v2060_v62 = vpop.permute.xlu1 %2059 }
 0x542   : > { %v2065_v19 = vpop.permute.xlu0 %2064  ;;  %4174 = vpow2.f32 %v2110_v35  ;;  %v2085_v34 = vsub.f32 %v6306_v46, %v2060_v62  ;;  %2167 = vadd.xlane.f32.xlu1 %v4165_v22  ;;  %2165 = vadd.xlane.f32.xlu0 %v4167_v45 }
 0x543   : > { %v2086_v42 = vsub.f32 %v6307_v43, %v2065_v19  ;;  %4176 = vpow2.f32 %v2112_v55  ;;  %3667 = vmatmul.mubr.f32.vlgmr.msra.gmra.mrb[16].mxu0 %v4153_v58  ;;  %v1310_v19 = vld [vmem:[#allocation4 + $0x48] sm:$0xff] }
 0x544   : > { %v4169_v0 = vpop.eup %4168  ;;  %v2114_v60 = vmul.f32 1.442695, %v2085_v34  ;;  %3669 = vmatprep.mubr.f32.mxu0 %v4159_v59  ;;  %v6314_v34 = vld [vmem:[#allocation34_spill] sm:$0xff] }
 0x545   : > { %v2116_v25 = vmul.f32 1.442695, %v2086_v42  ;;  %v4171_v32 = vpop.eup %4170  ;;  %v2070_v16 = vpop.permute.xlu1 %2069  ;;  %v6315_v42 = vld [vmem:[#allocation31_spill] sm:$0xff] }
 0x546   : > { %v1325_v13 = vpop.permute.xlu0 %1324  ;;  %4178 = vpow2.f32 %v2114_v60  ;;  %v2087_v50 = vsub.f32 %v6308_v10, %v2070_v16  ;;  %2169 = vadd.xlane.f32.xlu0 %v4169_v0  ;;  %2171 = vadd.xlane.f32.xlu1 %v4171_v32  ;;  %v6317_v10 = vld [vmem:[#allocation20_spill] sm:$0xff] }
 0x547   : > { %v1398_v6 = vmul.f32 %v1325_v13, %v1302_v37  ;;  %4180 = vpow2.f32 %v2116_v25  ;;  %3670 = vmatmul.mubr.f32.gmra.mrb[18].mxu0 %v4157_v30  ;;  %v6310_v30 = vld [vmem:[#allocation27_spill] sm:$0xff]  ;;  %v6316_v13 = vld [vmem:[#allocation18_spill] sm:$0xff] }
 0x548   : > { %v2118_v58 = vmul.f32 1.442695, %v2087_v50  ;;  %3672 = vmatprep.mubr.f32.mxu0 %v4161_v26 }
 0x549   : > { %v4173_v49 = vpop.eup %4172  ;;  %v1559_v40 = vadd.f32 %v6309_v39, %v1398_v6  ;;  %v1330_v33 = vpop.permute.xlu1 %1329  ;;  %v1311_v6 = vld [vmem:[#allocation4 + $0x50] sm:$0xff]  ;;  %v6320_v39 = vld [vmem:[#allocation35_spill] sm:$0xff] }
 0x54a   : > { %v1335_v8 = vpop.permute.xlu0 %1334  ;;  %4182 = vpow2.f32 %v2118_v58  ;;  %v1399_v9 = vmul.f32 %v1330_v33, %v1303_v7  ;;  %2173 = vadd.xlane.f32.xlu0 %v4173_v49  ;;  %v1312_v7 = vld [vmem:[#allocation4 + $0x58] sm:$0xff] }
 0x54b   : > { %1575 = vst.msk [vmem:[#allocation4 + $0x8] sm:$0xff] %vm722_vm2, %v1559_v40  ;;  %v1400_v15 = vmul.f32 %v1335_v8, %v1304_v3  ;;  %3673 = vmatmul.mubr.f32.gmra.mrb[20].mxu0 %v4163_v29  ;;  %v1308_v29 = vld [vmem:[#allocation4 + $0x38] sm:$0xff]  ;;  %v6321_v40 = vld [vmem:[#allocation19_spill] sm:$0xff] }
 0x54c   : > { %v4175_v59 = vpop.eup %4174  ;;  %v1560_v1 = vadd.f32 %v6310_v30, %v1399_v9  ;;  %3675 = vmatprep.mubr.f32.mxu0 %v4167_v45  ;;  %v6319_v3 = vld [vmem:[#allocation37_spill] sm:$0xff] }
 0x54d   : > { %v1561_v36 = vadd.f32 %v6311_v27, %v1400_v15  ;;  %v4177_v63 = vpop.eup %4176  ;;  %v1340_v5 = vpop.permute.xlu1 %1339  ;;  %2175 = vadd.xlane.f32.xlu1 %v4175_v59  ;;  %v6322_v33 = vld [vmem:[#allocation21_spill] sm:$0xff]  ;;  %v6324_v27 = vld [vmem:[#allocation38_spill] sm:$0xff] }
 0x54e   : > { %v1345_v61 = vpop.permute.xlu0 %1344  ;;  %1576 = vst.msk [vmem:[#allocation4 + $0x10] sm:$0xff] %vm722_vm2, %v1560_v1  ;;  %v1401_v26 = vmul.f32 %v1340_v5, %v1305_v41  ;;  %2177 = vadd.xlane.f32.xlu0 %v4177_v63  ;;  %v6323_v8 = vsub.f32 %v6321_v40, %v6322_v33  ;;  %v1314_v1 = vld [vmem:[#allocation4 + $0x68] sm:$0xff]  ;;  %v6325_v5 = vld [vmem:[#allocation36_spill] sm:$0xff] }
 0x54f   : > { %1577 = vst.msk [vmem:[#allocation4 + $0x18] sm:$0xff] %vm722_vm2, %v1561_v36  ;;  %v1402_v2 = vmul.f32 %v1345_v61, %v1306_v56  ;;  %3676 = vmatmul.mubr.f32.gmra.mrb[22].mxu0 %v4165_v22  ;;  %v1309_v22 = vld [vmem:[#allocation4 + $0x40] sm:$0xff] }
 0x550   : > { %v4179_v11 = vpop.eup %4178  ;;  %v1562_v24 = vadd.f32 %v6312_v17, %v1401_v26  ;;  %3678 = vmatprep.mubr.f32.mxu0 %v4169_v0  ;;  %v1990_v9 = vmul.f32 1.442695, %v6323_v8  ;;  %v1316_v17 = vld [vmem:[#allocation4 + $0x78] sm:$0xff] }
 0x551   : > { %v1563_v44 = vadd.f32 %v6313_v47, %v1402_v2  ;;  %v4181_v20 = vpop.eup %4180  ;;  %v1350_v35 = vpop.permute.xlu1 %1349  ;;  %2179 = vadd.xlane.f32.xlu1 %v4179_v11  ;;  %v6327_v47 = vld [vmem:[#allocation39_spill] sm:$0xff] }
 0x552   : > { %v1355_v55 = vpop.permute.xlu0 %1354  ;;  %1578 = vst.msk [vmem:[#allocation4 + $0x20] sm:$0xff] %vm722_vm2, %v1562_v24  ;;  %v1403_v45 = vmul.f32 %v1350_v35, %v1307_v28  ;;  %2181 = vadd.xlane.f32.xlu0 %v4181_v20 }
 0x553   : > { %1579 = vst.msk [vmem:[#allocation4 + $0x28] sm:$0xff] %vm722_vm2, %v1563_v44  ;;  %v1404_v62 = vmul.f32 %v1355_v55, %v1308_v29  ;;  %3679 = vmatmul.mubr.f32.gmra.mrb[24].mxu0 %v4171_v32  ;;  %v6318_v32 = vsub.f32 %v6316_v13, %v6317_v10  ;;  %v1315_v29 = vld [vmem:[#allocation4 + $0x70] sm:$0xff] }
 0x554   : > { %v4183_v46 = vpop.eup %4182  ;;  %v1564_v43 = vadd.f32 %v6314_v34, %v1403_v45  ;;  %3681 = vmatprep.mubr.f32.mxu0 %v4173_v49 }
 0x555   : > { %v1565_v37 = vadd.f32 %v6315_v42, %v1404_v62  ;;  %v1360_v0 = vpop.permute.xlu1 %1359  ;;  %2183 = vadd.xlane.f32.xlu1 %v4183_v46  ;;  %v1988_v50 = vmul.f32 1.442695, %v6318_v32  ;;  %v6328_v62 = vld [vmem:[#allocation42_spill] sm:$0xff] }
 0x556   : > { %v1365_v60 = vpop.permute.xlu0 %1364  ;;  %1580 = vst.msk [vmem:[#allocation4 + $0x30] sm:$0xff] %vm722_vm2, %v1564_v43  ;;  %v1405_v25 = vmul.f32 %v1360_v0, %v1309_v22 }
 0x557   : > { %1581 = vst.msk [vmem:[#allocation4 + $0x38] sm:$0xff] %vm722_vm2, %v1565_v37  ;;  %v1406_v16 = vmul.f32 %v1365_v60, %v1310_v19  ;;  %3682 = vmatmul.mubr.f32.gmra.mrb[26].mxu0 %v4175_v59  ;;  %4184 = vpow2.f32 %v1988_v50  ;;  %v1313_v59 = vld [vmem:[#allocation4 + $0x60] sm:$0xff]  ;;  %v6329_v19 = vld [vmem:[#allocation41_spill] sm:$0xff] }
 0x558   : > { %v1566_v58 = vadd.f32 %v6319_v3, %v1405_v25  ;;  %3684 = vmatprep.mubr.f32.mxu0 %v4177_v63  ;;  %4186 = vpow2.f32 %v1990_v9 }
 0x559   : > { %v1567_v49 = vadd.f32 %v6320_v39, %v1406_v16  ;;  %v1370_v15 = vpop.permute.xlu1 %1369 }
 0x55a   : > { %v1375_v41 = vpop.permute.xlu0 %1374  ;;  %1582 = vst.msk [vmem:[#allocation4 + $0x40] sm:$0xff] %vm722_vm2, %v1566_v58  ;;  %v1407_v56 = vmul.f32 %v1370_v15, %v1311_v6  ;;  %v2122_v58 = vld [vmem:[#allocation3 + $0x88] sm:$0xff] }
 0x55b   : > { %1583 = vst.msk [vmem:[#allocation4 + $0x48] sm:$0xff] %vm722_vm2, %v1567_v49  ;;  %v1408_v30 = vmul.f32 %v1375_v41, %v1312_v7  ;;  %3685 = vmatmul.mubr.f32.gmra.mrb[28].mxu0 %v4179_v11  ;;  %v6326_v11 = vld [vmem:[#allocation40_spill] sm:$0xff]  ;;  %v2121_v49 = vld [vmem:[#allocation3 + $0x80] sm:$0xff]  ;;  %v2138_v40 = vmul.f32 %v5773_v31, %v2122_v58  ;;  %v2124_v41 = vld [vmem:[#allocation3 + $0x98] sm:$0xff] }
 0x55c   : > { %v1568_v36 = vadd.f32 %v6324_v27, %v1407_v56  ;;  %3687 = vmatprep.mubr.f32.mxu0 %v4181_v20  ;;  %v2137_v8 = vmul.f32 %v5775_v53, %v2121_v49  ;;  %v2126_v31 = vld [vmem:[#allocation3 + $0xa8] sm:$0xff]  ;;  %v2132_v58 = vld [vmem:[#allocation3 + $0xd8] sm:$0xff] }
 0x55d   : > { %v1569_v63 = vadd.f32 %v6325_v5, %v1408_v30  ;;  %v1380_v61 = vpop.permute.xlu1 %1379  ;;  %v2123_v30 = vld [vmem:[#allocation3 + $0x90] sm:$0xff]  ;;  %v2142_v53 = vmul.f32 %v5793_v12, %v2126_v31  ;;  %v2129_v12 = vld [vmem:[#allocation3 + $0xc0] sm:$0xff] }
 0x55e   : > { %v1385_v26 = vpop.permute.xlu0 %1384  ;;  %1584 = vst.msk [vmem:[#allocation4 + $0x50] sm:$0xff] %vm722_vm2, %v1568_v36  ;;  %v1409_v2 = vmul.f32 %v1380_v61, %v1313_v59  ;;  %v2140_v59 = vmul.f32 %v5783_v51, %v2124_v41  ;;  %v2139_v27 = vmul.f32 %v5785_v14, %v2123_v30  ;;  %v2127_v51 = vld [vmem:[#allocation3 + $0xb0] sm:$0xff] }
 0x55f   : > { %1585 = vst.msk [vmem:[#allocation4 + $0x58] sm:$0xff] %vm722_vm2, %v1569_v63  ;;  %v1410_v28 = vmul.f32 %v1385_v26, %v1314_v1  ;;  %3688 = vmatmul.mubr.f32.gmra.mrb[30].mxu0 %v4183_v46  ;;  %v2125_v63 = vld [vmem:[#allocation3 + $0xa0] sm:$0xff] }
 0x560   : > { %v1570_v24 = vadd.f32 %v6326_v11, %v1409_v2  ;;  %v2141_v26 = vmul.f32 %v5795_v57, %v2125_v63 }
 0x561   : > { %v1571_v44 = vadd.f32 %v6327_v47, %v1410_v28  ;;  %v1390_v35 = vpop.permute.xlu1 %1389  ;;  %v5873_v43 = vpop.eup %4184 }
 0x562   : > { %v1395_v55 = vpop.permute.xlu0 %1394  ;;  %1586 = vst.msk [vmem:[#allocation4 + $0x60] sm:$0xff] %vm722_vm2, %v1570_v24  ;;  %v1411_v20 = vmul.f32 %v1390_v35, %v1315_v29  ;;  %v5878_v46 = vpop.eup %4186  ;;  %v2128_v29 = vld [vmem:[#allocation3 + $0xb8] sm:$0xff]  ;;  %v2143_v24 = vmul.f32 %v5801_v52, %v2127_v51  ;;  %v2130_v35 = vld [vmem:[#allocation3 + $0xc8] sm:$0xff] }
 0x563   : > { %1587 = vst.msk [vmem:[#allocation4 + $0x68] sm:$0xff] %vm722_vm2, %v1571_v44  ;;  %v1412_v45 = vmul.f32 %v1395_v55, %v1316_v17  ;;  %v2144_v14 = vmul.f32 %v5799_v38, %v2128_v29 }
 0x564   : > { %v1572_v22 = vadd.f32 %v6328_v62, %v1411_v20  ;;  %v2146_v20 = vmul.f32 %v5805_v48, %v2130_v35 }
 0x565   : > { %v1573_v34 = vadd.f32 %v6329_v19, %v1412_v45  ;;  %v5883_v37 = vpop.permute.xlu1 %2241  ;;  %v2145_v45 = vmul.f32 %v5807_v23, %v2129_v12  ;;  %v2131_v19 = vld [vmem:[#allocation3 + $0xd0] sm:$0xff] }
 0x566   : > { %1588 = vst.msk [vmem:[#allocation4 + $0x70] sm:$0xff] %vm722_vm2, %v1572_v22  ;;  %2306 = vperm.xlu1 %3979, %v5873_v43   ;;  %v5881_v42 = vpop.permute.xlu0 %2236  ;;  %v2147_v52 = vmul.f32 %v5813_v21, %v2131_v19  ;;  %v2227_v19 = vld [vmem:[#allocation4 + $0xc8] sm:$0xff] }
 0x567   : > { %1589 = vst.msk [vmem:[#allocation4 + $0x78] sm:$0xff] %vm722_vm2, %v1573_v34 }
 0x568   : > { %2311 = vperm.xlu0 %3978, %v5878_v46  }
 0x569   : > { %v5887_v60 = vpop.permute.xlu1 %2246 }
 0x56a   : > { %v5885_v0 = vpop.permute.xlu0 %2251 }
 0x56d   : > { %v5891_v16 = vpop.permute.xlu1 %2256 }
 0x56e   : > { %v5889_v25 = vpop.permute.xlu0 %2261 }
 0x571   : > { %v5895_v10 = vpop.permute.xlu1 %2266 }
 0x572   : > { %v5893_v13 = vpop.permute.xlu0 %2271 }
 0x575   : > { %v5899_v50 = vpop.permute.xlu1 %2276 }
 0x576   : > { %v5897_v32 = vpop.permute.xlu0 %2281 }
 0x579   : > { %v5903_v7 = vpop.permute.xlu1 %2286 }
 0x57a   : > { %v5901_v6 = vpop.permute.xlu0 %2291 }
 0x57d   : > { %v5907_v39 = vpop.permute.xlu1 %2296 }
 0x57e   : > { %v5905_v3 = vpop.permute.xlu0 %2301 }
 0x5c1   : > { %v2156_v33 = vpop.xlane.xlu0 %2155 }
 0x5c2   : > { %v2186_v9 = vadd.f32 %v2156_v33, %v2138_v40  ;;  %v2154_v15 = vpop.xlane.xlu1 %2153  ;;  %v2133_v40 = vld [vmem:[#allocation3 + $0xe0] sm:$0xff] }
 0x5c3   : > { %v2185_v56 = vadd.f32 %v2154_v15, %v2137_v8  ;;  %v2148_v8 = vmul.f32 %v5811_v4, %v2132_v58  ;;  %v2149_v23 = vmul.f32 %v5819_v18, %v2133_v40  ;;  %v2136_v4 = vld [vmem:[#allocation3 + $0xf8] sm:$0xff]  ;;  %v2323_v58 = vmul.f32 %v5897_v32, %v2227_v19 }
 0x5c4   : > { %2202 = vst.msk [vmem:[#allocation3 + $0x88] sm:$0xff] %vm1284_vm4, %v2186_v9  ;;  %v2134_v9 = vld [vmem:[#allocation3 + $0xe8] sm:$0xff]  ;;  %v2152_v18 = vmul.f32 %v5878_v46, %v2136_v4  ;;  %v2229_v40 = vld [vmem:[#allocation4 + $0xd8] sm:$0xff] }
 0x5c5   : > { %2201 = vst.msk [vmem:[#allocation3 + $0x80] sm:$0xff] %vm1284_vm4, %v2185_v56  ;;  %v2135_v56 = vld [vmem:[#allocation3 + $0xf0] sm:$0xff]  ;;  %v2150_v21 = vmul.f32 %v5817_v54, %v2134_v9  ;;  %v2219_v54 = vld [vmem:[#allocation4 + $0x88] sm:$0xff] }
 0x5c6   : > { %v2160_v1 = vpop.xlane.xlu1 %2159 }
 0x5c7   : > { %v2188_v36 = vadd.f32 %v2160_v1, %v2140_v59  ;;  %v2158_v5 = vpop.xlane.xlu0 %2157  ;;  %v2151_v1 = vmul.f32 %v5873_v43, %v2135_v56 }
 0x5c8   : > { %v2187_v61 = vadd.f32 %v2158_v5, %v2139_v27 }
 0x5c9   : > { %2204 = vst.msk [vmem:[#allocation3 + $0x98] sm:$0xff] %vm1284_vm4, %v2188_v36 }
 0x5ca   : > { %2203 = vst.msk [vmem:[#allocation3 + $0x90] sm:$0xff] %vm1284_vm4, %v2187_v61  ;;  %v2218_v61 = vld [vmem:[#allocation4 + $0x80] sm:$0xff] }
 0x5cb   : > { %v2164_v2 = vpop.xlane.xlu1 %2163  ;;  %v2162_v28 = vpop.xlane.xlu0 %2161  ;;  %v2314_v43 = vmul.f32 %v5881_v42, %v2218_v61 }
 0x5cc   : > { %v2190_v17 = vadd.f32 %v2164_v2, %v2142_v53  ;;  %v2189_v11 = vadd.f32 %v2162_v28, %v2141_v26  ;;  %v2315_v53 = vmul.f32 %v5883_v37, %v2219_v54  ;;  %v2221_v26 = vld [vmem:[#allocation4 + $0x98] sm:$0xff]  ;;  %v2220_v28 = vld [vmem:[#allocation4 + $0x90] sm:$0xff] }
 0x5cd   : > { %v2317_v46 = vmul.f32 %v5885_v0, %v2221_v26  ;;  %v2610_v26 = vld [vmem:[#allocation3 + $0x18] sm:$0xff] (!%p3329_p7) }
 0x5ce   : > { %2206 = vst.msk [vmem:[#allocation3 + $0xa8] sm:$0xff] %vm1284_vm4, %v2190_v17  ;;  %2205 = vst.msk [vmem:[#allocation3 + $0xa0] sm:$0xff] %vm1284_vm4, %v2189_v11  ;;  %v2316_v11 = vmul.f32 %v5887_v60, %v2220_v28  ;;  %v2608_v28 = vld [vmem:[#allocation3 + $0x8] sm:$0xff] (!%p3329_p7) }
 0x5cf   : > { %v2168_v47 = vpop.xlane.xlu1 %2167  ;;  %v2166_v44 = vpop.xlane.xlu0 %2165 }
 0x5d0   : > { %v2192_v55 = vadd.f32 %v2168_v47, %v2144_v14  ;;  %v2191_v57 = vadd.f32 %v2166_v44, %v2143_v24  ;;  %v2223_v14 = vld [vmem:[#allocation4 + $0xa8] sm:$0xff]  ;;  %v2222_v47 = vld [vmem:[#allocation4 + $0xa0] sm:$0xff] }
 0x5d1   : > { %v2319_v35 = vmul.f32 %v5889_v25, %v2223_v14  ;;  %v2318_v12 = vmul.f32 %v5891_v16, %v2222_v47 }
 0x5d2   : > { %2208 = vst.msk [vmem:[#allocation3 + $0xb8] sm:$0xff] %vm1284_vm4, %v2192_v55  ;;  %2207 = vst.msk [vmem:[#allocation3 + $0xb0] sm:$0xff] %vm1284_vm4, %v2191_v57  ;;  %v2225_v55 = vld [vmem:[#allocation4 + $0xb8] sm:$0xff]  ;;  %v2224_v57 = vld [vmem:[#allocation4 + $0xb0] sm:$0xff] }
 0x5d3   : > { %v2172_v62 = vpop.xlane.xlu1 %2171  ;;  %v2170_v22 = vpop.xlane.xlu0 %2169 }
 0x5d4   : > { %v2194_v38 = vadd.f32 %v2172_v62, %v2146_v20  ;;  %v2193_v34 = vadd.f32 %v2170_v22, %v2145_v45  ;;  %v2321_v62 = vmul.f32 %v5893_v13, %v2225_v55  ;;  %v2320_v22 = vmul.f32 %v5895_v10, %v2224_v57 }
 0x5d6   : > { %2210 = vst.msk [vmem:[#allocation3 + $0xc8] sm:$0xff] %vm1284_vm4, %v2194_v38  ;;  %2209 = vst.msk [vmem:[#allocation3 + $0xc0] sm:$0xff] %vm1284_vm4, %v2193_v34  ;;  %v2226_v38 = vld [vmem:[#allocation4 + $0xc0] sm:$0xff] }
 0x5d7   : > { %v2174_v49 = vpop.xlane.xlu0 %2173 }
 0x5d8   : > { %v2195_v33 = vadd.f32 %v2174_v49, %v2147_v52  ;;  %v2322_v49 = vmul.f32 %v5899_v50, %v2226_v38 }
 0x5da   : > { %2211 = vst.msk [vmem:[#allocation3 + $0xd0] sm:$0xff] %vm1284_vm4, %v2195_v33  ;;  %v2176_v48 = vpop.xlane.xlu1 %2175  ;;  %v2228_v33 = vld [vmem:[#allocation4 + $0xd0] sm:$0xff] }
 0x5db   : > { %v2196_v15 = vadd.f32 %v2176_v48, %v2148_v8  ;;  %v2178_v41 = vpop.xlane.xlu0 %2177  ;;  %v2324_v9 = vmul.f32 %v5903_v7, %v2228_v33  ;;  %v2232_v7 = vld [vmem:[#allocation4 + $0xf0] sm:$0xff] }
 0x5dc   : > { %v2197_v30 = vadd.f32 %v2178_v41, %v2149_v23  ;;  %v2325_v23 = vmul.f32 %v5901_v6, %v2229_v40  ;;  %v2230_v41 = vld [vmem:[#allocation4 + $0xe0] sm:$0xff] }
 0x5dd   : > { %2212 = vst.msk [vmem:[#allocation3 + $0xd8] sm:$0xff] %vm1284_vm4, %v2196_v15  ;;  %v2231_v15 = vld [vmem:[#allocation4 + $0xe8] sm:$0xff] }
 0x5de   : > { %2213 = vst.msk [vmem:[#allocation3 + $0xe0] sm:$0xff] %vm1284_vm4, %v2197_v30  ;;  %v2180_v59 = vpop.xlane.xlu1 %2179 }
 0x5df   : > { %v2198_v27 = vadd.f32 %v2180_v59, %v2150_v21  ;;  %v2182_v36 = vpop.xlane.xlu0 %2181  ;;  %v2327_v21 = vmul.f32 %v5905_v3, %v2231_v15  ;;  %v2326_v59 = vmul.f32 %v5907_v39, %v2230_v41 }
 0x5e0   : > { %v2199_v5 = vadd.f32 %v2182_v36, %v2151_v1  ;;  %v2233_v1 = vld [vmem:[#allocation4 + $0xf8] sm:$0xff] }
 0x5e1   : > { %2214 = vst.msk [vmem:[#allocation3 + $0xe8] sm:$0xff] %vm1284_vm4, %v2198_v27 }
 0x5e2   : > { %2215 = vst.msk [vmem:[#allocation3 + $0xf0] sm:$0xff] %vm1284_vm4, %v2199_v5  ;;  %v2184_v31 = vpop.xlane.xlu1 %2183 }
 0x5e3   : > { %v2200_v63 = vadd.f32 %v2184_v31, %v2152_v18 }
 0x5e5   : > { %2216 = vst.msk [vmem:[#allocation3 + $0xf8] sm:$0xff] %vm1284_vm4, %v2200_v63 }
 0x5e6   : > { %v2307_v27 = vpop.permute.xlu1 %2306 }
 0x5e7   : > { %v2312_v6 = vpop.permute.xlu0 %2311  ;;  %v2328_v63 = vmul.f32 %v2307_v27, %v2232_v7  ;;  %v2619_v7 = vld [vmem:[#allocation3 + $0x60] sm:$0xff] (!%p3329_p7) }
 0x5e8   : > { %v2329_v31 = vmul.f32 %v2312_v6, %v2233_v1  ;;  %v2620_v6 = vld [vmem:[#allocation3 + $0x68] sm:$0xff] (!%p3329_p7) }
 0x616   : > { %v3668_v2 = vpop.f32.mrb[16].mxu0 }
 0x617   : > { %v2540_v29 = vadd.f32 %v3668_v2, %v2315_v53  ;;  %v2460_v51 = vpop.f32.mrb[17].mxu0  ;;  %v2609_v53 = vld [vmem:[#allocation3 + $0x10] sm:$0xff] (!%p3329_p7)  ;;  %v4384_v2 = vmov (!%p3329_p7), 0  }
 0x618   : > { %v2539_v17 = vadd.f32 %v2460_v51, %v2314_v43  ;;  %v2607_v43 = vld [vmem:[#allocation3] sm:$0xff] (!%p3329_p7)  ;;  %4195 = vset.pattern.permute.xlu1 (!%p3329_p7), %v4384_v2  ;;  %4194 = vset.pattern.permute.xlu0 (!%p3329_p7), %v4384_v2  ;;  %4196 = vrcp.f32 (!%p3329_p7), %v2609_v53 }
 0x619   : > { %2556 = vst.msk [vmem:[#allocation4 + $0x88] sm:$0xff] %vm722_vm2, %v2540_v29  ;;  %4198 = vrcp.f32 (!%p3329_p7), %v2607_v43  ;;  %v2612_v29 = vld [vmem:[#allocation3 + $0x28] sm:$0xff] (!%p3329_p7)  ;;  %v2611_v51 = vld [vmem:[#allocation3 + $0x20] sm:$0xff] (!%p3329_p7) }
 0x61a   : > { %2555 = vst.msk [vmem:[#allocation4 + $0x80] sm:$0xff] %vm722_vm2, %v2539_v17  ;;  %v3671_v24 = vpop.f32.mrb[18].mxu0  ;;  %4200 = vrcp.f32 (!%p3329_p7), %v2610_v26  ;;  %v2614_v17 = vld [vmem:[#allocation3 + $0x38] sm:$0xff] (!%p3329_p7) }
 0x61b   : > { %v2542_v37 = vadd.f32 %v3671_v24, %v2317_v46  ;;  %v2470_v44 = vpop.f32.mrb[19].mxu0  ;;  %4202 = vrcp.f32 (!%p3329_p7), %v2608_v28  ;;  %v2613_v46 = vld [vmem:[#allocation3 + $0x30] sm:$0xff] (!%p3329_p7)  ;;  %v2751_v24 = vld [vmem:[#allocation3 + $0x80] sm:$0xff] (!%p3329_p7) }
 0x61c   : > { %v2541_v42 = vadd.f32 %v2470_v44, %v2316_v11  ;;  %4204 = vrcp.f32 (!%p3329_p7), %v2612_v29 }
 0x61d   : > { %2558 = vst.msk [vmem:[#allocation4 + $0x98] sm:$0xff] %vm722_vm2, %v2542_v37  ;;  %4206 = vrcp.f32 (!%p3329_p7), %v2611_v51  ;;  %v2615_v37 = vld [vmem:[#allocation3 + $0x40] sm:$0xff] (!%p3329_p7) }
 0x61e   : > { %2557 = vst.msk [vmem:[#allocation4 + $0x90] sm:$0xff] %vm722_vm2, %v2541_v42  ;;  %v3674_v0 = vpop.f32.mrb[20].mxu0  ;;  %4208 = vrcp.f32 (!%p3329_p7), %v2614_v17  ;;  %v2753_v42 = vld [vmem:[#allocation3 + $0x90] sm:$0xff] (!%p3329_p7) }
 0x61f   : > { %v2544_v60 = vadd.f32 %v3674_v0, %v2319_v35  ;;  %v2480_v20 = vpop.f32.mrb[21].mxu0  ;;  %4210 = vrcp.f32 (!%p3329_p7), %v2613_v46  ;;  %v2755_v0 = vld [vmem:[#allocation3 + $0xa0] sm:$0xff] (!%p3329_p7) }
 0x620   : > { %v2543_v45 = vadd.f32 %v2480_v20, %v2318_v12  ;;  %4212 = vrcp.f32 (!%p3329_p7), %v2751_v24  ;;  %v2752_v12 = vld [vmem:[#allocation3 + $0x88] sm:$0xff] (!%p3329_p7) }
 0x621   : > { %2560 = vst.msk [vmem:[#allocation4 + $0xa8] sm:$0xff] %vm722_vm2, %v2544_v60  ;;  %4214 = vrcp.f32 (!%p3329_p7), %v2615_v37  ;;  %v2754_v60 = vld [vmem:[#allocation3 + $0x98] sm:$0xff] (!%p3329_p7) }
 0x622   : > { %2559 = vst.msk [vmem:[#allocation4 + $0xa0] sm:$0xff] %vm722_vm2, %v2543_v45  ;;  %v3677_v25 = vpop.f32.mrb[22].mxu0  ;;  %v4197_v11 = vpop.eup (!%p3329_p7), %4196  ;;  %4216 = vrcp.f32 (!%p3329_p7), %v2753_v42  ;;  %v2757_v45 = vld [vmem:[#allocation3 + $0xb0] sm:$0xff] (!%p3329_p7) }
 0x623   : > { %v2546_v16 = vadd.f32 %v3677_v25, %v2321_v62  ;;  %v2490_v34 = vpop.f32.mrb[23].mxu0  ;;  %v4199_v14 = vpop.eup (!%p3329_p7), %4198  ;;  %2651 = vperm.xlu1 (!%p3329_p7), %4195, %v4197_v11   ;;  %4218 = vrcp.f32 (!%p3329_p7), %v2752_v12  ;;  %v2759_v25 = vld [vmem:[#allocation3 + $0xc0] sm:$0xff] (!%p3329_p7) }
 0x624   : > { %v2545_v52 = vadd.f32 %v2490_v34, %v2320_v22  ;;  %v4201_v47 = vpop.eup (!%p3329_p7), %4200  ;;  %2641 = vperm.xlu0 (!%p3329_p7), %4194, %v4199_v14   ;;  %4220 = vrcp.f32 (!%p3329_p7), %v2755_v0  ;;  %v2756_v22 = vld [vmem:[#allocation3 + $0xa8] sm:$0xff] (!%p3329_p7)  ;;  %v2735_v11 = vld [vmem:[#allocation4 + $0x80] sm:$0xff] (!%p3329_p7) }
 0x625   : > { %2562 = vst.msk [vmem:[#allocation4 + $0xb8] sm:$0xff] %vm722_vm2, %v2546_v16  ;;  %v4203_v44 = vpop.eup (!%p3329_p7), %4202  ;;  %4222 = vrcp.f32 (!%p3329_p7), %v2754_v60  ;;  %v2758_v16 = vld [vmem:[#allocation3 + $0xb8] sm:$0xff] (!%p3329_p7)  ;;  %v2737_v37 = vld [vmem:[#allocation4 + $0x90] sm:$0xff] (!%p3329_p7) }
 0x626   : > { %2561 = vst.msk [vmem:[#allocation4 + $0xb0] sm:$0xff] %vm722_vm2, %v2545_v52  ;;  %v3680_v13 = vpop.f32.mrb[24].mxu0  ;;  %v4205_v35 = vpop.eup (!%p3329_p7), %4204  ;;  %4224 = vrcp.f32 (!%p3329_p7), %v2757_v45  ;;  %v2761_v52 = vld [vmem:[#allocation3 + $0xd0] sm:$0xff] (!%p3329_p7) }
 0x627   : > { %v2548_v10 = vadd.f32 %v3680_v13, %v2323_v58  ;;  %v2500_v8 = vpop.f32.mrb[25].mxu0  ;;  %2656 = vperm.xlu1 (!%p3329_p7), %4195, %v4201_v47   ;;  %v4207_v55 = vpop.eup (!%p3329_p7), %4206  ;;  %4226 = vrcp.f32 (!%p3329_p7), %v2756_v22  ;;  %v2763_v13 = vld [vmem:[#allocation3 + $0xe0] sm:$0xff] (!%p3329_p7) }
 0x628   : > { %v2547_v48 = vadd.f32 %v2500_v8, %v2322_v49  ;;  %2646 = vperm.xlu0 (!%p3329_p7), %4194, %v4203_v44   ;;  %v4209_v57 = vpop.eup (!%p3329_p7), %4208  ;;  %4228 = vrcp.f32 (!%p3329_p7), %v2759_v25  ;;  %v2760_v49 = vld [vmem:[#allocation3 + $0xc8] sm:$0xff] (!%p3329_p7) }
 0x629   : > { %2564 = vst.msk [vmem:[#allocation4 + $0xc8] sm:$0xff] %vm722_vm2, %v2548_v10  ;;  %v4211_v20 = vpop.eup (!%p3329_p7), %4210  ;;  %4230 = vrcp.f32 (!%p3329_p7), %v2758_v16  ;;  %v2762_v10 = vld [vmem:[#allocation3 + $0xd8] sm:$0xff] (!%p3329_p7)  ;;  %v2736_v44 = vld [vmem:[#allocation4 + $0x88] sm:$0xff] (!%p3329_p7)  ;;  %v2739_v0 = vld [vmem:[#allocation4 + $0xa0] sm:$0xff] (!%p3329_p7) }
 0x62a   : > { %2563 = vst.msk [vmem:[#allocation4 + $0xc0] sm:$0xff] %vm722_vm2, %v2547_v48  ;;  %v3683_v32 = vpop.f32.mrb[26].mxu0  ;;  %v4213_v62 = vpop.eup (!%p3329_p7), %4212  ;;  %4232 = vrcp.f32 (!%p3329_p7), %v2761_v52  ;;  %v2765_v48 = vld [vmem:[#allocation3 + $0xf0] sm:$0xff] (!%p3329_p7) }
 0x62b   : > { %v2550_v50 = vadd.f32 %v3683_v32, %v2325_v23  ;;  %v2510_v56 = vpop.f32.mrb[27].mxu0  ;;  %2666 = vperm.xlu1 (!%p3329_p7), %4195, %v4205_v35   ;;  %v4215_v19 = vpop.eup (!%p3329_p7), %4214  ;;  %4234 = vrcp.f32 (!%p3329_p7), %v2760_v49  ;;  %v2616_v32 = vld [vmem:[#allocation3 + $0x48] sm:$0xff] (!%p3329_p7) }
 0x62c   : > { %v2549_v30 = vadd.f32 %v2510_v56, %v2324_v9  ;;  %2661 = vperm.xlu0 (!%p3329_p7), %4194, %v4207_v55   ;;  %v4217_v38 = vpop.eup (!%p3329_p7), %4216  ;;  %4236 = vrcp.f32 (!%p3329_p7), %v2763_v13  ;;  %v2764_v9 = vld [vmem:[#allocation3 + $0xe8] sm:$0xff] (!%p3329_p7) }
 0x62d   : > { %2566 = vst.msk [vmem:[#allocation4 + $0xd8] sm:$0xff] %vm722_vm2, %v2550_v50  ;;  %v4219_v34 = vpop.eup (!%p3329_p7), %4218  ;;  %4238 = vrcp.f32 (!%p3329_p7), %v2762_v10  ;;  %v2766_v50 = vld [vmem:[#allocation3 + $0xf8] sm:$0xff] (!%p3329_p7)  ;;  %v2741_v22 = vld [vmem:[#allocation4 + $0xb0] sm:$0xff] (!%p3329_p7) }
 0x62e   : > { %2565 = vst.msk [vmem:[#allocation4 + $0xd0] sm:$0xff] %vm722_vm2, %v2549_v30  ;;  %v3686_v4 = vpop.f32.mrb[28].mxu0  ;;  %v4221_v58 = vpop.eup (!%p3329_p7), %4220  ;;  %4240 = vrcp.f32 (!%p3329_p7), %v2765_v48  ;;  %v2618_v30 = vld [vmem:[#allocation3 + $0x58] sm:$0xff] (!%p3329_p7) }
 0x62f   : > { %v2552_v36 = vadd.f32 %v3686_v4, %v2327_v21  ;;  %v2520_v5 = vpop.f32.mrb[29].mxu0  ;;  %2676 = vperm.xlu1 (!%p3329_p7), %4195, %v4209_v57   ;;  %v4223_v40 = vpop.eup (!%p3329_p7), %4222  ;;  %4242 = vrcp.f32 (!%p3329_p7), %v2764_v9  ;;  %v2738_v57 = vld [vmem:[#allocation4 + $0x98] sm:$0xff] (!%p3329_p7) }
 0x630   : > { %v2551_v18 = vadd.f32 %v2520_v5, %v2326_v59  ;;  %2590 = sbr.rel (%p3329_p7) target bundleno = 1867 (0x74b), region = 154  ;;  %2671 = vperm.xlu0 (!%p3329_p7), %4194, %v4211_v20   ;;  %v4225_v33 = vpop.eup (!%p3329_p7), %4224  ;;  %4244 = vrcp.f32 (!%p3329_p7), %v2616_v32  ;;  %v2617_v59 = vld [vmem:[#allocation3 + $0x50] sm:$0xff] (!%p3329_p7) }
 0x631   : > { %2568 = vst.msk [vmem:[#allocation4 + $0xe8] sm:$0xff] %vm722_vm2, %v2552_v36  ;;  %v4227_v8 = vpop.eup (!%p3329_p7), %4226  ;;  %4246 = vrcp.f32 (!%p3329_p7), %v2766_v50  ;;  %v2622_v36 = vld [vmem:[#allocation3 + $0x78] sm:$0xff] (!%p3329_p7)  ;;  %v2743_v52 = vld [vmem:[#allocation4 + $0xc0] sm:$0xff] (!%p3329_p7) }
 0x632   : > { %2567 = vst.msk [vmem:[#allocation4 + $0xe0] sm:$0xff] %vm722_vm2, %v2551_v18  ;;  %v3689_v3 = vpop.f32.mrb[30].mxu0  ;;  %v4229_v23 = vpop.eup (!%p3329_p7), %4228  ;;  %4248 = vrcp.f32 (!%p3329_p7), %v2618_v30  ;;  %v2621_v18 = vld [vmem:[#allocation3 + $0x70] sm:$0xff] (!%p3329_p7) }
 0x633   : > { %v2554_v54 = vadd.f32 %v3689_v3, %v2329_v31  ;;  %v2530_v61 = vpop.f32.mrb[31].mxu0  ;;  %2785 = vperm.xlu1 (!%p3329_p7), %4195, %v4213_v62   ;;  %v4231_v15 = vpop.eup (!%p3329_p7), %4230  ;;  %4250 = vrcp.f32 (!%p3329_p7), %v2617_v59 }
 0x634   : > { %v2553_v39 = vadd.f32 %v2530_v61, %v2328_v63  ;;  %2681 = vperm.xlu0 (!%p3329_p7), %4194, %v4215_v19   ;;  %v4233_v41 = vpop.eup (!%p3329_p7), %4232  ;;  %4252 = vrcp.f32 (!%p3329_p7), %v2620_v6  ;;  %v2740_v19 = vld [vmem:[#allocation4 + $0xa8] sm:$0xff] (!%p3329_p7) }
 0x635   : > { %2570 = vst.msk [vmem:[#allocation4 + $0xf8] sm:$0xff] %vm722_vm2, %v2554_v54  ;;  %v4235_v56 = vpop.eup (!%p3329_p7), %4234  ;;  %4254 = vrcp.f32 (!%p3329_p7), %v2619_v7  ;;  %v2745_v10 = vld [vmem:[#allocation4 + $0xd0] sm:$0xff] (!%p3329_p7) }
 0x636   : > { %2569 = vst.msk [vmem:[#allocation4 + $0xf0] sm:$0xff] %vm722_vm2, %v2553_v39  ;;  %v4237_v21 = vpop.eup (!%p3329_p7), %4236  ;;  %4256 = vrcp.f32 (!%p3329_p7), %v2622_v36 }
 0x637   : > { %2795 = vperm.xlu1 %4195, %v4217_v38   ;;  %v4239_v1 = vpop.eup %4238  ;;  %4258 = vrcp.f32 %v2621_v18 }
 0x638   : > { %2790 = vperm.xlu0 %4194, %v4219_v34   ;;  %v4241_v4 = vpop.eup %4240 }
 0x639   : > { %v4243_v27 = vpop.eup %4242  ;;  %v2747_v32 = vld [vmem:[#allocation4 + $0xe0] sm:$0xff] }
 0x63a   : > { %v4245_v5 = vpop.eup %4244 }
 0x63b   : > { %2805 = vperm.xlu1 %4195, %v4221_v58   ;;  %v4247_v31 = vpop.eup %4246  ;;  %v2742_v58 = vld [vmem:[#allocation4 + $0xb8] sm:$0xff] }
 0x63c   : > { %2800 = vperm.xlu0 %4194, %v4223_v40   ;;  %v4249_v63 = vpop.eup %4248  ;;  %v2750_v36 = vld [vmem:[#allocation4 + $0xf8] sm:$0xff] }
 0x63d   : > { %v4251_v3 = vpop.eup %4250  ;;  %v2749_v59 = vld [vmem:[#allocation4 + $0xf0] sm:$0xff] }
 0x63e   : > { %v4253_v54 = vpop.eup %4252 }
 0x63f   : > { %2815 = vperm.xlu1 %4195, %v4225_v33   ;;  %v4255_v61 = vpop.eup %4254 }
 0x640   : > { %2810 = vperm.xlu0 %4194, %v4227_v8   ;;  %v4257_v39 = vpop.eup %4256  ;;  %v2744_v8 = vld [vmem:[#allocation4 + $0xc8] sm:$0xff] }
 0x641   : > { %v4259_v53 = vpop.eup %4258 }
 0x643   : > { %2825 = vperm.xlu1 %4195, %v4229_v23  }
 0x644   : > { %2820 = vperm.xlu0 %4194, %v4231_v15  }
 0x647   : > { %2835 = vperm.xlu1 %4195, %v4233_v41   ;;  %v2746_v41 = vld [vmem:[#allocation4 + $0xd8] sm:$0xff] }
 0x648   : > { %2830 = vperm.xlu0 %4194, %v4235_v56  }
 0x64b   : > { %2845 = vperm.xlu1 %4195, %v4237_v21  }
 0x64c   : > { %2840 = vperm.xlu0 %4194, %v4239_v1   ;;  %v2748_v1 = vld [vmem:[#allocation4 + $0xe8] sm:$0xff] }
 0x64f   : > { %2855 = vperm.xlu1 %4195, %v4241_v4  }
 0x650   : > { %2850 = vperm.xlu0 %4194, %v4243_v27  }
 0x653   : > { %2686 = vperm.xlu1 %4195, %v4245_v5  }
 0x654   : > { %2860 = vperm.xlu0 %4194, %v4247_v31  }
 0x657   : > { %2696 = vperm.xlu1 %4195, %v4249_v63  }
 0x658   : > { %2691 = vperm.xlu0 %4194, %v4251_v3  }
 0x65b   : > { %2706 = vperm.xlu1 %4195, %v4253_v54  }
 0x65c   : > { %2701 = vperm.xlu0 %4194, %v4255_v61  }
 0x65f   : > { %2716 = vperm.xlu1 %4195, %v4257_v39   ;;  %v2591_v39 = vld [vmem:[#allocation4] sm:$0xff] }
 0x660   : > { %2711 = vperm.xlu0 %4194, %v4259_v53  }
 0x6a2   : > { %v5972_v43 = vpop.permute.xlu1 %2651 }
 0x6a3   : > { %v5974_v26 = vpop.permute.xlu0 %2641 }
 0x6a6   : > { %v5976_v2 = vpop.permute.xlu1 %2656 }
 0x6a7   : > { %v5978_v28 = vpop.permute.xlu0 %2646 }
 0x6aa   : > { %v5980_v29 = vpop.permute.xlu1 %2666 }
 0x6ab   : > { %v5982_v51 = vpop.permute.xlu0 %2661 }
 0x6ae   : > { %v5984_v17 = vpop.permute.xlu1 %2676 }
 0x6af   : > { %v5986_v46 = vpop.permute.xlu0 %2671 }
 0x6b2   : > { %v2786_v14 = vpop.permute.xlu1 %2785 }
 0x6b3   : > { %v2863_v24 = vmul.f32 %v2786_v14, %v2735_v11  ;;  %v5988_v47 = vpop.permute.xlu0 %2681  ;;  %v2719_v11 = vmul.f32 %v5974_v26, %v2591_v39  ;;  %v2593_v14 = vld [vmem:[#allocation4 + $0x10] sm:$0xff] }
 0x6b5   : > { %2895 = vrot.lane.b32.xlu0 %v2863_v24, %s4385_s14 }
 0x6b6   : > { %v2796_v42 = vpop.permute.xlu1 %2795 }
 0x6b7   : > { %v2865_v35 = vmul.f32 %v2796_v42, %v2737_v37  ;;  %v2791_v12 = vpop.permute.xlu0 %2790  ;;  %v2592_v37 = vld [vmem:[#allocation4 + $0x8] sm:$0xff] }
 0x6b8   : > { %v2864_v55 = vmul.f32 %v2791_v12, %v2736_v44  ;;  %v2720_v12 = vmul.f32 %v5978_v28, %v2592_v37  ;;  %v2596_v28 = vld [vmem:[#allocation4 + $0x28] sm:$0xff] }
 0x6b9   : > { %2899 = vrot.lane.b32.xlu0 %v2865_v35, %s4385_s14  ;;  %v2721_v35 = vmul.f32 %v5972_v43, %v2593_v14 }
 0x6ba   : > { %2897 = vrot.lane.b32.xlu1 %v2864_v55, %s4385_s14  ;;  %v2806_v60 = vpop.permute.xlu1 %2805  ;;  %v2595_v55 = vld [vmem:[#allocation4 + $0x20] sm:$0xff] }
 0x6bb   : > { %v2867_v20 = vmul.f32 %v2806_v60, %v2739_v0  ;;  %v2801_v45 = vpop.permute.xlu0 %2800 }
 0x6bc   : > { %v2866_v62 = vmul.f32 %v2801_v45, %v2738_v57  ;;  %v2594_v57 = vld [vmem:[#allocation4 + $0x18] sm:$0xff]  ;;  %v2723_v45 = vmul.f32 %v5982_v51, %v2595_v55  ;;  %v2599_v51 = vld [vmem:[#allocation4 + $0x40] sm:$0xff] }
 0x6bd   : > { %2903 = vrot.lane.b32.xlu0 %v2867_v20, %s4385_s14 }
 0x6be   : > { %2901 = vrot.lane.b32.xlu1 %v2866_v62, %s4385_s14  ;;  %v2816_v25 = vpop.permute.xlu1 %2815  ;;  %v2722_v62 = vmul.f32 %v5976_v2, %v2594_v57  ;;  %v2598_v2 = vld [vmem:[#allocation4 + $0x38] sm:$0xff] }
 0x6bf   : > { %v2869_v38 = vmul.f32 %v2816_v25, %v2741_v22  ;;  %v2811_v16 = vpop.permute.xlu0 %2810  ;;  %v2597_v22 = vld [vmem:[#allocation4 + $0x30] sm:$0xff] }
 0x6c0   : > { %v2868_v34 = vmul.f32 %v2811_v16, %v2740_v19  ;;  %v2725_v16 = vmul.f32 %v5986_v46, %v2597_v22  ;;  %v2601_v46 = vld [vmem:[#allocation4 + $0x50] sm:$0xff] }
 0x6c1   : > { %2907 = vrot.lane.b32.xlu0 %v2869_v38, %s4385_s14 }
 0x6c2   : > { %2905 = vrot.lane.b32.xlu1 %v2868_v34, %s4385_s14  ;;  %v2826_v49 = vpop.permute.xlu1 %2825  ;;  %v2724_v34 = vmul.f32 %v5980_v29, %v2596_v28  ;;  %v2600_v29 = vld [vmem:[#allocation4 + $0x48] sm:$0xff] }
 0x6c3   : > { %v2871_v40 = vmul.f32 %v2826_v49, %v2743_v52  ;;  %v2821_v13 = vpop.permute.xlu0 %2820 }
 0x6c4   : > { %v2870_v33 = vmul.f32 %v2821_v13, %v2742_v58  ;;  %v2727_v13 = vmul.f32 %v5988_v47, %v2599_v51 }
 0x6c5   : > { %2911 = vrot.lane.b32.xlu0 %v2871_v40, %s4385_s14 }
 0x6c6   : > { %2909 = vrot.lane.b32.xlu1 %v2870_v33, %s4385_s14  ;;  %v2836_v48 = vpop.permute.xlu1 %2835  ;;  %v2726_v33 = vmul.f32 %v5984_v17, %v2598_v2 }
 0x6c7   : > { %v2873_v23 = vmul.f32 %v2836_v48, %v2745_v10  ;;  %v2831_v9 = vpop.permute.xlu0 %2830 }
 0x6c8   : > { %v2872_v15 = vmul.f32 %v2831_v9, %v2744_v8 }
 0x6c9   : > { %2915 = vrot.lane.b32.xlu0 %v2873_v23, %s4385_s14 }
 0x6ca   : > { %2913 = vrot.lane.b32.xlu1 %v2872_v15, %s4385_s14  ;;  %v2846_v50 = vpop.permute.xlu1 %2845 }
 0x6cb   : > { %v2875_v56 = vmul.f32 %v2846_v50, %v2747_v32  ;;  %v2841_v30 = vpop.permute.xlu0 %2840  ;;  %v2603_v32 = vld [vmem:[#allocation4 + $0x60] sm:$0xff] }
 0x6cc   : > { %v2874_v21 = vmul.f32 %v2841_v30, %v2746_v41  ;;  %v2602_v41 = vld [vmem:[#allocation4 + $0x58] sm:$0xff] }
 0x6cd   : > { %2919 = vrot.lane.b32.xlu0 %v2875_v56, %s4385_s14 }
 0x6ce   : > { %2917 = vrot.lane.b32.xlu1 %v2874_v21, %s4385_s14  ;;  %v2856_v6 = vpop.permute.xlu1 %2855 }
 0x6cf   : > { %v2877_v4 = vmul.f32 %v2856_v6, %v2749_v59  ;;  %v2851_v7 = vpop.permute.xlu0 %2850  ;;  %v2605_v59 = vld [vmem:[#allocation4 + $0x70] sm:$0xff]  ;;  %v2604_v6 = vld [vmem:[#allocation4 + $0x68] sm:$0xff] }
 0x6d0   : > { %v2876_v27 = vmul.f32 %v2851_v7, %v2748_v1 }
 0x6d1   : > { %2923 = vrot.lane.b32.xlu0 %v2877_v4, %s4385_s14 }
 0x6d2   : > { %2921 = vrot.lane.b32.xlu1 %v2876_v27, %s4385_s14  ;;  %v2687_v31 = vpop.permute.xlu1 %2686 }
 0x6d3   : > { %v2861_v5 = vpop.permute.xlu0 %2860  ;;  %v2728_v15 = vmul.f32 %v2687_v31, %v2600_v29  ;;  %v2606_v31 = vld [vmem:[#allocation4 + $0x78] sm:$0xff] }
 0x6d4   : > { %v2878_v18 = vmul.f32 %v2861_v5, %v2750_v36 }
 0x6d6   : > { %2925 = vrot.lane.b32.xlu1 %v2878_v18, %s4385_s14  ;;  %v6006_v3 = vpop.permute.xlu1 %2696 }
 0x6d7   : > { %v2692_v63 = vpop.permute.xlu0 %2691  ;;  %v2730_v21 = vmul.f32 %v6006_v3, %v2602_v41 }
 0x6d8   : > { %v2729_v9 = vmul.f32 %v2692_v63, %v2601_v46 }
 0x6da   : > { %v6008_v61 = vpop.permute.xlu1 %2706 }
 0x6db   : > { %v2702_v54 = vpop.permute.xlu0 %2701  ;;  %v2732_v5 = vmul.f32 %v6008_v61, %v2604_v6 }
 0x6dc   : > { %v2731_v30 = vmul.f32 %v2702_v54, %v2603_v32 }
 0x6de   : > { %v6013_v44 = vpop.permute.xlu1 %2716 }
 0x6df   : > { %v6010_v53 = vpop.permute.xlu0 %2711  ;;  %v2734_v39 = vmul.f32 %v6013_v44, %v2606_v31 }
 0x6e0   : > { %v2733_v36 = vmul.f32 %v6010_v53, %v2605_v59 }
 0x727   : > { %v2896_v24 = vpop.permute.xlu0 %2895 }
 0x728   : > { %v2943_v42 = vsel %vm722_vm2, %v2719_v11, %v2896_v24 }
 0x729   : > { %2959 = vst [vmem:[%s4653_s1] sm:$0xff] %v2943_v42 }
 0x72b   : > { %v2900_v0 = vpop.permute.xlu0 %2899 }
 0x72c   : > { %v2898_v60 = vpop.permute.xlu1 %2897  ;;  %v2945_v26 = vsel %vm722_vm2, %v2721_v35, %v2900_v0 }
 0x72d   : > { %v2944_v20 = vsel %vm722_vm2, %v2720_v12, %v2898_v60  ;;  %2961 = vst [vmem:[%s4653_s1 + $0x10] sm:$0xff] %v2945_v26 }
 0x72e   : > { %2960 = vst [vmem:[%s4653_s1 + $0x8] sm:$0xff] %v2944_v20 }
 0x72f   : > { %v2904_v43 = vpop.permute.xlu0 %2903 }
 0x730   : > { %v2902_v19 = vpop.permute.xlu1 %2901  ;;  %v2947_v25 = vsel %vm722_vm2, %v2723_v45, %v2904_v43 }
 0x731   : > { %v2946_v38 = vsel %vm722_vm2, %v2722_v62, %v2902_v19  ;;  %2963 = vst [vmem:[%s4653_s1 + $0x20] sm:$0xff] %v2947_v25 }
 0x732   : > { %2962 = vst [vmem:[%s4653_s1 + $0x18] sm:$0xff] %v2946_v38 }
 0x733   : > { %v2908_v52 = vpop.permute.xlu0 %2907 }
 0x734   : > { %v2906_v58 = vpop.permute.xlu1 %2905  ;;  %v2949_v49 = vsel %vm722_vm2, %v2725_v16, %v2908_v52 }
 0x735   : > { %v2948_v40 = vsel %vm722_vm2, %v2724_v34, %v2906_v58  ;;  %2965 = vst [vmem:[%s4653_s1 + $0x30] sm:$0xff] %v2949_v49 }
 0x736   : > { %2964 = vst [vmem:[%s4653_s1 + $0x28] sm:$0xff] %v2948_v40 }
 0x737   : > { %v2912_v10 = vpop.permute.xlu0 %2911 }
 0x738   : > { %v2910_v8 = vpop.permute.xlu1 %2909  ;;  %v2951_v48 = vsel %vm722_vm2, %v2727_v13, %v2912_v10 }
 0x739   : > { %v2950_v23 = vsel %vm722_vm2, %v2726_v33, %v2910_v8  ;;  %2967 = vst [vmem:[%s4653_s1 + $0x40] sm:$0xff] %v2951_v48 }
 0x73a   : > { %2966 = vst [vmem:[%s4653_s1 + $0x38] sm:$0xff] %v2950_v23 }
 0x73b   : > { %v2916_v47 = vpop.permute.xlu0 %2915 }
 0x73c   : > { %v2914_v17 = vpop.permute.xlu1 %2913  ;;  %v2953_v50 = vsel %vm722_vm2, %v2729_v9, %v2916_v47 }
 0x73d   : > { %v2952_v56 = vsel %vm722_vm2, %v2728_v15, %v2914_v17  ;;  %2969 = vst [vmem:[%s4653_s1 + $0x50] sm:$0xff] %v2953_v50 }
 0x73e   : > { %2968 = vst [vmem:[%s4653_s1 + $0x48] sm:$0xff] %v2952_v56 }
 0x73f   : > { %v2920_v1 = vpop.permute.xlu0 %2919 }
 0x740   : > { %v2918_v4 = vpop.permute.xlu1 %2917  ;;  %v2955_v7 = vsel %vm722_vm2, %v2731_v30, %v2920_v1 }
 0x741   : > { %v2954_v27 = vsel %vm722_vm2, %v2730_v21, %v2918_v4  ;;  %2971 = vst [vmem:[%s4653_s1 + $0x60] sm:$0xff] %v2955_v7 }
 0x742   : > { %2970 = vst [vmem:[%s4653_s1 + $0x58] sm:$0xff] %v2954_v27 }
 0x743   : > { %v2924_v18 = vpop.permute.xlu0 %2923 }
 0x744   : > { %v2922_v63 = vpop.permute.xlu1 %2921  ;;  %v2957_v3 = vsel %vm722_vm2, %v2733_v36, %v2924_v18 }
 0x745   : > { %v2956_v54 = vsel %vm722_vm2, %v2732_v5, %v2922_v63  ;;  %2973 = vst [vmem:[%s4653_s1 + $0x70] sm:$0xff] %v2957_v3 }
 0x746   : > { %2972 = vst [vmem:[%s4653_s1 + $0x68] sm:$0xff] %v2956_v54 }
 0x748   : > { %v2926_v11 = vpop.permute.xlu1 %2925 }
 0x749   : > { %v2958_v14 = vsel %vm722_vm2, %v2734_v39, %v2926_v11 }
 0x74a   : > { %2974 = vst [vmem:[%s4653_s1 + $0x78] sm:$0xff] %v2958_v14 }
 0x74b PF: > { %2981 = sbr.rel (!%p4556_p2) target bundleno = 1886 (0x75e), region = 158  ;;  %s6331_s19 = sld [smem:[#allocation11_spill]] (%p4556_p2)  ;;  %v3046_v61 = vld [vmem:[%s4653_s1] sm:$0xff] (%p4556_p2)  ;;  %v3048_v53 = vld [vmem:[%s4653_s1 + $0x8] sm:$0xff] (%p4556_p2)  ;;  %v3050_v24 = vld [vmem:[%s4653_s1 + $0x10] sm:$0xff] (%p4556_p2) }
 0x74c   : > { %s6332_s20 = sld [smem:[#allocation13_spill]] (%p4556_p2)  ;;  %s6333_s30 = sld [smem:[#allocation12_spill]] (%p4556_p2)  ;;  %v3052_v37 = vld [vmem:[%s4653_s1 + $0x18] sm:$0xff] (%p4556_p2)  ;;  %v3054_v44 = vld [vmem:[%s4653_s1 + $0x20] sm:$0xff] (%p4556_p2)  ;;  %v3056_v42 = vld [vmem:[%s4653_s1 + $0x28] sm:$0xff] (%p4556_p2) }
 0x74d   : > { %v3058_v35 = vld [vmem:[%s4653_s1 + $0x30] sm:$0xff] (%p4556_p2)  ;;  %v3060_v12 = vld [vmem:[%s4653_s1 + $0x38] sm:$0xff] (%p4556_p2)  ;;  %v3062_v55 = vld [vmem:[%s4653_s1 + $0x40] sm:$0xff] (%p4556_p2)  ;;  %s6334_s9 = sld [smem:[#allocation55_spill]] (%p4556_p2) }
 0x74e   : > { %v3064_v0 = vld [vmem:[%s4653_s1 + $0x48] sm:$0xff] (%p4556_p2)  ;;  %v3066_v57 = vld [vmem:[%s4653_s1 + $0x50] sm:$0xff] (%p4556_p2)  ;;  %v3068_v60 = vld [vmem:[%s4653_s1 + $0x58] sm:$0xff] (%p4556_p2) }
 0x74f   : > { %v3070_v26 = vld [vmem:[%s4653_s1 + $0x60] sm:$0xff] (%p4556_p2)  ;;  %v3072_v20 = vld [vmem:[%s4653_s1 + $0x68] sm:$0xff] (%p4556_p2)  ;;  %v3074_v45 = vld [vmem:[%s4653_s1 + $0x70] sm:$0xff] (%p4556_p2) }
 0x751   : > { %s3337_s21 = sshll.u32 (%p4556_p2), %s6331_s19, 6  ;;  %v3076_v62 = vld [vmem:[%s4653_s1 + $0x78] sm:$0xff] (%p4556_p2) }
 0x752   : > { %s3333_s27 = sshll.u32 %s6332_s20, 7  ;;  %s2984_s18 = sadd.s32 %s6333_s30, %s3337_s21 }
 0x753   : > { %s2986_s29 = sadd.s32 %s3333_s27, %s2984_s18 }
 0x754   : > { %s3334_s28 = sshll.u32 %s2986_s29, 3 }
 0x755   : > { %s2988_s10 = scalar_lea.vmem %s6334_s9, %s3334_s28 }
 0x756   : > { %3047 = vst [vmem:[%s2988_s10] sm:$0xff] %v3046_v61  ;;  %3049 = vst [vmem:[%s2988_s10 + $0x20] sm:$0xff] %v3048_v53 }
 0x757   : > { %3051 = vst [vmem:[%s2988_s10 + $0x40] sm:$0xff] %v3050_v24  ;;  %3053 = vst [vmem:[%s2988_s10 + $0x60] sm:$0xff] %v3052_v37 }
 0x758   : > { %3055 = vst [vmem:[%s2988_s10 + $0x80] sm:$0xff] %v3054_v44  ;;  %3057 = vst [vmem:[%s2988_s10 + $0xa0] sm:$0xff] %v3056_v42 }
 0x759   : > { %3059 = vst [vmem:[%s2988_s10 + $0xc0] sm:$0xff] %v3058_v35  ;;  %3061 = vst [vmem:[%s2988_s10 + $0xe0] sm:$0xff] %v3060_v12 }
 0x75a   : > { %3063 = vst [vmem:[%s2988_s10 + $0x100] sm:$0xff] %v3062_v55  ;;  %3065 = vst [vmem:[%s2988_s10 + $0x120] sm:$0xff] %v3064_v0 }
 0x75b   : > { %3067 = vst [vmem:[%s2988_s10 + $0x140] sm:$0xff] %v3066_v57  ;;  %3069 = vst [vmem:[%s2988_s10 + $0x160] sm:$0xff] %v3068_v60 }
 0x75c   : > { %3071 = vst [vmem:[%s2988_s10 + $0x180] sm:$0xff] %v3070_v26  ;;  %3073 = vst [vmem:[%s2988_s10 + $0x1a0] sm:$0xff] %v3072_v20 }
 0x75d   : > { %3075 = vst [vmem:[%s2988_s10 + $0x1c0] sm:$0xff] %v3074_v45  ;;  %3077 = vst [vmem:[%s2988_s10 + $0x1e0] sm:$0xff] %v3076_v62 }
 0x75e PF: > { %s13_s26 = sadd.s32 1, %s4378_s26   ;;  %s6336_s6 = sld [smem:[#allocation14_spill]] }
 0x75f   : > { %p6084_p8 = scmp.ge.s32.totalorder %s13_s26, 34   ;;  %s6337_s1 = sld [smem:[#allocation15_spill]] }
 0x760   : > { %s6338_s2 = sld [smem:[#allocation16_spill]]  ;;  %s6339_s30 = sld [smem:[#allocation17_spill]] }
 0x761   : > { %s6340_s12 = smov %s4326_s13  ;;  %s6341_s13 = smov %s4551_s8 }
 0x762   : > { %s6342_s14 = smov %s4334_s15  ;;  %s6343_s15 = smov %s4546_s11 }
 0x763   : > { %s6344_s16 = smov %s4342_s17  ;;  %s6345_s17 = smov %s4543_s3 }
 0x764   : > { %s6346_s18 = smov %s4362_s22  ;;  %s6347_s19 = smov %s4366_s23 }
 0x765   : > { %s6348_s20 = smov %s4370_s24  ;;  %s6349_s21 = smov %s4374_s25 }
 0x766   : > { %s6350_s22 = smov %s6336_s6  ;;  %s6351_s23 = smov %s6337_s1 }
 0x767   : > { %s6352_s24 = smov %s6338_s2  ;;  %s6353_s25 = smov %s6339_s30 }
 0x768   :  { %12 = sbr.rel (!%p6084_p8) target bundleno = 12 (0xc), region = 246 }

// kernel: attention_forward.3
= control target key start
LH: loop header
LB: loop body
LE: loop exit
PB: predicated region body
PF: predicated region fallthrough
CT: control target
= control target key end

     0   :  { %7 = vsyncpa [#allocation3], 0  ;;  %s6872_s0 = inlined_call_operand.hbm [shape: f32[512,128], index: 0, kind: input, shape index: {}]   ;;  %s6873_s1 = inlined_call_operand.hbm [shape: f32[128,1536], index: 1, kind: input, shape index: {}]   ;;  %s6874_s2 = inlined_call_operand.vmem [shape: f32[512,1536], index: 2, kind: output, shape index: {}]  }
   0x1   :  { %8 = vsyncpa [#allocation5], 0  ;;  %s4138_s9 = smov [#allocation2]   ;;  %s4090_s13 = scalar_lea.hbm %s6872_s0, 8192 }
   0x2   :  { %s14_s10 = sshll.u32 %s4138_s9, 4  ;;  %p4091_p0 = scmp.ne.s32.totalorder %s6872_s0, %s4090_s13  ;;  %s15_s10 = int_to_ptr.vmem [resolvable:$true] %s14_s10 }
   0x3   :  { %p4094_p1 = scmp.lt.u32.totalorder %s4090_s13, %s6872_s0 }
   0x5   :  { %p4096_p2 = pnand %p4094_p1, %p4091_p0 }
   0x7   :  { %4099 = shalt.err (!%p4096_p2)
}
   0x8   :  { %s4100_s18 = scalar_lea.vmem %s15_s10, 8192  ;;  %p4105_p4 = scmp.lt.s32.totalorder %s15_s10, %s15_s10 }
   0x9   :  { %p4101_p3 = scmp.ne.s32.totalorder %s15_s10, %s4100_s18  ;;  %p4106_p5 = scmp.lt.s32.totalorder %s4100_s18, %s4100_s18 }
   0xb   :  { %p4107_p6 = por %p4106_p5, %p4105_p4 }
   0xd   :  { %p4108_p7 = pnand %p4107_p6, %p4101_p3 }
   0xf   :  { %4111 = shalt.err (!%p4108_p7)
}
  0x10   :  { %s4139_s19 = smov 128   ;;  %s4140_s20 = smov 8  }
  0x11   :  { %20 = dma.hbm_to_vmem [thread:$0]  %s6872_s0, 8192, %s15_s10, [#allocation3], %s4139_s19, %s4139_s19, %s4140_s20  }
  0x12   :  { %s4141_s23 = smov [#allocation4]   ;;  %s4112_s27 = scalar_lea.hbm %s6873_s1, 24576 }
  0x13   :  { %s26_s24 = sshll.u32 %s4141_s23, 4  ;;  %p4113_p8 = scmp.ne.s32.totalorder %s6873_s1, %s4112_s27  ;;  %s27_s24 = int_to_ptr.vmem [resolvable:$true] %s26_s24 }
  0x14   :  { %p4116_p9 = scmp.lt.u32.totalorder %s4112_s27, %s6873_s1 }
  0x16   :  { %p4118_p10 = pnand %p4116_p9, %p4113_p8 }
  0x18   :  { %4121 = shalt.err (!%p4118_p10)
}
  0x19   :  { %s4122_s4 = scalar_lea.vmem %s27_s24, 24576  ;;  %p4127_p12 = scmp.lt.s32.totalorder %s27_s24, %s27_s24 }
  0x1a   :  { %p4123_p11 = scmp.ne.s32.totalorder %s27_s24, %s4122_s4  ;;  %p4128_p13 = scmp.lt.s32.totalorder %s4122_s4, %s4122_s4 }
  0x1c   :  { %p4129_p0 = por %p4128_p13, %p4127_p12 }
  0x1e   :  { %p4130_p1 = pnand %p4129_p0, %p4123_p11 }
  0x20   :  { %4133 = shalt.err (!%p4130_p1)
}
  0x21   :  { %s4142_s0 = smov 1536   ;;  %s4143_s5 = smov 96  }
  0x22   :  { %32 = dma.hbm_to_vmem [thread:$0]  %s6873_s1, 24576, %s27_s24, [#allocation5], %s4142_s0, %s4142_s0, %s4143_s5  }
  0x23   :  { %4134 = dma.done.wait [#allocation3], 8192  }
  0x24   :  { %4135 = vsyncadd [#allocation3], 4294959104 }
  0x25   :  { %4136 = dma.done.wait [#allocation5], 24576  }
  0x26   :  { %4137 = vsyncadd [#allocation5], 4294942720  ;;  %v4144_v0 = vmov 0.0   ;;  %v104_v1 = vld [vmem:[#allocation4 + $0x8] sm:$0xff]  ;;  %v106_v3 = vld [vmem:[#allocation4 + $0x18] sm:$0xff] }
  0x27   :  { %359 = vmatprep.mubr.f32.mxu0 %v4144_v0  ;;  %808 = vmatprep.mubr.f32.mxu1 %v4144_v0  ;;  %v116_v2 = vld [vmem:[#allocation4 + $0x68] sm:$0xff]  ;;  %v118_v5 = vld [vmem:[#allocation4 + $0x78] sm:$0xff]  ;;  %v103_v6 = vld [vmem:[#allocation4] sm:$0xff] }
  0x28   :  { %v3763_v4 = vpack.c.bf16 %v116_v2, %v104_v1  ;;  %v115_v7 = vld [vmem:[#allocation4 + $0x60] sm:$0xff]  ;;  %v3795_v8 = vpack.c.bf16 %v118_v5, %v106_v3  ;;  %v105_v10 = vld [vmem:[#allocation4 + $0x10] sm:$0xff]  ;;  %v128_v12 = vld [vmem:[#allocation4 + $0xc8] sm:$0xff] }
  0x29   :  { %v3765_v9 = vpack.c.bf16 %v115_v7, %v103_v6  ;;  %v117_v11 = vld [vmem:[#allocation4 + $0x70] sm:$0xff]  ;;  %v140_v14 = vld [vmem:[#allocation4 + $0x128] sm:$0xff]  ;;  %v130_v15 = vld [vmem:[#allocation4 + $0xd8] sm:$0xff] }
  0x2a   :  { %3764 = vmatprep.subr.bf16.mxu0 %v3763_v4  ;;  %v3797_v13 = vpack.c.bf16 %v117_v11, %v105_v10  ;;  %v142_v16 = vld [vmem:[#allocation4 + $0x138] sm:$0xff]  ;;  %3796 = vmatprep.subr.bf16.mxu1 %v3795_v8  ;;  %v3767_v17 = vpack.c.bf16 %v140_v14, %v128_v12  ;;  %v127_v19 = vld [vmem:[#allocation4 + $0xc0] sm:$0xff]  ;;  %v129_v21 = vld [vmem:[#allocation4 + $0xd0] sm:$0xff] }
  0x2b   :  { %3766 = vmatpush1.bf16.msra.mxu0 %v3765_v9  ;;  %v3799_v18 = vpack.c.bf16 %v142_v16, %v130_v15  ;;  %v139_v20 = vld [vmem:[#allocation4 + $0x120] sm:$0xff]  ;;  %v141_v23 = vld [vmem:[#allocation4 + $0x130] sm:$0xff]  ;;  %v152_v24 = vld [vmem:[#allocation4 + $0x188] sm:$0xff] }
  0x2c   :  { %3798 = vmatpush1.bf16.msra.mxu1 %v3797_v13  ;;  %v3769_v22 = vpack.c.bf16 %v139_v20, %v127_v19  ;;  %v164_v25 = vld [vmem:[#allocation4 + $0x1e8] sm:$0xff]  ;;  %3768 = vmatprep.subr.bf16.mxu0 %v3767_v17  ;;  %v3801_v26 = vpack.c.bf16 %v141_v23, %v129_v21  ;;  %v154_v28 = vld [vmem:[#allocation4 + $0x198] sm:$0xff]  ;;  %v151_v30 = vld [vmem:[#allocation4 + $0x180] sm:$0xff] }
  0x2d   :  { %3800 = vmatprep.subr.bf16.mxu1 %v3799_v18  ;;  %v3771_v27 = vpack.c.bf16 %v164_v25, %v152_v24  ;;  %v166_v29 = vld [vmem:[#allocation4 + $0x1f8] sm:$0xff]  ;;  %v163_v32 = vld [vmem:[#allocation4 + $0x1e0] sm:$0xff]  ;;  %v153_v33 = vld [vmem:[#allocation4 + $0x190] sm:$0xff] }
  0x2e   :  { %v3803_v31 = vpack.c.bf16 %v166_v29, %v154_v28  ;;  %v165_v34 = vld [vmem:[#allocation4 + $0x1f0] sm:$0xff]  ;;  %v3773_v35 = vpack.c.bf16 %v163_v32, %v151_v30  ;;  %v176_v36 = vld [vmem:[#allocation4 + $0x248] sm:$0xff]  ;;  %v178_v38 = vld [vmem:[#allocation4 + $0x258] sm:$0xff] }
  0x2f   :  { %3770 = vmatpush1.bf16.msra.mxu0 %v3769_v22  ;;  %v188_v37 = vld [vmem:[#allocation4 + $0x2a8] sm:$0xff]  ;;  %v3805_v39 = vpack.c.bf16 %v165_v34, %v153_v33  ;;  %v190_v41 = vld [vmem:[#allocation4 + $0x2b8] sm:$0xff]  ;;  %v175_v42 = vld [vmem:[#allocation4 + $0x240] sm:$0xff] }
  0x30   :  { %3802 = vmatpush1.bf16.msra.mxu1 %v3801_v26  ;;  %3772 = vmatprep.subr.bf16.mxu0 %v3771_v27  ;;  %v3775_v40 = vpack.c.bf16 %v188_v37, %v176_v36  ;;  %v187_v43 = vld [vmem:[#allocation4 + $0x2a0] sm:$0xff]  ;;  %v3807_v44 = vpack.c.bf16 %v190_v41, %v178_v38  ;;  %v177_v45 = vld [vmem:[#allocation4 + $0x250] sm:$0xff]  ;;  %v200_v47 = vld [vmem:[#allocation4 + $0x308] sm:$0xff] }
  0x31   :  { %3804 = vmatprep.subr.bf16.mxu1 %v3803_v31  ;;  %v189_v46 = vld [vmem:[#allocation4 + $0x2b0] sm:$0xff]  ;;  %v212_v48 = vld [vmem:[#allocation4 + $0x368] sm:$0xff]  ;;  %v202_v49 = vld [vmem:[#allocation4 + $0x318] sm:$0xff]  ;;  %v3777_v51 = vpack.c.bf16 %v187_v43, %v175_v42 }
  0x32   :  { %v214_v50 = vld [vmem:[#allocation4 + $0x378] sm:$0xff]  ;;  %v3809_v52 = vpack.c.bf16 %v189_v46, %v177_v45  ;;  %v3779_v53 = vpack.c.bf16 %v212_v48, %v200_v47  ;;  %v199_v54 = vld [vmem:[#allocation4 + $0x300] sm:$0xff]  ;;  %v201_v56 = vld [vmem:[#allocation4 + $0x310] sm:$0xff] }
  0x33   :  { %3774 = vmatpush1.bf16.msra.mxu0 %v3773_v35  ;;  %v211_v55 = vld [vmem:[#allocation4 + $0x360] sm:$0xff]  ;;  %v3811_v57 = vpack.c.bf16 %v214_v50, %v202_v49  ;;  %v213_v58 = vld [vmem:[#allocation4 + $0x370] sm:$0xff]  ;;  %v224_v59 = vld [vmem:[#allocation4 + $0x3c8] sm:$0xff] }
  0x34   :  { %3806 = vmatpush1.bf16.msra.mxu1 %v3805_v39  ;;  %3776 = vmatprep.subr.bf16.mxu0 %v3775_v40  ;;  %v236_v60 = vld [vmem:[#allocation4 + $0x428] sm:$0xff]  ;;  %v226_v61 = vld [vmem:[#allocation4 + $0x3d8] sm:$0xff]  ;;  %v3781_v63 = vpack.c.bf16 %v211_v55, %v199_v54  ;;  %v3813_v1 = vpack.c.bf16 %v213_v58, %v201_v56  ;;  %v223_v3 = vld [vmem:[#allocation4 + $0x3c0] sm:$0xff] }
  0x35   :  { %3808 = vmatprep.subr.bf16.mxu1 %v3807_v44  ;;  %v238_v62 = vld [vmem:[#allocation4 + $0x438] sm:$0xff]  ;;  %v3783_v2 = vpack.c.bf16 %v236_v60, %v224_v59  ;;  %v235_v4 = vld [vmem:[#allocation4 + $0x420] sm:$0xff]  ;;  %v225_v5 = vld [vmem:[#allocation4 + $0x3d0] sm:$0xff] }
  0x36   :  { %v3815_v6 = vpack.c.bf16 %v238_v62, %v226_v61  ;;  %v237_v7 = vld [vmem:[#allocation4 + $0x430] sm:$0xff]  ;;  %v248_v8 = vld [vmem:[#allocation4 + $0x488] sm:$0xff]  ;;  %v250_v10 = vld [vmem:[#allocation4 + $0x498] sm:$0xff]  ;;  %v3785_v12 = vpack.c.bf16 %v235_v4, %v223_v3 }
  0x37   :  { %3778 = vmatpush1.bf16.msra.mxu0 %v3777_v51  ;;  %v260_v9 = vld [vmem:[#allocation4 + $0x4e8] sm:$0xff]  ;;  %v262_v11 = vld [vmem:[#allocation4 + $0x4f8] sm:$0xff]  ;;  %v3817_v13 = vpack.c.bf16 %v237_v7, %v225_v5  ;;  %v247_v15 = vld [vmem:[#allocation4 + $0x480] sm:$0xff] }
  0x38   :  { %3810 = vmatpush1.bf16.msra.mxu1 %v3809_v52  ;;  %3780 = vmatprep.subr.bf16.mxu0 %v3779_v53  ;;  %v3787_v14 = vpack.c.bf16 %v260_v9, %v248_v8  ;;  %v259_v16 = vld [vmem:[#allocation4 + $0x4e0] sm:$0xff]  ;;  %v249_v17 = vld [vmem:[#allocation4 + $0x490] sm:$0xff]  ;;  %v3819_v18 = vpack.c.bf16 %v262_v11, %v250_v10  ;;  %v272_v20 = vld [vmem:[#allocation4 + $0x548] sm:$0xff] }
  0x39   :  { %3812 = vmatprep.subr.bf16.mxu1 %v3811_v57  ;;  %v261_v19 = vld [vmem:[#allocation4 + $0x4f0] sm:$0xff]  ;;  %v284_v21 = vld [vmem:[#allocation4 + $0x5a8] sm:$0xff]  ;;  %v274_v22 = vld [vmem:[#allocation4 + $0x558] sm:$0xff]  ;;  %v3789_v24 = vpack.c.bf16 %v259_v16, %v247_v15 }
  0x3a   :  { %v286_v23 = vld [vmem:[#allocation4 + $0x5b8] sm:$0xff]  ;;  %v3821_v25 = vpack.c.bf16 %v261_v19, %v249_v17  ;;  %v3791_v26 = vpack.c.bf16 %v284_v21, %v272_v20  ;;  %v271_v27 = vld [vmem:[#allocation4 + $0x540] sm:$0xff]  ;;  %v273_v29 = vld [vmem:[#allocation4 + $0x550] sm:$0xff] }
  0x3b   :  { %3782 = vmatpush1.bf16.msra.mxu0 %v3781_v63  ;;  %v283_v28 = vld [vmem:[#allocation4 + $0x5a0] sm:$0xff]  ;;  %v3823_v30 = vpack.c.bf16 %v286_v23, %v274_v22  ;;  %v285_v31 = vld [vmem:[#allocation4 + $0x5b0] sm:$0xff]  ;;  %v108_v32 = vld [vmem:[#allocation4 + $0x28] sm:$0xff] }
  0x3c   :  { %3814 = vmatpush1.bf16.msra.mxu1 %v3813_v1  ;;  %3784 = vmatprep.subr.bf16.mxu0 %v3783_v2  ;;  %v120_v33 = vld [vmem:[#allocation4 + $0x88] sm:$0xff]  ;;  %v110_v34 = vld [vmem:[#allocation4 + $0x38] sm:$0xff]  ;;  %v3793_v36 = vpack.c.bf16 %v283_v28, %v271_v27  ;;  %v3825_v37 = vpack.c.bf16 %v285_v31, %v273_v29  ;;  %v107_v39 = vld [vmem:[#allocation4 + $0x20] sm:$0xff] }
  0x3d   :  { %3816 = vmatprep.subr.bf16.mxu1 %v3815_v6  ;;  %v122_v35 = vld [vmem:[#allocation4 + $0x98] sm:$0xff]  ;;  %v3827_v38 = vpack.c.bf16 %v120_v33, %v108_v32  ;;  %v119_v40 = vld [vmem:[#allocation4 + $0x80] sm:$0xff]  ;;  %v109_v42 = vld [vmem:[#allocation4 + $0x30] sm:$0xff] }
  0x3e   :  { %v3859_v41 = vpack.c.bf16 %v122_v35, %v110_v34  ;;  %v121_v43 = vld [vmem:[#allocation4 + $0x90] sm:$0xff]  ;;  %v132_v44 = vld [vmem:[#allocation4 + $0xe8] sm:$0xff]  ;;  %v39_v46 = vld [vmem:[#allocation2] sm:$0xff]  ;;  %v3829_v47 = vpack.c.bf16 %v119_v40, %v107_v39 }
  0x3f   :  { %3786 = vmatpush1.bf16.msra.mxu0 %v3785_v12  ;;  %v144_v45 = vld [vmem:[#allocation4 + $0x148] sm:$0xff]  ;;  %v134_v48 = vld [vmem:[#allocation4 + $0xf8] sm:$0xff]  ;;  %v3861_v50 = vpack.c.bf16 %v121_v43, %v109_v42  ;;  %v131_v52 = vld [vmem:[#allocation4 + $0xe0] sm:$0xff] }
  0x40   :  { %3818 = vmatpush1.bf16.msra.mxu1 %v3817_v13  ;;  %3788 = vmatprep.subr.bf16.mxu0 %v3787_v14  ;;  %v146_v49 = vld [vmem:[#allocation4 + $0x158] sm:$0xff]  ;;  %v3831_v51 = vpack.c.bf16 %v144_v45, %v132_v44  ;;  %v143_v53 = vld [vmem:[#allocation4 + $0x140] sm:$0xff]  ;;  %v133_v54 = vld [vmem:[#allocation4 + $0xf0] sm:$0xff] }
  0x41   :  { %3820 = vmatprep.subr.bf16.mxu1 %v3819_v18  ;;  %v3863_v55 = vpack.c.bf16 %v146_v49, %v134_v48  ;;  %v145_v56 = vld [vmem:[#allocation4 + $0x150] sm:$0xff]  ;;  %v156_v57 = vld [vmem:[#allocation4 + $0x1a8] sm:$0xff]  ;;  %v158_v60 = vld [vmem:[#allocation4 + $0x1b8] sm:$0xff]  ;;  %v3833_v62 = vpack.c.bf16 %v143_v53, %v131_v52 }
  0x42   :  { %v168_v58 = vld [vmem:[#allocation4 + $0x208] sm:$0xff]  ;;  %v170_v61 = vld [vmem:[#allocation4 + $0x218] sm:$0xff]  ;;  %v3865_v63 = vpack.c.bf16 %v145_v56, %v133_v54  ;;  %v155_v2 = vld [vmem:[#allocation4 + $0x1a0] sm:$0xff] }
  0x43   :  { %3790 = vmatpush1.bf16.msra.mxu0 %v3789_v24  ;;  %v40_v59 = vld [vmem:[#allocation2 + $0x8] sm:$0xff]  ;;  %v3835_v1 = vpack.c.bf16 %v168_v58, %v156_v57  ;;  %v167_v3 = vld [vmem:[#allocation4 + $0x200] sm:$0xff]  ;;  %v157_v4 = vld [vmem:[#allocation4 + $0x1b0] sm:$0xff]  ;;  %v3867_v5 = vpack.c.bf16 %v170_v61, %v158_v60 }
  0x44   :  { %3822 = vmatpush1.bf16.msra.mxu1 %v3821_v25  ;;  %3792 = vmatprep.subr.bf16.mxu0 %v3791_v26  ;;  %v169_v6 = vld [vmem:[#allocation4 + $0x210] sm:$0xff]  ;;  %v180_v7 = vld [vmem:[#allocation4 + $0x268] sm:$0xff]  ;;  %v182_v10 = vld [vmem:[#allocation4 + $0x278] sm:$0xff]  ;;  %v3837_v12 = vpack.c.bf16 %v167_v3, %v155_v2 }
  0x45   :  { %3824 = vmatprep.subr.bf16.mxu1 %v3823_v30  ;;  %v192_v8 = vld [vmem:[#allocation4 + $0x2c8] sm:$0xff]  ;;  %v41_v9 = vld [vmem:[#allocation2 + $0x10] sm:$0xff]  ;;  %v194_v11 = vld [vmem:[#allocation4 + $0x2d8] sm:$0xff]  ;;  %v3869_v13 = vpack.c.bf16 %v169_v6, %v157_v4 }
  0x46   :  { %v3839_v14 = vpack.c.bf16 %v192_v8, %v180_v7  ;;  %v179_v15 = vld [vmem:[#allocation4 + $0x260] sm:$0xff]  ;;  %v181_v17 = vld [vmem:[#allocation4 + $0x270] sm:$0xff]  ;;  %v3871_v18 = vpack.c.bf16 %v194_v11, %v182_v10  ;;  %v204_v20 = vld [vmem:[#allocation4 + $0x328] sm:$0xff] }
  0x47   :  { %3794 = vmatpush1.bf16.msra.mxu0 %v3793_v36  ;;  %v191_v16 = vld [vmem:[#allocation4 + $0x2c0] sm:$0xff]  ;;  %v193_v19 = vld [vmem:[#allocation4 + $0x2d0] sm:$0xff]  ;;  %v216_v21 = vld [vmem:[#allocation4 + $0x388] sm:$0xff] }
  0x48   :  { %3826 = vmatpush1.bf16.msra.mxu1 %v3825_v37  ;;  %3828 = vmatprep.subr.bf16.mxu0 %v3827_v38  ;;  %v42_v22 = vld [vmem:[#allocation2 + $0x18] sm:$0xff]  ;;  %v3841_v25 = vpack.c.bf16 %v191_v16, %v179_v15  ;;  %v3873_v26 = vpack.c.bf16 %v193_v19, %v181_v17  ;;  %v3843_v27 = vpack.c.bf16 %v216_v21, %v204_v20  ;;  %v203_v28 = vld [vmem:[#allocation4 + $0x320] sm:$0xff]  ;;  %v205_v31 = vld [vmem:[#allocation4 + $0x330] sm:$0xff] }
  0x49   :  { %3860 = vmatprep.subr.bf16.mxu1 %v3859_v41  ;;  %v206_v23 = vld [vmem:[#allocation4 + $0x338] sm:$0xff]  ;;  %v215_v29 = vld [vmem:[#allocation4 + $0x380] sm:$0xff]  ;;  %v217_v32 = vld [vmem:[#allocation4 + $0x390] sm:$0xff] }
  0x4a   :  { %360 = vmatmul.mubr.f32.vlgmr.msra.gmra.mrb[0].mxu0 %v39_v46  ;;  %v218_v24 = vld [vmem:[#allocation4 + $0x398] sm:$0xff]  ;;  %v43_v33 = vld [vmem:[#allocation2 + $0x20] sm:$0xff]  ;;  %v3845_v34 = vpack.c.bf16 %v215_v29, %v203_v28  ;;  %v3877_v35 = vpack.c.bf16 %v217_v32, %v205_v31  ;;  %v44_v36 = vld [vmem:[#allocation2 + $0x28] sm:$0xff] }
  0x4b   :  { %809 = vmatmul.mubr.f32.vlgmr.msra.gmra.mrb[0].mxu1 %v39_v46  ;;  %3830 = vmatpush1.bf16.msra.mxu0 %v3829_v47  ;;  %v3875_v30 = vpack.c.bf16 %v218_v24, %v206_v23  ;;  %v45_v37 = vld [vmem:[#allocation2 + $0x30] sm:$0xff]  ;;  %v46_v38 = vld [vmem:[#allocation2 + $0x38] sm:$0xff]  ;;  %v47_v39 = vld [vmem:[#allocation2 + $0x40] sm:$0xff] }
  0x4c   :  { %3862 = vmatpush1.bf16.msra.mxu1 %v3861_v50  ;;  %365 = vmatprep.mubr.f32.mxu0 %v4144_v0  ;;  %v48_v40 = vld [vmem:[#allocation2 + $0x48] sm:$0xff]  ;;  %v230_v43 = vld [vmem:[#allocation4 + $0x3f8] sm:$0xff]  ;;  %v227_v46 = vld [vmem:[#allocation4 + $0x3e0] sm:$0xff] }
  0x4d   :  { %814 = vmatprep.mubr.f32.mxu1 %v4144_v0  ;;  %3832 = vmatprep.subr.bf16.mxu0 %v3831_v51  ;;  %v228_v41 = vld [vmem:[#allocation4 + $0x3e8] sm:$0xff]  ;;  %v242_v45 = vld [vmem:[#allocation4 + $0x458] sm:$0xff]  ;;  %v239_v47 = vld [vmem:[#allocation4 + $0x440] sm:$0xff] }
  0x4e   :  { %366 = vmatmul.mubr.f32.gmra.mrb[2].mxu0 %v40_v59  ;;  %3864 = vmatprep.subr.bf16.mxu1 %v3863_v55  ;;  %v240_v42 = vld [vmem:[#allocation4 + $0x448] sm:$0xff]  ;;  %v3879_v48 = vpack.c.bf16 %v242_v45, %v230_v43  ;;  %v3849_v49 = vpack.c.bf16 %v239_v47, %v227_v46  ;;  %v229_v50 = vld [vmem:[#allocation4 + $0x3f0] sm:$0xff]  ;;  %v50_v54 = vld [vmem:[#allocation2 + $0x58] sm:$0xff] }
  0x4f   :  { %815 = vmatmul.mubr.f32.gmra.mrb[2].mxu1 %v40_v59  ;;  %371 = vmatprep.mubr.f32.mxu0 %v4144_v0  ;;  %v3847_v44 = vpack.c.bf16 %v240_v42, %v228_v41  ;;  %v241_v51 = vld [vmem:[#allocation4 + $0x450] sm:$0xff]  ;;  %v51_v55 = vld [vmem:[#allocation2 + $0x60] sm:$0xff]  ;;  %v52_v56 = vld [vmem:[#allocation2 + $0x68] sm:$0xff] }
  0x50   :  { %820 = vmatprep.mubr.f32.mxu1 %v4144_v0  ;;  %3834 = vmatpush1.bf16.msra.mxu0 %v3833_v62  ;;  %v3881_v52 = vpack.c.bf16 %v241_v51, %v229_v50  ;;  %v49_v53 = vld [vmem:[#allocation2 + $0x50] sm:$0xff]  ;;  %v54_v58 = vld [vmem:[#allocation2 + $0x78] sm:$0xff]  ;;  %v55_v59 = vld [vmem:[#allocation2 + $0x80] sm:$0xff] }
  0x51   :  { %3866 = vmatpush1.bf16.msra.mxu1 %v3865_v63  ;;  %3836 = vmatprep.subr.bf16.mxu0 %v3835_v1  ;;  %v53_v57 = vld [vmem:[#allocation2 + $0x70] sm:$0xff]  ;;  %v56_v60 = vld [vmem:[#allocation2 + $0x88] sm:$0xff]  ;;  %v254_v63 = vld [vmem:[#allocation4 + $0x4b8] sm:$0xff] }
  0x52   :  { %372 = vmatmul.mubr.f32.gmra.mrb[4].mxu0 %v41_v9  ;;  %3868 = vmatprep.subr.bf16.mxu1 %v3867_v5  ;;  %v252_v61 = vld [vmem:[#allocation4 + $0x4a8] sm:$0xff]  ;;  %v266_v2 = vld [vmem:[#allocation4 + $0x518] sm:$0xff]  ;;  %v251_v3 = vld [vmem:[#allocation4 + $0x4a0] sm:$0xff] }
  0x53   :  { %821 = vmatmul.mubr.f32.gmra.mrb[4].mxu1 %v41_v9  ;;  %377 = vmatprep.mubr.f32.mxu0 %v4144_v0  ;;  %v264_v62 = vld [vmem:[#allocation4 + $0x508] sm:$0xff]  ;;  %v263_v4 = vld [vmem:[#allocation4 + $0x500] sm:$0xff]  ;;  %v3883_v5 = vpack.c.bf16 %v266_v2, %v254_v63  ;;  %v253_v7 = vld [vmem:[#allocation4 + $0x4b0] sm:$0xff] }
  0x54   :  { %826 = vmatprep.mubr.f32.mxu1 %v4144_v0  ;;  %3838 = vmatpush1.bf16.msra.mxu0 %v3837_v12  ;;  %v3851_v1 = vpack.c.bf16 %v264_v62, %v252_v61  ;;  %v3853_v6 = vpack.c.bf16 %v263_v4, %v251_v3  ;;  %v265_v8 = vld [vmem:[#allocation4 + $0x510] sm:$0xff]  ;;  %v58_v11 = vld [vmem:[#allocation2 + $0x98] sm:$0xff]  ;;  %v59_v12 = vld [vmem:[#allocation2 + $0xa0] sm:$0xff] }
  0x55   :  { %3870 = vmatpush1.bf16.msra.mxu1 %v3869_v13  ;;  %3840 = vmatprep.subr.bf16.mxu0 %v3839_v14  ;;  %v3885_v9 = vpack.c.bf16 %v265_v8, %v253_v7  ;;  %v57_v10 = vld [vmem:[#allocation2 + $0x90] sm:$0xff]  ;;  %v60_v13 = vld [vmem:[#allocation2 + $0xa8] sm:$0xff]  ;;  %v62_v15 = vld [vmem:[#allocation2 + $0xb8] sm:$0xff] }
  0x56   :  { %378 = vmatmul.mubr.f32.gmra.mrb[6].mxu0 %v42_v22  ;;  %3872 = vmatprep.subr.bf16.mxu1 %v3871_v18  ;;  %v61_v14 = vld [vmem:[#allocation2 + $0xb0] sm:$0xff]  ;;  %v63_v16 = vld [vmem:[#allocation2 + $0xc0] sm:$0xff]  ;;  %v64_v17 = vld [vmem:[#allocation2 + $0xc8] sm:$0xff] }
  0x57   :  { %827 = vmatmul.mubr.f32.gmra.mrb[6].mxu1 %v42_v22  ;;  %383 = vmatprep.mubr.f32.mxu0 %v4144_v0  ;;  %v276_v18 = vld [vmem:[#allocation4 + $0x568] sm:$0xff]  ;;  %v278_v20 = vld [vmem:[#allocation4 + $0x578] sm:$0xff]  ;;  %v275_v23 = vld [vmem:[#allocation4 + $0x560] sm:$0xff] }
  0x58   :  { %832 = vmatprep.mubr.f32.mxu1 %v4144_v0  ;;  %3842 = vmatpush1.bf16.msra.mxu0 %v3841_v25  ;;  %v288_v19 = vld [vmem:[#allocation4 + $0x5c8] sm:$0xff]  ;;  %v290_v22 = vld [vmem:[#allocation4 + $0x5d8] sm:$0xff]  ;;  %v287_v24 = vld [vmem:[#allocation4 + $0x5c0] sm:$0xff] }
  0x59   :  { %3874 = vmatpush1.bf16.msra.mxu1 %v3873_v26  ;;  %3844 = vmatprep.subr.bf16.mxu0 %v3843_v27  ;;  %v3855_v21 = vpack.c.bf16 %v288_v19, %v276_v18  ;;  %v3887_v25 = vpack.c.bf16 %v290_v22, %v278_v20  ;;  %v3857_v26 = vpack.c.bf16 %v287_v24, %v275_v23  ;;  %v277_v27 = vld [vmem:[#allocation4 + $0x570] sm:$0xff]  ;;  %v66_v31 = vld [vmem:[#allocation2 + $0xd8] sm:$0xff]  ;;  %v67_v32 = vld [vmem:[#allocation2 + $0xe0] sm:$0xff] }
  0x5a   :  { %384 = vmatmul.mubr.f32.gmra.mrb[8].mxu0 %v43_v33  ;;  %3876 = vmatprep.subr.bf16.mxu1 %v3875_v30  ;;  %v289_v28 = vld [vmem:[#allocation4 + $0x5d0] sm:$0xff]  ;;  %v126_v42 = vld [vmem:[#allocation4 + $0xb8] sm:$0xff]  ;;  %v75_v46 = vld [vmem:[#allocation2 + $0x120] sm:$0xff] }
  0x5b   :  { %833 = vmatmul.mubr.f32.gmra.mrb[8].mxu1 %v43_v33  ;;  %389 = vmatprep.mubr.f32.mxu0 %v4144_v0  ;;  %v65_v29 = vld [vmem:[#allocation2 + $0xd0] sm:$0xff]  ;;  %v3889_v30 = vpack.c.bf16 %v289_v28, %v277_v27  ;;  %v68_v33 = vld [vmem:[#allocation2 + $0xe8] sm:$0xff]  ;;  %v74_v45 = vld [vmem:[#allocation2 + $0x118] sm:$0xff] }
  0x5c   :  { %838 = vmatprep.mubr.f32.mxu1 %v4144_v0  ;;  %3846 = vmatpush1.bf16.msra.mxu0 %v3845_v34  ;;  %v69_v34 = vld [vmem:[#allocation2 + $0xf0] sm:$0xff]  ;;  %v76_v47 = vld [vmem:[#allocation2 + $0x128] sm:$0xff]  ;;  %v79_v50 = vld [vmem:[#allocation2 + $0x140] sm:$0xff] }
  0x5d   :  { %3878 = vmatpush1.bf16.msra.mxu1 %v3877_v35  ;;  %3848 = vmatprep.subr.bf16.mxu0 %v3847_v44  ;;  %v70_v35 = vld [vmem:[#allocation2 + $0xf8] sm:$0xff]  ;;  %v73_v44 = vld [vmem:[#allocation2 + $0x110] sm:$0xff]  ;;  %v80_v51 = vld [vmem:[#allocation2 + $0x148] sm:$0xff] }
  0x5e   :  { %390 = vmatmul.mubr.f32.gmra.mrb[10].mxu0 %v44_v36  ;;  %3880 = vmatprep.subr.bf16.mxu1 %v3879_v48  ;;  %v77_v48 = vld [vmem:[#allocation2 + $0x130] sm:$0xff]  ;;  %v90_v61 = vld [vmem:[#allocation2 + $0x198] sm:$0xff]  ;;  %v91_v62 = vld [vmem:[#allocation2 + $0x1a0] sm:$0xff] }
  0x5f   :  { %839 = vmatmul.mubr.f32.gmra.mrb[10].mxu1 %v44_v36  ;;  %395 = vmatprep.mubr.f32.mxu0 %v4144_v0  ;;  %v71_v36 = vld [vmem:[#allocation2 + $0x100] sm:$0xff]  ;;  %v92_v63 = vld [vmem:[#allocation2 + $0x1a8] sm:$0xff] }
  0x60   :  { %844 = vmatprep.mubr.f32.mxu1 %v4144_v0  ;;  %3850 = vmatpush1.bf16.msra.mxu0 %v3849_v49  ;;  %v78_v49 = vld [vmem:[#allocation2 + $0x138] sm:$0xff]  ;;  %v96_v20 = vld [vmem:[#allocation2 + $0x1c8] sm:$0xff] }
  0x61   :  { %3882 = vmatpush1.bf16.msra.mxu1 %v3881_v52  ;;  %3852 = vmatprep.subr.bf16.mxu0 %v3851_v1  ;;  %v81_v52 = vld [vmem:[#allocation2 + $0x150] sm:$0xff] }
  0x62   :  { %396 = vmatmul.mubr.f32.gmra.mrb[12].mxu0 %v45_v37  ;;  %3884 = vmatprep.subr.bf16.mxu1 %v3883_v5  ;;  %v93_v5 = vld [vmem:[#allocation2 + $0x1b0] sm:$0xff] }
  0x63   :  { %845 = vmatmul.mubr.f32.gmra.mrb[12].mxu1 %v45_v37  ;;  %401 = vmatprep.mubr.f32.mxu0 %v4144_v0  ;;  %v72_v37 = vld [vmem:[#allocation2 + $0x108] sm:$0xff] }
  0x64   :  { %850 = vmatprep.mubr.f32.mxu1 %v4144_v0  ;;  %3854 = vmatpush1.bf16.msra.mxu0 %v3853_v6 }
  0x65   :  { %3886 = vmatpush1.bf16.msra.mxu1 %v3885_v9  ;;  %3856 = vmatprep.subr.bf16.mxu0 %v3855_v21 }
  0x66   :  { %402 = vmatmul.mubr.f32.gmra.mrb[14].mxu0 %v46_v38  ;;  %3888 = vmatprep.subr.bf16.mxu1 %v3887_v25  ;;  %v97_v25 = vld [vmem:[#allocation2 + $0x1d0] sm:$0xff] }
  0x67   :  { %851 = vmatmul.mubr.f32.gmra.mrb[14].mxu1 %v46_v38  ;;  %407 = vmatprep.mubr.f32.mxu0 %v4144_v0  ;;  %v112_v38 = vld [vmem:[#allocation4 + $0x48] sm:$0xff] }
  0x68   :  { %856 = vmatprep.mubr.f32.mxu1 %v4144_v0  ;;  %3858 = vmatpush1.bf16.msra.mxu0 %v3857_v26 }
  0x69   :  { %3890 = vmatpush1.bf16.msra.mxu1 %v3889_v30  ;;  %v98_v30 = vld [vmem:[#allocation2 + $0x1d8] sm:$0xff] }
  0x6a   :  { %408 = vmatmul.mubr.f32.gmra.mrb[16].mxu0 %v47_v39 }
  0x6b   :  { %857 = vmatmul.mubr.f32.gmra.mrb[16].mxu1 %v47_v39  ;;  %413 = vmatprep.mubr.f32.mxu0 %v4144_v0  ;;  %v124_v39 = vld [vmem:[#allocation4 + $0xa8] sm:$0xff] }
  0x6c   :  { %862 = vmatprep.mubr.f32.mxu1 %v4144_v0  ;;  %v3891_v41 = vpack.c.bf16 %v124_v39, %v112_v38 }
  0x6e   :  { %414 = vmatmul.mubr.f32.gmra.mrb[18].mxu0 %v48_v40  ;;  %3892 = vmatprep.subr.bf16.mxu0 %v3891_v41 }
  0x6f   :  { %863 = vmatmul.mubr.f32.gmra.mrb[18].mxu1 %v48_v40  ;;  %419 = vmatprep.mubr.f32.mxu0 %v4144_v0  ;;  %v114_v40 = vld [vmem:[#allocation4 + $0x58] sm:$0xff] }
  0x70   :  { %868 = vmatprep.mubr.f32.mxu1 %v4144_v0  ;;  %v3923_v43 = vpack.c.bf16 %v126_v42, %v114_v40  ;;  %v100_v40 = vld [vmem:[#allocation2 + $0x1e8] sm:$0xff] }
  0x72   :  { %420 = vmatmul.mubr.f32.gmra.mrb[20].mxu0 %v49_v53  ;;  %3924 = vmatprep.subr.bf16.mxu1 %v3923_v43 }
  0x73   :  { %869 = vmatmul.mubr.f32.gmra.mrb[20].mxu1 %v49_v53  ;;  %425 = vmatprep.mubr.f32.mxu0 %v4144_v0  ;;  %v82_v53 = vld [vmem:[#allocation2 + $0x158] sm:$0xff] }
  0x74   :  { %874 = vmatprep.mubr.f32.mxu1 %v4144_v0 }
  0x76   :  { %426 = vmatmul.mubr.f32.gmra.mrb[22].mxu0 %v50_v54 }
  0x77   :  { %875 = vmatmul.mubr.f32.gmra.mrb[22].mxu1 %v50_v54  ;;  %431 = vmatprep.mubr.f32.mxu0 %v4144_v0  ;;  %v83_v54 = vld [vmem:[#allocation2 + $0x160] sm:$0xff] }
  0x78   :  { %880 = vmatprep.mubr.f32.mxu1 %v4144_v0 }
  0x7a   :  { %432 = vmatmul.mubr.f32.gmra.mrb[24].mxu0 %v51_v55 }
  0x7b   :  { %881 = vmatmul.mubr.f32.gmra.mrb[24].mxu1 %v51_v55  ;;  %437 = vmatprep.mubr.f32.mxu0 %v4144_v0  ;;  %v84_v55 = vld [vmem:[#allocation2 + $0x168] sm:$0xff] }
  0x7c   :  { %886 = vmatprep.mubr.f32.mxu1 %v4144_v0 }
  0x7e   :  { %438 = vmatmul.mubr.f32.gmra.mrb[26].mxu0 %v52_v56 }
  0x7f   :  { %887 = vmatmul.mubr.f32.gmra.mrb[26].mxu1 %v52_v56  ;;  %443 = vmatprep.mubr.f32.mxu0 %v4144_v0  ;;  %v85_v56 = vld [vmem:[#allocation2 + $0x170] sm:$0xff] }
  0x80   :  { %892 = vmatprep.mubr.f32.mxu1 %v4144_v0 }
  0x82   :  { %444 = vmatmul.mubr.f32.gmra.mrb[28].mxu0 %v53_v57 }
  0x83   :  { %893 = vmatmul.mubr.f32.gmra.mrb[28].mxu1 %v53_v57  ;;  %449 = vmatprep.mubr.f32.mxu0 %v4144_v0  ;;  %v86_v57 = vld [vmem:[#allocation2 + $0x178] sm:$0xff] }
  0x84   :  { %898 = vmatprep.mubr.f32.mxu1 %v4144_v0 }
  0x86   :  { %450 = vmatmul.mubr.f32.gmra.mrb[30].mxu0 %v54_v58 }
  0x87   :  { %899 = vmatmul.mubr.f32.gmra.mrb[30].mxu1 %v54_v58  ;;  %455 = vmatprep.mubr.f32.mxu0 %v4144_v0  ;;  %v87_v58 = vld [vmem:[#allocation2 + $0x180] sm:$0xff] }
  0x88   :  { %904 = vmatprep.mubr.f32.mxu1 %v4144_v0 }
  0x8a   :  { %456 = vmatmul.mubr.f32.gmra.mrb[32].mxu0 %v55_v59 }
  0x8b   :  { %905 = vmatmul.mubr.f32.gmra.mrb[32].mxu1 %v55_v59  ;;  %461 = vmatprep.mubr.f32.mxu0 %v4144_v0  ;;  %v88_v59 = vld [vmem:[#allocation2 + $0x188] sm:$0xff] }
  0x8c   :  { %910 = vmatprep.mubr.f32.mxu1 %v4144_v0 }
  0x8e   :  { %462 = vmatmul.mubr.f32.gmra.mrb[34].mxu0 %v56_v60 }
  0x8f   :  { %911 = vmatmul.mubr.f32.gmra.mrb[34].mxu1 %v56_v60  ;;  %467 = vmatprep.mubr.f32.mxu0 %v4144_v0  ;;  %v89_v60 = vld [vmem:[#allocation2 + $0x190] sm:$0xff] }
  0x90   :  { %916 = vmatprep.mubr.f32.mxu1 %v4144_v0 }
  0x92   :  { %468 = vmatmul.mubr.f32.gmra.mrb[36].mxu0 %v57_v10 }
  0x93   :  { %917 = vmatmul.mubr.f32.gmra.mrb[36].mxu1 %v57_v10  ;;  %473 = vmatprep.mubr.f32.mxu0 %v4144_v0  ;;  %v94_v10 = vld [vmem:[#allocation2 + $0x1b8] sm:$0xff] }
  0x94   :  { %922 = vmatprep.mubr.f32.mxu1 %v4144_v0 }
  0x96   :  { %474 = vmatmul.mubr.f32.gmra.mrb[38].mxu0 %v58_v11 }
  0x97   :  { %923 = vmatmul.mubr.f32.gmra.mrb[38].mxu1 %v58_v11  ;;  %479 = vmatprep.mubr.f32.mxu0 %v4144_v0 }
  0x98   :  { %928 = vmatprep.mubr.f32.mxu1 %v4144_v0 }
  0x9a   :  { %480 = vmatmul.mubr.f32.gmra.mrb[40].mxu0 %v59_v12 }
  0x9b   :  { %929 = vmatmul.mubr.f32.gmra.mrb[40].mxu1 %v59_v12  ;;  %485 = vmatprep.mubr.f32.mxu0 %v4144_v0 }
  0x9c   :  { %934 = vmatprep.mubr.f32.mxu1 %v4144_v0 }
  0x9e   :  { %486 = vmatmul.mubr.f32.gmra.mrb[42].mxu0 %v60_v13 }
  0x9f   :  { %935 = vmatmul.mubr.f32.gmra.mrb[42].mxu1 %v60_v13  ;;  %491 = vmatprep.mubr.f32.mxu0 %v4144_v0 }
  0xa0   :  { %940 = vmatprep.mubr.f32.mxu1 %v4144_v0 }
  0xa2   :  { %492 = vmatmul.mubr.f32.gmra.mrb[44].mxu0 %v61_v14 }
  0xa3   :  { %941 = vmatmul.mubr.f32.gmra.mrb[44].mxu1 %v61_v14  ;;  %497 = vmatprep.mubr.f32.mxu0 %v4144_v0 }
  0xa4   :  { %946 = vmatprep.mubr.f32.mxu1 %v4144_v0 }
  0xa6   :  { %498 = vmatmul.mubr.f32.gmra.mrb[46].mxu0 %v62_v15 }
  0xa7   :  { %947 = vmatmul.mubr.f32.gmra.mrb[46].mxu1 %v62_v15  ;;  %503 = vmatprep.mubr.f32.mxu0 %v4144_v0  ;;  %v95_v15 = vld [vmem:[#allocation2 + $0x1c0] sm:$0xff] }
  0xa8   :  { %952 = vmatprep.mubr.f32.mxu1 %v4144_v0 }
  0xaa   :  { %504 = vmatmul.mubr.f32.gmra.mrb[48].mxu0 %v63_v16 }
  0xab   :  { %953 = vmatmul.mubr.f32.gmra.mrb[48].mxu1 %v63_v16  ;;  %509 = vmatprep.mubr.f32.mxu0 %v4144_v0 }
  0xac   :  { %958 = vmatprep.mubr.f32.mxu1 %v4144_v0 }
  0xae   :  { %510 = vmatmul.mubr.f32.gmra.mrb[50].mxu0 %v64_v17 }
  0xaf   :  { %959 = vmatmul.mubr.f32.gmra.mrb[50].mxu1 %v64_v17  ;;  %515 = vmatprep.mubr.f32.mxu0 %v4144_v0 }
  0xb0   :  { %964 = vmatprep.mubr.f32.mxu1 %v4144_v0 }
  0xb2   :  { %516 = vmatmul.mubr.f32.gmra.mrb[52].mxu0 %v65_v29 }
  0xb3   :  { %965 = vmatmul.mubr.f32.gmra.mrb[52].mxu1 %v65_v29  ;;  %521 = vmatprep.mubr.f32.mxu0 %v4144_v0 }
  0xb4   :  { %970 = vmatprep.mubr.f32.mxu1 %v4144_v0 }
  0xb6   :  { %522 = vmatmul.mubr.f32.gmra.mrb[54].mxu0 %v66_v31 }
  0xb7   :  { %971 = vmatmul.mubr.f32.gmra.mrb[54].mxu1 %v66_v31  ;;  %527 = vmatprep.mubr.f32.mxu0 %v4144_v0 }
  0xb8   :  { %976 = vmatprep.mubr.f32.mxu1 %v4144_v0 }
  0xba   :  { %528 = vmatmul.mubr.f32.gmra.mrb[56].mxu0 %v67_v32 }
  0xbb   :  { %977 = vmatmul.mubr.f32.gmra.mrb[56].mxu1 %v67_v32  ;;  %533 = vmatprep.mubr.f32.mxu0 %v4144_v0 }
  0xbc   :  { %982 = vmatprep.mubr.f32.mxu1 %v4144_v0 }
  0xbe   :  { %534 = vmatmul.mubr.f32.gmra.mrb[58].mxu0 %v68_v33 }
  0xbf   :  { %983 = vmatmul.mubr.f32.gmra.mrb[58].mxu1 %v68_v33  ;;  %539 = vmatprep.mubr.f32.mxu0 %v4144_v0 }
  0xc0   :  { %988 = vmatprep.mubr.f32.mxu1 %v4144_v0 }
  0xc2   :  { %540 = vmatmul.mubr.f32.gmra.mrb[60].mxu0 %v69_v34 }
  0xc3   :  { %989 = vmatmul.mubr.f32.gmra.mrb[60].mxu1 %v69_v34  ;;  %545 = vmatprep.mubr.f32.mxu0 %v4144_v0 }
  0xc4   :  { %994 = vmatprep.mubr.f32.mxu1 %v4144_v0 }
  0xc6   :  { %546 = vmatmul.mubr.f32.gmra.mrb[62].mxu0 %v70_v35 }
  0xc7   :  { %995 = vmatmul.mubr.f32.gmra.mrb[62].mxu1 %v70_v35  ;;  %551 = vmatprep.mubr.f32.mxu0 %v4144_v0  ;;  %v99_v35 = vld [vmem:[#allocation2 + $0x1e0] sm:$0xff] }
  0xc8   :  { %1000 = vmatprep.mubr.f32.mxu1 %v4144_v0 }
  0xca   :  { %552 = vmatmul.mubr.f32.gmra.mrb[64].mxu0 %v71_v36 }
  0xcb   :  { %1001 = vmatmul.mubr.f32.gmra.mrb[64].mxu1 %v71_v36  ;;  %557 = vmatprep.mubr.f32.mxu0 %v4144_v0 }
  0xcc   :  { %1006 = vmatprep.mubr.f32.mxu1 %v4144_v0 }
  0xce   :  { %558 = vmatmul.mubr.f32.gmra.mrb[66].mxu0 %v72_v37 }
  0xcf   :  { %1007 = vmatmul.mubr.f32.gmra.mrb[66].mxu1 %v72_v37  ;;  %563 = vmatprep.mubr.f32.mxu0 %v4144_v0 }
  0xd0   :  { %1012 = vmatprep.mubr.f32.mxu1 %v4144_v0 }
  0xd2   :  { %564 = vmatmul.mubr.f32.gmra.mrb[68].mxu0 %v73_v44 }
  0xd3   :  { %1013 = vmatmul.mubr.f32.gmra.mrb[68].mxu1 %v73_v44  ;;  %569 = vmatprep.mubr.f32.mxu0 %v4144_v0 }
  0xd4   :  { %1018 = vmatprep.mubr.f32.mxu1 %v4144_v0 }
  0xd6   :  { %570 = vmatmul.mubr.f32.gmra.mrb[70].mxu0 %v74_v45 }
  0xd7   :  { %1019 = vmatmul.mubr.f32.gmra.mrb[70].mxu1 %v74_v45  ;;  %575 = vmatprep.mubr.f32.mxu0 %v4144_v0  ;;  %v101_v45 = vld [vmem:[#allocation2 + $0x1f0] sm:$0xff] }
  0xd8   :  { %1024 = vmatprep.mubr.f32.mxu1 %v4144_v0 }
  0xda   :  { %576 = vmatmul.mubr.f32.gmra.mrb[72].mxu0 %v75_v46 }
  0xdb   :  { %1025 = vmatmul.mubr.f32.gmra.mrb[72].mxu1 %v75_v46  ;;  %581 = vmatprep.mubr.f32.mxu0 %v4144_v0 }
  0xdc   :  { %1030 = vmatprep.mubr.f32.mxu1 %v4144_v0 }
  0xde   :  { %582 = vmatmul.mubr.f32.gmra.mrb[74].mxu0 %v76_v47 }
  0xdf   :  { %1031 = vmatmul.mubr.f32.gmra.mrb[74].mxu1 %v76_v47  ;;  %587 = vmatprep.mubr.f32.mxu0 %v4144_v0 }
  0xe0   :  { %1036 = vmatprep.mubr.f32.mxu1 %v4144_v0 }
  0xe2   :  { %588 = vmatmul.mubr.f32.gmra.mrb[76].mxu0 %v77_v48 }
  0xe3   :  { %1037 = vmatmul.mubr.f32.gmra.mrb[76].mxu1 %v77_v48  ;;  %593 = vmatprep.mubr.f32.mxu0 %v4144_v0 }
  0xe4   :  { %1042 = vmatprep.mubr.f32.mxu1 %v4144_v0 }
  0xe6   :  { %594 = vmatmul.mubr.f32.gmra.mrb[78].mxu0 %v78_v49 }
  0xe7   :  { %1043 = vmatmul.mubr.f32.gmra.mrb[78].mxu1 %v78_v49  ;;  %599 = vmatprep.mubr.f32.mxu0 %v4144_v0 }
  0xe8   :  { %1048 = vmatprep.mubr.f32.mxu1 %v4144_v0 }
  0xea   :  { %600 = vmatmul.mubr.f32.gmra.mrb[80].mxu0 %v79_v50 }
  0xeb   :  { %1049 = vmatmul.mubr.f32.gmra.mrb[80].mxu1 %v79_v50  ;;  %605 = vmatprep.mubr.f32.mxu0 %v4144_v0  ;;  %v102_v50 = vld [vmem:[#allocation2 + $0x1f8] sm:$0xff] }
  0xec   :  { %1054 = vmatprep.mubr.f32.mxu1 %v4144_v0 }
  0xee   :  { %606 = vmatmul.mubr.f32.gmra.mrb[82].mxu0 %v80_v51 }
  0xef   :  { %1055 = vmatmul.mubr.f32.gmra.mrb[82].mxu1 %v80_v51  ;;  %611 = vmatprep.mubr.f32.mxu0 %v4144_v0  ;;  %v111_v51 = vld [vmem:[#allocation4 + $0x40] sm:$0xff] }
  0xf0   :  { %1060 = vmatprep.mubr.f32.mxu1 %v4144_v0 }
  0xf2   :  { %612 = vmatmul.mubr.f32.gmra.mrb[84].mxu0 %v81_v52 }
  0xf3   :  { %1061 = vmatmul.mubr.f32.gmra.mrb[84].mxu1 %v81_v52  ;;  %617 = vmatprep.mubr.f32.mxu0 %v4144_v0  ;;  %v123_v52 = vld [vmem:[#allocation4 + $0xa0] sm:$0xff] }
  0xf4   :  { %1066 = vmatprep.mubr.f32.mxu1 %v4144_v0 }
  0xf6   :  { %618 = vmatmul.mubr.f32.gmra.mrb[86].mxu0 %v82_v53 }
  0xf7   :  { %1067 = vmatmul.mubr.f32.gmra.mrb[86].mxu1 %v82_v53  ;;  %623 = vmatprep.mubr.f32.mxu0 %v4144_v0 }
  0xf8   :  { %1072 = vmatprep.mubr.f32.mxu1 %v4144_v0 }
  0xfa   :  { %624 = vmatmul.mubr.f32.gmra.mrb[88].mxu0 %v83_v54 }
  0xfb   :  { %1073 = vmatmul.mubr.f32.gmra.mrb[88].mxu1 %v83_v54  ;;  %629 = vmatprep.mubr.f32.mxu0 %v4144_v0  ;;  %v113_v54 = vld [vmem:[#allocation4 + $0x50] sm:$0xff] }
  0xfc   :  { %1078 = vmatprep.mubr.f32.mxu1 %v4144_v0 }
  0xfe   :  { %630 = vmatmul.mubr.f32.gmra.mrb[90].mxu0 %v84_v55 }
  0xff   :  { %1079 = vmatmul.mubr.f32.gmra.mrb[90].mxu1 %v84_v55  ;;  %635 = vmatprep.mubr.f32.mxu0 %v4144_v0  ;;  %v125_v55 = vld [vmem:[#allocation4 + $0xb0] sm:$0xff] }
 0x100   :  { %1084 = vmatprep.mubr.f32.mxu1 %v4144_v0 }
 0x102   :  { %636 = vmatmul.mubr.f32.gmra.mrb[92].mxu0 %v85_v56 }
 0x103   :  { %1085 = vmatmul.mubr.f32.gmra.mrb[92].mxu1 %v85_v56  ;;  %641 = vmatprep.mubr.f32.mxu0 %v4144_v0 }
 0x104   :  { %1090 = vmatprep.mubr.f32.mxu1 %v4144_v0 }
 0x106   :  { %642 = vmatmul.mubr.f32.gmra.mrb[94].mxu0 %v86_v57 }
 0x107   :  { %1091 = vmatmul.mubr.f32.gmra.mrb[94].mxu1 %v86_v57  ;;  %647 = vmatprep.mubr.f32.mxu0 %v4144_v0 }
 0x108   :  { %1096 = vmatprep.mubr.f32.mxu1 %v4144_v0 }
 0x10a   :  { %648 = vmatmul.mubr.f32.gmra.mrb[96].mxu0 %v87_v58 }
 0x10b   :  { %1097 = vmatmul.mubr.f32.gmra.mrb[96].mxu1 %v87_v58  ;;  %653 = vmatprep.mubr.f32.mxu0 %v4144_v0  ;;  %v136_v58 = vld [vmem:[#allocation4 + $0x108] sm:$0xff] }
 0x10c   :  { %1102 = vmatprep.mubr.f32.mxu1 %v4144_v0 }
 0x10e   :  { %654 = vmatmul.mubr.f32.gmra.mrb[98].mxu0 %v88_v59 }
 0x10f   :  { %1103 = vmatmul.mubr.f32.gmra.mrb[98].mxu1 %v88_v59  ;;  %659 = vmatprep.mubr.f32.mxu0 %v4144_v0  ;;  %v148_v59 = vld [vmem:[#allocation4 + $0x168] sm:$0xff] }
 0x110   :  { %1108 = vmatprep.mubr.f32.mxu1 %v4144_v0 }
 0x112   :  { %660 = vmatmul.mubr.f32.gmra.mrb[100].mxu0 %v89_v60 }
 0x113   :  { %1109 = vmatmul.mubr.f32.gmra.mrb[100].mxu1 %v89_v60  ;;  %665 = vmatprep.mubr.f32.mxu0 %v4144_v0 }
 0x114   :  { %1114 = vmatprep.mubr.f32.mxu1 %v4144_v0 }
 0x116   :  { %666 = vmatmul.mubr.f32.gmra.mrb[102].mxu0 %v90_v61 }
 0x117   :  { %1115 = vmatmul.mubr.f32.gmra.mrb[102].mxu1 %v90_v61  ;;  %671 = vmatprep.mubr.f32.mxu0 %v4144_v0  ;;  %v3893_v61 = vpack.c.bf16 %v123_v52, %v111_v51 }
 0x118   :  { %1120 = vmatprep.mubr.f32.mxu1 %v4144_v0 }
 0x11a   :  { %672 = vmatmul.mubr.f32.gmra.mrb[104].mxu0 %v91_v62 }
 0x11b   :  { %1121 = vmatmul.mubr.f32.gmra.mrb[104].mxu1 %v91_v62  ;;  %677 = vmatprep.mubr.f32.mxu0 %v4144_v0  ;;  %v138_v62 = vld [vmem:[#allocation4 + $0x118] sm:$0xff] }
 0x11c   :  { %1126 = vmatprep.mubr.f32.mxu1 %v4144_v0 }
 0x11d   :  { %v361_v1 = vpop.f32.mrb[0].mxu0 }
 0x11e   :  { %2989 = vst [vmem:[%s6874_s2] sm:$0xff] %v361_v1  ;;  %v810_v2 = vpop.f32.mrb[0].mxu1  ;;  %v363_v3 = vpop.f32.mrb[1].mxu0  ;;  %678 = vmatmul.mubr.f32.gmra.mrb[106].mxu0 %v92_v63  ;;  %v3925_v1 = vpack.c.bf16 %v125_v55, %v113_v54  ;;  %v207_v55 = vld [vmem:[#allocation4 + $0x340] sm:$0xff] }
 0x11f   :  { %2991 = vst [vmem:[%s6874_s2 + $0x10] sm:$0xff] %v810_v2  ;;  %2990 = vst [vmem:[%s6874_s2 + $0x8] sm:$0xff] %v363_v3  ;;  %v812_v4 = vpop.f32.mrb[1].mxu1  ;;  %1127 = vmatmul.mubr.f32.gmra.mrb[106].mxu1 %v92_v63  ;;  %683 = vmatprep.mubr.f32.mxu0 %v4144_v0  ;;  %v150_v63 = vld [vmem:[#allocation4 + $0x178] sm:$0xff]  ;;  %v3895_v3 = vpack.c.bf16 %v148_v59, %v136_v58 }
 0x120   :  { %2992 = vst [vmem:[%s6874_s2 + $0x18] sm:$0xff] %v812_v4  ;;  %1132 = vmatprep.mubr.f32.mxu1 %v4144_v0  ;;  %v135_v4 = vld [vmem:[#allocation4 + $0x100] sm:$0xff]  ;;  %v3965_v59 = vld [vmem:[#allocation2 + $0x18] sm:$0xff] }
 0x121   :  { %v367_v6 = vpop.f32.mrb[2].mxu0 }
 0x122   :  { %3001 = vst [vmem:[%s6874_s2 + $0x60] sm:$0xff] %v367_v6  ;;  %v816_v7 = vpop.f32.mrb[2].mxu1  ;;  %v369_v8 = vpop.f32.mrb[3].mxu0  ;;  %684 = vmatmul.mubr.f32.gmra.mrb[108].mxu0 %v93_v5  ;;  %v137_v6 = vld [vmem:[#allocation4 + $0x110] sm:$0xff] }
 0x123   :  { %3003 = vst [vmem:[%s6874_s2 + $0x70] sm:$0xff] %v816_v7  ;;  %3002 = vst [vmem:[%s6874_s2 + $0x68] sm:$0xff] %v369_v8  ;;  %v818_v9 = vpop.f32.mrb[3].mxu1  ;;  %1133 = vmatmul.mubr.f32.gmra.mrb[108].mxu1 %v93_v5  ;;  %689 = vmatprep.mubr.f32.mxu0 %v4144_v0  ;;  %v147_v5 = vld [vmem:[#allocation4 + $0x160] sm:$0xff] }
 0x124   :  { %3004 = vst [vmem:[%s6874_s2 + $0x78] sm:$0xff] %v818_v9  ;;  %1138 = vmatprep.mubr.f32.mxu1 %v4144_v0  ;;  %v3962_v9 = vld [vmem:[#allocation2] sm:$0xff] }
 0x125   :  { %v373_v11 = vpop.f32.mrb[4].mxu0 }
 0x126   :  { %3013 = vst [vmem:[%s6874_s2 + $0xc0] sm:$0xff] %v373_v11  ;;  %v822_v12 = vpop.f32.mrb[4].mxu1  ;;  %v375_v13 = vpop.f32.mrb[5].mxu0  ;;  %690 = vmatmul.mubr.f32.gmra.mrb[110].mxu0 %v94_v10  ;;  %v149_v11 = vld [vmem:[#allocation4 + $0x170] sm:$0xff] }
 0x127   :  { %3015 = vst [vmem:[%s6874_s2 + $0xd0] sm:$0xff] %v822_v12  ;;  %3014 = vst [vmem:[%s6874_s2 + $0xc8] sm:$0xff] %v375_v13  ;;  %v824_v14 = vpop.f32.mrb[5].mxu1  ;;  %1139 = vmatmul.mubr.f32.gmra.mrb[110].mxu1 %v94_v10  ;;  %695 = vmatprep.mubr.f32.mxu0 %v4144_v0  ;;  %v3927_v10 = vpack.c.bf16 %v150_v63, %v138_v62  ;;  %v160_v12 = vld [vmem:[#allocation4 + $0x1c8] sm:$0xff]  ;;  %v221_v62 = vld [vmem:[#allocation4 + $0x3b0] sm:$0xff] }
 0x128   :  { %3016 = vst [vmem:[%s6874_s2 + $0xd8] sm:$0xff] %v824_v14  ;;  %1144 = vmatprep.mubr.f32.mxu1 %v4144_v0  ;;  %v172_v13 = vld [vmem:[#allocation4 + $0x228] sm:$0xff] }
 0x129   :  { %v379_v16 = vpop.f32.mrb[6].mxu0 }
 0x12a   :  { %3025 = vst [vmem:[%s6874_s2 + $0x120] sm:$0xff] %v379_v16  ;;  %v828_v17 = vpop.f32.mrb[6].mxu1  ;;  %v381_v18 = vpop.f32.mrb[7].mxu0  ;;  %696 = vmatmul.mubr.f32.gmra.mrb[112].mxu0 %v95_v15  ;;  %v174_v16 = vld [vmem:[#allocation4 + $0x238] sm:$0xff] }
 0x12b   :  { %3027 = vst [vmem:[%s6874_s2 + $0x130] sm:$0xff] %v828_v17  ;;  %3026 = vst [vmem:[%s6874_s2 + $0x128] sm:$0xff] %v381_v18  ;;  %v830_v19 = vpop.f32.mrb[7].mxu1  ;;  %1145 = vmatmul.mubr.f32.gmra.mrb[112].mxu1 %v95_v15  ;;  %701 = vmatprep.mubr.f32.mxu0 %v4144_v0  ;;  %v162_v15 = vld [vmem:[#allocation4 + $0x1d8] sm:$0xff]  ;;  %v3897_v17 = vpack.c.bf16 %v147_v5, %v135_v4 }
 0x12c   :  { %3028 = vst [vmem:[%s6874_s2 + $0x138] sm:$0xff] %v830_v19  ;;  %1150 = vmatprep.mubr.f32.mxu1 %v4144_v0  ;;  %v3929_v19 = vpack.c.bf16 %v149_v11, %v137_v6  ;;  %v3966_v6 = vld [vmem:[#allocation2 + $0x20] sm:$0xff]  ;;  %v3967_v11 = vld [vmem:[#allocation2 + $0x28] sm:$0xff] }
 0x12d   :  { %v385_v21 = vpop.f32.mrb[8].mxu0 }
 0x12e   :  { %3037 = vst [vmem:[%s6874_s2 + $0x180] sm:$0xff] %v385_v21  ;;  %v834_v22 = vpop.f32.mrb[8].mxu1  ;;  %v387_v23 = vpop.f32.mrb[9].mxu0  ;;  %702 = vmatmul.mubr.f32.gmra.mrb[114].mxu0 %v96_v20  ;;  %v159_v21 = vld [vmem:[#allocation4 + $0x1c0] sm:$0xff] }
 0x12f   :  { %3039 = vst [vmem:[%s6874_s2 + $0x190] sm:$0xff] %v834_v22  ;;  %3038 = vst [vmem:[%s6874_s2 + $0x188] sm:$0xff] %v387_v23  ;;  %v836_v24 = vpop.f32.mrb[9].mxu1  ;;  %1151 = vmatmul.mubr.f32.gmra.mrb[114].mxu1 %v96_v20  ;;  %707 = vmatprep.mubr.f32.mxu0 %v4144_v0  ;;  %v3899_v20 = vpack.c.bf16 %v172_v13, %v160_v12  ;;  %v171_v22 = vld [vmem:[#allocation4 + $0x220] sm:$0xff]  ;;  %v161_v23 = vld [vmem:[#allocation4 + $0x1d0] sm:$0xff] }
 0x130   :  { %3040 = vst [vmem:[%s6874_s2 + $0x198] sm:$0xff] %v836_v24  ;;  %1156 = vmatprep.mubr.f32.mxu1 %v4144_v0 }
 0x131   :  { %v391_v26 = vpop.f32.mrb[10].mxu0 }
 0x132   :  { %3049 = vst [vmem:[%s6874_s2 + $0x1e0] sm:$0xff] %v391_v26  ;;  %v840_v27 = vpop.f32.mrb[10].mxu1  ;;  %v393_v28 = vpop.f32.mrb[11].mxu0  ;;  %708 = vmatmul.mubr.f32.gmra.mrb[116].mxu0 %v97_v25  ;;  %v3963_v26 = vld [vmem:[#allocation2 + $0x8] sm:$0xff] }
 0x133   :  { %3051 = vst [vmem:[%s6874_s2 + $0x1f0] sm:$0xff] %v840_v27  ;;  %3050 = vst [vmem:[%s6874_s2 + $0x1e8] sm:$0xff] %v393_v28  ;;  %v842_v29 = vpop.f32.mrb[11].mxu1  ;;  %1157 = vmatmul.mubr.f32.gmra.mrb[116].mxu1 %v97_v25  ;;  %713 = vmatprep.mubr.f32.mxu0 %v4144_v0  ;;  %v3931_v27 = vpack.c.bf16 %v174_v16, %v162_v15  ;;  %v173_v28 = vld [vmem:[#allocation4 + $0x230] sm:$0xff] }
 0x134   :  { %3052 = vst [vmem:[%s6874_s2 + $0x1f8] sm:$0xff] %v842_v29  ;;  %1162 = vmatprep.mubr.f32.mxu1 %v4144_v0  ;;  %v184_v29 = vld [vmem:[#allocation4 + $0x288] sm:$0xff]  ;;  %v3968_v16 = vld [vmem:[#allocation2 + $0x30] sm:$0xff] }
 0x135   :  { %v397_v31 = vpop.f32.mrb[12].mxu0 }
 0x136   :  { %3061 = vst [vmem:[%s6874_s2 + $0x240] sm:$0xff] %v397_v31  ;;  %v846_v32 = vpop.f32.mrb[12].mxu1  ;;  %v399_v33 = vpop.f32.mrb[13].mxu0  ;;  %714 = vmatmul.mubr.f32.gmra.mrb[118].mxu0 %v98_v30 }
 0x137   :  { %3063 = vst [vmem:[%s6874_s2 + $0x250] sm:$0xff] %v846_v32  ;;  %3062 = vst [vmem:[%s6874_s2 + $0x248] sm:$0xff] %v399_v33  ;;  %v848_v34 = vpop.f32.mrb[13].mxu1  ;;  %1163 = vmatmul.mubr.f32.gmra.mrb[118].mxu1 %v98_v30  ;;  %719 = vmatprep.mubr.f32.mxu0 %v4144_v0  ;;  %v196_v30 = vld [vmem:[#allocation4 + $0x2e8] sm:$0xff]  ;;  %v186_v32 = vld [vmem:[#allocation4 + $0x298] sm:$0xff] }
 0x138   :  { %3064 = vst [vmem:[%s6874_s2 + $0x258] sm:$0xff] %v848_v34  ;;  %1168 = vmatprep.mubr.f32.mxu1 %v4144_v0  ;;  %v198_v33 = vld [vmem:[#allocation4 + $0x2f8] sm:$0xff]  ;;  %v3901_v34 = vpack.c.bf16 %v171_v22, %v159_v21 }
 0x139   :  { %v403_v36 = vpop.f32.mrb[14].mxu0  ;;  %v3969_v21 = vld [vmem:[#allocation2 + $0x38] sm:$0xff] }
 0x13a   :  { %3073 = vst [vmem:[%s6874_s2 + $0x2a0] sm:$0xff] %v403_v36  ;;  %v852_v37 = vpop.f32.mrb[14].mxu1  ;;  %v405_v38 = vpop.f32.mrb[15].mxu0  ;;  %720 = vmatmul.mubr.f32.gmra.mrb[120].mxu0 %v99_v35  ;;  %v3933_v36 = vpack.c.bf16 %v173_v28, %v161_v23  ;;  %v232_v28 = vld [vmem:[#allocation4 + $0x408] sm:$0xff] }
 0x13b   :  { %3075 = vst [vmem:[%s6874_s2 + $0x2b0] sm:$0xff] %v852_v37  ;;  %3074 = vst [vmem:[%s6874_s2 + $0x2a8] sm:$0xff] %v405_v38  ;;  %v854_v39 = vpop.f32.mrb[15].mxu1  ;;  %1169 = vmatmul.mubr.f32.gmra.mrb[120].mxu1 %v99_v35  ;;  %725 = vmatprep.mubr.f32.mxu0 %v4144_v0  ;;  %v3903_v37 = vpack.c.bf16 %v196_v30, %v184_v29  ;;  %v183_v38 = vld [vmem:[#allocation4 + $0x280] sm:$0xff]  ;;  %v244_v29 = vld [vmem:[#allocation4 + $0x468] sm:$0xff] }
 0x13c   :  { %3076 = vst [vmem:[%s6874_s2 + $0x2b8] sm:$0xff] %v854_v39  ;;  %1174 = vmatprep.mubr.f32.mxu1 %v4144_v0  ;;  %v195_v39 = vld [vmem:[#allocation4 + $0x2e0] sm:$0xff]  ;;  %v234_v30 = vld [vmem:[#allocation4 + $0x418] sm:$0xff] }
 0x13d   :  { %v409_v41 = vpop.f32.mrb[16].mxu0  ;;  %v3905_v51 = vpack.c.bf16 %v195_v39, %v183_v38  ;;  %v3971_v38 = vld [vmem:[#allocation2 + $0x48] sm:$0xff] }
 0x13e   :  { %3085 = vst [vmem:[%s6874_s2 + $0x300] sm:$0xff] %v409_v41  ;;  %v858_v42 = vpop.f32.mrb[16].mxu1  ;;  %v411_v43 = vpop.f32.mrb[17].mxu0  ;;  %726 = vmatmul.mubr.f32.gmra.mrb[122].mxu0 %v100_v40 }
 0x13f   :  { %3087 = vst [vmem:[%s6874_s2 + $0x310] sm:$0xff] %v858_v42  ;;  %3086 = vst [vmem:[%s6874_s2 + $0x308] sm:$0xff] %v411_v43  ;;  %v860_v44 = vpop.f32.mrb[17].mxu1  ;;  %1175 = vmatmul.mubr.f32.gmra.mrb[122].mxu1 %v100_v40  ;;  %731 = vmatprep.mubr.f32.mxu0 %v4144_v0  ;;  %v185_v40 = vld [vmem:[#allocation4 + $0x290] sm:$0xff] }
 0x140   :  { %3088 = vst [vmem:[%s6874_s2 + $0x318] sm:$0xff] %v860_v44  ;;  %1180 = vmatprep.mubr.f32.mxu1 %v4144_v0  ;;  %v3964_v43 = vld [vmem:[#allocation2 + $0x10] sm:$0xff]  ;;  %v3935_v44 = vpack.c.bf16 %v198_v33, %v186_v32  ;;  %v3911_v32 = vpack.c.bf16 %v244_v29, %v232_v28  ;;  %v246_v33 = vld [vmem:[#allocation4 + $0x478] sm:$0xff] }
 0x141   :  { %v415_v46 = vpop.f32.mrb[18].mxu0  ;;  %v3943_v39 = vpack.c.bf16 %v246_v33, %v234_v30  ;;  %v257_v30 = vld [vmem:[#allocation4 + $0x4d0] sm:$0xff] }
 0x142   :  { %3097 = vst [vmem:[%s6874_s2 + $0x360] sm:$0xff] %v415_v46  ;;  %v864_v47 = vpop.f32.mrb[18].mxu1  ;;  %v417_v48 = vpop.f32.mrb[19].mxu0  ;;  %732 = vmatmul.mubr.f32.gmra.mrb[124].mxu0 %v101_v45  ;;  %v208_v46 = vld [vmem:[#allocation4 + $0x348] sm:$0xff] }
 0x143   :  { %3099 = vst [vmem:[%s6874_s2 + $0x370] sm:$0xff] %v864_v47  ;;  %3098 = vst [vmem:[%s6874_s2 + $0x368] sm:$0xff] %v417_v48  ;;  %v866_v49 = vpop.f32.mrb[19].mxu1  ;;  %1181 = vmatmul.mubr.f32.gmra.mrb[124].mxu1 %v101_v45  ;;  %737 = vmatprep.mubr.f32.mxu0 %v4144_v0  ;;  %v197_v45 = vld [vmem:[#allocation4 + $0x2f0] sm:$0xff]  ;;  %v220_v47 = vld [vmem:[#allocation4 + $0x3a8] sm:$0xff] }
 0x144   :  { %3100 = vst [vmem:[%s6874_s2 + $0x378] sm:$0xff] %v866_v49  ;;  %1186 = vmatprep.mubr.f32.mxu1 %v4144_v0  ;;  %v210_v49 = vld [vmem:[#allocation4 + $0x358] sm:$0xff]  ;;  %v3907_v54 = vpack.c.bf16 %v220_v47, %v208_v46 }
 0x145   :  { %v421_v53 = vpop.f32.mrb[20].mxu0 }
 0x146   :  { %3109 = vst [vmem:[%s6874_s2 + $0x3c0] sm:$0xff] %v421_v53  ;;  %v870_v56 = vpop.f32.mrb[20].mxu1  ;;  %v423_v57 = vpop.f32.mrb[21].mxu0  ;;  %738 = vmatmul.mubr.f32.gmra.mrb[126].mxu0 %v102_v50  ;;  %v3937_v53 = vpack.c.bf16 %v197_v45, %v185_v40 }
 0x147   :  { %3111 = vst [vmem:[%s6874_s2 + $0x3d0] sm:$0xff] %v870_v56  ;;  %3110 = vst [vmem:[%s6874_s2 + $0x3c8] sm:$0xff] %v423_v57  ;;  %v872_v60 = vpop.f32.mrb[21].mxu1  ;;  %1187 = vmatmul.mubr.f32.gmra.mrb[126].mxu1 %v102_v50  ;;  %1257 = vmatprep.mubr.f32.mxu0 %v4144_v0  ;;  %v222_v50 = vld [vmem:[#allocation4 + $0x3b8] sm:$0xff]  ;;  %v219_v56 = vld [vmem:[#allocation4 + $0x3a0] sm:$0xff] }
 0x148   :  { %3112 = vst [vmem:[%s6874_s2 + $0x3d8] sm:$0xff] %v872_v60  ;;  %1706 = vmatprep.mubr.f32.mxu1 %v4144_v0  ;;  %v3939_v60 = vpack.c.bf16 %v222_v50, %v210_v49 }
 0x149   :  { %v427_v2 = vpop.f32.mrb[22].mxu0 }
 0x14a   :  { %3121 = vst [vmem:[%s6874_s2 + $0x420] sm:$0xff] %v427_v2  ;;  %v876_v7 = vpop.f32.mrb[22].mxu1  ;;  %v429_v8 = vpop.f32.mrb[23].mxu0  ;;  %1258 = vmatmul.mubr.f32.vlgmr.msra.gmra.mrb[128].mxu0 %v3962_v9 }
 0x14b   :  { %3123 = vst [vmem:[%s6874_s2 + $0x430] sm:$0xff] %v876_v7  ;;  %3122 = vst [vmem:[%s6874_s2 + $0x428] sm:$0xff] %v429_v8  ;;  %v878_v14 = vpop.f32.mrb[23].mxu1  ;;  %1707 = vmatmul.mubr.f32.vlgmr.msra.gmra.mrb[128].mxu1 %v3962_v9  ;;  %3894 = vmatpush1.bf16.msra.mxu0 %v3893_v61  ;;  %v209_v61 = vld [vmem:[#allocation4 + $0x350] sm:$0xff] }
 0x14c   :  { %3124 = vst [vmem:[%s6874_s2 + $0x438] sm:$0xff] %v878_v14  ;;  %3926 = vmatpush1.bf16.msra.mxu1 %v3925_v1  ;;  %1263 = vmatprep.mubr.f32.mxu0 %v4144_v0  ;;  %v3909_v1 = vpack.c.bf16 %v219_v56, %v207_v55 }
 0x14d   :  { %v433_v18 = vpop.f32.mrb[24].mxu0  ;;  %1712 = vmatprep.mubr.f32.mxu1 %v4144_v0  ;;  %3896 = vmatprep.subr.bf16.mxu0 %v3895_v3  ;;  %v3941_v3 = vpack.c.bf16 %v221_v62, %v209_v61 }
 0x14e   :  { %3133 = vst [vmem:[%s6874_s2 + $0x480] sm:$0xff] %v433_v18  ;;  %v882_v24 = vpop.f32.mrb[24].mxu1  ;;  %v435_v25 = vpop.f32.mrb[25].mxu0  ;;  %1264 = vmatmul.mubr.f32.gmra.mrb[130].mxu0 %v3963_v26  ;;  %3928 = vmatprep.subr.bf16.mxu1 %v3927_v10 }
 0x14f   :  { %3135 = vst [vmem:[%s6874_s2 + $0x490] sm:$0xff] %v882_v24  ;;  %3134 = vst [vmem:[%s6874_s2 + $0x488] sm:$0xff] %v435_v25  ;;  %v884_v31 = vpop.f32.mrb[25].mxu1  ;;  %1713 = vmatmul.mubr.f32.gmra.mrb[130].mxu1 %v3963_v26  ;;  %1269 = vmatprep.mubr.f32.mxu0 %v4144_v0  ;;  %v3970_v26 = vld [vmem:[#allocation2 + $0x40] sm:$0xff] }
 0x150   :  { %3136 = vst [vmem:[%s6874_s2 + $0x498] sm:$0xff] %v884_v31  ;;  %1718 = vmatprep.mubr.f32.mxu1 %v4144_v0  ;;  %3898 = vmatpush1.bf16.msra.mxu0 %v3897_v17 }
 0x151   :  { %v439_v35 = vpop.f32.mrb[26].mxu0  ;;  %3930 = vmatpush1.bf16.msra.mxu1 %v3929_v19  ;;  %3900 = vmatprep.subr.bf16.mxu0 %v3899_v20 }
 0x152   :  { %3145 = vst [vmem:[%s6874_s2 + $0x4e0] sm:$0xff] %v439_v35  ;;  %v888_v41 = vpop.f32.mrb[26].mxu1  ;;  %v441_v42 = vpop.f32.mrb[27].mxu0  ;;  %1270 = vmatmul.mubr.f32.gmra.mrb[132].mxu0 %v3964_v43  ;;  %3932 = vmatprep.subr.bf16.mxu1 %v3931_v27  ;;  %v243_v35 = vld [vmem:[#allocation4 + $0x460] sm:$0xff] }
 0x153   :  { %3147 = vst [vmem:[%s6874_s2 + $0x4f0] sm:$0xff] %v888_v41  ;;  %3146 = vst [vmem:[%s6874_s2 + $0x4e8] sm:$0xff] %v441_v42  ;;  %v890_v48 = vpop.f32.mrb[27].mxu1  ;;  %1719 = vmatmul.mubr.f32.gmra.mrb[132].mxu1 %v3964_v43  ;;  %1275 = vmatprep.mubr.f32.mxu0 %v4144_v0  ;;  %v233_v41 = vld [vmem:[#allocation4 + $0x410] sm:$0xff] }
 0x154   :  { %3148 = vst [vmem:[%s6874_s2 + $0x4f8] sm:$0xff] %v890_v48  ;;  %1724 = vmatprep.mubr.f32.mxu1 %v4144_v0  ;;  %3902 = vmatpush1.bf16.msra.mxu0 %v3901_v34  ;;  %v231_v34 = vld [vmem:[#allocation4 + $0x400] sm:$0xff]  ;;  %v245_v42 = vld [vmem:[#allocation4 + $0x470] sm:$0xff] }
 0x155   :  { %v445_v52 = vpop.f32.mrb[28].mxu0  ;;  %3934 = vmatpush1.bf16.msra.mxu1 %v3933_v36  ;;  %3904 = vmatprep.subr.bf16.mxu0 %v3903_v37  ;;  %v3913_v40 = vpack.c.bf16 %v243_v35, %v231_v34  ;;  %v3972_v48 = vld [vmem:[#allocation2 + $0x50] sm:$0xff] }
 0x156   :  { %3157 = vst [vmem:[%s6874_s2 + $0x540] sm:$0xff] %v445_v52  ;;  %v894_v57 = vpop.f32.mrb[28].mxu1  ;;  %v447_v58 = vpop.f32.mrb[29].mxu0  ;;  %1276 = vmatmul.mubr.f32.gmra.mrb[134].mxu0 %v3965_v59  ;;  %3936 = vmatprep.subr.bf16.mxu1 %v3935_v44  ;;  %v3945_v44 = vpack.c.bf16 %v245_v42, %v233_v41  ;;  %v3981_v42 = vld [vmem:[#allocation2 + $0x98] sm:$0xff] }
 0x157   :  { %3159 = vst [vmem:[%s6874_s2 + $0x550] sm:$0xff] %v894_v57  ;;  %3158 = vst [vmem:[%s6874_s2 + $0x548] sm:$0xff] %v447_v58  ;;  %v896_v63 = vpop.f32.mrb[29].mxu1  ;;  %1725 = vmatmul.mubr.f32.gmra.mrb[134].mxu1 %v3965_v59  ;;  %1281 = vmatprep.mubr.f32.mxu0 %v4144_v0  ;;  %v3974_v58 = vld [vmem:[#allocation2 + $0x60] sm:$0xff] }
 0x158   :  { %3160 = vst [vmem:[%s6874_s2 + $0x558] sm:$0xff] %v896_v63  ;;  %1730 = vmatprep.mubr.f32.mxu1 %v4144_v0  ;;  %3906 = vmatpush1.bf16.msra.mxu0 %v3905_v51  ;;  %v3975_v63 = vld [vmem:[#allocation2 + $0x68] sm:$0xff] }
 0x159   :  { %v451_v2 = vpop.f32.mrb[30].mxu0  ;;  %3938 = vmatpush1.bf16.msra.mxu1 %v3937_v53  ;;  %3908 = vmatprep.subr.bf16.mxu0 %v3907_v54  ;;  %v3973_v53 = vld [vmem:[#allocation2 + $0x58] sm:$0xff] }
 0x15a   :  { %3169 = vst [vmem:[%s6874_s2 + $0x5a0] sm:$0xff] %v451_v2  ;;  %v900_v4 = vpop.f32.mrb[30].mxu1  ;;  %v453_v5 = vpop.f32.mrb[31].mxu0  ;;  %1282 = vmatmul.mubr.f32.gmra.mrb[136].mxu0 %v3966_v6  ;;  %3940 = vmatprep.subr.bf16.mxu1 %v3939_v60 }
 0x15b   :  { %3171 = vst [vmem:[%s6874_s2 + $0x5b0] sm:$0xff] %v900_v4  ;;  %3170 = vst [vmem:[%s6874_s2 + $0x5a8] sm:$0xff] %v453_v5  ;;  %v902_v7 = vpop.f32.mrb[31].mxu1  ;;  %1731 = vmatmul.mubr.f32.gmra.mrb[136].mxu1 %v3966_v6  ;;  %1287 = vmatprep.mubr.f32.mxu0 %v4144_v0  ;;  %v3976_v5 = vld [vmem:[#allocation2 + $0x70] sm:$0xff] }
 0x15c   :  { %3172 = vst [vmem:[%s6874_s2 + $0x5b8] sm:$0xff] %v902_v7  ;;  %1736 = vmatprep.mubr.f32.mxu1 %v4144_v0  ;;  %3910 = vmatpush1.bf16.msra.mxu0 %v3909_v1 }
 0x15d   :  { %v457_v8 = vpop.f32.mrb[32].mxu0  ;;  %3942 = vmatpush1.bf16.msra.mxu1 %v3941_v3  ;;  %3912 = vmatprep.subr.bf16.mxu0 %v3911_v32 }
 0x15e   :  { %3181 = vst [vmem:[%s6874_s2 + $0x600] sm:$0xff] %v457_v8  ;;  %v906_v9 = vpop.f32.mrb[32].mxu1  ;;  %v459_v10 = vpop.f32.mrb[33].mxu0  ;;  %1288 = vmatmul.mubr.f32.gmra.mrb[138].mxu0 %v3967_v11  ;;  %3944 = vmatprep.subr.bf16.mxu1 %v3943_v39 }
 0x15f   :  { %3183 = vst [vmem:[%s6874_s2 + $0x610] sm:$0xff] %v906_v9  ;;  %3182 = vst [vmem:[%s6874_s2 + $0x608] sm:$0xff] %v459_v10  ;;  %v908_v12 = vpop.f32.mrb[33].mxu1  ;;  %1737 = vmatmul.mubr.f32.gmra.mrb[138].mxu1 %v3967_v11  ;;  %1293 = vmatprep.mubr.f32.mxu0 %v4144_v0  ;;  %v3977_v10 = vld [vmem:[#allocation2 + $0x78] sm:$0xff] }
 0x160   :  { %3184 = vst [vmem:[%s6874_s2 + $0x618] sm:$0xff] %v908_v12  ;;  %1742 = vmatprep.mubr.f32.mxu1 %v4144_v0  ;;  %3914 = vmatpush1.bf16.msra.mxu0 %v3913_v40 }
 0x161   :  { %v463_v13 = vpop.f32.mrb[34].mxu0  ;;  %3946 = vmatpush1.bf16.msra.mxu1 %v3945_v44 }
 0x162   :  { %3193 = vst [vmem:[%s6874_s2 + $0x660] sm:$0xff] %v463_v13  ;;  %v912_v14 = vpop.f32.mrb[34].mxu1  ;;  %v465_v15 = vpop.f32.mrb[35].mxu0  ;;  %1294 = vmatmul.mubr.f32.gmra.mrb[140].mxu0 %v3968_v16 }
 0x163   :  { %3195 = vst [vmem:[%s6874_s2 + $0x670] sm:$0xff] %v912_v14  ;;  %3194 = vst [vmem:[%s6874_s2 + $0x668] sm:$0xff] %v465_v15  ;;  %v914_v17 = vpop.f32.mrb[35].mxu1  ;;  %1743 = vmatmul.mubr.f32.gmra.mrb[140].mxu1 %v3968_v16  ;;  %1299 = vmatprep.mubr.f32.mxu0 %v4144_v0  ;;  %v3978_v15 = vld [vmem:[#allocation2 + $0x80] sm:$0xff] }
 0x164   :  { %3196 = vst [vmem:[%s6874_s2 + $0x678] sm:$0xff] %v914_v17  ;;  %1748 = vmatprep.mubr.f32.mxu1 %v4144_v0  ;;  %v256_v17 = vld [vmem:[#allocation4 + $0x4c8] sm:$0xff] }
 0x165   :  { %v469_v18 = vpop.f32.mrb[36].mxu0 }
 0x166   :  { %3205 = vst [vmem:[%s6874_s2 + $0x6c0] sm:$0xff] %v469_v18  ;;  %v918_v19 = vpop.f32.mrb[36].mxu1  ;;  %v471_v20 = vpop.f32.mrb[37].mxu0  ;;  %1300 = vmatmul.mubr.f32.gmra.mrb[142].mxu0 %v3969_v21  ;;  %v268_v18 = vld [vmem:[#allocation4 + $0x528] sm:$0xff] }
 0x167   :  { %3207 = vst [vmem:[%s6874_s2 + $0x6d0] sm:$0xff] %v918_v19  ;;  %3206 = vst [vmem:[%s6874_s2 + $0x6c8] sm:$0xff] %v471_v20  ;;  %v920_v22 = vpop.f32.mrb[37].mxu1  ;;  %1749 = vmatmul.mubr.f32.gmra.mrb[142].mxu1 %v3969_v21  ;;  %1305 = vmatprep.mubr.f32.mxu0 %v4144_v0  ;;  %v258_v19 = vld [vmem:[#allocation4 + $0x4d8] sm:$0xff]  ;;  %v3915_v21 = vpack.c.bf16 %v268_v18, %v256_v17 }
 0x168   :  { %3208 = vst [vmem:[%s6874_s2 + $0x6d8] sm:$0xff] %v920_v22  ;;  %1754 = vmatprep.mubr.f32.mxu1 %v4144_v0  ;;  %v270_v22 = vld [vmem:[#allocation4 + $0x538] sm:$0xff] }
 0x169   :  { %v475_v23 = vpop.f32.mrb[38].mxu0  ;;  %v3947_v28 = vpack.c.bf16 %v270_v22, %v258_v19  ;;  %3916 = vmatprep.subr.bf16.mxu0 %v3915_v21  ;;  %v281_v19 = vld [vmem:[#allocation4 + $0x590] sm:$0xff] }
 0x16a   :  { %3217 = vst [vmem:[%s6874_s2 + $0x720] sm:$0xff] %v475_v23  ;;  %v924_v24 = vpop.f32.mrb[38].mxu1  ;;  %v477_v25 = vpop.f32.mrb[39].mxu0  ;;  %1306 = vmatmul.mubr.f32.gmra.mrb[144].mxu0 %v3970_v26  ;;  %v255_v23 = vld [vmem:[#allocation4 + $0x4c0] sm:$0xff] }
 0x16b   :  { %3219 = vst [vmem:[%s6874_s2 + $0x730] sm:$0xff] %v924_v24  ;;  %3218 = vst [vmem:[%s6874_s2 + $0x728] sm:$0xff] %v477_v25  ;;  %v926_v27 = vpop.f32.mrb[39].mxu1  ;;  %1755 = vmatmul.mubr.f32.gmra.mrb[144].mxu1 %v3970_v26  ;;  %1311 = vmatprep.mubr.f32.mxu0 %v4144_v0  ;;  %v267_v24 = vld [vmem:[#allocation4 + $0x520] sm:$0xff] }
 0x16c   :  { %3220 = vst [vmem:[%s6874_s2 + $0x738] sm:$0xff] %v926_v27  ;;  %1760 = vmatprep.mubr.f32.mxu1 %v4144_v0  ;;  %v3979_v27 = vld [vmem:[#allocation2 + $0x88] sm:$0xff]  ;;  %v3917_v29 = vpack.c.bf16 %v267_v24, %v255_v23  ;;  %3948 = vmatprep.subr.bf16.mxu1 %v3947_v28 }
 0x16d   :  { %v481_v31 = vpop.f32.mrb[40].mxu0 }
 0x16e   :  { %3229 = vst [vmem:[%s6874_s2 + $0x780] sm:$0xff] %v481_v31  ;;  %v930_v36 = vpop.f32.mrb[40].mxu1  ;;  %v483_v37 = vpop.f32.mrb[41].mxu0  ;;  %1312 = vmatmul.mubr.f32.gmra.mrb[146].mxu0 %v3971_v38  ;;  %v269_v31 = vld [vmem:[#allocation4 + $0x530] sm:$0xff] }
 0x16f   :  { %3231 = vst [vmem:[%s6874_s2 + $0x790] sm:$0xff] %v930_v36  ;;  %3230 = vst [vmem:[%s6874_s2 + $0x788] sm:$0xff] %v483_v37  ;;  %v932_v43 = vpop.f32.mrb[41].mxu1  ;;  %1761 = vmatmul.mubr.f32.gmra.mrb[146].mxu1 %v3971_v38  ;;  %1317 = vmatprep.mubr.f32.mxu0 %v4144_v0  ;;  %v3949_v33 = vpack.c.bf16 %v269_v31, %v257_v30  ;;  %v3980_v37 = vld [vmem:[#allocation2 + $0x90] sm:$0xff]  ;;  %v3989_v31 = vld [vmem:[#allocation2 + $0xd8] sm:$0xff] }
 0x170   :  { %3232 = vst [vmem:[%s6874_s2 + $0x798] sm:$0xff] %v932_v43  ;;  %1766 = vmatprep.mubr.f32.mxu1 %v4144_v0  ;;  %3918 = vmatpush1.bf16.msra.mxu0 %v3917_v29 }
 0x171   :  { %v487_v45 = vpop.f32.mrb[42].mxu0  ;;  %3950 = vmatpush1.bf16.msra.mxu1 %v3949_v33 }
 0x172   :  { %3241 = vst [vmem:[%s6874_s2 + $0x7e0] sm:$0xff] %v487_v45  ;;  %v936_v46 = vpop.f32.mrb[42].mxu1  ;;  %v489_v47 = vpop.f32.mrb[43].mxu0  ;;  %1318 = vmatmul.mubr.f32.gmra.mrb[148].mxu0 %v3972_v48 }
 0x173   :  { %3243 = vst [vmem:[%s6874_s2 + $0x7f0] sm:$0xff] %v936_v46  ;;  %3242 = vst [vmem:[%s6874_s2 + $0x7e8] sm:$0xff] %v489_v47  ;;  %v938_v49 = vpop.f32.mrb[43].mxu1  ;;  %1767 = vmatmul.mubr.f32.gmra.mrb[148].mxu1 %v3972_v48  ;;  %1323 = vmatprep.mubr.f32.mxu0 %v4144_v0  ;;  %v3982_v47 = vld [vmem:[#allocation2 + $0xa0] sm:$0xff] }
 0x174   :  { %3244 = vst [vmem:[%s6874_s2 + $0x7f8] sm:$0xff] %v938_v49  ;;  %1772 = vmatprep.mubr.f32.mxu1 %v4144_v0 }
 0x175   :  { %v493_v50 = vpop.f32.mrb[44].mxu0 }
 0x176   :  { %3253 = vst [vmem:[%s6874_s2 + $0x840] sm:$0xff] %v493_v50  ;;  %v942_v51 = vpop.f32.mrb[44].mxu1  ;;  %v495_v52 = vpop.f32.mrb[45].mxu0  ;;  %1324 = vmatmul.mubr.f32.gmra.mrb[150].mxu0 %v3973_v53 }
 0x177   :  { %3255 = vst [vmem:[%s6874_s2 + $0x850] sm:$0xff] %v942_v51  ;;  %3254 = vst [vmem:[%s6874_s2 + $0x848] sm:$0xff] %v495_v52  ;;  %v944_v54 = vpop.f32.mrb[45].mxu1  ;;  %1773 = vmatmul.mubr.f32.gmra.mrb[150].mxu1 %v3973_v53  ;;  %1329 = vmatprep.mubr.f32.mxu0 %v4144_v0  ;;  %v3983_v52 = vld [vmem:[#allocation2 + $0xa8] sm:$0xff] }
 0x178   :  { %3256 = vst [vmem:[%s6874_s2 + $0x858] sm:$0xff] %v944_v54  ;;  %1778 = vmatprep.mubr.f32.mxu1 %v4144_v0 }
 0x179   :  { %v499_v55 = vpop.f32.mrb[46].mxu0 }
 0x17a   :  { %3265 = vst [vmem:[%s6874_s2 + $0x8a0] sm:$0xff] %v499_v55  ;;  %v948_v56 = vpop.f32.mrb[46].mxu1  ;;  %v501_v57 = vpop.f32.mrb[47].mxu0  ;;  %1330 = vmatmul.mubr.f32.gmra.mrb[152].mxu0 %v3974_v58 }
 0x17b   :  { %3267 = vst [vmem:[%s6874_s2 + $0x8b0] sm:$0xff] %v948_v56  ;;  %3266 = vst [vmem:[%s6874_s2 + $0x8a8] sm:$0xff] %v501_v57  ;;  %v950_v59 = vpop.f32.mrb[47].mxu1  ;;  %1779 = vmatmul.mubr.f32.gmra.mrb[152].mxu1 %v3974_v58  ;;  %1335 = vmatprep.mubr.f32.mxu0 %v4144_v0  ;;  %v3984_v57 = vld [vmem:[#allocation2 + $0xb0] sm:$0xff] }
 0x17c   :  { %3268 = vst [vmem:[%s6874_s2 + $0x8b8] sm:$0xff] %v950_v59  ;;  %1784 = vmatprep.mubr.f32.mxu1 %v4144_v0 }
 0x17d   :  { %v505_v60 = vpop.f32.mrb[48].mxu0 }
 0x17e   :  { %3277 = vst [vmem:[%s6874_s2 + $0x900] sm:$0xff] %v505_v60  ;;  %v954_v61 = vpop.f32.mrb[48].mxu1  ;;  %v507_v62 = vpop.f32.mrb[49].mxu0  ;;  %1336 = vmatmul.mubr.f32.gmra.mrb[154].mxu0 %v3975_v63 }
 0x17f   :  { %3279 = vst [vmem:[%s6874_s2 + $0x910] sm:$0xff] %v954_v61  ;;  %3278 = vst [vmem:[%s6874_s2 + $0x908] sm:$0xff] %v507_v62  ;;  %v956_v1 = vpop.f32.mrb[49].mxu1  ;;  %1785 = vmatmul.mubr.f32.gmra.mrb[154].mxu1 %v3975_v63  ;;  %1341 = vmatprep.mubr.f32.mxu0 %v4144_v0  ;;  %v3985_v62 = vld [vmem:[#allocation2 + $0xb8] sm:$0xff] }
 0x180   :  { %3280 = vst [vmem:[%s6874_s2 + $0x918] sm:$0xff] %v956_v1  ;;  %1790 = vmatprep.mubr.f32.mxu1 %v4144_v0 }
 0x181   :  { %v511_v2 = vpop.f32.mrb[50].mxu0 }
 0x182   :  { %3289 = vst [vmem:[%s6874_s2 + $0x960] sm:$0xff] %v511_v2  ;;  %v960_v3 = vpop.f32.mrb[50].mxu1  ;;  %v513_v4 = vpop.f32.mrb[51].mxu0  ;;  %1342 = vmatmul.mubr.f32.gmra.mrb[156].mxu0 %v3976_v5 }
 0x183   :  { %3291 = vst [vmem:[%s6874_s2 + $0x970] sm:$0xff] %v960_v3  ;;  %3290 = vst [vmem:[%s6874_s2 + $0x968] sm:$0xff] %v513_v4  ;;  %v962_v6 = vpop.f32.mrb[51].mxu1  ;;  %1791 = vmatmul.mubr.f32.gmra.mrb[156].mxu1 %v3976_v5  ;;  %1347 = vmatprep.mubr.f32.mxu0 %v4144_v0  ;;  %v3986_v4 = vld [vmem:[#allocation2 + $0xc0] sm:$0xff] }
 0x184   :  { %3292 = vst [vmem:[%s6874_s2 + $0x978] sm:$0xff] %v962_v6  ;;  %1796 = vmatprep.mubr.f32.mxu1 %v4144_v0  ;;  %v280_v6 = vld [vmem:[#allocation4 + $0x588] sm:$0xff] }
 0x185   :  { %v517_v7 = vpop.f32.mrb[52].mxu0 }
 0x186   :  { %3301 = vst [vmem:[%s6874_s2 + $0x9c0] sm:$0xff] %v517_v7  ;;  %v966_v8 = vpop.f32.mrb[52].mxu1  ;;  %v519_v9 = vpop.f32.mrb[53].mxu0  ;;  %1348 = vmatmul.mubr.f32.gmra.mrb[158].mxu0 %v3977_v10  ;;  %v292_v7 = vld [vmem:[#allocation4 + $0x5e8] sm:$0xff] }
 0x187   :  { %3303 = vst [vmem:[%s6874_s2 + $0x9d0] sm:$0xff] %v966_v8  ;;  %3302 = vst [vmem:[%s6874_s2 + $0x9c8] sm:$0xff] %v519_v9  ;;  %v968_v11 = vpop.f32.mrb[53].mxu1  ;;  %1797 = vmatmul.mubr.f32.gmra.mrb[158].mxu1 %v3977_v10  ;;  %1353 = vmatprep.mubr.f32.mxu0 %v4144_v0  ;;  %v282_v8 = vld [vmem:[#allocation4 + $0x598] sm:$0xff]  ;;  %v3919_v10 = vpack.c.bf16 %v292_v7, %v280_v6 }
 0x188   :  { %3304 = vst [vmem:[%s6874_s2 + $0x9d8] sm:$0xff] %v968_v11  ;;  %1802 = vmatprep.mubr.f32.mxu1 %v4144_v0  ;;  %v294_v11 = vld [vmem:[#allocation4 + $0x5f8] sm:$0xff] }
 0x189   :  { %v523_v12 = vpop.f32.mrb[54].mxu0  ;;  %v3951_v17 = vpack.c.bf16 %v294_v11, %v282_v8  ;;  %3920 = vmatprep.subr.bf16.mxu0 %v3919_v10  ;;  %v3997_v8 = vld [vmem:[#allocation2 + $0x118] sm:$0xff] }
 0x18a   :  { %3313 = vst [vmem:[%s6874_s2 + $0xa20] sm:$0xff] %v523_v12  ;;  %v972_v13 = vpop.f32.mrb[54].mxu1  ;;  %v525_v14 = vpop.f32.mrb[55].mxu0  ;;  %1354 = vmatmul.mubr.f32.gmra.mrb[160].mxu0 %v3978_v15  ;;  %v279_v12 = vld [vmem:[#allocation4 + $0x580] sm:$0xff] }
 0x18b   :  { %3315 = vst [vmem:[%s6874_s2 + $0xa30] sm:$0xff] %v972_v13  ;;  %3314 = vst [vmem:[%s6874_s2 + $0xa28] sm:$0xff] %v525_v14  ;;  %v974_v16 = vpop.f32.mrb[55].mxu1  ;;  %1803 = vmatmul.mubr.f32.gmra.mrb[160].mxu1 %v3978_v15  ;;  %1359 = vmatprep.mubr.f32.mxu0 %v4144_v0  ;;  %v291_v13 = vld [vmem:[#allocation4 + $0x5e0] sm:$0xff] }
 0x18c   :  { %3316 = vst [vmem:[%s6874_s2 + $0xa38] sm:$0xff] %v974_v16  ;;  %1808 = vmatprep.mubr.f32.mxu1 %v4144_v0  ;;  %v3987_v16 = vld [vmem:[#allocation2 + $0xc8] sm:$0xff]  ;;  %v3921_v18 = vpack.c.bf16 %v291_v13, %v279_v12  ;;  %3952 = vmatprep.subr.bf16.mxu1 %v3951_v17  ;;  %v3998_v13 = vld [vmem:[#allocation2 + $0x120] sm:$0xff] }
 0x18d   :  { %v529_v20 = vpop.f32.mrb[56].mxu0 }
 0x18e   :  { %3325 = vst [vmem:[%s6874_s2 + $0xa80] sm:$0xff] %v529_v20  ;;  %v978_v25 = vpop.f32.mrb[56].mxu1  ;;  %v531_v26 = vpop.f32.mrb[57].mxu0  ;;  %1360 = vmatmul.mubr.f32.gmra.mrb[162].mxu0 %v3979_v27  ;;  %v293_v20 = vld [vmem:[#allocation4 + $0x5f0] sm:$0xff] }
 0x18f   :  { %3327 = vst [vmem:[%s6874_s2 + $0xa90] sm:$0xff] %v978_v25  ;;  %3326 = vst [vmem:[%s6874_s2 + $0xa88] sm:$0xff] %v531_v26  ;;  %v980_v32 = vpop.f32.mrb[57].mxu1  ;;  %1809 = vmatmul.mubr.f32.gmra.mrb[162].mxu1 %v3979_v27  ;;  %1365 = vmatprep.mubr.f32.mxu0 %v4144_v0  ;;  %v3953_v22 = vpack.c.bf16 %v293_v20, %v281_v19  ;;  %v3988_v26 = vld [vmem:[#allocation2 + $0xd0] sm:$0xff] }
 0x190   :  { %3328 = vst [vmem:[%s6874_s2 + $0xa98] sm:$0xff] %v980_v32  ;;  %1814 = vmatprep.mubr.f32.mxu1 %v4144_v0  ;;  %3922 = vmatpush1.bf16.msra.mxu0 %v3921_v18  ;;  %v3999_v18 = vld [vmem:[#allocation2 + $0x128] sm:$0xff] }
 0x191   :  { %v535_v34 = vpop.f32.mrb[58].mxu0  ;;  %3954 = vmatpush1.bf16.msra.mxu1 %v3953_v22 }
 0x192   :  { %3337 = vst [vmem:[%s6874_s2 + $0xae0] sm:$0xff] %v535_v34  ;;  %v984_v35 = vpop.f32.mrb[58].mxu1  ;;  %v537_v36 = vpop.f32.mrb[59].mxu0  ;;  %1366 = vmatmul.mubr.f32.gmra.mrb[164].mxu0 %v3980_v37 }
 0x193   :  { %3339 = vst [vmem:[%s6874_s2 + $0xaf0] sm:$0xff] %v984_v35  ;;  %3338 = vst [vmem:[%s6874_s2 + $0xae8] sm:$0xff] %v537_v36  ;;  %v986_v38 = vpop.f32.mrb[59].mxu1  ;;  %1815 = vmatmul.mubr.f32.gmra.mrb[164].mxu1 %v3980_v37  ;;  %1371 = vmatprep.mubr.f32.mxu0 %v4144_v0  ;;  %v3990_v36 = vld [vmem:[#allocation2 + $0xe0] sm:$0xff] }
 0x194   :  { %3340 = vst [vmem:[%s6874_s2 + $0xaf8] sm:$0xff] %v986_v38  ;;  %1820 = vmatprep.mubr.f32.mxu1 %v4144_v0 }
 0x195   :  { %v541_v39 = vpop.f32.mrb[60].mxu0 }
 0x196   :  { %3349 = vst [vmem:[%s6874_s2 + $0xb40] sm:$0xff] %v541_v39  ;;  %v990_v40 = vpop.f32.mrb[60].mxu1  ;;  %v543_v41 = vpop.f32.mrb[61].mxu0  ;;  %1372 = vmatmul.mubr.f32.gmra.mrb[166].mxu0 %v3981_v42 }
 0x197   :  { %3351 = vst [vmem:[%s6874_s2 + $0xb50] sm:$0xff] %v990_v40  ;;  %3350 = vst [vmem:[%s6874_s2 + $0xb48] sm:$0xff] %v543_v41  ;;  %v992_v43 = vpop.f32.mrb[61].mxu1  ;;  %1821 = vmatmul.mubr.f32.gmra.mrb[166].mxu1 %v3981_v42  ;;  %1377 = vmatprep.mubr.f32.mxu0 %v4144_v0  ;;  %v3991_v41 = vld [vmem:[#allocation2 + $0xe8] sm:$0xff] }
 0x198   :  { %3352 = vst [vmem:[%s6874_s2 + $0xb58] sm:$0xff] %v992_v43  ;;  %1826 = vmatprep.mubr.f32.mxu1 %v4144_v0 }
 0x199   :  { %v547_v44 = vpop.f32.mrb[62].mxu0 }
 0x19a   :  { %3361 = vst [vmem:[%s6874_s2 + $0xba0] sm:$0xff] %v547_v44  ;;  %v996_v45 = vpop.f32.mrb[62].mxu1  ;;  %v549_v46 = vpop.f32.mrb[63].mxu0  ;;  %1378 = vmatmul.mubr.f32.gmra.mrb[168].mxu0 %v3982_v47 }
 0x19b   :  { %3363 = vst [vmem:[%s6874_s2 + $0xbb0] sm:$0xff] %v996_v45  ;;  %3362 = vst [vmem:[%s6874_s2 + $0xba8] sm:$0xff] %v549_v46  ;;  %v998_v48 = vpop.f32.mrb[63].mxu1  ;;  %1827 = vmatmul.mubr.f32.gmra.mrb[168].mxu1 %v3982_v47  ;;  %1383 = vmatprep.mubr.f32.mxu0 %v4144_v0  ;;  %v3992_v46 = vld [vmem:[#allocation2 + $0xf0] sm:$0xff] }
 0x19c   :  { %3364 = vst [vmem:[%s6874_s2 + $0xbb8] sm:$0xff] %v998_v48  ;;  %1832 = vmatprep.mubr.f32.mxu1 %v4144_v0 }
 0x19d   :  { %v553_v49 = vpop.f32.mrb[64].mxu0 }
 0x19e   :  { %3373 = vst [vmem:[%s6874_s2 + $0xc00] sm:$0xff] %v553_v49  ;;  %v1002_v50 = vpop.f32.mrb[64].mxu1  ;;  %v555_v51 = vpop.f32.mrb[65].mxu0  ;;  %1384 = vmatmul.mubr.f32.gmra.mrb[170].mxu0 %v3983_v52 }
 0x19f   :  { %3375 = vst [vmem:[%s6874_s2 + $0xc10] sm:$0xff] %v1002_v50  ;;  %3374 = vst [vmem:[%s6874_s2 + $0xc08] sm:$0xff] %v555_v51  ;;  %v1004_v53 = vpop.f32.mrb[65].mxu1  ;;  %1833 = vmatmul.mubr.f32.gmra.mrb[170].mxu1 %v3983_v52  ;;  %1389 = vmatprep.mubr.f32.mxu0 %v4144_v0  ;;  %v3993_v51 = vld [vmem:[#allocation2 + $0xf8] sm:$0xff] }
 0x1a0   :  { %3376 = vst [vmem:[%s6874_s2 + $0xc18] sm:$0xff] %v1004_v53  ;;  %1838 = vmatprep.mubr.f32.mxu1 %v4144_v0 }
 0x1a1   :  { %v559_v54 = vpop.f32.mrb[66].mxu0 }
 0x1a2   :  { %3385 = vst [vmem:[%s6874_s2 + $0xc60] sm:$0xff] %v559_v54  ;;  %v1008_v55 = vpop.f32.mrb[66].mxu1  ;;  %v561_v56 = vpop.f32.mrb[67].mxu0  ;;  %1390 = vmatmul.mubr.f32.gmra.mrb[172].mxu0 %v3984_v57 }
 0x1a3   :  { %3387 = vst [vmem:[%s6874_s2 + $0xc70] sm:$0xff] %v1008_v55  ;;  %3386 = vst [vmem:[%s6874_s2 + $0xc68] sm:$0xff] %v561_v56  ;;  %v1010_v58 = vpop.f32.mrb[67].mxu1  ;;  %1839 = vmatmul.mubr.f32.gmra.mrb[172].mxu1 %v3984_v57  ;;  %1395 = vmatprep.mubr.f32.mxu0 %v4144_v0  ;;  %v3994_v56 = vld [vmem:[#allocation2 + $0x100] sm:$0xff] }
 0x1a4   :  { %3388 = vst [vmem:[%s6874_s2 + $0xc78] sm:$0xff] %v1010_v58  ;;  %1844 = vmatprep.mubr.f32.mxu1 %v4144_v0 }
 0x1a5   :  { %v565_v59 = vpop.f32.mrb[68].mxu0 }
 0x1a6   :  { %3397 = vst [vmem:[%s6874_s2 + $0xcc0] sm:$0xff] %v565_v59  ;;  %v1014_v60 = vpop.f32.mrb[68].mxu1  ;;  %v567_v61 = vpop.f32.mrb[69].mxu0  ;;  %1396 = vmatmul.mubr.f32.gmra.mrb[174].mxu0 %v3985_v62 }
 0x1a7   :  { %3399 = vst [vmem:[%s6874_s2 + $0xcd0] sm:$0xff] %v1014_v60  ;;  %3398 = vst [vmem:[%s6874_s2 + $0xcc8] sm:$0xff] %v567_v61  ;;  %v1016_v63 = vpop.f32.mrb[69].mxu1  ;;  %1845 = vmatmul.mubr.f32.gmra.mrb[174].mxu1 %v3985_v62  ;;  %1401 = vmatprep.mubr.f32.mxu0 %v4144_v0  ;;  %v3995_v61 = vld [vmem:[#allocation2 + $0x108] sm:$0xff] }
 0x1a8   :  { %3400 = vst [vmem:[%s6874_s2 + $0xcd8] sm:$0xff] %v1016_v63  ;;  %1850 = vmatprep.mubr.f32.mxu1 %v4144_v0 }
 0x1a9   :  { %v571_v1 = vpop.f32.mrb[70].mxu0 }
 0x1aa   :  { %3409 = vst [vmem:[%s6874_s2 + $0xd20] sm:$0xff] %v571_v1  ;;  %v1020_v2 = vpop.f32.mrb[70].mxu1  ;;  %v573_v3 = vpop.f32.mrb[71].mxu0  ;;  %1402 = vmatmul.mubr.f32.gmra.mrb[176].mxu0 %v3986_v4 }
 0x1ab   :  { %3411 = vst [vmem:[%s6874_s2 + $0xd30] sm:$0xff] %v1020_v2  ;;  %3410 = vst [vmem:[%s6874_s2 + $0xd28] sm:$0xff] %v573_v3  ;;  %v1022_v5 = vpop.f32.mrb[71].mxu1  ;;  %1851 = vmatmul.mubr.f32.gmra.mrb[176].mxu1 %v3986_v4  ;;  %1407 = vmatprep.mubr.f32.mxu0 %v4144_v0  ;;  %v3996_v3 = vld [vmem:[#allocation2 + $0x110] sm:$0xff] }
 0x1ac   :  { %3412 = vst [vmem:[%s6874_s2 + $0xd38] sm:$0xff] %v1022_v5  ;;  %1856 = vmatprep.mubr.f32.mxu1 %v4144_v0 }
 0x1ad   :  { %v577_v9 = vpop.f32.mrb[72].mxu0 }
 0x1ae   :  { %3421 = vst [vmem:[%s6874_s2 + $0xd80] sm:$0xff] %v577_v9  ;;  %v1026_v14 = vpop.f32.mrb[72].mxu1  ;;  %v579_v15 = vpop.f32.mrb[73].mxu0  ;;  %1408 = vmatmul.mubr.f32.gmra.mrb[178].mxu0 %v3987_v16 }
 0x1af   :  { %3423 = vst [vmem:[%s6874_s2 + $0xd90] sm:$0xff] %v1026_v14  ;;  %3422 = vst [vmem:[%s6874_s2 + $0xd88] sm:$0xff] %v579_v15  ;;  %v1028_v21 = vpop.f32.mrb[73].mxu1  ;;  %1857 = vmatmul.mubr.f32.gmra.mrb[178].mxu1 %v3987_v16  ;;  %1413 = vmatprep.mubr.f32.mxu0 %v4144_v0 }
 0x1b0   :  { %3424 = vst [vmem:[%s6874_s2 + $0xd98] sm:$0xff] %v1028_v21  ;;  %1862 = vmatprep.mubr.f32.mxu1 %v4144_v0 }
 0x1b1   :  { %v583_v23 = vpop.f32.mrb[74].mxu0 }
 0x1b2   :  { %3433 = vst [vmem:[%s6874_s2 + $0xde0] sm:$0xff] %v583_v23  ;;  %v1032_v24 = vpop.f32.mrb[74].mxu1  ;;  %v585_v25 = vpop.f32.mrb[75].mxu0  ;;  %1414 = vmatmul.mubr.f32.gmra.mrb[180].mxu0 %v3988_v26  ;;  %v4000_v23 = vld [vmem:[#allocation2 + $0x130] sm:$0xff] }
 0x1b3   :  { %3435 = vst [vmem:[%s6874_s2 + $0xdf0] sm:$0xff] %v1032_v24  ;;  %3434 = vst [vmem:[%s6874_s2 + $0xde8] sm:$0xff] %v585_v25  ;;  %v1034_v27 = vpop.f32.mrb[75].mxu1  ;;  %1863 = vmatmul.mubr.f32.gmra.mrb[180].mxu1 %v3988_v26  ;;  %1419 = vmatprep.mubr.f32.mxu0 %v4144_v0 }
 0x1b4   :  { %3436 = vst [vmem:[%s6874_s2 + $0xdf8] sm:$0xff] %v1034_v27  ;;  %1868 = vmatprep.mubr.f32.mxu1 %v4144_v0 }
 0x1b5   :  { %v589_v28 = vpop.f32.mrb[76].mxu0 }
 0x1b6   :  { %3445 = vst [vmem:[%s6874_s2 + $0xe40] sm:$0xff] %v589_v28  ;;  %v1038_v29 = vpop.f32.mrb[76].mxu1  ;;  %v591_v30 = vpop.f32.mrb[77].mxu0  ;;  %1420 = vmatmul.mubr.f32.gmra.mrb[182].mxu0 %v3989_v31  ;;  %v4001_v28 = vld [vmem:[#allocation2 + $0x138] sm:$0xff] }
 0x1b7   :  { %3447 = vst [vmem:[%s6874_s2 + $0xe50] sm:$0xff] %v1038_v29  ;;  %3446 = vst [vmem:[%s6874_s2 + $0xe48] sm:$0xff] %v591_v30  ;;  %v1040_v32 = vpop.f32.mrb[77].mxu1  ;;  %1869 = vmatmul.mubr.f32.gmra.mrb[182].mxu1 %v3989_v31  ;;  %1425 = vmatprep.mubr.f32.mxu0 %v4144_v0 }
 0x1b8   :  { %3448 = vst [vmem:[%s6874_s2 + $0xe58] sm:$0xff] %v1040_v32  ;;  %1874 = vmatprep.mubr.f32.mxu1 %v4144_v0 }
 0x1b9   :  { %v595_v33 = vpop.f32.mrb[78].mxu0 }
 0x1ba   :  { %3457 = vst [vmem:[%s6874_s2 + $0xea0] sm:$0xff] %v595_v33  ;;  %v1044_v34 = vpop.f32.mrb[78].mxu1  ;;  %v597_v35 = vpop.f32.mrb[79].mxu0  ;;  %1426 = vmatmul.mubr.f32.gmra.mrb[184].mxu0 %v3990_v36  ;;  %v4002_v33 = vld [vmem:[#allocation2 + $0x140] sm:$0xff] }
 0x1bb   :  { %3459 = vst [vmem:[%s6874_s2 + $0xeb0] sm:$0xff] %v1044_v34  ;;  %3458 = vst [vmem:[%s6874_s2 + $0xea8] sm:$0xff] %v597_v35  ;;  %v1046_v37 = vpop.f32.mrb[79].mxu1  ;;  %1875 = vmatmul.mubr.f32.gmra.mrb[184].mxu1 %v3990_v36  ;;  %1431 = vmatprep.mubr.f32.mxu0 %v4144_v0 }
 0x1bc   :  { %3460 = vst [vmem:[%s6874_s2 + $0xeb8] sm:$0xff] %v1046_v37  ;;  %1880 = vmatprep.mubr.f32.mxu1 %v4144_v0 }
 0x1bd   :  { %v601_v38 = vpop.f32.mrb[80].mxu0 }
 0x1be   :  { %3469 = vst [vmem:[%s6874_s2 + $0xf00] sm:$0xff] %v601_v38  ;;  %v1050_v39 = vpop.f32.mrb[80].mxu1  ;;  %v603_v40 = vpop.f32.mrb[81].mxu0  ;;  %1432 = vmatmul.mubr.f32.gmra.mrb[186].mxu0 %v3991_v41  ;;  %v4003_v38 = vld [vmem:[#allocation2 + $0x148] sm:$0xff] }
 0x1bf   :  { %3471 = vst [vmem:[%s6874_s2 + $0xf10] sm:$0xff] %v1050_v39  ;;  %3470 = vst [vmem:[%s6874_s2 + $0xf08] sm:$0xff] %v603_v40  ;;  %v1052_v42 = vpop.f32.mrb[81].mxu1  ;;  %1881 = vmatmul.mubr.f32.gmra.mrb[186].mxu1 %v3991_v41  ;;  %1437 = vmatprep.mubr.f32.mxu0 %v4144_v0 }
 0x1c0   :  { %3472 = vst [vmem:[%s6874_s2 + $0xf18] sm:$0xff] %v1052_v42  ;;  %1886 = vmatprep.mubr.f32.mxu1 %v4144_v0 }
 0x1c1   :  { %v607_v43 = vpop.f32.mrb[82].mxu0 }
 0x1c2   :  { %3481 = vst [vmem:[%s6874_s2 + $0xf60] sm:$0xff] %v607_v43  ;;  %v1056_v44 = vpop.f32.mrb[82].mxu1  ;;  %v609_v45 = vpop.f32.mrb[83].mxu0  ;;  %1438 = vmatmul.mubr.f32.gmra.mrb[188].mxu0 %v3992_v46  ;;  %v4004_v43 = vld [vmem:[#allocation2 + $0x150] sm:$0xff] }
 0x1c3   :  { %3483 = vst [vmem:[%s6874_s2 + $0xf70] sm:$0xff] %v1056_v44  ;;  %3482 = vst [vmem:[%s6874_s2 + $0xf68] sm:$0xff] %v609_v45  ;;  %v1058_v47 = vpop.f32.mrb[83].mxu1  ;;  %1887 = vmatmul.mubr.f32.gmra.mrb[188].mxu1 %v3992_v46  ;;  %1443 = vmatprep.mubr.f32.mxu0 %v4144_v0 }
 0x1c4   :  { %3484 = vst [vmem:[%s6874_s2 + $0xf78] sm:$0xff] %v1058_v47  ;;  %1892 = vmatprep.mubr.f32.mxu1 %v4144_v0 }
 0x1c5   :  { %v613_v48 = vpop.f32.mrb[84].mxu0 }
 0x1c6   :  { %3493 = vst [vmem:[%s6874_s2 + $0xfc0] sm:$0xff] %v613_v48  ;;  %v1062_v49 = vpop.f32.mrb[84].mxu1  ;;  %v615_v50 = vpop.f32.mrb[85].mxu0  ;;  %1444 = vmatmul.mubr.f32.gmra.mrb[190].mxu0 %v3993_v51  ;;  %v4005_v48 = vld [vmem:[#allocation2 + $0x158] sm:$0xff] }
 0x1c7   :  { %3495 = vst [vmem:[%s6874_s2 + $0xfd0] sm:$0xff] %v1062_v49  ;;  %3494 = vst [vmem:[%s6874_s2 + $0xfc8] sm:$0xff] %v615_v50  ;;  %v1064_v52 = vpop.f32.mrb[85].mxu1  ;;  %1893 = vmatmul.mubr.f32.gmra.mrb[190].mxu1 %v3993_v51  ;;  %1449 = vmatprep.mubr.f32.mxu0 %v4144_v0 }
 0x1c8   :  { %3496 = vst [vmem:[%s6874_s2 + $0xfd8] sm:$0xff] %v1064_v52  ;;  %1898 = vmatprep.mubr.f32.mxu1 %v4144_v0 }
 0x1c9   :  { %v619_v53 = vpop.f32.mrb[86].mxu0 }
 0x1ca   :  { %3505 = vst [vmem:[%s6874_s2 + $0x1020] sm:$0xff] %v619_v53  ;;  %v1068_v54 = vpop.f32.mrb[86].mxu1  ;;  %v621_v55 = vpop.f32.mrb[87].mxu0  ;;  %1450 = vmatmul.mubr.f32.gmra.mrb[192].mxu0 %v3994_v56  ;;  %v4006_v53 = vld [vmem:[#allocation2 + $0x160] sm:$0xff] }
 0x1cb   :  { %3507 = vst [vmem:[%s6874_s2 + $0x1030] sm:$0xff] %v1068_v54  ;;  %3506 = vst [vmem:[%s6874_s2 + $0x1028] sm:$0xff] %v621_v55  ;;  %v1070_v57 = vpop.f32.mrb[87].mxu1  ;;  %1899 = vmatmul.mubr.f32.gmra.mrb[192].mxu1 %v3994_v56  ;;  %1455 = vmatprep.mubr.f32.mxu0 %v4144_v0 }
 0x1cc   :  { %3508 = vst [vmem:[%s6874_s2 + $0x1038] sm:$0xff] %v1070_v57  ;;  %1904 = vmatprep.mubr.f32.mxu1 %v4144_v0 }
 0x1cd   :  { %v625_v58 = vpop.f32.mrb[88].mxu0 }
 0x1ce   :  { %3517 = vst [vmem:[%s6874_s2 + $0x1080] sm:$0xff] %v625_v58  ;;  %v1074_v59 = vpop.f32.mrb[88].mxu1  ;;  %v627_v60 = vpop.f32.mrb[89].mxu0  ;;  %1456 = vmatmul.mubr.f32.gmra.mrb[194].mxu0 %v3995_v61  ;;  %v4007_v58 = vld [vmem:[#allocation2 + $0x168] sm:$0xff] }
 0x1cf   :  { %3519 = vst [vmem:[%s6874_s2 + $0x1090] sm:$0xff] %v1074_v59  ;;  %3518 = vst [vmem:[%s6874_s2 + $0x1088] sm:$0xff] %v627_v60  ;;  %v1076_v62 = vpop.f32.mrb[89].mxu1  ;;  %1905 = vmatmul.mubr.f32.gmra.mrb[194].mxu1 %v3995_v61  ;;  %1461 = vmatprep.mubr.f32.mxu0 %v4144_v0 }
 0x1d0   :  { %3520 = vst [vmem:[%s6874_s2 + $0x1098] sm:$0xff] %v1076_v62  ;;  %1910 = vmatprep.mubr.f32.mxu1 %v4144_v0 }
 0x1d1   :  { %v631_v63 = vpop.f32.mrb[90].mxu0 }
 0x1d2   :  { %3529 = vst [vmem:[%s6874_s2 + $0x10e0] sm:$0xff] %v631_v63  ;;  %v1080_v1 = vpop.f32.mrb[90].mxu1  ;;  %v633_v2 = vpop.f32.mrb[91].mxu0  ;;  %1462 = vmatmul.mubr.f32.gmra.mrb[196].mxu0 %v3996_v3  ;;  %v4008_v63 = vld [vmem:[#allocation2 + $0x170] sm:$0xff] }
 0x1d3   :  { %3531 = vst [vmem:[%s6874_s2 + $0x10f0] sm:$0xff] %v1080_v1  ;;  %3530 = vst [vmem:[%s6874_s2 + $0x10e8] sm:$0xff] %v633_v2  ;;  %v1082_v4 = vpop.f32.mrb[91].mxu1  ;;  %1911 = vmatmul.mubr.f32.gmra.mrb[196].mxu1 %v3996_v3  ;;  %1467 = vmatprep.mubr.f32.mxu0 %v4144_v0 }
 0x1d4   :  { %3532 = vst [vmem:[%s6874_s2 + $0x10f8] sm:$0xff] %v1082_v4  ;;  %1916 = vmatprep.mubr.f32.mxu1 %v4144_v0 }
 0x1d5   :  { %v637_v5 = vpop.f32.mrb[92].mxu0 }
 0x1d6   :  { %3541 = vst [vmem:[%s6874_s2 + $0x1140] sm:$0xff] %v637_v5  ;;  %v1086_v6 = vpop.f32.mrb[92].mxu1  ;;  %v639_v7 = vpop.f32.mrb[93].mxu0  ;;  %1468 = vmatmul.mubr.f32.gmra.mrb[198].mxu0 %v3997_v8  ;;  %v4009_v5 = vld [vmem:[#allocation2 + $0x178] sm:$0xff] }
 0x1d7   :  { %3543 = vst [vmem:[%s6874_s2 + $0x1150] sm:$0xff] %v1086_v6  ;;  %3542 = vst [vmem:[%s6874_s2 + $0x1148] sm:$0xff] %v639_v7  ;;  %v1088_v9 = vpop.f32.mrb[93].mxu1  ;;  %1917 = vmatmul.mubr.f32.gmra.mrb[198].mxu1 %v3997_v8  ;;  %1473 = vmatprep.mubr.f32.mxu0 %v4144_v0 }
 0x1d8   :  { %3544 = vst [vmem:[%s6874_s2 + $0x1158] sm:$0xff] %v1088_v9  ;;  %1922 = vmatprep.mubr.f32.mxu1 %v4144_v0 }
 0x1d9   :  { %v643_v10 = vpop.f32.mrb[94].mxu0 }
 0x1da   :  { %3553 = vst [vmem:[%s6874_s2 + $0x11a0] sm:$0xff] %v643_v10  ;;  %v1092_v11 = vpop.f32.mrb[94].mxu1  ;;  %v645_v12 = vpop.f32.mrb[95].mxu0  ;;  %1474 = vmatmul.mubr.f32.gmra.mrb[200].mxu0 %v3998_v13  ;;  %v4010_v10 = vld [vmem:[#allocation2 + $0x180] sm:$0xff] }
 0x1db   :  { %3555 = vst [vmem:[%s6874_s2 + $0x11b0] sm:$0xff] %v1092_v11  ;;  %3554 = vst [vmem:[%s6874_s2 + $0x11a8] sm:$0xff] %v645_v12  ;;  %v1094_v14 = vpop.f32.mrb[95].mxu1  ;;  %1923 = vmatmul.mubr.f32.gmra.mrb[200].mxu1 %v3998_v13  ;;  %1479 = vmatprep.mubr.f32.mxu0 %v4144_v0 }
 0x1dc   :  { %3556 = vst [vmem:[%s6874_s2 + $0x11b8] sm:$0xff] %v1094_v14  ;;  %1928 = vmatprep.mubr.f32.mxu1 %v4144_v0 }
 0x1dd   :  { %v649_v15 = vpop.f32.mrb[96].mxu0 }
 0x1de   :  { %3565 = vst [vmem:[%s6874_s2 + $0x1200] sm:$0xff] %v649_v15  ;;  %v1098_v16 = vpop.f32.mrb[96].mxu1  ;;  %v651_v17 = vpop.f32.mrb[97].mxu0  ;;  %1480 = vmatmul.mubr.f32.gmra.mrb[202].mxu0 %v3999_v18  ;;  %v4011_v15 = vld [vmem:[#allocation2 + $0x188] sm:$0xff] }
 0x1df   :  { %3567 = vst [vmem:[%s6874_s2 + $0x1210] sm:$0xff] %v1098_v16  ;;  %3566 = vst [vmem:[%s6874_s2 + $0x1208] sm:$0xff] %v651_v17  ;;  %v1100_v19 = vpop.f32.mrb[97].mxu1  ;;  %1929 = vmatmul.mubr.f32.gmra.mrb[202].mxu1 %v3999_v18  ;;  %1485 = vmatprep.mubr.f32.mxu0 %v4144_v0 }
 0x1e0   :  { %3568 = vst [vmem:[%s6874_s2 + $0x1218] sm:$0xff] %v1100_v19  ;;  %1934 = vmatprep.mubr.f32.mxu1 %v4144_v0 }
 0x1e1   :  { %v655_v20 = vpop.f32.mrb[98].mxu0 }
 0x1e2   :  { %3577 = vst [vmem:[%s6874_s2 + $0x1260] sm:$0xff] %v655_v20  ;;  %v1104_v21 = vpop.f32.mrb[98].mxu1  ;;  %v657_v22 = vpop.f32.mrb[99].mxu0  ;;  %1486 = vmatmul.mubr.f32.gmra.mrb[204].mxu0 %v4000_v23  ;;  %v4012_v20 = vld [vmem:[#allocation2 + $0x190] sm:$0xff] }
 0x1e3   :  { %3579 = vst [vmem:[%s6874_s2 + $0x1270] sm:$0xff] %v1104_v21  ;;  %3578 = vst [vmem:[%s6874_s2 + $0x1268] sm:$0xff] %v657_v22  ;;  %v1106_v24 = vpop.f32.mrb[99].mxu1  ;;  %1935 = vmatmul.mubr.f32.gmra.mrb[204].mxu1 %v4000_v23  ;;  %1491 = vmatprep.mubr.f32.mxu0 %v4144_v0 }
 0x1e4   :  { %3580 = vst [vmem:[%s6874_s2 + $0x1278] sm:$0xff] %v1106_v24  ;;  %1940 = vmatprep.mubr.f32.mxu1 %v4144_v0 }
 0x1e5   :  { %v661_v25 = vpop.f32.mrb[100].mxu0 }
 0x1e6   :  { %3589 = vst [vmem:[%s6874_s2 + $0x12c0] sm:$0xff] %v661_v25  ;;  %v1110_v26 = vpop.f32.mrb[100].mxu1  ;;  %v663_v27 = vpop.f32.mrb[101].mxu0  ;;  %1492 = vmatmul.mubr.f32.gmra.mrb[206].mxu0 %v4001_v28  ;;  %v4013_v25 = vld [vmem:[#allocation2 + $0x198] sm:$0xff] }
 0x1e7   :  { %3591 = vst [vmem:[%s6874_s2 + $0x12d0] sm:$0xff] %v1110_v26  ;;  %3590 = vst [vmem:[%s6874_s2 + $0x12c8] sm:$0xff] %v663_v27  ;;  %v1112_v29 = vpop.f32.mrb[101].mxu1  ;;  %1941 = vmatmul.mubr.f32.gmra.mrb[206].mxu1 %v4001_v28  ;;  %1497 = vmatprep.mubr.f32.mxu0 %v4144_v0 }
 0x1e8   :  { %3592 = vst [vmem:[%s6874_s2 + $0x12d8] sm:$0xff] %v1112_v29  ;;  %1946 = vmatprep.mubr.f32.mxu1 %v4144_v0 }
 0x1e9   :  { %v667_v30 = vpop.f32.mrb[102].mxu0 }
 0x1ea   :  { %3601 = vst [vmem:[%s6874_s2 + $0x1320] sm:$0xff] %v667_v30  ;;  %v1116_v31 = vpop.f32.mrb[102].mxu1  ;;  %v669_v32 = vpop.f32.mrb[103].mxu0  ;;  %1498 = vmatmul.mubr.f32.gmra.mrb[208].mxu0 %v4002_v33  ;;  %v4014_v30 = vld [vmem:[#allocation2 + $0x1a0] sm:$0xff] }
 0x1eb   :  { %3603 = vst [vmem:[%s6874_s2 + $0x1330] sm:$0xff] %v1116_v31  ;;  %3602 = vst [vmem:[%s6874_s2 + $0x1328] sm:$0xff] %v669_v32  ;;  %v1118_v34 = vpop.f32.mrb[103].mxu1  ;;  %1947 = vmatmul.mubr.f32.gmra.mrb[208].mxu1 %v4002_v33  ;;  %1503 = vmatprep.mubr.f32.mxu0 %v4144_v0 }
 0x1ec   :  { %3604 = vst [vmem:[%s6874_s2 + $0x1338] sm:$0xff] %v1118_v34  ;;  %1952 = vmatprep.mubr.f32.mxu1 %v4144_v0 }
 0x1ed   :  { %v673_v35 = vpop.f32.mrb[104].mxu0 }
 0x1ee   :  { %3613 = vst [vmem:[%s6874_s2 + $0x1380] sm:$0xff] %v673_v35  ;;  %v1122_v36 = vpop.f32.mrb[104].mxu1  ;;  %v675_v37 = vpop.f32.mrb[105].mxu0  ;;  %1504 = vmatmul.mubr.f32.gmra.mrb[210].mxu0 %v4003_v38  ;;  %v4015_v35 = vld [vmem:[#allocation2 + $0x1a8] sm:$0xff] }
 0x1ef   :  { %3615 = vst [vmem:[%s6874_s2 + $0x1390] sm:$0xff] %v1122_v36  ;;  %3614 = vst [vmem:[%s6874_s2 + $0x1388] sm:$0xff] %v675_v37  ;;  %v1124_v39 = vpop.f32.mrb[105].mxu1  ;;  %1953 = vmatmul.mubr.f32.gmra.mrb[210].mxu1 %v4003_v38  ;;  %1509 = vmatprep.mubr.f32.mxu0 %v4144_v0 }
 0x1f0   :  { %3616 = vst [vmem:[%s6874_s2 + $0x1398] sm:$0xff] %v1124_v39  ;;  %1958 = vmatprep.mubr.f32.mxu1 %v4144_v0 }
 0x1f1   :  { %v679_v40 = vpop.f32.mrb[106].mxu0 }
 0x1f2   :  { %3625 = vst [vmem:[%s6874_s2 + $0x13e0] sm:$0xff] %v679_v40  ;;  %v1128_v41 = vpop.f32.mrb[106].mxu1  ;;  %v681_v42 = vpop.f32.mrb[107].mxu0  ;;  %1510 = vmatmul.mubr.f32.gmra.mrb[212].mxu0 %v4004_v43  ;;  %v4016_v40 = vld [vmem:[#allocation2 + $0x1b0] sm:$0xff] }
 0x1f3   :  { %3627 = vst [vmem:[%s6874_s2 + $0x13f0] sm:$0xff] %v1128_v41  ;;  %3626 = vst [vmem:[%s6874_s2 + $0x13e8] sm:$0xff] %v681_v42  ;;  %v1130_v44 = vpop.f32.mrb[107].mxu1  ;;  %1959 = vmatmul.mubr.f32.gmra.mrb[212].mxu1 %v4004_v43  ;;  %1515 = vmatprep.mubr.f32.mxu0 %v4144_v0 }
 0x1f4   :  { %3628 = vst [vmem:[%s6874_s2 + $0x13f8] sm:$0xff] %v1130_v44  ;;  %1964 = vmatprep.mubr.f32.mxu1 %v4144_v0 }
 0x1f5   :  { %v685_v45 = vpop.f32.mrb[108].mxu0 }
 0x1f6   :  { %3637 = vst [vmem:[%s6874_s2 + $0x1440] sm:$0xff] %v685_v45  ;;  %v1134_v46 = vpop.f32.mrb[108].mxu1  ;;  %v687_v47 = vpop.f32.mrb[109].mxu0  ;;  %1516 = vmatmul.mubr.f32.gmra.mrb[214].mxu0 %v4005_v48  ;;  %v4017_v45 = vld [vmem:[#allocation2 + $0x1b8] sm:$0xff] }
 0x1f7   :  { %3639 = vst [vmem:[%s6874_s2 + $0x1450] sm:$0xff] %v1134_v46  ;;  %3638 = vst [vmem:[%s6874_s2 + $0x1448] sm:$0xff] %v687_v47  ;;  %v1136_v49 = vpop.f32.mrb[109].mxu1  ;;  %1965 = vmatmul.mubr.f32.gmra.mrb[214].mxu1 %v4005_v48  ;;  %1521 = vmatprep.mubr.f32.mxu0 %v4144_v0 }
 0x1f8   :  { %3640 = vst [vmem:[%s6874_s2 + $0x1458] sm:$0xff] %v1136_v49  ;;  %1970 = vmatprep.mubr.f32.mxu1 %v4144_v0 }
 0x1f9   :  { %v691_v50 = vpop.f32.mrb[110].mxu0 }
 0x1fa   :  { %3649 = vst [vmem:[%s6874_s2 + $0x14a0] sm:$0xff] %v691_v50  ;;  %v1140_v51 = vpop.f32.mrb[110].mxu1  ;;  %v693_v52 = vpop.f32.mrb[111].mxu0  ;;  %1522 = vmatmul.mubr.f32.gmra.mrb[216].mxu0 %v4006_v53  ;;  %v4018_v50 = vld [vmem:[#allocation2 + $0x1c0] sm:$0xff] }
 0x1fb   :  { %3651 = vst [vmem:[%s6874_s2 + $0x14b0] sm:$0xff] %v1140_v51  ;;  %3650 = vst [vmem:[%s6874_s2 + $0x14a8] sm:$0xff] %v693_v52  ;;  %v1142_v54 = vpop.f32.mrb[111].mxu1  ;;  %1971 = vmatmul.mubr.f32.gmra.mrb[216].mxu1 %v4006_v53  ;;  %1527 = vmatprep.mubr.f32.mxu0 %v4144_v0 }
 0x1fc   :  { %3652 = vst [vmem:[%s6874_s2 + $0x14b8] sm:$0xff] %v1142_v54  ;;  %1976 = vmatprep.mubr.f32.mxu1 %v4144_v0 }
 0x1fd   :  { %v697_v55 = vpop.f32.mrb[112].mxu0 }
 0x1fe   :  { %3661 = vst [vmem:[%s6874_s2 + $0x1500] sm:$0xff] %v697_v55  ;;  %v1146_v56 = vpop.f32.mrb[112].mxu1  ;;  %v699_v57 = vpop.f32.mrb[113].mxu0  ;;  %1528 = vmatmul.mubr.f32.gmra.mrb[218].mxu0 %v4007_v58  ;;  %v4019_v55 = vld [vmem:[#allocation2 + $0x1c8] sm:$0xff] }
 0x1ff   :  { %3663 = vst [vmem:[%s6874_s2 + $0x1510] sm:$0xff] %v1146_v56  ;;  %3662 = vst [vmem:[%s6874_s2 + $0x1508] sm:$0xff] %v699_v57  ;;  %v1148_v59 = vpop.f32.mrb[113].mxu1  ;;  %1977 = vmatmul.mubr.f32.gmra.mrb[218].mxu1 %v4007_v58  ;;  %1533 = vmatprep.mubr.f32.mxu0 %v4144_v0 }
 0x200   :  { %3664 = vst [vmem:[%s6874_s2 + $0x1518] sm:$0xff] %v1148_v59  ;;  %1982 = vmatprep.mubr.f32.mxu1 %v4144_v0 }
 0x201   :  { %v703_v60 = vpop.f32.mrb[114].mxu0 }
 0x202   :  { %3673 = vst [vmem:[%s6874_s2 + $0x1560] sm:$0xff] %v703_v60  ;;  %v1152_v61 = vpop.f32.mrb[114].mxu1  ;;  %v705_v62 = vpop.f32.mrb[115].mxu0  ;;  %1534 = vmatmul.mubr.f32.gmra.mrb[220].mxu0 %v4008_v63  ;;  %v4020_v60 = vld [vmem:[#allocation2 + $0x1d0] sm:$0xff] }
 0x203   :  { %3675 = vst [vmem:[%s6874_s2 + $0x1570] sm:$0xff] %v1152_v61  ;;  %3674 = vst [vmem:[%s6874_s2 + $0x1568] sm:$0xff] %v705_v62  ;;  %v1154_v1 = vpop.f32.mrb[115].mxu1  ;;  %1983 = vmatmul.mubr.f32.gmra.mrb[220].mxu1 %v4008_v63  ;;  %1539 = vmatprep.mubr.f32.mxu0 %v4144_v0 }
 0x204   :  { %3676 = vst [vmem:[%s6874_s2 + $0x1578] sm:$0xff] %v1154_v1  ;;  %1988 = vmatprep.mubr.f32.mxu1 %v4144_v0 }
 0x205   :  { %v709_v2 = vpop.f32.mrb[116].mxu0 }
 0x206   :  { %3685 = vst [vmem:[%s6874_s2 + $0x15c0] sm:$0xff] %v709_v2  ;;  %v1158_v3 = vpop.f32.mrb[116].mxu1  ;;  %v711_v4 = vpop.f32.mrb[117].mxu0  ;;  %1540 = vmatmul.mubr.f32.gmra.mrb[222].mxu0 %v4009_v5  ;;  %v4021_v2 = vld [vmem:[#allocation2 + $0x1d8] sm:$0xff] }
 0x207   :  { %3687 = vst [vmem:[%s6874_s2 + $0x15d0] sm:$0xff] %v1158_v3  ;;  %3686 = vst [vmem:[%s6874_s2 + $0x15c8] sm:$0xff] %v711_v4  ;;  %v1160_v6 = vpop.f32.mrb[117].mxu1  ;;  %1989 = vmatmul.mubr.f32.gmra.mrb[222].mxu1 %v4009_v5  ;;  %1545 = vmatprep.mubr.f32.mxu0 %v4144_v0 }
 0x208   :  { %3688 = vst [vmem:[%s6874_s2 + $0x15d8] sm:$0xff] %v1160_v6  ;;  %1994 = vmatprep.mubr.f32.mxu1 %v4144_v0 }
 0x209   :  { %v715_v7 = vpop.f32.mrb[118].mxu0 }
 0x20a   :  { %3697 = vst [vmem:[%s6874_s2 + $0x1620] sm:$0xff] %v715_v7  ;;  %v1164_v8 = vpop.f32.mrb[118].mxu1  ;;  %v717_v9 = vpop.f32.mrb[119].mxu0  ;;  %1546 = vmatmul.mubr.f32.gmra.mrb[224].mxu0 %v4010_v10  ;;  %v4022_v7 = vld [vmem:[#allocation2 + $0x1e0] sm:$0xff] }
 0x20b   :  { %3699 = vst [vmem:[%s6874_s2 + $0x1630] sm:$0xff] %v1164_v8  ;;  %3698 = vst [vmem:[%s6874_s2 + $0x1628] sm:$0xff] %v717_v9  ;;  %v1166_v11 = vpop.f32.mrb[119].mxu1  ;;  %1995 = vmatmul.mubr.f32.gmra.mrb[224].mxu1 %v4010_v10  ;;  %1551 = vmatprep.mubr.f32.mxu0 %v4144_v0 }
 0x20c   :  { %3700 = vst [vmem:[%s6874_s2 + $0x1638] sm:$0xff] %v1166_v11  ;;  %2000 = vmatprep.mubr.f32.mxu1 %v4144_v0 }
 0x20d   :  { %v721_v12 = vpop.f32.mrb[120].mxu0 }
 0x20e   :  { %3709 = vst [vmem:[%s6874_s2 + $0x1680] sm:$0xff] %v721_v12  ;;  %v1170_v13 = vpop.f32.mrb[120].mxu1  ;;  %v723_v14 = vpop.f32.mrb[121].mxu0  ;;  %1552 = vmatmul.mubr.f32.gmra.mrb[226].mxu0 %v4011_v15  ;;  %v4023_v12 = vld [vmem:[#allocation2 + $0x1e8] sm:$0xff] }
 0x20f   :  { %3711 = vst [vmem:[%s6874_s2 + $0x1690] sm:$0xff] %v1170_v13  ;;  %3710 = vst [vmem:[%s6874_s2 + $0x1688] sm:$0xff] %v723_v14  ;;  %v1172_v16 = vpop.f32.mrb[121].mxu1  ;;  %2001 = vmatmul.mubr.f32.gmra.mrb[226].mxu1 %v4011_v15  ;;  %1557 = vmatprep.mubr.f32.mxu0 %v4144_v0 }
 0x210   :  { %3712 = vst [vmem:[%s6874_s2 + $0x1698] sm:$0xff] %v1172_v16  ;;  %2006 = vmatprep.mubr.f32.mxu1 %v4144_v0 }
 0x211   :  { %v727_v17 = vpop.f32.mrb[122].mxu0 }
 0x212   :  { %3721 = vst [vmem:[%s6874_s2 + $0x16e0] sm:$0xff] %v727_v17  ;;  %v1176_v18 = vpop.f32.mrb[122].mxu1  ;;  %v729_v19 = vpop.f32.mrb[123].mxu0  ;;  %1558 = vmatmul.mubr.f32.gmra.mrb[228].mxu0 %v4012_v20  ;;  %v4024_v17 = vld [vmem:[#allocation2 + $0x1f0] sm:$0xff] }
 0x213   :  { %3723 = vst [vmem:[%s6874_s2 + $0x16f0] sm:$0xff] %v1176_v18  ;;  %3722 = vst [vmem:[%s6874_s2 + $0x16e8] sm:$0xff] %v729_v19  ;;  %v1178_v21 = vpop.f32.mrb[123].mxu1  ;;  %2007 = vmatmul.mubr.f32.gmra.mrb[228].mxu1 %v4012_v20  ;;  %1563 = vmatprep.mubr.f32.mxu0 %v4144_v0 }
 0x214   :  { %3724 = vst [vmem:[%s6874_s2 + $0x16f8] sm:$0xff] %v1178_v21  ;;  %2012 = vmatprep.mubr.f32.mxu1 %v4144_v0 }
 0x215   :  { %v733_v22 = vpop.f32.mrb[124].mxu0 }
 0x216   :  { %3733 = vst [vmem:[%s6874_s2 + $0x1740] sm:$0xff] %v733_v22  ;;  %v1182_v23 = vpop.f32.mrb[124].mxu1  ;;  %v735_v24 = vpop.f32.mrb[125].mxu0  ;;  %1564 = vmatmul.mubr.f32.gmra.mrb[230].mxu0 %v4013_v25  ;;  %v4025_v22 = vld [vmem:[#allocation2 + $0x1f8] sm:$0xff] }
 0x217   :  { %3735 = vst [vmem:[%s6874_s2 + $0x1750] sm:$0xff] %v1182_v23  ;;  %3734 = vst [vmem:[%s6874_s2 + $0x1748] sm:$0xff] %v735_v24  ;;  %v1184_v26 = vpop.f32.mrb[125].mxu1  ;;  %2013 = vmatmul.mubr.f32.gmra.mrb[230].mxu1 %v4013_v25  ;;  %1569 = vmatprep.mubr.f32.mxu0 %v4144_v0 }
 0x218   :  { %3736 = vst [vmem:[%s6874_s2 + $0x1758] sm:$0xff] %v1184_v26  ;;  %2018 = vmatprep.mubr.f32.mxu1 %v4144_v0 }
 0x219   :  { %v739_v27 = vpop.f32.mrb[126].mxu0 }
 0x21a   :  { %3745 = vst [vmem:[%s6874_s2 + $0x17a0] sm:$0xff] %v739_v27  ;;  %v1188_v28 = vpop.f32.mrb[126].mxu1  ;;  %v741_v29 = vpop.f32.mrb[127].mxu0  ;;  %1570 = vmatmul.mubr.f32.gmra.mrb[232].mxu0 %v4014_v30  ;;  %v4026_v27 = vld [vmem:[#allocation2] sm:$0xff] }
 0x21b   :  { %3747 = vst [vmem:[%s6874_s2 + $0x17b0] sm:$0xff] %v1188_v28  ;;  %3746 = vst [vmem:[%s6874_s2 + $0x17a8] sm:$0xff] %v741_v29  ;;  %v1190_v31 = vpop.f32.mrb[127].mxu1  ;;  %2019 = vmatmul.mubr.f32.gmra.mrb[232].mxu1 %v4014_v30  ;;  %1575 = vmatprep.mubr.f32.mxu0 %v4144_v0 }
 0x21c   :  { %3748 = vst [vmem:[%s6874_s2 + $0x17b8] sm:$0xff] %v1190_v31  ;;  %2024 = vmatprep.mubr.f32.mxu1 %v4144_v0 }
 0x21d   :  { %v1259_v32 = vpop.f32.mrb[128].mxu0 }
 0x21e   :  { %2993 = vst [vmem:[%s6874_s2 + $0x20] sm:$0xff] %v1259_v32  ;;  %v1708_v33 = vpop.f32.mrb[128].mxu1  ;;  %v1261_v34 = vpop.f32.mrb[129].mxu0  ;;  %1576 = vmatmul.mubr.f32.gmra.mrb[234].mxu0 %v4015_v35  ;;  %v4027_v32 = vld [vmem:[#allocation2 + $0x8] sm:$0xff] }
 0x21f   :  { %2995 = vst [vmem:[%s6874_s2 + $0x30] sm:$0xff] %v1708_v33  ;;  %2994 = vst [vmem:[%s6874_s2 + $0x28] sm:$0xff] %v1261_v34  ;;  %v1710_v36 = vpop.f32.mrb[129].mxu1  ;;  %2025 = vmatmul.mubr.f32.gmra.mrb[234].mxu1 %v4015_v35  ;;  %1581 = vmatprep.mubr.f32.mxu0 %v4144_v0 }
 0x220   :  { %2996 = vst [vmem:[%s6874_s2 + $0x38] sm:$0xff] %v1710_v36  ;;  %2030 = vmatprep.mubr.f32.mxu1 %v4144_v0 }
 0x221   :  { %v1265_v37 = vpop.f32.mrb[130].mxu0 }
 0x222   :  { %3005 = vst [vmem:[%s6874_s2 + $0x80] sm:$0xff] %v1265_v37  ;;  %v1714_v38 = vpop.f32.mrb[130].mxu1  ;;  %v1267_v39 = vpop.f32.mrb[131].mxu0  ;;  %1582 = vmatmul.mubr.f32.gmra.mrb[236].mxu0 %v4016_v40  ;;  %v4028_v37 = vld [vmem:[#allocation2 + $0x10] sm:$0xff] }
 0x223   :  { %3007 = vst [vmem:[%s6874_s2 + $0x90] sm:$0xff] %v1714_v38  ;;  %3006 = vst [vmem:[%s6874_s2 + $0x88] sm:$0xff] %v1267_v39  ;;  %v1716_v41 = vpop.f32.mrb[131].mxu1  ;;  %2031 = vmatmul.mubr.f32.gmra.mrb[236].mxu1 %v4016_v40  ;;  %1587 = vmatprep.mubr.f32.mxu0 %v4144_v0 }
 0x224   :  { %3008 = vst [vmem:[%s6874_s2 + $0x98] sm:$0xff] %v1716_v41  ;;  %2036 = vmatprep.mubr.f32.mxu1 %v4144_v0 }
 0x225   :  { %v1271_v42 = vpop.f32.mrb[132].mxu0 }
 0x226   :  { %3017 = vst [vmem:[%s6874_s2 + $0xe0] sm:$0xff] %v1271_v42  ;;  %v1720_v43 = vpop.f32.mrb[132].mxu1  ;;  %v1273_v44 = vpop.f32.mrb[133].mxu0  ;;  %1588 = vmatmul.mubr.f32.gmra.mrb[238].mxu0 %v4017_v45  ;;  %v4029_v42 = vld [vmem:[#allocation2 + $0x18] sm:$0xff] }
 0x227   :  { %3019 = vst [vmem:[%s6874_s2 + $0xf0] sm:$0xff] %v1720_v43  ;;  %3018 = vst [vmem:[%s6874_s2 + $0xe8] sm:$0xff] %v1273_v44  ;;  %v1722_v46 = vpop.f32.mrb[133].mxu1  ;;  %2037 = vmatmul.mubr.f32.gmra.mrb[238].mxu1 %v4017_v45  ;;  %1593 = vmatprep.mubr.f32.mxu0 %v4144_v0 }
 0x228   :  { %3020 = vst [vmem:[%s6874_s2 + $0xf8] sm:$0xff] %v1722_v46  ;;  %2042 = vmatprep.mubr.f32.mxu1 %v4144_v0 }
 0x229   :  { %v1277_v47 = vpop.f32.mrb[134].mxu0 }
 0x22a   :  { %3029 = vst [vmem:[%s6874_s2 + $0x140] sm:$0xff] %v1277_v47  ;;  %v1726_v48 = vpop.f32.mrb[134].mxu1  ;;  %v1279_v49 = vpop.f32.mrb[135].mxu0  ;;  %1594 = vmatmul.mubr.f32.gmra.mrb[240].mxu0 %v4018_v50  ;;  %v4030_v47 = vld [vmem:[#allocation2 + $0x20] sm:$0xff] }
 0x22b   :  { %3031 = vst [vmem:[%s6874_s2 + $0x150] sm:$0xff] %v1726_v48  ;;  %3030 = vst [vmem:[%s6874_s2 + $0x148] sm:$0xff] %v1279_v49  ;;  %v1728_v51 = vpop.f32.mrb[135].mxu1  ;;  %2043 = vmatmul.mubr.f32.gmra.mrb[240].mxu1 %v4018_v50  ;;  %1599 = vmatprep.mubr.f32.mxu0 %v4144_v0 }
 0x22c   :  { %3032 = vst [vmem:[%s6874_s2 + $0x158] sm:$0xff] %v1728_v51  ;;  %2048 = vmatprep.mubr.f32.mxu1 %v4144_v0 }
 0x22d   :  { %v1283_v52 = vpop.f32.mrb[136].mxu0 }
 0x22e   :  { %3041 = vst [vmem:[%s6874_s2 + $0x1a0] sm:$0xff] %v1283_v52  ;;  %v1732_v53 = vpop.f32.mrb[136].mxu1  ;;  %v1285_v54 = vpop.f32.mrb[137].mxu0  ;;  %1600 = vmatmul.mubr.f32.gmra.mrb[242].mxu0 %v4019_v55  ;;  %v4031_v52 = vld [vmem:[#allocation2 + $0x28] sm:$0xff] }
 0x22f   :  { %3043 = vst [vmem:[%s6874_s2 + $0x1b0] sm:$0xff] %v1732_v53  ;;  %3042 = vst [vmem:[%s6874_s2 + $0x1a8] sm:$0xff] %v1285_v54  ;;  %v1734_v56 = vpop.f32.mrb[137].mxu1  ;;  %2049 = vmatmul.mubr.f32.gmra.mrb[242].mxu1 %v4019_v55  ;;  %1605 = vmatprep.mubr.f32.mxu0 %v4144_v0 }
 0x230   :  { %3044 = vst [vmem:[%s6874_s2 + $0x1b8] sm:$0xff] %v1734_v56  ;;  %2054 = vmatprep.mubr.f32.mxu1 %v4144_v0 }
 0x231   :  { %v1289_v57 = vpop.f32.mrb[138].mxu0 }
 0x232   :  { %3053 = vst [vmem:[%s6874_s2 + $0x200] sm:$0xff] %v1289_v57  ;;  %v1738_v58 = vpop.f32.mrb[138].mxu1  ;;  %v1291_v59 = vpop.f32.mrb[139].mxu0  ;;  %1606 = vmatmul.mubr.f32.gmra.mrb[244].mxu0 %v4020_v60  ;;  %v4032_v57 = vld [vmem:[#allocation2 + $0x30] sm:$0xff] }
 0x233   :  { %3055 = vst [vmem:[%s6874_s2 + $0x210] sm:$0xff] %v1738_v58  ;;  %3054 = vst [vmem:[%s6874_s2 + $0x208] sm:$0xff] %v1291_v59  ;;  %v1740_v61 = vpop.f32.mrb[139].mxu1  ;;  %2055 = vmatmul.mubr.f32.gmra.mrb[244].mxu1 %v4020_v60  ;;  %1611 = vmatprep.mubr.f32.mxu0 %v4144_v0 }
 0x234   :  { %3056 = vst [vmem:[%s6874_s2 + $0x218] sm:$0xff] %v1740_v61  ;;  %2060 = vmatprep.mubr.f32.mxu1 %v4144_v0 }
 0x235   :  { %v1295_v62 = vpop.f32.mrb[140].mxu0 }
 0x236   :  { %3065 = vst [vmem:[%s6874_s2 + $0x260] sm:$0xff] %v1295_v62  ;;  %v1744_v63 = vpop.f32.mrb[140].mxu1  ;;  %v1297_v1 = vpop.f32.mrb[141].mxu0  ;;  %1612 = vmatmul.mubr.f32.gmra.mrb[246].mxu0 %v4021_v2  ;;  %v4033_v62 = vld [vmem:[#allocation2 + $0x38] sm:$0xff] }
 0x237   :  { %3067 = vst [vmem:[%s6874_s2 + $0x270] sm:$0xff] %v1744_v63  ;;  %3066 = vst [vmem:[%s6874_s2 + $0x268] sm:$0xff] %v1297_v1  ;;  %v1746_v3 = vpop.f32.mrb[141].mxu1  ;;  %2061 = vmatmul.mubr.f32.gmra.mrb[246].mxu1 %v4021_v2  ;;  %1617 = vmatprep.mubr.f32.mxu0 %v4144_v0 }
 0x238   :  { %3068 = vst [vmem:[%s6874_s2 + $0x278] sm:$0xff] %v1746_v3  ;;  %2066 = vmatprep.mubr.f32.mxu1 %v4144_v0 }
 0x239   :  { %v1301_v4 = vpop.f32.mrb[142].mxu0 }
 0x23a   :  { %3077 = vst [vmem:[%s6874_s2 + $0x2c0] sm:$0xff] %v1301_v4  ;;  %v1750_v5 = vpop.f32.mrb[142].mxu1  ;;  %v1303_v6 = vpop.f32.mrb[143].mxu0  ;;  %1618 = vmatmul.mubr.f32.gmra.mrb[248].mxu0 %v4022_v7  ;;  %v4034_v4 = vld [vmem:[#allocation2 + $0x40] sm:$0xff] }
 0x23b   :  { %3079 = vst [vmem:[%s6874_s2 + $0x2d0] sm:$0xff] %v1750_v5  ;;  %3078 = vst [vmem:[%s6874_s2 + $0x2c8] sm:$0xff] %v1303_v6  ;;  %v1752_v8 = vpop.f32.mrb[143].mxu1  ;;  %2067 = vmatmul.mubr.f32.gmra.mrb[248].mxu1 %v4022_v7  ;;  %1623 = vmatprep.mubr.f32.mxu0 %v4144_v0 }
 0x23c   :  { %3080 = vst [vmem:[%s6874_s2 + $0x2d8] sm:$0xff] %v1752_v8  ;;  %2072 = vmatprep.mubr.f32.mxu1 %v4144_v0 }
 0x23d   :  { %v1307_v9 = vpop.f32.mrb[144].mxu0 }
 0x23e   :  { %3089 = vst [vmem:[%s6874_s2 + $0x320] sm:$0xff] %v1307_v9  ;;  %v1756_v10 = vpop.f32.mrb[144].mxu1  ;;  %v1309_v11 = vpop.f32.mrb[145].mxu0  ;;  %1624 = vmatmul.mubr.f32.gmra.mrb[250].mxu0 %v4023_v12  ;;  %v4035_v9 = vld [vmem:[#allocation2 + $0x48] sm:$0xff] }
 0x23f   :  { %3091 = vst [vmem:[%s6874_s2 + $0x330] sm:$0xff] %v1756_v10  ;;  %3090 = vst [vmem:[%s6874_s2 + $0x328] sm:$0xff] %v1309_v11  ;;  %v1758_v13 = vpop.f32.mrb[145].mxu1  ;;  %2073 = vmatmul.mubr.f32.gmra.mrb[250].mxu1 %v4023_v12  ;;  %1629 = vmatprep.mubr.f32.mxu0 %v4144_v0 }
 0x240   :  { %3092 = vst [vmem:[%s6874_s2 + $0x338] sm:$0xff] %v1758_v13  ;;  %2078 = vmatprep.mubr.f32.mxu1 %v4144_v0 }
 0x241   :  { %v1313_v14 = vpop.f32.mrb[146].mxu0 }
 0x242   :  { %3101 = vst [vmem:[%s6874_s2 + $0x380] sm:$0xff] %v1313_v14  ;;  %v1762_v15 = vpop.f32.mrb[146].mxu1  ;;  %v1315_v16 = vpop.f32.mrb[147].mxu0  ;;  %1630 = vmatmul.mubr.f32.gmra.mrb[252].mxu0 %v4024_v17  ;;  %v4036_v14 = vld [vmem:[#allocation2 + $0x50] sm:$0xff] }
 0x243   :  { %3103 = vst [vmem:[%s6874_s2 + $0x390] sm:$0xff] %v1762_v15  ;;  %3102 = vst [vmem:[%s6874_s2 + $0x388] sm:$0xff] %v1315_v16  ;;  %v1764_v18 = vpop.f32.mrb[147].mxu1  ;;  %2079 = vmatmul.mubr.f32.gmra.mrb[252].mxu1 %v4024_v17  ;;  %1635 = vmatprep.mubr.f32.mxu0 %v4144_v0 }
 0x244   :  { %3104 = vst [vmem:[%s6874_s2 + $0x398] sm:$0xff] %v1764_v18  ;;  %2084 = vmatprep.mubr.f32.mxu1 %v4144_v0 }
 0x245   :  { %v1319_v19 = vpop.f32.mrb[148].mxu0 }
 0x246   :  { %3113 = vst [vmem:[%s6874_s2 + $0x3e0] sm:$0xff] %v1319_v19  ;;  %v1768_v20 = vpop.f32.mrb[148].mxu1  ;;  %v1321_v21 = vpop.f32.mrb[149].mxu0  ;;  %1636 = vmatmul.mubr.f32.gmra.mrb[254].mxu0 %v4025_v22  ;;  %v4037_v19 = vld [vmem:[#allocation2 + $0x58] sm:$0xff] }
 0x247   :  { %3115 = vst [vmem:[%s6874_s2 + $0x3f0] sm:$0xff] %v1768_v20  ;;  %3114 = vst [vmem:[%s6874_s2 + $0x3e8] sm:$0xff] %v1321_v21  ;;  %v1770_v23 = vpop.f32.mrb[149].mxu1  ;;  %2085 = vmatmul.mubr.f32.gmra.mrb[254].mxu1 %v4025_v22  ;;  %2155 = vmatprep.mubr.f32.mxu0 %v4144_v0 }
 0x248   :  { %3116 = vst [vmem:[%s6874_s2 + $0x3f8] sm:$0xff] %v1770_v23  ;;  %2604 = vmatprep.mubr.f32.mxu1 %v4144_v0 }
 0x249   :  { %v1325_v24 = vpop.f32.mrb[150].mxu0 }
 0x24a   :  { %3125 = vst [vmem:[%s6874_s2 + $0x440] sm:$0xff] %v1325_v24  ;;  %v1774_v25 = vpop.f32.mrb[150].mxu1  ;;  %v1327_v26 = vpop.f32.mrb[151].mxu0  ;;  %2156 = vmatmul.mubr.f32.vlgmr.msra.gmra.mrb[0].mxu0 %v4026_v27  ;;  %v4038_v24 = vld [vmem:[#allocation2 + $0x60] sm:$0xff] }
 0x24b   :  { %3127 = vst [vmem:[%s6874_s2 + $0x450] sm:$0xff] %v1774_v25  ;;  %3126 = vst [vmem:[%s6874_s2 + $0x448] sm:$0xff] %v1327_v26  ;;  %v1776_v28 = vpop.f32.mrb[151].mxu1  ;;  %2605 = vmatmul.mubr.f32.vlgmr.msra.gmra.mrb[0].mxu1 %v4026_v27  ;;  %2161 = vmatprep.mubr.f32.mxu0 %v4144_v0 }
 0x24c   :  { %3128 = vst [vmem:[%s6874_s2 + $0x458] sm:$0xff] %v1776_v28  ;;  %2610 = vmatprep.mubr.f32.mxu1 %v4144_v0 }
 0x24d   :  { %v1331_v29 = vpop.f32.mrb[152].mxu0 }
 0x24e   :  { %3137 = vst [vmem:[%s6874_s2 + $0x4a0] sm:$0xff] %v1331_v29  ;;  %v1780_v30 = vpop.f32.mrb[152].mxu1  ;;  %v1333_v31 = vpop.f32.mrb[153].mxu0  ;;  %2162 = vmatmul.mubr.f32.gmra.mrb[2].mxu0 %v4027_v32  ;;  %v4039_v29 = vld [vmem:[#allocation2 + $0x68] sm:$0xff] }
 0x24f   :  { %3139 = vst [vmem:[%s6874_s2 + $0x4b0] sm:$0xff] %v1780_v30  ;;  %3138 = vst [vmem:[%s6874_s2 + $0x4a8] sm:$0xff] %v1333_v31  ;;  %v1782_v33 = vpop.f32.mrb[153].mxu1  ;;  %2611 = vmatmul.mubr.f32.gmra.mrb[2].mxu1 %v4027_v32  ;;  %2167 = vmatprep.mubr.f32.mxu0 %v4144_v0 }
 0x250   :  { %3140 = vst [vmem:[%s6874_s2 + $0x4b8] sm:$0xff] %v1782_v33  ;;  %2616 = vmatprep.mubr.f32.mxu1 %v4144_v0 }
 0x251   :  { %v1337_v34 = vpop.f32.mrb[154].mxu0 }
 0x252   :  { %3149 = vst [vmem:[%s6874_s2 + $0x500] sm:$0xff] %v1337_v34  ;;  %v1786_v35 = vpop.f32.mrb[154].mxu1  ;;  %v1339_v36 = vpop.f32.mrb[155].mxu0  ;;  %2168 = vmatmul.mubr.f32.gmra.mrb[4].mxu0 %v4028_v37  ;;  %v4040_v34 = vld [vmem:[#allocation2 + $0x70] sm:$0xff] }
 0x253   :  { %3151 = vst [vmem:[%s6874_s2 + $0x510] sm:$0xff] %v1786_v35  ;;  %3150 = vst [vmem:[%s6874_s2 + $0x508] sm:$0xff] %v1339_v36  ;;  %v1788_v38 = vpop.f32.mrb[155].mxu1  ;;  %2617 = vmatmul.mubr.f32.gmra.mrb[4].mxu1 %v4028_v37  ;;  %2173 = vmatprep.mubr.f32.mxu0 %v4144_v0 }
 0x254   :  { %3152 = vst [vmem:[%s6874_s2 + $0x518] sm:$0xff] %v1788_v38  ;;  %2622 = vmatprep.mubr.f32.mxu1 %v4144_v0 }
 0x255   :  { %v1343_v39 = vpop.f32.mrb[156].mxu0 }
 0x256   :  { %3161 = vst [vmem:[%s6874_s2 + $0x560] sm:$0xff] %v1343_v39  ;;  %v1792_v40 = vpop.f32.mrb[156].mxu1  ;;  %v1345_v41 = vpop.f32.mrb[157].mxu0  ;;  %2174 = vmatmul.mubr.f32.gmra.mrb[6].mxu0 %v4029_v42  ;;  %v4041_v39 = vld [vmem:[#allocation2 + $0x78] sm:$0xff] }
 0x257   :  { %3163 = vst [vmem:[%s6874_s2 + $0x570] sm:$0xff] %v1792_v40  ;;  %3162 = vst [vmem:[%s6874_s2 + $0x568] sm:$0xff] %v1345_v41  ;;  %v1794_v43 = vpop.f32.mrb[157].mxu1  ;;  %2623 = vmatmul.mubr.f32.gmra.mrb[6].mxu1 %v4029_v42  ;;  %2179 = vmatprep.mubr.f32.mxu0 %v4144_v0 }
 0x258   :  { %3164 = vst [vmem:[%s6874_s2 + $0x578] sm:$0xff] %v1794_v43  ;;  %2628 = vmatprep.mubr.f32.mxu1 %v4144_v0 }
 0x259   :  { %v1349_v44 = vpop.f32.mrb[158].mxu0 }
 0x25a   :  { %3173 = vst [vmem:[%s6874_s2 + $0x5c0] sm:$0xff] %v1349_v44  ;;  %v1798_v45 = vpop.f32.mrb[158].mxu1  ;;  %v1351_v46 = vpop.f32.mrb[159].mxu0  ;;  %2180 = vmatmul.mubr.f32.gmra.mrb[8].mxu0 %v4030_v47  ;;  %v4042_v44 = vld [vmem:[#allocation2 + $0x80] sm:$0xff] }
 0x25b   :  { %3175 = vst [vmem:[%s6874_s2 + $0x5d0] sm:$0xff] %v1798_v45  ;;  %3174 = vst [vmem:[%s6874_s2 + $0x5c8] sm:$0xff] %v1351_v46  ;;  %v1800_v48 = vpop.f32.mrb[159].mxu1  ;;  %2629 = vmatmul.mubr.f32.gmra.mrb[8].mxu1 %v4030_v47  ;;  %2185 = vmatprep.mubr.f32.mxu0 %v4144_v0 }
 0x25c   :  { %3176 = vst [vmem:[%s6874_s2 + $0x5d8] sm:$0xff] %v1800_v48  ;;  %2634 = vmatprep.mubr.f32.mxu1 %v4144_v0 }
 0x25d   :  { %v1355_v49 = vpop.f32.mrb[160].mxu0 }
 0x25e   :  { %3185 = vst [vmem:[%s6874_s2 + $0x620] sm:$0xff] %v1355_v49  ;;  %v1804_v50 = vpop.f32.mrb[160].mxu1  ;;  %v1357_v51 = vpop.f32.mrb[161].mxu0  ;;  %2186 = vmatmul.mubr.f32.gmra.mrb[10].mxu0 %v4031_v52  ;;  %v4043_v49 = vld [vmem:[#allocation2 + $0x88] sm:$0xff] }
 0x25f   :  { %3187 = vst [vmem:[%s6874_s2 + $0x630] sm:$0xff] %v1804_v50  ;;  %3186 = vst [vmem:[%s6874_s2 + $0x628] sm:$0xff] %v1357_v51  ;;  %v1806_v53 = vpop.f32.mrb[161].mxu1  ;;  %2635 = vmatmul.mubr.f32.gmra.mrb[10].mxu1 %v4031_v52  ;;  %2191 = vmatprep.mubr.f32.mxu0 %v4144_v0 }
 0x260   :  { %3188 = vst [vmem:[%s6874_s2 + $0x638] sm:$0xff] %v1806_v53  ;;  %2640 = vmatprep.mubr.f32.mxu1 %v4144_v0 }
 0x261   :  { %v1361_v54 = vpop.f32.mrb[162].mxu0 }
 0x262   :  { %3197 = vst [vmem:[%s6874_s2 + $0x680] sm:$0xff] %v1361_v54  ;;  %v1810_v55 = vpop.f32.mrb[162].mxu1  ;;  %v1363_v56 = vpop.f32.mrb[163].mxu0  ;;  %2192 = vmatmul.mubr.f32.gmra.mrb[12].mxu0 %v4032_v57  ;;  %v4044_v54 = vld [vmem:[#allocation2 + $0x90] sm:$0xff] }
 0x263   :  { %3199 = vst [vmem:[%s6874_s2 + $0x690] sm:$0xff] %v1810_v55  ;;  %3198 = vst [vmem:[%s6874_s2 + $0x688] sm:$0xff] %v1363_v56  ;;  %v1812_v58 = vpop.f32.mrb[163].mxu1  ;;  %2641 = vmatmul.mubr.f32.gmra.mrb[12].mxu1 %v4032_v57  ;;  %2197 = vmatprep.mubr.f32.mxu0 %v4144_v0 }
 0x264   :  { %3200 = vst [vmem:[%s6874_s2 + $0x698] sm:$0xff] %v1812_v58  ;;  %2646 = vmatprep.mubr.f32.mxu1 %v4144_v0 }
 0x265   :  { %v1367_v59 = vpop.f32.mrb[164].mxu0 }
 0x266   :  { %3209 = vst [vmem:[%s6874_s2 + $0x6e0] sm:$0xff] %v1367_v59  ;;  %v1816_v60 = vpop.f32.mrb[164].mxu1  ;;  %v1369_v61 = vpop.f32.mrb[165].mxu0  ;;  %2198 = vmatmul.mubr.f32.gmra.mrb[14].mxu0 %v4033_v62  ;;  %v4045_v59 = vld [vmem:[#allocation2 + $0x98] sm:$0xff] }
 0x267   :  { %3211 = vst [vmem:[%s6874_s2 + $0x6f0] sm:$0xff] %v1816_v60  ;;  %3210 = vst [vmem:[%s6874_s2 + $0x6e8] sm:$0xff] %v1369_v61  ;;  %v1818_v63 = vpop.f32.mrb[165].mxu1  ;;  %2647 = vmatmul.mubr.f32.gmra.mrb[14].mxu1 %v4033_v62  ;;  %2203 = vmatprep.mubr.f32.mxu0 %v4144_v0 }
 0x268   :  { %3212 = vst [vmem:[%s6874_s2 + $0x6f8] sm:$0xff] %v1818_v63  ;;  %2652 = vmatprep.mubr.f32.mxu1 %v4144_v0 }
 0x269   :  { %v1373_v1 = vpop.f32.mrb[166].mxu0 }
 0x26a   :  { %3221 = vst [vmem:[%s6874_s2 + $0x740] sm:$0xff] %v1373_v1  ;;  %v1822_v2 = vpop.f32.mrb[166].mxu1  ;;  %v1375_v3 = vpop.f32.mrb[167].mxu0  ;;  %2204 = vmatmul.mubr.f32.gmra.mrb[16].mxu0 %v4034_v4  ;;  %v4046_v1 = vld [vmem:[#allocation2 + $0xa0] sm:$0xff] }
 0x26b   :  { %3223 = vst [vmem:[%s6874_s2 + $0x750] sm:$0xff] %v1822_v2  ;;  %3222 = vst [vmem:[%s6874_s2 + $0x748] sm:$0xff] %v1375_v3  ;;  %v1824_v5 = vpop.f32.mrb[167].mxu1  ;;  %2653 = vmatmul.mubr.f32.gmra.mrb[16].mxu1 %v4034_v4  ;;  %2209 = vmatprep.mubr.f32.mxu0 %v4144_v0 }
 0x26c   :  { %3224 = vst [vmem:[%s6874_s2 + $0x758] sm:$0xff] %v1824_v5  ;;  %2658 = vmatprep.mubr.f32.mxu1 %v4144_v0 }
 0x26d   :  { %v1379_v6 = vpop.f32.mrb[168].mxu0 }
 0x26e   :  { %3233 = vst [vmem:[%s6874_s2 + $0x7a0] sm:$0xff] %v1379_v6  ;;  %v1828_v7 = vpop.f32.mrb[168].mxu1  ;;  %v1381_v8 = vpop.f32.mrb[169].mxu0  ;;  %2210 = vmatmul.mubr.f32.gmra.mrb[18].mxu0 %v4035_v9  ;;  %v4047_v6 = vld [vmem:[#allocation2 + $0xa8] sm:$0xff] }
 0x26f   :  { %3235 = vst [vmem:[%s6874_s2 + $0x7b0] sm:$0xff] %v1828_v7  ;;  %3234 = vst [vmem:[%s6874_s2 + $0x7a8] sm:$0xff] %v1381_v8  ;;  %v1830_v10 = vpop.f32.mrb[169].mxu1  ;;  %2659 = vmatmul.mubr.f32.gmra.mrb[18].mxu1 %v4035_v9  ;;  %2215 = vmatprep.mubr.f32.mxu0 %v4144_v0 }
 0x270   :  { %3236 = vst [vmem:[%s6874_s2 + $0x7b8] sm:$0xff] %v1830_v10  ;;  %2664 = vmatprep.mubr.f32.mxu1 %v4144_v0 }
 0x271   :  { %v1385_v11 = vpop.f32.mrb[170].mxu0 }
 0x272   :  { %3245 = vst [vmem:[%s6874_s2 + $0x800] sm:$0xff] %v1385_v11  ;;  %v1834_v12 = vpop.f32.mrb[170].mxu1  ;;  %v1387_v13 = vpop.f32.mrb[171].mxu0  ;;  %2216 = vmatmul.mubr.f32.gmra.mrb[20].mxu0 %v4036_v14  ;;  %v4048_v11 = vld [vmem:[#allocation2 + $0xb0] sm:$0xff] }
 0x273   :  { %3247 = vst [vmem:[%s6874_s2 + $0x810] sm:$0xff] %v1834_v12  ;;  %3246 = vst [vmem:[%s6874_s2 + $0x808] sm:$0xff] %v1387_v13  ;;  %v1836_v15 = vpop.f32.mrb[171].mxu1  ;;  %2665 = vmatmul.mubr.f32.gmra.mrb[20].mxu1 %v4036_v14  ;;  %2221 = vmatprep.mubr.f32.mxu0 %v4144_v0 }
 0x274   :  { %3248 = vst [vmem:[%s6874_s2 + $0x818] sm:$0xff] %v1836_v15  ;;  %2670 = vmatprep.mubr.f32.mxu1 %v4144_v0 }
 0x275   :  { %v1391_v16 = vpop.f32.mrb[172].mxu0 }
 0x276   :  { %3257 = vst [vmem:[%s6874_s2 + $0x860] sm:$0xff] %v1391_v16  ;;  %v1840_v17 = vpop.f32.mrb[172].mxu1  ;;  %v1393_v18 = vpop.f32.mrb[173].mxu0  ;;  %2222 = vmatmul.mubr.f32.gmra.mrb[22].mxu0 %v4037_v19  ;;  %v4049_v16 = vld [vmem:[#allocation2 + $0xb8] sm:$0xff] }
 0x277   :  { %3259 = vst [vmem:[%s6874_s2 + $0x870] sm:$0xff] %v1840_v17  ;;  %3258 = vst [vmem:[%s6874_s2 + $0x868] sm:$0xff] %v1393_v18  ;;  %v1842_v20 = vpop.f32.mrb[173].mxu1  ;;  %2671 = vmatmul.mubr.f32.gmra.mrb[22].mxu1 %v4037_v19  ;;  %2227 = vmatprep.mubr.f32.mxu0 %v4144_v0 }
 0x278   :  { %3260 = vst [vmem:[%s6874_s2 + $0x878] sm:$0xff] %v1842_v20  ;;  %2676 = vmatprep.mubr.f32.mxu1 %v4144_v0 }
 0x279   :  { %v1397_v21 = vpop.f32.mrb[174].mxu0 }
 0x27a   :  { %3269 = vst [vmem:[%s6874_s2 + $0x8c0] sm:$0xff] %v1397_v21  ;;  %v1846_v22 = vpop.f32.mrb[174].mxu1  ;;  %v1399_v23 = vpop.f32.mrb[175].mxu0  ;;  %2228 = vmatmul.mubr.f32.gmra.mrb[24].mxu0 %v4038_v24  ;;  %v4050_v21 = vld [vmem:[#allocation2 + $0xc0] sm:$0xff] }
 0x27b   :  { %3271 = vst [vmem:[%s6874_s2 + $0x8d0] sm:$0xff] %v1846_v22  ;;  %3270 = vst [vmem:[%s6874_s2 + $0x8c8] sm:$0xff] %v1399_v23  ;;  %v1848_v25 = vpop.f32.mrb[175].mxu1  ;;  %2677 = vmatmul.mubr.f32.gmra.mrb[24].mxu1 %v4038_v24  ;;  %2233 = vmatprep.mubr.f32.mxu0 %v4144_v0 }
 0x27c   :  { %3272 = vst [vmem:[%s6874_s2 + $0x8d8] sm:$0xff] %v1848_v25  ;;  %2682 = vmatprep.mubr.f32.mxu1 %v4144_v0 }
 0x27d   :  { %v1403_v26 = vpop.f32.mrb[176].mxu0 }
 0x27e   :  { %3281 = vst [vmem:[%s6874_s2 + $0x920] sm:$0xff] %v1403_v26  ;;  %v1852_v27 = vpop.f32.mrb[176].mxu1  ;;  %v1405_v28 = vpop.f32.mrb[177].mxu0  ;;  %2234 = vmatmul.mubr.f32.gmra.mrb[26].mxu0 %v4039_v29  ;;  %v4051_v26 = vld [vmem:[#allocation2 + $0xc8] sm:$0xff] }
 0x27f   :  { %3283 = vst [vmem:[%s6874_s2 + $0x930] sm:$0xff] %v1852_v27  ;;  %3282 = vst [vmem:[%s6874_s2 + $0x928] sm:$0xff] %v1405_v28  ;;  %v1854_v30 = vpop.f32.mrb[177].mxu1  ;;  %2683 = vmatmul.mubr.f32.gmra.mrb[26].mxu1 %v4039_v29  ;;  %2239 = vmatprep.mubr.f32.mxu0 %v4144_v0 }
 0x280   :  { %3284 = vst [vmem:[%s6874_s2 + $0x938] sm:$0xff] %v1854_v30  ;;  %2688 = vmatprep.mubr.f32.mxu1 %v4144_v0 }
 0x281   :  { %v1409_v31 = vpop.f32.mrb[178].mxu0 }
 0x282   :  { %3293 = vst [vmem:[%s6874_s2 + $0x980] sm:$0xff] %v1409_v31  ;;  %v1858_v32 = vpop.f32.mrb[178].mxu1  ;;  %v1411_v33 = vpop.f32.mrb[179].mxu0  ;;  %2240 = vmatmul.mubr.f32.gmra.mrb[28].mxu0 %v4040_v34  ;;  %v4052_v31 = vld [vmem:[#allocation2 + $0xd0] sm:$0xff] }
 0x283   :  { %3295 = vst [vmem:[%s6874_s2 + $0x990] sm:$0xff] %v1858_v32  ;;  %3294 = vst [vmem:[%s6874_s2 + $0x988] sm:$0xff] %v1411_v33  ;;  %v1860_v35 = vpop.f32.mrb[179].mxu1  ;;  %2689 = vmatmul.mubr.f32.gmra.mrb[28].mxu1 %v4040_v34  ;;  %2245 = vmatprep.mubr.f32.mxu0 %v4144_v0 }
 0x284   :  { %3296 = vst [vmem:[%s6874_s2 + $0x998] sm:$0xff] %v1860_v35  ;;  %2694 = vmatprep.mubr.f32.mxu1 %v4144_v0 }
 0x285   :  { %v1415_v36 = vpop.f32.mrb[180].mxu0 }
 0x286   :  { %3305 = vst [vmem:[%s6874_s2 + $0x9e0] sm:$0xff] %v1415_v36  ;;  %v1864_v37 = vpop.f32.mrb[180].mxu1  ;;  %v1417_v38 = vpop.f32.mrb[181].mxu0  ;;  %2246 = vmatmul.mubr.f32.gmra.mrb[30].mxu0 %v4041_v39  ;;  %v4053_v36 = vld [vmem:[#allocation2 + $0xd8] sm:$0xff] }
 0x287   :  { %3307 = vst [vmem:[%s6874_s2 + $0x9f0] sm:$0xff] %v1864_v37  ;;  %3306 = vst [vmem:[%s6874_s2 + $0x9e8] sm:$0xff] %v1417_v38  ;;  %v1866_v40 = vpop.f32.mrb[181].mxu1  ;;  %2695 = vmatmul.mubr.f32.gmra.mrb[30].mxu1 %v4041_v39  ;;  %2251 = vmatprep.mubr.f32.mxu0 %v4144_v0 }
 0x288   :  { %3308 = vst [vmem:[%s6874_s2 + $0x9f8] sm:$0xff] %v1866_v40  ;;  %2700 = vmatprep.mubr.f32.mxu1 %v4144_v0 }
 0x289   :  { %v1421_v41 = vpop.f32.mrb[182].mxu0 }
 0x28a   :  { %3317 = vst [vmem:[%s6874_s2 + $0xa40] sm:$0xff] %v1421_v41  ;;  %v1870_v42 = vpop.f32.mrb[182].mxu1  ;;  %v1423_v43 = vpop.f32.mrb[183].mxu0  ;;  %2252 = vmatmul.mubr.f32.gmra.mrb[32].mxu0 %v4042_v44  ;;  %v4054_v41 = vld [vmem:[#allocation2 + $0xe0] sm:$0xff] }
 0x28b   :  { %3319 = vst [vmem:[%s6874_s2 + $0xa50] sm:$0xff] %v1870_v42  ;;  %3318 = vst [vmem:[%s6874_s2 + $0xa48] sm:$0xff] %v1423_v43  ;;  %v1872_v45 = vpop.f32.mrb[183].mxu1  ;;  %2701 = vmatmul.mubr.f32.gmra.mrb[32].mxu1 %v4042_v44  ;;  %2257 = vmatprep.mubr.f32.mxu0 %v4144_v0 }
 0x28c   :  { %3320 = vst [vmem:[%s6874_s2 + $0xa58] sm:$0xff] %v1872_v45  ;;  %2706 = vmatprep.mubr.f32.mxu1 %v4144_v0 }
 0x28d   :  { %v1427_v46 = vpop.f32.mrb[184].mxu0 }
 0x28e   :  { %3329 = vst [vmem:[%s6874_s2 + $0xaa0] sm:$0xff] %v1427_v46  ;;  %v1876_v47 = vpop.f32.mrb[184].mxu1  ;;  %v1429_v48 = vpop.f32.mrb[185].mxu0  ;;  %2258 = vmatmul.mubr.f32.gmra.mrb[34].mxu0 %v4043_v49  ;;  %v4055_v46 = vld [vmem:[#allocation2 + $0xe8] sm:$0xff] }
 0x28f   :  { %3331 = vst [vmem:[%s6874_s2 + $0xab0] sm:$0xff] %v1876_v47  ;;  %3330 = vst [vmem:[%s6874_s2 + $0xaa8] sm:$0xff] %v1429_v48  ;;  %v1878_v50 = vpop.f32.mrb[185].mxu1  ;;  %2707 = vmatmul.mubr.f32.gmra.mrb[34].mxu1 %v4043_v49  ;;  %2263 = vmatprep.mubr.f32.mxu0 %v4144_v0 }
 0x290   :  { %3332 = vst [vmem:[%s6874_s2 + $0xab8] sm:$0xff] %v1878_v50  ;;  %2712 = vmatprep.mubr.f32.mxu1 %v4144_v0 }
 0x291   :  { %v1433_v51 = vpop.f32.mrb[186].mxu0 }
 0x292   :  { %3341 = vst [vmem:[%s6874_s2 + $0xb00] sm:$0xff] %v1433_v51  ;;  %v1882_v52 = vpop.f32.mrb[186].mxu1  ;;  %v1435_v53 = vpop.f32.mrb[187].mxu0  ;;  %2264 = vmatmul.mubr.f32.gmra.mrb[36].mxu0 %v4044_v54  ;;  %v4056_v51 = vld [vmem:[#allocation2 + $0xf0] sm:$0xff] }
 0x293   :  { %3343 = vst [vmem:[%s6874_s2 + $0xb10] sm:$0xff] %v1882_v52  ;;  %3342 = vst [vmem:[%s6874_s2 + $0xb08] sm:$0xff] %v1435_v53  ;;  %v1884_v55 = vpop.f32.mrb[187].mxu1  ;;  %2713 = vmatmul.mubr.f32.gmra.mrb[36].mxu1 %v4044_v54  ;;  %2269 = vmatprep.mubr.f32.mxu0 %v4144_v0 }
 0x294   :  { %3344 = vst [vmem:[%s6874_s2 + $0xb18] sm:$0xff] %v1884_v55  ;;  %2718 = vmatprep.mubr.f32.mxu1 %v4144_v0 }
 0x295   :  { %v1439_v56 = vpop.f32.mrb[188].mxu0 }
 0x296   :  { %3353 = vst [vmem:[%s6874_s2 + $0xb60] sm:$0xff] %v1439_v56  ;;  %v1888_v57 = vpop.f32.mrb[188].mxu1  ;;  %v1441_v58 = vpop.f32.mrb[189].mxu0  ;;  %2270 = vmatmul.mubr.f32.gmra.mrb[38].mxu0 %v4045_v59  ;;  %v4057_v56 = vld [vmem:[#allocation2 + $0xf8] sm:$0xff] }
 0x297   :  { %3355 = vst [vmem:[%s6874_s2 + $0xb70] sm:$0xff] %v1888_v57  ;;  %3354 = vst [vmem:[%s6874_s2 + $0xb68] sm:$0xff] %v1441_v58  ;;  %v1890_v60 = vpop.f32.mrb[189].mxu1  ;;  %2719 = vmatmul.mubr.f32.gmra.mrb[38].mxu1 %v4045_v59  ;;  %2275 = vmatprep.mubr.f32.mxu0 %v4144_v0 }
 0x298   :  { %3356 = vst [vmem:[%s6874_s2 + $0xb78] sm:$0xff] %v1890_v60  ;;  %2724 = vmatprep.mubr.f32.mxu1 %v4144_v0 }
 0x299   :  { %v1445_v61 = vpop.f32.mrb[190].mxu0 }
 0x29a   :  { %3365 = vst [vmem:[%s6874_s2 + $0xbc0] sm:$0xff] %v1445_v61  ;;  %v1894_v62 = vpop.f32.mrb[190].mxu1  ;;  %v1447_v63 = vpop.f32.mrb[191].mxu0  ;;  %2276 = vmatmul.mubr.f32.gmra.mrb[40].mxu0 %v4046_v1  ;;  %v4058_v61 = vld [vmem:[#allocation2 + $0x100] sm:$0xff] }
 0x29b   :  { %3367 = vst [vmem:[%s6874_s2 + $0xbd0] sm:$0xff] %v1894_v62  ;;  %3366 = vst [vmem:[%s6874_s2 + $0xbc8] sm:$0xff] %v1447_v63  ;;  %v1896_v2 = vpop.f32.mrb[191].mxu1  ;;  %2725 = vmatmul.mubr.f32.gmra.mrb[40].mxu1 %v4046_v1  ;;  %2281 = vmatprep.mubr.f32.mxu0 %v4144_v0 }
 0x29c   :  { %3368 = vst [vmem:[%s6874_s2 + $0xbd8] sm:$0xff] %v1896_v2  ;;  %2730 = vmatprep.mubr.f32.mxu1 %v4144_v0 }
 0x29d   :  { %v1451_v3 = vpop.f32.mrb[192].mxu0 }
 0x29e   :  { %3377 = vst [vmem:[%s6874_s2 + $0xc20] sm:$0xff] %v1451_v3  ;;  %v1900_v4 = vpop.f32.mrb[192].mxu1  ;;  %v1453_v5 = vpop.f32.mrb[193].mxu0  ;;  %2282 = vmatmul.mubr.f32.gmra.mrb[42].mxu0 %v4047_v6  ;;  %v4059_v3 = vld [vmem:[#allocation2 + $0x108] sm:$0xff] }
 0x29f   :  { %3379 = vst [vmem:[%s6874_s2 + $0xc30] sm:$0xff] %v1900_v4  ;;  %3378 = vst [vmem:[%s6874_s2 + $0xc28] sm:$0xff] %v1453_v5  ;;  %v1902_v7 = vpop.f32.mrb[193].mxu1  ;;  %2731 = vmatmul.mubr.f32.gmra.mrb[42].mxu1 %v4047_v6  ;;  %2287 = vmatprep.mubr.f32.mxu0 %v4144_v0 }
 0x2a0   :  { %3380 = vst [vmem:[%s6874_s2 + $0xc38] sm:$0xff] %v1902_v7  ;;  %2736 = vmatprep.mubr.f32.mxu1 %v4144_v0 }
 0x2a1   :  { %v1457_v8 = vpop.f32.mrb[194].mxu0 }
 0x2a2   :  { %3389 = vst [vmem:[%s6874_s2 + $0xc80] sm:$0xff] %v1457_v8  ;;  %v1906_v9 = vpop.f32.mrb[194].mxu1  ;;  %v1459_v10 = vpop.f32.mrb[195].mxu0  ;;  %2288 = vmatmul.mubr.f32.gmra.mrb[44].mxu0 %v4048_v11  ;;  %v4060_v8 = vld [vmem:[#allocation2 + $0x110] sm:$0xff] }
 0x2a3   :  { %3391 = vst [vmem:[%s6874_s2 + $0xc90] sm:$0xff] %v1906_v9  ;;  %3390 = vst [vmem:[%s6874_s2 + $0xc88] sm:$0xff] %v1459_v10  ;;  %v1908_v12 = vpop.f32.mrb[195].mxu1  ;;  %2737 = vmatmul.mubr.f32.gmra.mrb[44].mxu1 %v4048_v11  ;;  %2293 = vmatprep.mubr.f32.mxu0 %v4144_v0 }
 0x2a4   :  { %3392 = vst [vmem:[%s6874_s2 + $0xc98] sm:$0xff] %v1908_v12  ;;  %2742 = vmatprep.mubr.f32.mxu1 %v4144_v0 }
 0x2a5   :  { %v1463_v13 = vpop.f32.mrb[196].mxu0 }
 0x2a6   :  { %3401 = vst [vmem:[%s6874_s2 + $0xce0] sm:$0xff] %v1463_v13  ;;  %v1912_v14 = vpop.f32.mrb[196].mxu1  ;;  %v1465_v15 = vpop.f32.mrb[197].mxu0  ;;  %2294 = vmatmul.mubr.f32.gmra.mrb[46].mxu0 %v4049_v16  ;;  %v4061_v13 = vld [vmem:[#allocation2 + $0x118] sm:$0xff] }
 0x2a7   :  { %3403 = vst [vmem:[%s6874_s2 + $0xcf0] sm:$0xff] %v1912_v14  ;;  %3402 = vst [vmem:[%s6874_s2 + $0xce8] sm:$0xff] %v1465_v15  ;;  %v1914_v17 = vpop.f32.mrb[197].mxu1  ;;  %2743 = vmatmul.mubr.f32.gmra.mrb[46].mxu1 %v4049_v16  ;;  %2299 = vmatprep.mubr.f32.mxu0 %v4144_v0 }
 0x2a8   :  { %3404 = vst [vmem:[%s6874_s2 + $0xcf8] sm:$0xff] %v1914_v17  ;;  %2748 = vmatprep.mubr.f32.mxu1 %v4144_v0 }
 0x2a9   :  { %v1469_v18 = vpop.f32.mrb[198].mxu0 }
 0x2aa   :  { %3413 = vst [vmem:[%s6874_s2 + $0xd40] sm:$0xff] %v1469_v18  ;;  %v1918_v19 = vpop.f32.mrb[198].mxu1  ;;  %v1471_v20 = vpop.f32.mrb[199].mxu0  ;;  %2300 = vmatmul.mubr.f32.gmra.mrb[48].mxu0 %v4050_v21  ;;  %v4062_v18 = vld [vmem:[#allocation2 + $0x120] sm:$0xff] }
 0x2ab   :  { %3415 = vst [vmem:[%s6874_s2 + $0xd50] sm:$0xff] %v1918_v19  ;;  %3414 = vst [vmem:[%s6874_s2 + $0xd48] sm:$0xff] %v1471_v20  ;;  %v1920_v22 = vpop.f32.mrb[199].mxu1  ;;  %2749 = vmatmul.mubr.f32.gmra.mrb[48].mxu1 %v4050_v21  ;;  %2305 = vmatprep.mubr.f32.mxu0 %v4144_v0 }
 0x2ac   :  { %3416 = vst [vmem:[%s6874_s2 + $0xd58] sm:$0xff] %v1920_v22  ;;  %2754 = vmatprep.mubr.f32.mxu1 %v4144_v0 }
 0x2ad   :  { %v1475_v23 = vpop.f32.mrb[200].mxu0 }
 0x2ae   :  { %3425 = vst [vmem:[%s6874_s2 + $0xda0] sm:$0xff] %v1475_v23  ;;  %v1924_v24 = vpop.f32.mrb[200].mxu1  ;;  %v1477_v25 = vpop.f32.mrb[201].mxu0  ;;  %2306 = vmatmul.mubr.f32.gmra.mrb[50].mxu0 %v4051_v26  ;;  %v4063_v23 = vld [vmem:[#allocation2 + $0x128] sm:$0xff] }
 0x2af   :  { %3427 = vst [vmem:[%s6874_s2 + $0xdb0] sm:$0xff] %v1924_v24  ;;  %3426 = vst [vmem:[%s6874_s2 + $0xda8] sm:$0xff] %v1477_v25  ;;  %v1926_v27 = vpop.f32.mrb[201].mxu1  ;;  %2755 = vmatmul.mubr.f32.gmra.mrb[50].mxu1 %v4051_v26  ;;  %2311 = vmatprep.mubr.f32.mxu0 %v4144_v0 }
 0x2b0   :  { %3428 = vst [vmem:[%s6874_s2 + $0xdb8] sm:$0xff] %v1926_v27  ;;  %2760 = vmatprep.mubr.f32.mxu1 %v4144_v0 }
 0x2b1   :  { %v1481_v28 = vpop.f32.mrb[202].mxu0 }
 0x2b2   :  { %3437 = vst [vmem:[%s6874_s2 + $0xe00] sm:$0xff] %v1481_v28  ;;  %v1930_v29 = vpop.f32.mrb[202].mxu1  ;;  %v1483_v30 = vpop.f32.mrb[203].mxu0  ;;  %2312 = vmatmul.mubr.f32.gmra.mrb[52].mxu0 %v4052_v31  ;;  %v4064_v28 = vld [vmem:[#allocation2 + $0x130] sm:$0xff] }
 0x2b3   :  { %3439 = vst [vmem:[%s6874_s2 + $0xe10] sm:$0xff] %v1930_v29  ;;  %3438 = vst [vmem:[%s6874_s2 + $0xe08] sm:$0xff] %v1483_v30  ;;  %v1932_v32 = vpop.f32.mrb[203].mxu1  ;;  %2761 = vmatmul.mubr.f32.gmra.mrb[52].mxu1 %v4052_v31  ;;  %2317 = vmatprep.mubr.f32.mxu0 %v4144_v0 }
 0x2b4   :  { %3440 = vst [vmem:[%s6874_s2 + $0xe18] sm:$0xff] %v1932_v32  ;;  %2766 = vmatprep.mubr.f32.mxu1 %v4144_v0 }
 0x2b5   :  { %v1487_v33 = vpop.f32.mrb[204].mxu0 }
 0x2b6   :  { %3449 = vst [vmem:[%s6874_s2 + $0xe60] sm:$0xff] %v1487_v33  ;;  %v1936_v34 = vpop.f32.mrb[204].mxu1  ;;  %v1489_v35 = vpop.f32.mrb[205].mxu0  ;;  %2318 = vmatmul.mubr.f32.gmra.mrb[54].mxu0 %v4053_v36  ;;  %v4065_v33 = vld [vmem:[#allocation2 + $0x138] sm:$0xff] }
 0x2b7   :  { %3451 = vst [vmem:[%s6874_s2 + $0xe70] sm:$0xff] %v1936_v34  ;;  %3450 = vst [vmem:[%s6874_s2 + $0xe68] sm:$0xff] %v1489_v35  ;;  %v1938_v37 = vpop.f32.mrb[205].mxu1  ;;  %2767 = vmatmul.mubr.f32.gmra.mrb[54].mxu1 %v4053_v36  ;;  %2323 = vmatprep.mubr.f32.mxu0 %v4144_v0 }
 0x2b8   :  { %3452 = vst [vmem:[%s6874_s2 + $0xe78] sm:$0xff] %v1938_v37  ;;  %2772 = vmatprep.mubr.f32.mxu1 %v4144_v0 }
 0x2b9   :  { %v1493_v38 = vpop.f32.mrb[206].mxu0 }
 0x2ba   :  { %3461 = vst [vmem:[%s6874_s2 + $0xec0] sm:$0xff] %v1493_v38  ;;  %v1942_v39 = vpop.f32.mrb[206].mxu1  ;;  %v1495_v40 = vpop.f32.mrb[207].mxu0  ;;  %2324 = vmatmul.mubr.f32.gmra.mrb[56].mxu0 %v4054_v41  ;;  %v4066_v38 = vld [vmem:[#allocation2 + $0x140] sm:$0xff] }
 0x2bb   :  { %3463 = vst [vmem:[%s6874_s2 + $0xed0] sm:$0xff] %v1942_v39  ;;  %3462 = vst [vmem:[%s6874_s2 + $0xec8] sm:$0xff] %v1495_v40  ;;  %v1944_v42 = vpop.f32.mrb[207].mxu1  ;;  %2773 = vmatmul.mubr.f32.gmra.mrb[56].mxu1 %v4054_v41  ;;  %2329 = vmatprep.mubr.f32.mxu0 %v4144_v0 }
 0x2bc   :  { %3464 = vst [vmem:[%s6874_s2 + $0xed8] sm:$0xff] %v1944_v42  ;;  %2778 = vmatprep.mubr.f32.mxu1 %v4144_v0 }
 0x2bd   :  { %v1499_v43 = vpop.f32.mrb[208].mxu0 }
 0x2be   :  { %3473 = vst [vmem:[%s6874_s2 + $0xf20] sm:$0xff] %v1499_v43  ;;  %v1948_v44 = vpop.f32.mrb[208].mxu1  ;;  %v1501_v45 = vpop.f32.mrb[209].mxu0  ;;  %2330 = vmatmul.mubr.f32.gmra.mrb[58].mxu0 %v4055_v46  ;;  %v4067_v43 = vld [vmem:[#allocation2 + $0x148] sm:$0xff] }
 0x2bf   :  { %3475 = vst [vmem:[%s6874_s2 + $0xf30] sm:$0xff] %v1948_v44  ;;  %3474 = vst [vmem:[%s6874_s2 + $0xf28] sm:$0xff] %v1501_v45  ;;  %v1950_v47 = vpop.f32.mrb[209].mxu1  ;;  %2779 = vmatmul.mubr.f32.gmra.mrb[58].mxu1 %v4055_v46  ;;  %2335 = vmatprep.mubr.f32.mxu0 %v4144_v0 }
 0x2c0   :  { %3476 = vst [vmem:[%s6874_s2 + $0xf38] sm:$0xff] %v1950_v47  ;;  %2784 = vmatprep.mubr.f32.mxu1 %v4144_v0 }
 0x2c1   :  { %v1505_v48 = vpop.f32.mrb[210].mxu0 }
 0x2c2   :  { %3485 = vst [vmem:[%s6874_s2 + $0xf80] sm:$0xff] %v1505_v48  ;;  %v1954_v49 = vpop.f32.mrb[210].mxu1  ;;  %v1507_v50 = vpop.f32.mrb[211].mxu0  ;;  %2336 = vmatmul.mubr.f32.gmra.mrb[60].mxu0 %v4056_v51  ;;  %v4068_v48 = vld [vmem:[#allocation2 + $0x150] sm:$0xff] }
 0x2c3   :  { %3487 = vst [vmem:[%s6874_s2 + $0xf90] sm:$0xff] %v1954_v49  ;;  %3486 = vst [vmem:[%s6874_s2 + $0xf88] sm:$0xff] %v1507_v50  ;;  %v1956_v52 = vpop.f32.mrb[211].mxu1  ;;  %2785 = vmatmul.mubr.f32.gmra.mrb[60].mxu1 %v4056_v51  ;;  %2341 = vmatprep.mubr.f32.mxu0 %v4144_v0 }
 0x2c4   :  { %3488 = vst [vmem:[%s6874_s2 + $0xf98] sm:$0xff] %v1956_v52  ;;  %2790 = vmatprep.mubr.f32.mxu1 %v4144_v0 }
 0x2c5   :  { %v1511_v53 = vpop.f32.mrb[212].mxu0 }
 0x2c6   :  { %3497 = vst [vmem:[%s6874_s2 + $0xfe0] sm:$0xff] %v1511_v53  ;;  %v1960_v54 = vpop.f32.mrb[212].mxu1  ;;  %v1513_v55 = vpop.f32.mrb[213].mxu0  ;;  %2342 = vmatmul.mubr.f32.gmra.mrb[62].mxu0 %v4057_v56  ;;  %v4069_v53 = vld [vmem:[#allocation2 + $0x158] sm:$0xff] }
 0x2c7   :  { %3499 = vst [vmem:[%s6874_s2 + $0xff0] sm:$0xff] %v1960_v54  ;;  %3498 = vst [vmem:[%s6874_s2 + $0xfe8] sm:$0xff] %v1513_v55  ;;  %v1962_v57 = vpop.f32.mrb[213].mxu1  ;;  %2791 = vmatmul.mubr.f32.gmra.mrb[62].mxu1 %v4057_v56  ;;  %2347 = vmatprep.mubr.f32.mxu0 %v4144_v0 }
 0x2c8   :  { %3500 = vst [vmem:[%s6874_s2 + $0xff8] sm:$0xff] %v1962_v57  ;;  %2796 = vmatprep.mubr.f32.mxu1 %v4144_v0 }
 0x2c9   :  { %v1517_v58 = vpop.f32.mrb[214].mxu0 }
 0x2ca   :  { %3509 = vst [vmem:[%s6874_s2 + $0x1040] sm:$0xff] %v1517_v58  ;;  %v1966_v59 = vpop.f32.mrb[214].mxu1  ;;  %v1519_v60 = vpop.f32.mrb[215].mxu0  ;;  %2348 = vmatmul.mubr.f32.gmra.mrb[64].mxu0 %v4058_v61  ;;  %v4070_v58 = vld [vmem:[#allocation2 + $0x160] sm:$0xff] }
 0x2cb   :  { %3511 = vst [vmem:[%s6874_s2 + $0x1050] sm:$0xff] %v1966_v59  ;;  %3510 = vst [vmem:[%s6874_s2 + $0x1048] sm:$0xff] %v1519_v60  ;;  %v1968_v62 = vpop.f32.mrb[215].mxu1  ;;  %2797 = vmatmul.mubr.f32.gmra.mrb[64].mxu1 %v4058_v61  ;;  %2353 = vmatprep.mubr.f32.mxu0 %v4144_v0 }
 0x2cc   :  { %3512 = vst [vmem:[%s6874_s2 + $0x1058] sm:$0xff] %v1968_v62  ;;  %2802 = vmatprep.mubr.f32.mxu1 %v4144_v0 }
 0x2cd   :  { %v1523_v63 = vpop.f32.mrb[216].mxu0 }
 0x2ce   :  { %3521 = vst [vmem:[%s6874_s2 + $0x10a0] sm:$0xff] %v1523_v63  ;;  %v1972_v1 = vpop.f32.mrb[216].mxu1  ;;  %v1525_v2 = vpop.f32.mrb[217].mxu0  ;;  %2354 = vmatmul.mubr.f32.gmra.mrb[66].mxu0 %v4059_v3  ;;  %v4071_v63 = vld [vmem:[#allocation2 + $0x168] sm:$0xff] }
 0x2cf   :  { %3523 = vst [vmem:[%s6874_s2 + $0x10b0] sm:$0xff] %v1972_v1  ;;  %3522 = vst [vmem:[%s6874_s2 + $0x10a8] sm:$0xff] %v1525_v2  ;;  %v1974_v4 = vpop.f32.mrb[217].mxu1  ;;  %2803 = vmatmul.mubr.f32.gmra.mrb[66].mxu1 %v4059_v3  ;;  %2359 = vmatprep.mubr.f32.mxu0 %v4144_v0 }
 0x2d0   :  { %3524 = vst [vmem:[%s6874_s2 + $0x10b8] sm:$0xff] %v1974_v4  ;;  %2808 = vmatprep.mubr.f32.mxu1 %v4144_v0 }
 0x2d1   :  { %v1529_v5 = vpop.f32.mrb[218].mxu0 }
 0x2d2   :  { %3533 = vst [vmem:[%s6874_s2 + $0x1100] sm:$0xff] %v1529_v5  ;;  %v1978_v6 = vpop.f32.mrb[218].mxu1  ;;  %v1531_v7 = vpop.f32.mrb[219].mxu0  ;;  %2360 = vmatmul.mubr.f32.gmra.mrb[68].mxu0 %v4060_v8  ;;  %v4072_v5 = vld [vmem:[#allocation2 + $0x170] sm:$0xff] }
 0x2d3   :  { %3535 = vst [vmem:[%s6874_s2 + $0x1110] sm:$0xff] %v1978_v6  ;;  %3534 = vst [vmem:[%s6874_s2 + $0x1108] sm:$0xff] %v1531_v7  ;;  %v1980_v9 = vpop.f32.mrb[219].mxu1  ;;  %2809 = vmatmul.mubr.f32.gmra.mrb[68].mxu1 %v4060_v8  ;;  %2365 = vmatprep.mubr.f32.mxu0 %v4144_v0 }
 0x2d4   :  { %3536 = vst [vmem:[%s6874_s2 + $0x1118] sm:$0xff] %v1980_v9  ;;  %2814 = vmatprep.mubr.f32.mxu1 %v4144_v0 }
 0x2d5   :  { %v1535_v10 = vpop.f32.mrb[220].mxu0 }
 0x2d6   :  { %3545 = vst [vmem:[%s6874_s2 + $0x1160] sm:$0xff] %v1535_v10  ;;  %v1984_v11 = vpop.f32.mrb[220].mxu1  ;;  %v1537_v12 = vpop.f32.mrb[221].mxu0  ;;  %2366 = vmatmul.mubr.f32.gmra.mrb[70].mxu0 %v4061_v13  ;;  %v4073_v10 = vld [vmem:[#allocation2 + $0x178] sm:$0xff] }
 0x2d7   :  { %3547 = vst [vmem:[%s6874_s2 + $0x1170] sm:$0xff] %v1984_v11  ;;  %3546 = vst [vmem:[%s6874_s2 + $0x1168] sm:$0xff] %v1537_v12  ;;  %v1986_v14 = vpop.f32.mrb[221].mxu1  ;;  %2815 = vmatmul.mubr.f32.gmra.mrb[70].mxu1 %v4061_v13  ;;  %2371 = vmatprep.mubr.f32.mxu0 %v4144_v0 }
 0x2d8   :  { %3548 = vst [vmem:[%s6874_s2 + $0x1178] sm:$0xff] %v1986_v14  ;;  %2820 = vmatprep.mubr.f32.mxu1 %v4144_v0 }
 0x2d9   :  { %v1541_v15 = vpop.f32.mrb[222].mxu0 }
 0x2da   :  { %3557 = vst [vmem:[%s6874_s2 + $0x11c0] sm:$0xff] %v1541_v15  ;;  %v1990_v16 = vpop.f32.mrb[222].mxu1  ;;  %v1543_v17 = vpop.f32.mrb[223].mxu0  ;;  %2372 = vmatmul.mubr.f32.gmra.mrb[72].mxu0 %v4062_v18  ;;  %v4074_v15 = vld [vmem:[#allocation2 + $0x180] sm:$0xff] }
 0x2db   :  { %3559 = vst [vmem:[%s6874_s2 + $0x11d0] sm:$0xff] %v1990_v16  ;;  %3558 = vst [vmem:[%s6874_s2 + $0x11c8] sm:$0xff] %v1543_v17  ;;  %v1992_v19 = vpop.f32.mrb[223].mxu1  ;;  %2821 = vmatmul.mubr.f32.gmra.mrb[72].mxu1 %v4062_v18  ;;  %2377 = vmatprep.mubr.f32.mxu0 %v4144_v0 }
 0x2dc   :  { %3560 = vst [vmem:[%s6874_s2 + $0x11d8] sm:$0xff] %v1992_v19  ;;  %2826 = vmatprep.mubr.f32.mxu1 %v4144_v0 }
 0x2dd   :  { %v1547_v20 = vpop.f32.mrb[224].mxu0 }
 0x2de   :  { %3569 = vst [vmem:[%s6874_s2 + $0x1220] sm:$0xff] %v1547_v20  ;;  %v1996_v21 = vpop.f32.mrb[224].mxu1  ;;  %v1549_v22 = vpop.f32.mrb[225].mxu0  ;;  %2378 = vmatmul.mubr.f32.gmra.mrb[74].mxu0 %v4063_v23  ;;  %v4075_v20 = vld [vmem:[#allocation2 + $0x188] sm:$0xff] }
 0x2df   :  { %3571 = vst [vmem:[%s6874_s2 + $0x1230] sm:$0xff] %v1996_v21  ;;  %3570 = vst [vmem:[%s6874_s2 + $0x1228] sm:$0xff] %v1549_v22  ;;  %v1998_v24 = vpop.f32.mrb[225].mxu1  ;;  %2827 = vmatmul.mubr.f32.gmra.mrb[74].mxu1 %v4063_v23  ;;  %2383 = vmatprep.mubr.f32.mxu0 %v4144_v0 }
 0x2e0   :  { %3572 = vst [vmem:[%s6874_s2 + $0x1238] sm:$0xff] %v1998_v24  ;;  %2832 = vmatprep.mubr.f32.mxu1 %v4144_v0 }
 0x2e1   :  { %v1553_v25 = vpop.f32.mrb[226].mxu0 }
 0x2e2   :  { %3581 = vst [vmem:[%s6874_s2 + $0x1280] sm:$0xff] %v1553_v25  ;;  %v2002_v26 = vpop.f32.mrb[226].mxu1  ;;  %v1555_v27 = vpop.f32.mrb[227].mxu0  ;;  %2384 = vmatmul.mubr.f32.gmra.mrb[76].mxu0 %v4064_v28  ;;  %v4076_v25 = vld [vmem:[#allocation2 + $0x190] sm:$0xff] }
 0x2e3   :  { %3583 = vst [vmem:[%s6874_s2 + $0x1290] sm:$0xff] %v2002_v26  ;;  %3582 = vst [vmem:[%s6874_s2 + $0x1288] sm:$0xff] %v1555_v27  ;;  %v2004_v29 = vpop.f32.mrb[227].mxu1  ;;  %2833 = vmatmul.mubr.f32.gmra.mrb[76].mxu1 %v4064_v28  ;;  %2389 = vmatprep.mubr.f32.mxu0 %v4144_v0 }
 0x2e4   :  { %3584 = vst [vmem:[%s6874_s2 + $0x1298] sm:$0xff] %v2004_v29  ;;  %2838 = vmatprep.mubr.f32.mxu1 %v4144_v0 }
 0x2e5   :  { %v1559_v30 = vpop.f32.mrb[228].mxu0 }
 0x2e6   :  { %3593 = vst [vmem:[%s6874_s2 + $0x12e0] sm:$0xff] %v1559_v30  ;;  %v2008_v31 = vpop.f32.mrb[228].mxu1  ;;  %v1561_v32 = vpop.f32.mrb[229].mxu0  ;;  %2390 = vmatmul.mubr.f32.gmra.mrb[78].mxu0 %v4065_v33  ;;  %v4077_v30 = vld [vmem:[#allocation2 + $0x198] sm:$0xff] }
 0x2e7   :  { %3595 = vst [vmem:[%s6874_s2 + $0x12f0] sm:$0xff] %v2008_v31  ;;  %3594 = vst [vmem:[%s6874_s2 + $0x12e8] sm:$0xff] %v1561_v32  ;;  %v2010_v34 = vpop.f32.mrb[229].mxu1  ;;  %2839 = vmatmul.mubr.f32.gmra.mrb[78].mxu1 %v4065_v33  ;;  %2395 = vmatprep.mubr.f32.mxu0 %v4144_v0 }
 0x2e8   :  { %3596 = vst [vmem:[%s6874_s2 + $0x12f8] sm:$0xff] %v2010_v34  ;;  %2844 = vmatprep.mubr.f32.mxu1 %v4144_v0 }
 0x2e9   :  { %v1565_v35 = vpop.f32.mrb[230].mxu0 }
 0x2ea   :  { %3605 = vst [vmem:[%s6874_s2 + $0x1340] sm:$0xff] %v1565_v35  ;;  %v2014_v36 = vpop.f32.mrb[230].mxu1  ;;  %v1567_v37 = vpop.f32.mrb[231].mxu0  ;;  %2396 = vmatmul.mubr.f32.gmra.mrb[80].mxu0 %v4066_v38  ;;  %v4078_v35 = vld [vmem:[#allocation2 + $0x1a0] sm:$0xff] }
 0x2eb   :  { %3607 = vst [vmem:[%s6874_s2 + $0x1350] sm:$0xff] %v2014_v36  ;;  %3606 = vst [vmem:[%s6874_s2 + $0x1348] sm:$0xff] %v1567_v37  ;;  %v2016_v39 = vpop.f32.mrb[231].mxu1  ;;  %2845 = vmatmul.mubr.f32.gmra.mrb[80].mxu1 %v4066_v38  ;;  %2401 = vmatprep.mubr.f32.mxu0 %v4144_v0 }
 0x2ec   :  { %3608 = vst [vmem:[%s6874_s2 + $0x1358] sm:$0xff] %v2016_v39  ;;  %2850 = vmatprep.mubr.f32.mxu1 %v4144_v0 }
 0x2ed   :  { %v1571_v40 = vpop.f32.mrb[232].mxu0 }
 0x2ee   :  { %3617 = vst [vmem:[%s6874_s2 + $0x13a0] sm:$0xff] %v1571_v40  ;;  %v2020_v41 = vpop.f32.mrb[232].mxu1  ;;  %v1573_v42 = vpop.f32.mrb[233].mxu0  ;;  %2402 = vmatmul.mubr.f32.gmra.mrb[82].mxu0 %v4067_v43  ;;  %v4079_v40 = vld [vmem:[#allocation2 + $0x1a8] sm:$0xff] }
 0x2ef   :  { %3619 = vst [vmem:[%s6874_s2 + $0x13b0] sm:$0xff] %v2020_v41  ;;  %3618 = vst [vmem:[%s6874_s2 + $0x13a8] sm:$0xff] %v1573_v42  ;;  %v2022_v44 = vpop.f32.mrb[233].mxu1  ;;  %2851 = vmatmul.mubr.f32.gmra.mrb[82].mxu1 %v4067_v43  ;;  %2407 = vmatprep.mubr.f32.mxu0 %v4144_v0 }
 0x2f0   :  { %3620 = vst [vmem:[%s6874_s2 + $0x13b8] sm:$0xff] %v2022_v44  ;;  %2856 = vmatprep.mubr.f32.mxu1 %v4144_v0 }
 0x2f1   :  { %v1577_v45 = vpop.f32.mrb[234].mxu0 }
 0x2f2   :  { %3629 = vst [vmem:[%s6874_s2 + $0x1400] sm:$0xff] %v1577_v45  ;;  %v2026_v46 = vpop.f32.mrb[234].mxu1  ;;  %v1579_v47 = vpop.f32.mrb[235].mxu0  ;;  %2408 = vmatmul.mubr.f32.gmra.mrb[84].mxu0 %v4068_v48  ;;  %v4080_v45 = vld [vmem:[#allocation2 + $0x1b0] sm:$0xff] }
 0x2f3   :  { %3631 = vst [vmem:[%s6874_s2 + $0x1410] sm:$0xff] %v2026_v46  ;;  %3630 = vst [vmem:[%s6874_s2 + $0x1408] sm:$0xff] %v1579_v47  ;;  %v2028_v49 = vpop.f32.mrb[235].mxu1  ;;  %2857 = vmatmul.mubr.f32.gmra.mrb[84].mxu1 %v4068_v48  ;;  %2413 = vmatprep.mubr.f32.mxu0 %v4144_v0 }
 0x2f4   :  { %3632 = vst [vmem:[%s6874_s2 + $0x1418] sm:$0xff] %v2028_v49  ;;  %2862 = vmatprep.mubr.f32.mxu1 %v4144_v0 }
 0x2f5   :  { %v1583_v50 = vpop.f32.mrb[236].mxu0 }
 0x2f6   :  { %3641 = vst [vmem:[%s6874_s2 + $0x1460] sm:$0xff] %v1583_v50  ;;  %v2032_v51 = vpop.f32.mrb[236].mxu1  ;;  %v1585_v52 = vpop.f32.mrb[237].mxu0  ;;  %2414 = vmatmul.mubr.f32.gmra.mrb[86].mxu0 %v4069_v53  ;;  %v4081_v50 = vld [vmem:[#allocation2 + $0x1b8] sm:$0xff] }
 0x2f7   :  { %3643 = vst [vmem:[%s6874_s2 + $0x1470] sm:$0xff] %v2032_v51  ;;  %3642 = vst [vmem:[%s6874_s2 + $0x1468] sm:$0xff] %v1585_v52  ;;  %v2034_v54 = vpop.f32.mrb[237].mxu1  ;;  %2863 = vmatmul.mubr.f32.gmra.mrb[86].mxu1 %v4069_v53  ;;  %2419 = vmatprep.mubr.f32.mxu0 %v4144_v0 }
 0x2f8   :  { %3644 = vst [vmem:[%s6874_s2 + $0x1478] sm:$0xff] %v2034_v54  ;;  %2868 = vmatprep.mubr.f32.mxu1 %v4144_v0 }
 0x2f9   :  { %v1589_v55 = vpop.f32.mrb[238].mxu0 }
 0x2fa   :  { %3653 = vst [vmem:[%s6874_s2 + $0x14c0] sm:$0xff] %v1589_v55  ;;  %v2038_v56 = vpop.f32.mrb[238].mxu1  ;;  %v1591_v57 = vpop.f32.mrb[239].mxu0  ;;  %2420 = vmatmul.mubr.f32.gmra.mrb[88].mxu0 %v4070_v58  ;;  %v4082_v55 = vld [vmem:[#allocation2 + $0x1c0] sm:$0xff] }
 0x2fb   :  { %3655 = vst [vmem:[%s6874_s2 + $0x14d0] sm:$0xff] %v2038_v56  ;;  %3654 = vst [vmem:[%s6874_s2 + $0x14c8] sm:$0xff] %v1591_v57  ;;  %v2040_v59 = vpop.f32.mrb[239].mxu1  ;;  %2869 = vmatmul.mubr.f32.gmra.mrb[88].mxu1 %v4070_v58  ;;  %2425 = vmatprep.mubr.f32.mxu0 %v4144_v0 }
 0x2fc   :  { %3656 = vst [vmem:[%s6874_s2 + $0x14d8] sm:$0xff] %v2040_v59  ;;  %2874 = vmatprep.mubr.f32.mxu1 %v4144_v0 }
 0x2fd   :  { %v1595_v60 = vpop.f32.mrb[240].mxu0 }
 0x2fe   :  { %3665 = vst [vmem:[%s6874_s2 + $0x1520] sm:$0xff] %v1595_v60  ;;  %v2044_v61 = vpop.f32.mrb[240].mxu1  ;;  %v1597_v62 = vpop.f32.mrb[241].mxu0  ;;  %2426 = vmatmul.mubr.f32.gmra.mrb[90].mxu0 %v4071_v63  ;;  %v4083_v60 = vld [vmem:[#allocation2 + $0x1c8] sm:$0xff] }
 0x2ff   :  { %3667 = vst [vmem:[%s6874_s2 + $0x1530] sm:$0xff] %v2044_v61  ;;  %3666 = vst [vmem:[%s6874_s2 + $0x1528] sm:$0xff] %v1597_v62  ;;  %v2046_v1 = vpop.f32.mrb[241].mxu1  ;;  %2875 = vmatmul.mubr.f32.gmra.mrb[90].mxu1 %v4071_v63  ;;  %2431 = vmatprep.mubr.f32.mxu0 %v4144_v0 }
 0x300   :  { %3668 = vst [vmem:[%s6874_s2 + $0x1538] sm:$0xff] %v2046_v1  ;;  %2880 = vmatprep.mubr.f32.mxu1 %v4144_v0 }
 0x301   :  { %v1601_v2 = vpop.f32.mrb[242].mxu0 }
 0x302   :  { %3677 = vst [vmem:[%s6874_s2 + $0x1580] sm:$0xff] %v1601_v2  ;;  %v2050_v3 = vpop.f32.mrb[242].mxu1  ;;  %v1603_v4 = vpop.f32.mrb[243].mxu0  ;;  %2432 = vmatmul.mubr.f32.gmra.mrb[92].mxu0 %v4072_v5  ;;  %v4084_v2 = vld [vmem:[#allocation2 + $0x1d0] sm:$0xff] }
 0x303   :  { %3679 = vst [vmem:[%s6874_s2 + $0x1590] sm:$0xff] %v2050_v3  ;;  %3678 = vst [vmem:[%s6874_s2 + $0x1588] sm:$0xff] %v1603_v4  ;;  %v2052_v6 = vpop.f32.mrb[243].mxu1  ;;  %2881 = vmatmul.mubr.f32.gmra.mrb[92].mxu1 %v4072_v5  ;;  %2437 = vmatprep.mubr.f32.mxu0 %v4144_v0 }
 0x304   :  { %3680 = vst [vmem:[%s6874_s2 + $0x1598] sm:$0xff] %v2052_v6  ;;  %2886 = vmatprep.mubr.f32.mxu1 %v4144_v0 }
 0x305   :  { %v1607_v7 = vpop.f32.mrb[244].mxu0 }
 0x306   :  { %3689 = vst [vmem:[%s6874_s2 + $0x15e0] sm:$0xff] %v1607_v7  ;;  %v2056_v8 = vpop.f32.mrb[244].mxu1  ;;  %v1609_v9 = vpop.f32.mrb[245].mxu0  ;;  %2438 = vmatmul.mubr.f32.gmra.mrb[94].mxu0 %v4073_v10  ;;  %v4085_v7 = vld [vmem:[#allocation2 + $0x1d8] sm:$0xff] }
 0x307   :  { %3691 = vst [vmem:[%s6874_s2 + $0x15f0] sm:$0xff] %v2056_v8  ;;  %3690 = vst [vmem:[%s6874_s2 + $0x15e8] sm:$0xff] %v1609_v9  ;;  %v2058_v11 = vpop.f32.mrb[245].mxu1  ;;  %2887 = vmatmul.mubr.f32.gmra.mrb[94].mxu1 %v4073_v10  ;;  %2443 = vmatprep.mubr.f32.mxu0 %v4144_v0 }
 0x308   :  { %3692 = vst [vmem:[%s6874_s2 + $0x15f8] sm:$0xff] %v2058_v11  ;;  %2892 = vmatprep.mubr.f32.mxu1 %v4144_v0 }
 0x309   :  { %v1613_v12 = vpop.f32.mrb[246].mxu0 }
 0x30a   :  { %3701 = vst [vmem:[%s6874_s2 + $0x1640] sm:$0xff] %v1613_v12  ;;  %v2062_v13 = vpop.f32.mrb[246].mxu1  ;;  %v1615_v14 = vpop.f32.mrb[247].mxu0  ;;  %2444 = vmatmul.mubr.f32.gmra.mrb[96].mxu0 %v4074_v15  ;;  %v4086_v12 = vld [vmem:[#allocation2 + $0x1e0] sm:$0xff] }
 0x30b   :  { %3703 = vst [vmem:[%s6874_s2 + $0x1650] sm:$0xff] %v2062_v13  ;;  %3702 = vst [vmem:[%s6874_s2 + $0x1648] sm:$0xff] %v1615_v14  ;;  %v2064_v16 = vpop.f32.mrb[247].mxu1  ;;  %2893 = vmatmul.mubr.f32.gmra.mrb[96].mxu1 %v4074_v15  ;;  %2449 = vmatprep.mubr.f32.mxu0 %v4144_v0 }
 0x30c   :  { %3704 = vst [vmem:[%s6874_s2 + $0x1658] sm:$0xff] %v2064_v16  ;;  %2898 = vmatprep.mubr.f32.mxu1 %v4144_v0 }
 0x30d   :  { %v1619_v17 = vpop.f32.mrb[248].mxu0 }
 0x30e   :  { %3713 = vst [vmem:[%s6874_s2 + $0x16a0] sm:$0xff] %v1619_v17  ;;  %v2068_v18 = vpop.f32.mrb[248].mxu1  ;;  %v1621_v19 = vpop.f32.mrb[249].mxu0  ;;  %2450 = vmatmul.mubr.f32.gmra.mrb[98].mxu0 %v4075_v20  ;;  %v4087_v17 = vld [vmem:[#allocation2 + $0x1e8] sm:$0xff] }
 0x30f   :  { %3715 = vst [vmem:[%s6874_s2 + $0x16b0] sm:$0xff] %v2068_v18  ;;  %3714 = vst [vmem:[%s6874_s2 + $0x16a8] sm:$0xff] %v1621_v19  ;;  %v2070_v21 = vpop.f32.mrb[249].mxu1  ;;  %2899 = vmatmul.mubr.f32.gmra.mrb[98].mxu1 %v4075_v20  ;;  %2455 = vmatprep.mubr.f32.mxu0 %v4144_v0 }
 0x310   :  { %3716 = vst [vmem:[%s6874_s2 + $0x16b8] sm:$0xff] %v2070_v21  ;;  %2904 = vmatprep.mubr.f32.mxu1 %v4144_v0 }
 0x311   :  { %v1625_v22 = vpop.f32.mrb[250].mxu0 }
 0x312   :  { %3725 = vst [vmem:[%s6874_s2 + $0x1700] sm:$0xff] %v1625_v22  ;;  %v2074_v23 = vpop.f32.mrb[250].mxu1  ;;  %v1627_v24 = vpop.f32.mrb[251].mxu0  ;;  %2456 = vmatmul.mubr.f32.gmra.mrb[100].mxu0 %v4076_v25  ;;  %v4088_v22 = vld [vmem:[#allocation2 + $0x1f0] sm:$0xff] }
 0x313   :  { %3727 = vst [vmem:[%s6874_s2 + $0x1710] sm:$0xff] %v2074_v23  ;;  %3726 = vst [vmem:[%s6874_s2 + $0x1708] sm:$0xff] %v1627_v24  ;;  %v2076_v26 = vpop.f32.mrb[251].mxu1  ;;  %2905 = vmatmul.mubr.f32.gmra.mrb[100].mxu1 %v4076_v25  ;;  %2461 = vmatprep.mubr.f32.mxu0 %v4144_v0 }
 0x314   :  { %3728 = vst [vmem:[%s6874_s2 + $0x1718] sm:$0xff] %v2076_v26  ;;  %2910 = vmatprep.mubr.f32.mxu1 %v4144_v0 }
 0x315   :  { %v1631_v27 = vpop.f32.mrb[252].mxu0 }
 0x316   :  { %3737 = vst [vmem:[%s6874_s2 + $0x1760] sm:$0xff] %v1631_v27  ;;  %v2080_v28 = vpop.f32.mrb[252].mxu1  ;;  %v1633_v29 = vpop.f32.mrb[253].mxu0  ;;  %2462 = vmatmul.mubr.f32.gmra.mrb[102].mxu0 %v4077_v30  ;;  %v4089_v27 = vld [vmem:[#allocation2 + $0x1f8] sm:$0xff] }
 0x317   :  { %3739 = vst [vmem:[%s6874_s2 + $0x1770] sm:$0xff] %v2080_v28  ;;  %3738 = vst [vmem:[%s6874_s2 + $0x1768] sm:$0xff] %v1633_v29  ;;  %v2082_v31 = vpop.f32.mrb[253].mxu1  ;;  %2911 = vmatmul.mubr.f32.gmra.mrb[102].mxu1 %v4077_v30  ;;  %2467 = vmatprep.mubr.f32.mxu0 %v4144_v0 }
 0x318   :  { %3740 = vst [vmem:[%s6874_s2 + $0x1778] sm:$0xff] %v2082_v31  ;;  %2916 = vmatprep.mubr.f32.mxu1 %v4144_v0 }
 0x319   :  { %v1637_v32 = vpop.f32.mrb[254].mxu0 }
 0x31a   :  { %3749 = vst [vmem:[%s6874_s2 + $0x17c0] sm:$0xff] %v1637_v32  ;;  %v2086_v33 = vpop.f32.mrb[254].mxu1  ;;  %v1639_v34 = vpop.f32.mrb[255].mxu0  ;;  %2468 = vmatmul.mubr.f32.gmra.mrb[104].mxu0 %v4078_v35 }
 0x31b   :  { %3751 = vst [vmem:[%s6874_s2 + $0x17d0] sm:$0xff] %v2086_v33  ;;  %3750 = vst [vmem:[%s6874_s2 + $0x17c8] sm:$0xff] %v1639_v34  ;;  %v2088_v36 = vpop.f32.mrb[255].mxu1  ;;  %2917 = vmatmul.mubr.f32.gmra.mrb[104].mxu1 %v4078_v35  ;;  %2473 = vmatprep.mubr.f32.mxu0 %v4144_v0 }
 0x31c   :  { %3752 = vst [vmem:[%s6874_s2 + $0x17d8] sm:$0xff] %v2088_v36  ;;  %2922 = vmatprep.mubr.f32.mxu1 %v4144_v0 }
 0x31d   :  { %v2157_v37 = vpop.f32.mrb[0].mxu0 }
 0x31e   :  { %2997 = vst [vmem:[%s6874_s2 + $0x40] sm:$0xff] %v2157_v37  ;;  %v2606_v38 = vpop.f32.mrb[0].mxu1  ;;  %v2159_v39 = vpop.f32.mrb[1].mxu0  ;;  %2474 = vmatmul.mubr.f32.gmra.mrb[106].mxu0 %v4079_v40 }
 0x31f   :  { %2999 = vst [vmem:[%s6874_s2 + $0x50] sm:$0xff] %v2606_v38  ;;  %2998 = vst [vmem:[%s6874_s2 + $0x48] sm:$0xff] %v2159_v39  ;;  %v2608_v41 = vpop.f32.mrb[1].mxu1  ;;  %2923 = vmatmul.mubr.f32.gmra.mrb[106].mxu1 %v4079_v40  ;;  %2479 = vmatprep.mubr.f32.mxu0 %v4144_v0 }
 0x320   :  { %3000 = vst [vmem:[%s6874_s2 + $0x58] sm:$0xff] %v2608_v41  ;;  %2928 = vmatprep.mubr.f32.mxu1 %v4144_v0 }
 0x321   :  { %v2163_v42 = vpop.f32.mrb[2].mxu0 }
 0x322   :  { %3009 = vst [vmem:[%s6874_s2 + $0xa0] sm:$0xff] %v2163_v42  ;;  %v2612_v43 = vpop.f32.mrb[2].mxu1  ;;  %v2165_v44 = vpop.f32.mrb[3].mxu0  ;;  %2480 = vmatmul.mubr.f32.gmra.mrb[108].mxu0 %v4080_v45 }
 0x323   :  { %3011 = vst [vmem:[%s6874_s2 + $0xb0] sm:$0xff] %v2612_v43  ;;  %3010 = vst [vmem:[%s6874_s2 + $0xa8] sm:$0xff] %v2165_v44  ;;  %v2614_v46 = vpop.f32.mrb[3].mxu1  ;;  %2929 = vmatmul.mubr.f32.gmra.mrb[108].mxu1 %v4080_v45  ;;  %2485 = vmatprep.mubr.f32.mxu0 %v4144_v0 }
 0x324   :  { %3012 = vst [vmem:[%s6874_s2 + $0xb8] sm:$0xff] %v2614_v46  ;;  %2934 = vmatprep.mubr.f32.mxu1 %v4144_v0 }
 0x325   :  { %v2169_v47 = vpop.f32.mrb[4].mxu0 }
 0x326   :  { %3021 = vst [vmem:[%s6874_s2 + $0x100] sm:$0xff] %v2169_v47  ;;  %v2618_v48 = vpop.f32.mrb[4].mxu1  ;;  %v2171_v49 = vpop.f32.mrb[5].mxu0  ;;  %2486 = vmatmul.mubr.f32.gmra.mrb[110].mxu0 %v4081_v50 }
 0x327   :  { %3023 = vst [vmem:[%s6874_s2 + $0x110] sm:$0xff] %v2618_v48  ;;  %3022 = vst [vmem:[%s6874_s2 + $0x108] sm:$0xff] %v2171_v49  ;;  %v2620_v51 = vpop.f32.mrb[5].mxu1  ;;  %2935 = vmatmul.mubr.f32.gmra.mrb[110].mxu1 %v4081_v50  ;;  %2491 = vmatprep.mubr.f32.mxu0 %v4144_v0 }
 0x328   :  { %3024 = vst [vmem:[%s6874_s2 + $0x118] sm:$0xff] %v2620_v51  ;;  %2940 = vmatprep.mubr.f32.mxu1 %v4144_v0 }
 0x329   :  { %v2175_v52 = vpop.f32.mrb[6].mxu0 }
 0x32a   :  { %3033 = vst [vmem:[%s6874_s2 + $0x160] sm:$0xff] %v2175_v52  ;;  %v2624_v53 = vpop.f32.mrb[6].mxu1  ;;  %v2177_v54 = vpop.f32.mrb[7].mxu0  ;;  %2492 = vmatmul.mubr.f32.gmra.mrb[112].mxu0 %v4082_v55 }
 0x32b   :  { %3035 = vst [vmem:[%s6874_s2 + $0x170] sm:$0xff] %v2624_v53  ;;  %3034 = vst [vmem:[%s6874_s2 + $0x168] sm:$0xff] %v2177_v54  ;;  %v2626_v56 = vpop.f32.mrb[7].mxu1  ;;  %2941 = vmatmul.mubr.f32.gmra.mrb[112].mxu1 %v4082_v55  ;;  %2497 = vmatprep.mubr.f32.mxu0 %v4144_v0 }
 0x32c   :  { %3036 = vst [vmem:[%s6874_s2 + $0x178] sm:$0xff] %v2626_v56  ;;  %2946 = vmatprep.mubr.f32.mxu1 %v4144_v0 }
 0x32d   :  { %v2181_v57 = vpop.f32.mrb[8].mxu0 }
 0x32e   :  { %3045 = vst [vmem:[%s6874_s2 + $0x1c0] sm:$0xff] %v2181_v57  ;;  %v2630_v58 = vpop.f32.mrb[8].mxu1  ;;  %v2183_v59 = vpop.f32.mrb[9].mxu0  ;;  %2498 = vmatmul.mubr.f32.gmra.mrb[114].mxu0 %v4083_v60 }
 0x32f   :  { %3047 = vst [vmem:[%s6874_s2 + $0x1d0] sm:$0xff] %v2630_v58  ;;  %3046 = vst [vmem:[%s6874_s2 + $0x1c8] sm:$0xff] %v2183_v59  ;;  %v2632_v61 = vpop.f32.mrb[9].mxu1  ;;  %2947 = vmatmul.mubr.f32.gmra.mrb[114].mxu1 %v4083_v60  ;;  %2503 = vmatprep.mubr.f32.mxu0 %v4144_v0 }
 0x330   :  { %3048 = vst [vmem:[%s6874_s2 + $0x1d8] sm:$0xff] %v2632_v61  ;;  %2952 = vmatprep.mubr.f32.mxu1 %v4144_v0 }
 0x331   :  { %v2187_v62 = vpop.f32.mrb[10].mxu0 }
 0x332   :  { %3057 = vst [vmem:[%s6874_s2 + $0x220] sm:$0xff] %v2187_v62  ;;  %v2636_v63 = vpop.f32.mrb[10].mxu1  ;;  %v2189_v1 = vpop.f32.mrb[11].mxu0  ;;  %2504 = vmatmul.mubr.f32.gmra.mrb[116].mxu0 %v4084_v2 }
 0x333   :  { %3059 = vst [vmem:[%s6874_s2 + $0x230] sm:$0xff] %v2636_v63  ;;  %3058 = vst [vmem:[%s6874_s2 + $0x228] sm:$0xff] %v2189_v1  ;;  %v2638_v3 = vpop.f32.mrb[11].mxu1  ;;  %2953 = vmatmul.mubr.f32.gmra.mrb[116].mxu1 %v4084_v2  ;;  %2509 = vmatprep.mubr.f32.mxu0 %v4144_v0 }
 0x334   :  { %3060 = vst [vmem:[%s6874_s2 + $0x238] sm:$0xff] %v2638_v3  ;;  %2958 = vmatprep.mubr.f32.mxu1 %v4144_v0 }
 0x335   :  { %v2193_v4 = vpop.f32.mrb[12].mxu0 }
 0x336   :  { %3069 = vst [vmem:[%s6874_s2 + $0x280] sm:$0xff] %v2193_v4  ;;  %v2642_v5 = vpop.f32.mrb[12].mxu1  ;;  %v2195_v6 = vpop.f32.mrb[13].mxu0  ;;  %2510 = vmatmul.mubr.f32.gmra.mrb[118].mxu0 %v4085_v7 }
 0x337   :  { %3071 = vst [vmem:[%s6874_s2 + $0x290] sm:$0xff] %v2642_v5  ;;  %3070 = vst [vmem:[%s6874_s2 + $0x288] sm:$0xff] %v2195_v6  ;;  %v2644_v8 = vpop.f32.mrb[13].mxu1  ;;  %2959 = vmatmul.mubr.f32.gmra.mrb[118].mxu1 %v4085_v7  ;;  %2515 = vmatprep.mubr.f32.mxu0 %v4144_v0 }
 0x338   :  { %3072 = vst [vmem:[%s6874_s2 + $0x298] sm:$0xff] %v2644_v8  ;;  %2964 = vmatprep.mubr.f32.mxu1 %v4144_v0 }
 0x339   :  { %v2199_v9 = vpop.f32.mrb[14].mxu0 }
 0x33a   :  { %3081 = vst [vmem:[%s6874_s2 + $0x2e0] sm:$0xff] %v2199_v9  ;;  %v2648_v10 = vpop.f32.mrb[14].mxu1  ;;  %v2201_v11 = vpop.f32.mrb[15].mxu0  ;;  %2516 = vmatmul.mubr.f32.gmra.mrb[120].mxu0 %v4086_v12 }
 0x33b   :  { %3083 = vst [vmem:[%s6874_s2 + $0x2f0] sm:$0xff] %v2648_v10  ;;  %3082 = vst [vmem:[%s6874_s2 + $0x2e8] sm:$0xff] %v2201_v11  ;;  %v2650_v13 = vpop.f32.mrb[15].mxu1  ;;  %2965 = vmatmul.mubr.f32.gmra.mrb[120].mxu1 %v4086_v12  ;;  %2521 = vmatprep.mubr.f32.mxu0 %v4144_v0 }
 0x33c   :  { %3084 = vst [vmem:[%s6874_s2 + $0x2f8] sm:$0xff] %v2650_v13  ;;  %2970 = vmatprep.mubr.f32.mxu1 %v4144_v0 }
 0x33d   :  { %v2205_v14 = vpop.f32.mrb[16].mxu0 }
 0x33e   :  { %3093 = vst [vmem:[%s6874_s2 + $0x340] sm:$0xff] %v2205_v14  ;;  %v2654_v15 = vpop.f32.mrb[16].mxu1  ;;  %v2207_v16 = vpop.f32.mrb[17].mxu0  ;;  %2522 = vmatmul.mubr.f32.gmra.mrb[122].mxu0 %v4087_v17 }
 0x33f   :  { %3095 = vst [vmem:[%s6874_s2 + $0x350] sm:$0xff] %v2654_v15  ;;  %3094 = vst [vmem:[%s6874_s2 + $0x348] sm:$0xff] %v2207_v16  ;;  %v2656_v18 = vpop.f32.mrb[17].mxu1  ;;  %2971 = vmatmul.mubr.f32.gmra.mrb[122].mxu1 %v4087_v17  ;;  %2527 = vmatprep.mubr.f32.mxu0 %v4144_v0 }
 0x340   :  { %3096 = vst [vmem:[%s6874_s2 + $0x358] sm:$0xff] %v2656_v18  ;;  %2976 = vmatprep.mubr.f32.mxu1 %v4144_v0 }
 0x341   :  { %v2211_v19 = vpop.f32.mrb[18].mxu0 }
 0x342   :  { %3105 = vst [vmem:[%s6874_s2 + $0x3a0] sm:$0xff] %v2211_v19  ;;  %v2660_v20 = vpop.f32.mrb[18].mxu1  ;;  %v2213_v21 = vpop.f32.mrb[19].mxu0  ;;  %2528 = vmatmul.mubr.f32.gmra.mrb[124].mxu0 %v4088_v22 }
 0x343   :  { %3107 = vst [vmem:[%s6874_s2 + $0x3b0] sm:$0xff] %v2660_v20  ;;  %3106 = vst [vmem:[%s6874_s2 + $0x3a8] sm:$0xff] %v2213_v21  ;;  %v2662_v23 = vpop.f32.mrb[19].mxu1  ;;  %2977 = vmatmul.mubr.f32.gmra.mrb[124].mxu1 %v4088_v22  ;;  %2533 = vmatprep.mubr.f32.mxu0 %v4144_v0 }
 0x344   :  { %3108 = vst [vmem:[%s6874_s2 + $0x3b8] sm:$0xff] %v2662_v23  ;;  %2982 = vmatprep.mubr.f32.mxu1 %v4144_v0 }
 0x345   :  { %v2217_v24 = vpop.f32.mrb[20].mxu0 }
 0x346   :  { %3117 = vst [vmem:[%s6874_s2 + $0x400] sm:$0xff] %v2217_v24  ;;  %v2666_v25 = vpop.f32.mrb[20].mxu1  ;;  %v2219_v26 = vpop.f32.mrb[21].mxu0  ;;  %2534 = vmatmul.mubr.f32.gmra.mrb[126].mxu0 %v4089_v27 }
 0x347   :  { %3119 = vst [vmem:[%s6874_s2 + $0x410] sm:$0xff] %v2666_v25  ;;  %3118 = vst [vmem:[%s6874_s2 + $0x408] sm:$0xff] %v2219_v26  ;;  %v2668_v28 = vpop.f32.mrb[21].mxu1  ;;  %2983 = vmatmul.mubr.f32.gmra.mrb[126].mxu1 %v4089_v27 }
 0x348   :  { %3120 = vst [vmem:[%s6874_s2 + $0x418] sm:$0xff] %v2668_v28 }
 0x349   :  { %v2223_v0 = vpop.f32.mrb[22].mxu0 }
 0x34a   :  { %3129 = vst [vmem:[%s6874_s2 + $0x460] sm:$0xff] %v2223_v0  ;;  %v2672_v29 = vpop.f32.mrb[22].mxu1  ;;  %v2225_v30 = vpop.f32.mrb[23].mxu0 }
 0x34b   :  { %3131 = vst [vmem:[%s6874_s2 + $0x470] sm:$0xff] %v2672_v29  ;;  %3130 = vst [vmem:[%s6874_s2 + $0x468] sm:$0xff] %v2225_v30  ;;  %v2674_v31 = vpop.f32.mrb[23].mxu1 }
 0x34c   :  { %3132 = vst [vmem:[%s6874_s2 + $0x478] sm:$0xff] %v2674_v31 }
 0x34d   :  { %v2229_v32 = vpop.f32.mrb[24].mxu0 }
 0x34e   :  { %3141 = vst [vmem:[%s6874_s2 + $0x4c0] sm:$0xff] %v2229_v32  ;;  %v2678_v33 = vpop.f32.mrb[24].mxu1  ;;  %v2231_v34 = vpop.f32.mrb[25].mxu0 }
 0x34f   :  { %3143 = vst [vmem:[%s6874_s2 + $0x4d0] sm:$0xff] %v2678_v33  ;;  %3142 = vst [vmem:[%s6874_s2 + $0x4c8] sm:$0xff] %v2231_v34  ;;  %v2680_v35 = vpop.f32.mrb[25].mxu1 }
 0x350   :  { %3144 = vst [vmem:[%s6874_s2 + $0x4d8] sm:$0xff] %v2680_v35 }
 0x351   :  { %v2235_v36 = vpop.f32.mrb[26].mxu0 }
 0x352   :  { %3153 = vst [vmem:[%s6874_s2 + $0x520] sm:$0xff] %v2235_v36  ;;  %v2684_v37 = vpop.f32.mrb[26].mxu1  ;;  %v2237_v38 = vpop.f32.mrb[27].mxu0 }
 0x353   :  { %3155 = vst [vmem:[%s6874_s2 + $0x530] sm:$0xff] %v2684_v37  ;;  %3154 = vst [vmem:[%s6874_s2 + $0x528] sm:$0xff] %v2237_v38  ;;  %v2686_v39 = vpop.f32.mrb[27].mxu1 }
 0x354   :  { %3156 = vst [vmem:[%s6874_s2 + $0x538] sm:$0xff] %v2686_v39 }
 0x355   :  { %v2241_v40 = vpop.f32.mrb[28].mxu0 }
 0x356   :  { %3165 = vst [vmem:[%s6874_s2 + $0x580] sm:$0xff] %v2241_v40  ;;  %v2690_v41 = vpop.f32.mrb[28].mxu1  ;;  %v2243_v42 = vpop.f32.mrb[29].mxu0 }
 0x357   :  { %3167 = vst [vmem:[%s6874_s2 + $0x590] sm:$0xff] %v2690_v41  ;;  %3166 = vst [vmem:[%s6874_s2 + $0x588] sm:$0xff] %v2243_v42  ;;  %v2692_v43 = vpop.f32.mrb[29].mxu1 }
 0x358   :  { %3168 = vst [vmem:[%s6874_s2 + $0x598] sm:$0xff] %v2692_v43 }
 0x359   :  { %v2247_v44 = vpop.f32.mrb[30].mxu0 }
 0x35a   :  { %3177 = vst [vmem:[%s6874_s2 + $0x5e0] sm:$0xff] %v2247_v44  ;;  %v2696_v45 = vpop.f32.mrb[30].mxu1  ;;  %v2249_v46 = vpop.f32.mrb[31].mxu0 }
 0x35b   :  { %3179 = vst [vmem:[%s6874_s2 + $0x5f0] sm:$0xff] %v2696_v45  ;;  %3178 = vst [vmem:[%s6874_s2 + $0x5e8] sm:$0xff] %v2249_v46  ;;  %v2698_v47 = vpop.f32.mrb[31].mxu1 }
 0x35c   :  { %3180 = vst [vmem:[%s6874_s2 + $0x5f8] sm:$0xff] %v2698_v47 }
 0x35d   :  { %v2253_v48 = vpop.f32.mrb[32].mxu0 }
 0x35e   :  { %3189 = vst [vmem:[%s6874_s2 + $0x640] sm:$0xff] %v2253_v48  ;;  %v2702_v49 = vpop.f32.mrb[32].mxu1  ;;  %v2255_v50 = vpop.f32.mrb[33].mxu0 }
 0x35f   :  { %3191 = vst [vmem:[%s6874_s2 + $0x650] sm:$0xff] %v2702_v49  ;;  %3190 = vst [vmem:[%s6874_s2 + $0x648] sm:$0xff] %v2255_v50  ;;  %v2704_v51 = vpop.f32.mrb[33].mxu1 }
 0x360   :  { %3192 = vst [vmem:[%s6874_s2 + $0x658] sm:$0xff] %v2704_v51 }
 0x361   :  { %v2259_v52 = vpop.f32.mrb[34].mxu0 }
 0x362   :  { %3201 = vst [vmem:[%s6874_s2 + $0x6a0] sm:$0xff] %v2259_v52  ;;  %v2708_v53 = vpop.f32.mrb[34].mxu1  ;;  %v2261_v54 = vpop.f32.mrb[35].mxu0 }
 0x363   :  { %3203 = vst [vmem:[%s6874_s2 + $0x6b0] sm:$0xff] %v2708_v53  ;;  %3202 = vst [vmem:[%s6874_s2 + $0x6a8] sm:$0xff] %v2261_v54  ;;  %v2710_v55 = vpop.f32.mrb[35].mxu1 }
 0x364   :  { %3204 = vst [vmem:[%s6874_s2 + $0x6b8] sm:$0xff] %v2710_v55 }
 0x365   :  { %v2265_v56 = vpop.f32.mrb[36].mxu0 }
 0x366   :  { %3213 = vst [vmem:[%s6874_s2 + $0x700] sm:$0xff] %v2265_v56  ;;  %v2714_v57 = vpop.f32.mrb[36].mxu1  ;;  %v2267_v58 = vpop.f32.mrb[37].mxu0 }
 0x367   :  { %3215 = vst [vmem:[%s6874_s2 + $0x710] sm:$0xff] %v2714_v57  ;;  %3214 = vst [vmem:[%s6874_s2 + $0x708] sm:$0xff] %v2267_v58  ;;  %v2716_v59 = vpop.f32.mrb[37].mxu1 }
 0x368   :  { %3216 = vst [vmem:[%s6874_s2 + $0x718] sm:$0xff] %v2716_v59 }
 0x369   :  { %v2271_v60 = vpop.f32.mrb[38].mxu0 }
 0x36a   :  { %3225 = vst [vmem:[%s6874_s2 + $0x760] sm:$0xff] %v2271_v60  ;;  %v2720_v61 = vpop.f32.mrb[38].mxu1  ;;  %v2273_v62 = vpop.f32.mrb[39].mxu0 }
 0x36b   :  { %3227 = vst [vmem:[%s6874_s2 + $0x770] sm:$0xff] %v2720_v61  ;;  %3226 = vst [vmem:[%s6874_s2 + $0x768] sm:$0xff] %v2273_v62  ;;  %v2722_v63 = vpop.f32.mrb[39].mxu1 }
 0x36c   :  { %3228 = vst [vmem:[%s6874_s2 + $0x778] sm:$0xff] %v2722_v63 }
 0x36d   :  { %v2277_v1 = vpop.f32.mrb[40].mxu0 }
 0x36e   :  { %3237 = vst [vmem:[%s6874_s2 + $0x7c0] sm:$0xff] %v2277_v1  ;;  %v2726_v2 = vpop.f32.mrb[40].mxu1  ;;  %v2279_v3 = vpop.f32.mrb[41].mxu0 }
 0x36f   :  { %3239 = vst [vmem:[%s6874_s2 + $0x7d0] sm:$0xff] %v2726_v2  ;;  %3238 = vst [vmem:[%s6874_s2 + $0x7c8] sm:$0xff] %v2279_v3  ;;  %v2728_v4 = vpop.f32.mrb[41].mxu1 }
 0x370   :  { %3240 = vst [vmem:[%s6874_s2 + $0x7d8] sm:$0xff] %v2728_v4 }
 0x371   :  { %v2283_v5 = vpop.f32.mrb[42].mxu0 }
 0x372   :  { %3249 = vst [vmem:[%s6874_s2 + $0x820] sm:$0xff] %v2283_v5  ;;  %v2732_v6 = vpop.f32.mrb[42].mxu1  ;;  %v2285_v7 = vpop.f32.mrb[43].mxu0 }
 0x373   :  { %3251 = vst [vmem:[%s6874_s2 + $0x830] sm:$0xff] %v2732_v6  ;;  %3250 = vst [vmem:[%s6874_s2 + $0x828] sm:$0xff] %v2285_v7  ;;  %v2734_v8 = vpop.f32.mrb[43].mxu1 }
 0x374   :  { %3252 = vst [vmem:[%s6874_s2 + $0x838] sm:$0xff] %v2734_v8 }
 0x375   :  { %v2289_v9 = vpop.f32.mrb[44].mxu0 }
 0x376   :  { %3261 = vst [vmem:[%s6874_s2 + $0x880] sm:$0xff] %v2289_v9  ;;  %v2738_v10 = vpop.f32.mrb[44].mxu1  ;;  %v2291_v11 = vpop.f32.mrb[45].mxu0 }
 0x377   :  { %3263 = vst [vmem:[%s6874_s2 + $0x890] sm:$0xff] %v2738_v10  ;;  %3262 = vst [vmem:[%s6874_s2 + $0x888] sm:$0xff] %v2291_v11  ;;  %v2740_v12 = vpop.f32.mrb[45].mxu1 }
 0x378   :  { %3264 = vst [vmem:[%s6874_s2 + $0x898] sm:$0xff] %v2740_v12 }
 0x379   :  { %v2295_v13 = vpop.f32.mrb[46].mxu0 }
 0x37a   :  { %3273 = vst [vmem:[%s6874_s2 + $0x8e0] sm:$0xff] %v2295_v13  ;;  %v2744_v14 = vpop.f32.mrb[46].mxu1  ;;  %v2297_v15 = vpop.f32.mrb[47].mxu0 }
 0x37b   :  { %3275 = vst [vmem:[%s6874_s2 + $0x8f0] sm:$0xff] %v2744_v14  ;;  %3274 = vst [vmem:[%s6874_s2 + $0x8e8] sm:$0xff] %v2297_v15  ;;  %v2746_v16 = vpop.f32.mrb[47].mxu1 }
 0x37c   :  { %3276 = vst [vmem:[%s6874_s2 + $0x8f8] sm:$0xff] %v2746_v16 }
 0x37d   :  { %v2301_v17 = vpop.f32.mrb[48].mxu0 }
 0x37e   :  { %3285 = vst [vmem:[%s6874_s2 + $0x940] sm:$0xff] %v2301_v17  ;;  %v2750_v18 = vpop.f32.mrb[48].mxu1  ;;  %v2303_v19 = vpop.f32.mrb[49].mxu0 }
 0x37f   :  { %3287 = vst [vmem:[%s6874_s2 + $0x950] sm:$0xff] %v2750_v18  ;;  %3286 = vst [vmem:[%s6874_s2 + $0x948] sm:$0xff] %v2303_v19  ;;  %v2752_v20 = vpop.f32.mrb[49].mxu1 }
 0x380   :  { %3288 = vst [vmem:[%s6874_s2 + $0x958] sm:$0xff] %v2752_v20 }
 0x381   :  { %v2307_v21 = vpop.f32.mrb[50].mxu0 }
 0x382   :  { %3297 = vst [vmem:[%s6874_s2 + $0x9a0] sm:$0xff] %v2307_v21  ;;  %v2756_v22 = vpop.f32.mrb[50].mxu1  ;;  %v2309_v23 = vpop.f32.mrb[51].mxu0 }
 0x383   :  { %3299 = vst [vmem:[%s6874_s2 + $0x9b0] sm:$0xff] %v2756_v22  ;;  %3298 = vst [vmem:[%s6874_s2 + $0x9a8] sm:$0xff] %v2309_v23  ;;  %v2758_v24 = vpop.f32.mrb[51].mxu1 }
 0x384   :  { %3300 = vst [vmem:[%s6874_s2 + $0x9b8] sm:$0xff] %v2758_v24 }
 0x385   :  { %v2313_v25 = vpop.f32.mrb[52].mxu0 }
 0x386   :  { %3309 = vst [vmem:[%s6874_s2 + $0xa00] sm:$0xff] %v2313_v25  ;;  %v2762_v26 = vpop.f32.mrb[52].mxu1  ;;  %v2315_v27 = vpop.f32.mrb[53].mxu0 }
 0x387   :  { %3311 = vst [vmem:[%s6874_s2 + $0xa10] sm:$0xff] %v2762_v26  ;;  %3310 = vst [vmem:[%s6874_s2 + $0xa08] sm:$0xff] %v2315_v27  ;;  %v2764_v28 = vpop.f32.mrb[53].mxu1 }
 0x388   :  { %3312 = vst [vmem:[%s6874_s2 + $0xa18] sm:$0xff] %v2764_v28 }
 0x389   :  { %v2319_v0 = vpop.f32.mrb[54].mxu0 }
 0x38a   :  { %3321 = vst [vmem:[%s6874_s2 + $0xa60] sm:$0xff] %v2319_v0  ;;  %v2768_v29 = vpop.f32.mrb[54].mxu1  ;;  %v2321_v30 = vpop.f32.mrb[55].mxu0 }
 0x38b   :  { %3323 = vst [vmem:[%s6874_s2 + $0xa70] sm:$0xff] %v2768_v29  ;;  %3322 = vst [vmem:[%s6874_s2 + $0xa68] sm:$0xff] %v2321_v30  ;;  %v2770_v31 = vpop.f32.mrb[55].mxu1 }
 0x38c   :  { %3324 = vst [vmem:[%s6874_s2 + $0xa78] sm:$0xff] %v2770_v31 }
 0x38d   :  { %v2325_v32 = vpop.f32.mrb[56].mxu0 }
 0x38e   :  { %3333 = vst [vmem:[%s6874_s2 + $0xac0] sm:$0xff] %v2325_v32  ;;  %v2774_v33 = vpop.f32.mrb[56].mxu1  ;;  %v2327_v34 = vpop.f32.mrb[57].mxu0 }
 0x38f   :  { %3335 = vst [vmem:[%s6874_s2 + $0xad0] sm:$0xff] %v2774_v33  ;;  %3334 = vst [vmem:[%s6874_s2 + $0xac8] sm:$0xff] %v2327_v34  ;;  %v2776_v35 = vpop.f32.mrb[57].mxu1 }
 0x390   :  { %3336 = vst [vmem:[%s6874_s2 + $0xad8] sm:$0xff] %v2776_v35 }
 0x391   :  { %v2331_v36 = vpop.f32.mrb[58].mxu0 }
 0x392   :  { %3345 = vst [vmem:[%s6874_s2 + $0xb20] sm:$0xff] %v2331_v36  ;;  %v2780_v37 = vpop.f32.mrb[58].mxu1  ;;  %v2333_v38 = vpop.f32.mrb[59].mxu0 }
 0x393   :  { %3347 = vst [vmem:[%s6874_s2 + $0xb30] sm:$0xff] %v2780_v37  ;;  %3346 = vst [vmem:[%s6874_s2 + $0xb28] sm:$0xff] %v2333_v38  ;;  %v2782_v39 = vpop.f32.mrb[59].mxu1 }
 0x394   :  { %3348 = vst [vmem:[%s6874_s2 + $0xb38] sm:$0xff] %v2782_v39 }
 0x395   :  { %v2337_v40 = vpop.f32.mrb[60].mxu0 }
 0x396   :  { %3357 = vst [vmem:[%s6874_s2 + $0xb80] sm:$0xff] %v2337_v40  ;;  %v2786_v41 = vpop.f32.mrb[60].mxu1  ;;  %v2339_v42 = vpop.f32.mrb[61].mxu0 }
 0x397   :  { %3359 = vst [vmem:[%s6874_s2 + $0xb90] sm:$0xff] %v2786_v41  ;;  %3358 = vst [vmem:[%s6874_s2 + $0xb88] sm:$0xff] %v2339_v42  ;;  %v2788_v43 = vpop.f32.mrb[61].mxu1 }
 0x398   :  { %3360 = vst [vmem:[%s6874_s2 + $0xb98] sm:$0xff] %v2788_v43 }
 0x399   :  { %v2343_v44 = vpop.f32.mrb[62].mxu0 }
 0x39a   :  { %3369 = vst [vmem:[%s6874_s2 + $0xbe0] sm:$0xff] %v2343_v44  ;;  %v2792_v45 = vpop.f32.mrb[62].mxu1  ;;  %v2345_v46 = vpop.f32.mrb[63].mxu0 }
 0x39b   :  { %3371 = vst [vmem:[%s6874_s2 + $0xbf0] sm:$0xff] %v2792_v45  ;;  %3370 = vst [vmem:[%s6874_s2 + $0xbe8] sm:$0xff] %v2345_v46  ;;  %v2794_v47 = vpop.f32.mrb[63].mxu1 }
 0x39c   :  { %3372 = vst [vmem:[%s6874_s2 + $0xbf8] sm:$0xff] %v2794_v47 }
 0x39d   :  { %v2349_v48 = vpop.f32.mrb[64].mxu0 }
 0x39e   :  { %3381 = vst [vmem:[%s6874_s2 + $0xc40] sm:$0xff] %v2349_v48  ;;  %v2798_v49 = vpop.f32.mrb[64].mxu1  ;;  %v2351_v50 = vpop.f32.mrb[65].mxu0 }
 0x39f   :  { %3383 = vst [vmem:[%s6874_s2 + $0xc50] sm:$0xff] %v2798_v49  ;;  %3382 = vst [vmem:[%s6874_s2 + $0xc48] sm:$0xff] %v2351_v50  ;;  %v2800_v51 = vpop.f32.mrb[65].mxu1 }
 0x3a0   :  { %3384 = vst [vmem:[%s6874_s2 + $0xc58] sm:$0xff] %v2800_v51 }
 0x3a1   :  { %v2355_v52 = vpop.f32.mrb[66].mxu0 }
 0x3a2   :  { %3393 = vst [vmem:[%s6874_s2 + $0xca0] sm:$0xff] %v2355_v52  ;;  %v2804_v53 = vpop.f32.mrb[66].mxu1  ;;  %v2357_v54 = vpop.f32.mrb[67].mxu0 }
 0x3a3   :  { %3395 = vst [vmem:[%s6874_s2 + $0xcb0] sm:$0xff] %v2804_v53  ;;  %3394 = vst [vmem:[%s6874_s2 + $0xca8] sm:$0xff] %v2357_v54  ;;  %v2806_v55 = vpop.f32.mrb[67].mxu1 }
 0x3a4   :  { %3396 = vst [vmem:[%s6874_s2 + $0xcb8] sm:$0xff] %v2806_v55 }
 0x3a5   :  { %v2361_v56 = vpop.f32.mrb[68].mxu0 }
 0x3a6   :  { %3405 = vst [vmem:[%s6874_s2 + $0xd00] sm:$0xff] %v2361_v56  ;;  %v2810_v57 = vpop.f32.mrb[68].mxu1  ;;  %v2363_v58 = vpop.f32.mrb[69].mxu0 }
 0x3a7   :  { %3407 = vst [vmem:[%s6874_s2 + $0xd10] sm:$0xff] %v2810_v57  ;;  %3406 = vst [vmem:[%s6874_s2 + $0xd08] sm:$0xff] %v2363_v58  ;;  %v2812_v59 = vpop.f32.mrb[69].mxu1 }
 0x3a8   :  { %3408 = vst [vmem:[%s6874_s2 + $0xd18] sm:$0xff] %v2812_v59 }
 0x3a9   :  { %v2367_v60 = vpop.f32.mrb[70].mxu0 }
 0x3aa   :  { %3417 = vst [vmem:[%s6874_s2 + $0xd60] sm:$0xff] %v2367_v60  ;;  %v2816_v61 = vpop.f32.mrb[70].mxu1  ;;  %v2369_v62 = vpop.f32.mrb[71].mxu0 }
 0x3ab   :  { %3419 = vst [vmem:[%s6874_s2 + $0xd70] sm:$0xff] %v2816_v61  ;;  %3418 = vst [vmem:[%s6874_s2 + $0xd68] sm:$0xff] %v2369_v62  ;;  %v2818_v63 = vpop.f32.mrb[71].mxu1 }
 0x3ac   :  { %3420 = vst [vmem:[%s6874_s2 + $0xd78] sm:$0xff] %v2818_v63 }
 0x3ad   :  { %v2373_v1 = vpop.f32.mrb[72].mxu0 }
 0x3ae   :  { %3429 = vst [vmem:[%s6874_s2 + $0xdc0] sm:$0xff] %v2373_v1  ;;  %v2822_v2 = vpop.f32.mrb[72].mxu1  ;;  %v2375_v3 = vpop.f32.mrb[73].mxu0 }
 0x3af   :  { %3431 = vst [vmem:[%s6874_s2 + $0xdd0] sm:$0xff] %v2822_v2  ;;  %3430 = vst [vmem:[%s6874_s2 + $0xdc8] sm:$0xff] %v2375_v3  ;;  %v2824_v4 = vpop.f32.mrb[73].mxu1 }
 0x3b0   :  { %3432 = vst [vmem:[%s6874_s2 + $0xdd8] sm:$0xff] %v2824_v4 }
 0x3b1   :  { %v2379_v5 = vpop.f32.mrb[74].mxu0 }
 0x3b2   :  { %3441 = vst [vmem:[%s6874_s2 + $0xe20] sm:$0xff] %v2379_v5  ;;  %v2828_v6 = vpop.f32.mrb[74].mxu1  ;;  %v2381_v7 = vpop.f32.mrb[75].mxu0 }
 0x3b3   :  { %3443 = vst [vmem:[%s6874_s2 + $0xe30] sm:$0xff] %v2828_v6  ;;  %3442 = vst [vmem:[%s6874_s2 + $0xe28] sm:$0xff] %v2381_v7  ;;  %v2830_v8 = vpop.f32.mrb[75].mxu1 }
 0x3b4   :  { %3444 = vst [vmem:[%s6874_s2 + $0xe38] sm:$0xff] %v2830_v8 }
 0x3b5   :  { %v2385_v9 = vpop.f32.mrb[76].mxu0 }
 0x3b6   :  { %3453 = vst [vmem:[%s6874_s2 + $0xe80] sm:$0xff] %v2385_v9  ;;  %v2834_v10 = vpop.f32.mrb[76].mxu1  ;;  %v2387_v11 = vpop.f32.mrb[77].mxu0 }
 0x3b7   :  { %3455 = vst [vmem:[%s6874_s2 + $0xe90] sm:$0xff] %v2834_v10  ;;  %3454 = vst [vmem:[%s6874_s2 + $0xe88] sm:$0xff] %v2387_v11  ;;  %v2836_v12 = vpop.f32.mrb[77].mxu1 }
 0x3b8   :  { %3456 = vst [vmem:[%s6874_s2 + $0xe98] sm:$0xff] %v2836_v12 }
 0x3b9   :  { %v2391_v13 = vpop.f32.mrb[78].mxu0 }
 0x3ba   :  { %3465 = vst [vmem:[%s6874_s2 + $0xee0] sm:$0xff] %v2391_v13  ;;  %v2840_v14 = vpop.f32.mrb[78].mxu1  ;;  %v2393_v15 = vpop.f32.mrb[79].mxu0 }
 0x3bb   :  { %3467 = vst [vmem:[%s6874_s2 + $0xef0] sm:$0xff] %v2840_v14  ;;  %3466 = vst [vmem:[%s6874_s2 + $0xee8] sm:$0xff] %v2393_v15  ;;  %v2842_v16 = vpop.f32.mrb[79].mxu1 }
 0x3bc   :  { %3468 = vst [vmem:[%s6874_s2 + $0xef8] sm:$0xff] %v2842_v16 }
 0x3bd   :  { %v2397_v17 = vpop.f32.mrb[80].mxu0 }
 0x3be   :  { %3477 = vst [vmem:[%s6874_s2 + $0xf40] sm:$0xff] %v2397_v17  ;;  %v2846_v18 = vpop.f32.mrb[80].mxu1  ;;  %v2399_v19 = vpop.f32.mrb[81].mxu0 }
 0x3bf   :  { %3479 = vst [vmem:[%s6874_s2 + $0xf50] sm:$0xff] %v2846_v18  ;;  %3478 = vst [vmem:[%s6874_s2 + $0xf48] sm:$0xff] %v2399_v19  ;;  %v2848_v20 = vpop.f32.mrb[81].mxu1 }
 0x3c0   :  { %3480 = vst [vmem:[%s6874_s2 + $0xf58] sm:$0xff] %v2848_v20 }
 0x3c1   :  { %v2403_v21 = vpop.f32.mrb[82].mxu0 }
 0x3c2   :  { %3489 = vst [vmem:[%s6874_s2 + $0xfa0] sm:$0xff] %v2403_v21  ;;  %v2852_v22 = vpop.f32.mrb[82].mxu1  ;;  %v2405_v23 = vpop.f32.mrb[83].mxu0 }
 0x3c3   :  { %3491 = vst [vmem:[%s6874_s2 + $0xfb0] sm:$0xff] %v2852_v22  ;;  %3490 = vst [vmem:[%s6874_s2 + $0xfa8] sm:$0xff] %v2405_v23  ;;  %v2854_v24 = vpop.f32.mrb[83].mxu1 }
 0x3c4   :  { %3492 = vst [vmem:[%s6874_s2 + $0xfb8] sm:$0xff] %v2854_v24 }
 0x3c5   :  { %v2409_v25 = vpop.f32.mrb[84].mxu0 }
 0x3c6   :  { %3501 = vst [vmem:[%s6874_s2 + $0x1000] sm:$0xff] %v2409_v25  ;;  %v2858_v26 = vpop.f32.mrb[84].mxu1  ;;  %v2411_v27 = vpop.f32.mrb[85].mxu0 }
 0x3c7   :  { %3503 = vst [vmem:[%s6874_s2 + $0x1010] sm:$0xff] %v2858_v26  ;;  %3502 = vst [vmem:[%s6874_s2 + $0x1008] sm:$0xff] %v2411_v27  ;;  %v2860_v28 = vpop.f32.mrb[85].mxu1 }
 0x3c8   :  { %3504 = vst [vmem:[%s6874_s2 + $0x1018] sm:$0xff] %v2860_v28 }
 0x3c9   :  { %v2415_v0 = vpop.f32.mrb[86].mxu0 }
 0x3ca   :  { %3513 = vst [vmem:[%s6874_s2 + $0x1060] sm:$0xff] %v2415_v0  ;;  %v2864_v29 = vpop.f32.mrb[86].mxu1  ;;  %v2417_v30 = vpop.f32.mrb[87].mxu0 }
 0x3cb   :  { %3515 = vst [vmem:[%s6874_s2 + $0x1070] sm:$0xff] %v2864_v29  ;;  %3514 = vst [vmem:[%s6874_s2 + $0x1068] sm:$0xff] %v2417_v30  ;;  %v2866_v31 = vpop.f32.mrb[87].mxu1 }
 0x3cc   :  { %3516 = vst [vmem:[%s6874_s2 + $0x1078] sm:$0xff] %v2866_v31 }
 0x3cd   :  { %v2421_v32 = vpop.f32.mrb[88].mxu0 }
 0x3ce   :  { %3525 = vst [vmem:[%s6874_s2 + $0x10c0] sm:$0xff] %v2421_v32  ;;  %v2870_v33 = vpop.f32.mrb[88].mxu1  ;;  %v2423_v34 = vpop.f32.mrb[89].mxu0 }
 0x3cf   :  { %3527 = vst [vmem:[%s6874_s2 + $0x10d0] sm:$0xff] %v2870_v33  ;;  %3526 = vst [vmem:[%s6874_s2 + $0x10c8] sm:$0xff] %v2423_v34  ;;  %v2872_v35 = vpop.f32.mrb[89].mxu1 }
 0x3d0   :  { %3528 = vst [vmem:[%s6874_s2 + $0x10d8] sm:$0xff] %v2872_v35 }
 0x3d1   :  { %v2427_v36 = vpop.f32.mrb[90].mxu0 }
 0x3d2   :  { %3537 = vst [vmem:[%s6874_s2 + $0x1120] sm:$0xff] %v2427_v36  ;;  %v2876_v37 = vpop.f32.mrb[90].mxu1  ;;  %v2429_v38 = vpop.f32.mrb[91].mxu0 }
 0x3d3   :  { %3539 = vst [vmem:[%s6874_s2 + $0x1130] sm:$0xff] %v2876_v37  ;;  %3538 = vst [vmem:[%s6874_s2 + $0x1128] sm:$0xff] %v2429_v38  ;;  %v2878_v39 = vpop.f32.mrb[91].mxu1 }
 0x3d4   :  { %3540 = vst [vmem:[%s6874_s2 + $0x1138] sm:$0xff] %v2878_v39 }
 0x3d5   :  { %v2433_v40 = vpop.f32.mrb[92].mxu0 }
 0x3d6   :  { %3549 = vst [vmem:[%s6874_s2 + $0x1180] sm:$0xff] %v2433_v40  ;;  %v2882_v41 = vpop.f32.mrb[92].mxu1  ;;  %v2435_v42 = vpop.f32.mrb[93].mxu0 }
 0x3d7   :  { %3551 = vst [vmem:[%s6874_s2 + $0x1190] sm:$0xff] %v2882_v41  ;;  %3550 = vst [vmem:[%s6874_s2 + $0x1188] sm:$0xff] %v2435_v42  ;;  %v2884_v43 = vpop.f32.mrb[93].mxu1 }
 0x3d8   :  { %3552 = vst [vmem:[%s6874_s2 + $0x1198] sm:$0xff] %v2884_v43 }
 0x3d9   :  { %v2439_v44 = vpop.f32.mrb[94].mxu0 }
 0x3da   :  { %3561 = vst [vmem:[%s6874_s2 + $0x11e0] sm:$0xff] %v2439_v44  ;;  %v2888_v45 = vpop.f32.mrb[94].mxu1  ;;  %v2441_v46 = vpop.f32.mrb[95].mxu0 }
 0x3db   :  { %3563 = vst [vmem:[%s6874_s2 + $0x11f0] sm:$0xff] %v2888_v45  ;;  %3562 = vst [vmem:[%s6874_s2 + $0x11e8] sm:$0xff] %v2441_v46  ;;  %v2890_v47 = vpop.f32.mrb[95].mxu1 }
 0x3dc   :  { %3564 = vst [vmem:[%s6874_s2 + $0x11f8] sm:$0xff] %v2890_v47 }
 0x3dd   :  { %v2445_v48 = vpop.f32.mrb[96].mxu0 }
 0x3de   :  { %3573 = vst [vmem:[%s6874_s2 + $0x1240] sm:$0xff] %v2445_v48  ;;  %v2894_v49 = vpop.f32.mrb[96].mxu1  ;;  %v2447_v50 = vpop.f32.mrb[97].mxu0 }
 0x3df   :  { %3575 = vst [vmem:[%s6874_s2 + $0x1250] sm:$0xff] %v2894_v49  ;;  %3574 = vst [vmem:[%s6874_s2 + $0x1248] sm:$0xff] %v2447_v50  ;;  %v2896_v51 = vpop.f32.mrb[97].mxu1 }
 0x3e0   :  { %3576 = vst [vmem:[%s6874_s2 + $0x1258] sm:$0xff] %v2896_v51 }
 0x3e1   :  { %v2451_v52 = vpop.f32.mrb[98].mxu0 }
 0x3e2   :  { %3585 = vst [vmem:[%s6874_s2 + $0x12a0] sm:$0xff] %v2451_v52  ;;  %v2900_v53 = vpop.f32.mrb[98].mxu1  ;;  %v2453_v54 = vpop.f32.mrb[99].mxu0 }
 0x3e3   :  { %3587 = vst [vmem:[%s6874_s2 + $0x12b0] sm:$0xff] %v2900_v53  ;;  %3586 = vst [vmem:[%s6874_s2 + $0x12a8] sm:$0xff] %v2453_v54  ;;  %v2902_v55 = vpop.f32.mrb[99].mxu1 }
 0x3e4   :  { %3588 = vst [vmem:[%s6874_s2 + $0x12b8] sm:$0xff] %v2902_v55 }
 0x3e5   :  { %v2457_v56 = vpop.f32.mrb[100].mxu0 }
 0x3e6   :  { %3597 = vst [vmem:[%s6874_s2 + $0x1300] sm:$0xff] %v2457_v56  ;;  %v2906_v57 = vpop.f32.mrb[100].mxu1  ;;  %v2459_v58 = vpop.f32.mrb[101].mxu0 }
 0x3e7   :  { %3599 = vst [vmem:[%s6874_s2 + $0x1310] sm:$0xff] %v2906_v57  ;;  %3598 = vst [vmem:[%s6874_s2 + $0x1308] sm:$0xff] %v2459_v58  ;;  %v2908_v59 = vpop.f32.mrb[101].mxu1 }
 0x3e8   :  { %3600 = vst [vmem:[%s6874_s2 + $0x1318] sm:$0xff] %v2908_v59 }
 0x3e9   :  { %v2463_v60 = vpop.f32.mrb[102].mxu0 }
 0x3ea   :  { %3609 = vst [vmem:[%s6874_s2 + $0x1360] sm:$0xff] %v2463_v60  ;;  %v2912_v61 = vpop.f32.mrb[102].mxu1  ;;  %v2465_v62 = vpop.f32.mrb[103].mxu0 }
 0x3eb   :  { %3611 = vst [vmem:[%s6874_s2 + $0x1370] sm:$0xff] %v2912_v61  ;;  %3610 = vst [vmem:[%s6874_s2 + $0x1368] sm:$0xff] %v2465_v62  ;;  %v2914_v63 = vpop.f32.mrb[103].mxu1 }
 0x3ec   :  { %3612 = vst [vmem:[%s6874_s2 + $0x1378] sm:$0xff] %v2914_v63 }
 0x3ed   :  { %v2469_v1 = vpop.f32.mrb[104].mxu0 }
 0x3ee   :  { %3621 = vst [vmem:[%s6874_s2 + $0x13c0] sm:$0xff] %v2469_v1  ;;  %v2918_v2 = vpop.f32.mrb[104].mxu1  ;;  %v2471_v3 = vpop.f32.mrb[105].mxu0 }
 0x3ef   :  { %3623 = vst [vmem:[%s6874_s2 + $0x13d0] sm:$0xff] %v2918_v2  ;;  %3622 = vst [vmem:[%s6874_s2 + $0x13c8] sm:$0xff] %v2471_v3  ;;  %v2920_v4 = vpop.f32.mrb[105].mxu1 }
 0x3f0   :  { %3624 = vst [vmem:[%s6874_s2 + $0x13d8] sm:$0xff] %v2920_v4 }
 0x3f1   :  { %v2475_v5 = vpop.f32.mrb[106].mxu0 }
 0x3f2   :  { %3633 = vst [vmem:[%s6874_s2 + $0x1420] sm:$0xff] %v2475_v5  ;;  %v2924_v6 = vpop.f32.mrb[106].mxu1  ;;  %v2477_v7 = vpop.f32.mrb[107].mxu0 }
 0x3f3   :  { %3635 = vst [vmem:[%s6874_s2 + $0x1430] sm:$0xff] %v2924_v6  ;;  %3634 = vst [vmem:[%s6874_s2 + $0x1428] sm:$0xff] %v2477_v7  ;;  %v2926_v8 = vpop.f32.mrb[107].mxu1 }
 0x3f4   :  { %3636 = vst [vmem:[%s6874_s2 + $0x1438] sm:$0xff] %v2926_v8 }
 0x3f5   :  { %v2481_v9 = vpop.f32.mrb[108].mxu0 }
 0x3f6   :  { %3645 = vst [vmem:[%s6874_s2 + $0x1480] sm:$0xff] %v2481_v9  ;;  %v2930_v10 = vpop.f32.mrb[108].mxu1  ;;  %v2483_v11 = vpop.f32.mrb[109].mxu0 }
 0x3f7   :  { %3647 = vst [vmem:[%s6874_s2 + $0x1490] sm:$0xff] %v2930_v10  ;;  %3646 = vst [vmem:[%s6874_s2 + $0x1488] sm:$0xff] %v2483_v11  ;;  %v2932_v12 = vpop.f32.mrb[109].mxu1 }
 0x3f8   :  { %3648 = vst [vmem:[%s6874_s2 + $0x1498] sm:$0xff] %v2932_v12 }
 0x3f9   :  { %v2487_v13 = vpop.f32.mrb[110].mxu0 }
 0x3fa   :  { %3657 = vst [vmem:[%s6874_s2 + $0x14e0] sm:$0xff] %v2487_v13  ;;  %v2936_v14 = vpop.f32.mrb[110].mxu1  ;;  %v2489_v15 = vpop.f32.mrb[111].mxu0 }
 0x3fb   :  { %3659 = vst [vmem:[%s6874_s2 + $0x14f0] sm:$0xff] %v2936_v14  ;;  %3658 = vst [vmem:[%s6874_s2 + $0x14e8] sm:$0xff] %v2489_v15  ;;  %v2938_v16 = vpop.f32.mrb[111].mxu1 }
 0x3fc   :  { %3660 = vst [vmem:[%s6874_s2 + $0x14f8] sm:$0xff] %v2938_v16 }
 0x3fd   :  { %v2493_v17 = vpop.f32.mrb[112].mxu0 }
 0x3fe   :  { %3669 = vst [vmem:[%s6874_s2 + $0x1540] sm:$0xff] %v2493_v17  ;;  %v2942_v18 = vpop.f32.mrb[112].mxu1  ;;  %v2495_v19 = vpop.f32.mrb[113].mxu0 }
 0x3ff   :  { %3671 = vst [vmem:[%s6874_s2 + $0x1550] sm:$0xff] %v2942_v18  ;;  %3670 = vst [vmem:[%s6874_s2 + $0x1548] sm:$0xff] %v2495_v19  ;;  %v2944_v20 = vpop.f32.mrb[113].mxu1 }
 0x400   :  { %3672 = vst [vmem:[%s6874_s2 + $0x1558] sm:$0xff] %v2944_v20 }
 0x401   :  { %v2499_v21 = vpop.f32.mrb[114].mxu0 }
 0x402   :  { %3681 = vst [vmem:[%s6874_s2 + $0x15a0] sm:$0xff] %v2499_v21  ;;  %v2948_v22 = vpop.f32.mrb[114].mxu1  ;;  %v2501_v23 = vpop.f32.mrb[115].mxu0 }
 0x403   :  { %3683 = vst [vmem:[%s6874_s2 + $0x15b0] sm:$0xff] %v2948_v22  ;;  %3682 = vst [vmem:[%s6874_s2 + $0x15a8] sm:$0xff] %v2501_v23  ;;  %v2950_v24 = vpop.f32.mrb[115].mxu1 }
 0x404   :  { %3684 = vst [vmem:[%s6874_s2 + $0x15b8] sm:$0xff] %v2950_v24 }
 0x405   :  { %v2505_v25 = vpop.f32.mrb[116].mxu0 }
 0x406   :  { %3693 = vst [vmem:[%s6874_s2 + $0x1600] sm:$0xff] %v2505_v25  ;;  %v2954_v26 = vpop.f32.mrb[116].mxu1  ;;  %v2507_v27 = vpop.f32.mrb[117].mxu0 }
 0x407   :  { %3695 = vst [vmem:[%s6874_s2 + $0x1610] sm:$0xff] %v2954_v26  ;;  %3694 = vst [vmem:[%s6874_s2 + $0x1608] sm:$0xff] %v2507_v27  ;;  %v2956_v28 = vpop.f32.mrb[117].mxu1 }
 0x408   :  { %3696 = vst [vmem:[%s6874_s2 + $0x1618] sm:$0xff] %v2956_v28 }
 0x409   :  { %v2511_v0 = vpop.f32.mrb[118].mxu0 }
 0x40a   :  { %3705 = vst [vmem:[%s6874_s2 + $0x1660] sm:$0xff] %v2511_v0  ;;  %v2960_v29 = vpop.f32.mrb[118].mxu1  ;;  %v2513_v30 = vpop.f32.mrb[119].mxu0 }
 0x40b   :  { %3707 = vst [vmem:[%s6874_s2 + $0x1670] sm:$0xff] %v2960_v29  ;;  %3706 = vst [vmem:[%s6874_s2 + $0x1668] sm:$0xff] %v2513_v30  ;;  %v2962_v31 = vpop.f32.mrb[119].mxu1 }
 0x40c   :  { %3708 = vst [vmem:[%s6874_s2 + $0x1678] sm:$0xff] %v2962_v31 }
 0x40d   :  { %v2517_v32 = vpop.f32.mrb[120].mxu0 }
 0x40e   :  { %3717 = vst [vmem:[%s6874_s2 + $0x16c0] sm:$0xff] %v2517_v32  ;;  %v2966_v33 = vpop.f32.mrb[120].mxu1  ;;  %v2519_v34 = vpop.f32.mrb[121].mxu0 }
 0x40f   :  { %3719 = vst [vmem:[%s6874_s2 + $0x16d0] sm:$0xff] %v2966_v33  ;;  %3718 = vst [vmem:[%s6874_s2 + $0x16c8] sm:$0xff] %v2519_v34  ;;  %v2968_v35 = vpop.f32.mrb[121].mxu1 }
 0x410   :  { %3720 = vst [vmem:[%s6874_s2 + $0x16d8] sm:$0xff] %v2968_v35 }
 0x411   :  { %v2523_v36 = vpop.f32.mrb[122].mxu0 }
 0x412   :  { %3729 = vst [vmem:[%s6874_s2 + $0x1720] sm:$0xff] %v2523_v36  ;;  %v2972_v37 = vpop.f32.mrb[122].mxu1  ;;  %v2525_v38 = vpop.f32.mrb[123].mxu0 }
 0x413   :  { %3731 = vst [vmem:[%s6874_s2 + $0x1730] sm:$0xff] %v2972_v37  ;;  %3730 = vst [vmem:[%s6874_s2 + $0x1728] sm:$0xff] %v2525_v38  ;;  %v2974_v39 = vpop.f32.mrb[123].mxu1 }
 0x414   :  { %3732 = vst [vmem:[%s6874_s2 + $0x1738] sm:$0xff] %v2974_v39 }
 0x415   :  { %v2529_v40 = vpop.f32.mrb[124].mxu0 }
 0x416   :  { %3741 = vst [vmem:[%s6874_s2 + $0x1780] sm:$0xff] %v2529_v40  ;;  %v2978_v41 = vpop.f32.mrb[124].mxu1  ;;  %v2531_v42 = vpop.f32.mrb[125].mxu0 }
 0x417   :  { %3743 = vst [vmem:[%s6874_s2 + $0x1790] sm:$0xff] %v2978_v41  ;;  %3742 = vst [vmem:[%s6874_s2 + $0x1788] sm:$0xff] %v2531_v42  ;;  %v2980_v43 = vpop.f32.mrb[125].mxu1 }
 0x418   :  { %3744 = vst [vmem:[%s6874_s2 + $0x1798] sm:$0xff] %v2980_v43 }
 0x419   :  { %v2535_v44 = vpop.f32.mrb[126].mxu0 }
 0x41a   :  { %3753 = vst [vmem:[%s6874_s2 + $0x17e0] sm:$0xff] %v2535_v44  ;;  %v2984_v45 = vpop.f32.mrb[126].mxu1  ;;  %v2537_v46 = vpop.f32.mrb[127].mxu0 }
 0x41b   :  { %3755 = vst [vmem:[%s6874_s2 + $0x17f0] sm:$0xff] %v2984_v45  ;;  %3754 = vst [vmem:[%s6874_s2 + $0x17e8] sm:$0xff] %v2537_v46  ;;  %v2986_v47 = vpop.f32.mrb[127].mxu1 }
 0x41c   :  { %3756 = vst [vmem:[%s6874_s2 + $0x17f8] sm:$0xff] %v2986_v47 }
 0x41d   :  { %3761 = vsyncpa [#allocation3], 1 }
 0x41e   :  { %3762 = vsyncpa [#allocation5], 1 }

</bundles_post_ra>
